<compile_context>
chip_gen: v5e
topology: v5e:2x2
jax: 0.10.0
libtpu: 0.0.40
codegen_flags: <defaults>
</compile_context>

<pallas_src>
import jax
import jax.numpy as jnp
from jax.experimental import pallas as pl
from jax.experimental.pallas import tpu as pltpu


def _round_up(x, m):
    return ((x + m - 1) // m) * m


def _vmem_capacity_bytes():
    """Physical per-TensorCore VMEM (128 MiB v5e/v6e, 64 MiB v7x)."""
    try:
        return int(pltpu.get_tpu_info().vmem_capacity_bytes)
    except Exception:
        return 64 * (1 << 20)      # conservative default: v7x per-TC VMEM


# ----------------------------------------------------------------------------
# Kernel
# ----------------------------------------------------------------------------
def _make_kernel(fused_pool, inv_hw):
    """Fused ClassificationNet forward on one batch block.

    fused_pool=True : x_ref is [bb, C*HW] bf16; the global-average-pool and the
                      backbone projection are ONE MXU matmul (1/HW folded into
                      wp by pack_params).
    fused_pool=False: x_ref is [bb, C, HW] bf16; pool in f32, apply 1/HW BEFORE
                      the bf16 cast, then project (small-K fallback).
    """

    def kernel(x_ref, wp_ref, bp_ref, w1_ref, b1_ref, w2_ref, b2_ref,
               wc1_ref, bc1_ref, wc2_ref, bc2_ref, out_ref):
        # ---- pre_net stand-in -------------------------------------------------
        # TODO(synk): pre_net is a *pretrained* torchvision resnet34 (ImageNet
        # checkpoint) that cannot be reproduced in-script; it is stood in by a
        # global-average-pool over the spatial axis + linear projection + ReLU
        # producing the 512-d feature resnet34 (fc=Identity) would emit.
        if fused_pool:
            feat = jnp.dot(x_ref[...], wp_ref[...],
                           preferred_element_type=jnp.float32) + bp_ref[...]
        else:
            x = x_ref[...].astype(jnp.float32)               # [bb, C, HW]
            pooled = jnp.sum(x, axis=-1) * inv_hw            # f32 scale pre-cast
            feat = jnp.dot(pooled.astype(jnp.bfloat16), wp_ref[...],
                           preferred_element_type=jnp.float32) + bp_ref[...]
        feat = jnp.maximum(feat, 0.0)                        # [bb, 512]  f32

        # ---- self.features: Linear(512,512)+ReLU, Linear(512,512)+ReLU -------
        h = jnp.maximum(
            jnp.dot(feat.astype(jnp.bfloat16), w1_ref[...],
                    preferred_element_type=jnp.float32) + b1_ref[...], 0.0)
        h = jnp.maximum(
            jnp.dot(h.astype(jnp.bfloat16), w2_ref[...],
                    preferred_element_type=jnp.float32) + b2_ref[...], 0.0)

        # ---- all classifier heads fused: wide Linear(512, 256*H)+ReLU, then
        #      block-diagonal Linear(256*H, N_pad) -> lane-dense output --------
        t = jnp.maximum(
            jnp.dot(h.astype(jnp.bfloat16), wc1_ref[...],
                    preferred_element_type=jnp.float32) + bc1_ref[...], 0.0)
        out_ref[...] = (
            jnp.dot(t.astype(jnp.bfloat16), wc2_ref[...],
                    preferred_element_type=jnp.float32) + bc2_ref[...]
        ).astype(out_ref.dtype)                              # [bb, N_pad]

    return kernel


# ----------------------------------------------------------------------------
# One-time parameter packing (hoisted out of the forward hot path)
# ----------------------------------------------------------------------------
def pack_params(params, n_classes, in_channels, height, width,
                *, fuse_pool_max_bytes=8 << 20):
    HW = height * width
    CHW = in_channels * HW
    n_heads = len(n_classes)
    wdt = jnp.bfloat16

    # Fuse GAP + projection into one matmul if the repeated weight is small.
    fused_pool = CHW * 512 * 2 <= fuse_pool_max_bytes
    if fused_pool:
        # wp_fused[c*HW + s, :] = wp[c, :] / HW   (matches x.reshape(B, C*HW)).
        wp = (jnp.repeat(params["wp"].astype(jnp.float32), HW, axis=0)
              * (1.0 / HW)).astype(wdt)                      # [C*HW, 512]
    else:
        wp = params["wp"].astype(wdt)                        # [C, 512]
    bp = params["bp"].astype(jnp.float32)

    w1 = params["w1"].astype(wdt)
    b1 = params["b1"].astype(jnp.float32)
    w2 = params["w2"].astype(wdt)
    b2 = params["b2"].astype(jnp.float32)

    # Per-head first layers -> one wide matmul.
    wc1 = jnp.concatenate([params[f"wc1_{i}"] for i in range(n_heads)],
                          axis=1).astype(wdt)                # [512, 256*H]
    bc1 = jnp.concatenate([params[f"bc1_{i}"] for i in range(n_heads)],
                          axis=1).astype(jnp.float32)

    # Per-head second layers -> zero-padded block-diagonal, lane-dense output.
    offsets, off = [], 0
    for n in n_classes:
        offsets.append(off)
        off += n
    N_pad = _round_up(off, 128)
    wc2 = jnp.zeros((256 * n_heads, N_pad), jnp.float32)
    bc2 = jnp.zeros((1, N_pad), jnp.float32)
    for i, n in enumerate(n_classes):
        wc2 = wc2.at[256 * i:256 * (i + 1),
                     offsets[i]:offsets[i] + n].set(params[f"wc2_{i}"])
        bc2 = bc2.at[:, offsets[i]:offsets[i] + n].set(params[f"bc2_{i}"])
    wc2 = wc2.astype(wdt)

    weights = tuple(jax.device_put(a)
                    for a in (wp, bp, w1, b1, w2, b2, wc1, bc1, wc2, bc2))
    meta = dict(fused_pool=fused_pool, offsets=tuple(offsets),
                n_classes=tuple(n_classes), N_pad=N_pad,
                in_channels=in_channels, HW=HW)
    return weights, meta


# ----------------------------------------------------------------------------
# Forward wrapper
# ----------------------------------------------------------------------------
def classification_net_forward(x_nchw, weights, meta, *, block_b=256):
    """x_nchw: [B, C, H, W]. Returns tuple of [B, n_i] float32 logits."""
    B, C, H, W = x_nchw.shape
    HW = H * W
    assert C == meta["in_channels"] and HW == meta["HW"]
    fused_pool = meta["fused_pool"]
    N_pad = meta["N_pad"]
    offsets = meta["offsets"]
    n_classes = meta["n_classes"]

    # The image block DMA dominates HBM traffic -> feed it as bf16.
    if fused_pool:
        x = x_nchw.reshape(B, C * HW).astype(jnp.bfloat16)
        x_row_bytes = C * HW * 2
    else:
        x = x_nchw.reshape(B, C, HW).astype(jnp.bfloat16)
        x_row_bytes = _round_up(C, 8) * HW * 2               # sublane-padded slab

    # ---- batch-block sizing & VMEM budget ------------------------------------
    vmem_budget = _vmem_capacity_bytes() * 3 // 4            # ~25% headroom
    resident_bytes = sum(int(a.size) * a.dtype.itemsize for a in weights)
    out_row_bytes = N_pad * 4
    slack = 4 << 20

    def vmem_needed(bb):
        # Weights counted 2x: correct even if Buffered(1) is unavailable and
        # the compiler double-buffers the constant-index specs.
        return (2 * resident_bytes + 2 * bb * x_row_bytes
                + 2 * bb * out_row_bytes + slack)

    bb = min(block_b, _round_up(max(B, 1), 8))
    while bb > 8 and vmem_needed(bb) > vmem_budget:
        bb = max(8, _round_up(bb // 2, 8))
    # Keep both TensorCores busy (v7x megacore): >=2 grid steps when possible.
    if B > 8 and _round_up(B, bb) // bb < 2:
        bb = _round_up(pl.cdiv(B, 2), 8)
    B_pad = _round_up(B, bb)
    if B_pad != B:
        x = jnp.pad(x, ((0, B_pad - B),) + ((0, 0),) * (x.ndim - 1))

    vmem_limit = int(min(vmem_budget, max(vmem_needed(bb), 16 << 20)))

    kernel = _make_kernel(fused_pool, 1.0 / HW)
    if fused_pool:
        x_spec = pl.BlockSpec((bb, C * HW), lambda b: (b, 0))
    else:
        x_spec = pl.BlockSpec((bb, C, HW), lambda b: (b, 0, 0))

    def run(single_buffer_weights):
        # Constant index_map -> weights stay VMEM-resident across batch blocks;
        # Buffered(1) drops their second (useless) pipeline buffer.
        def resident(a):
            nd = a.ndim
            imap = lambda b, _nd=nd: (0,) * _nd
            if single_buffer_weights:
                return pl.BlockSpec(a.shape, imap, pipeline_mode=pl.Buffered(1))
            return pl.BlockSpec(a.shape, imap)

        out = pl.pallas_call(
            kernel,
            grid=(B_pad // bb,),
            in_specs=[x_spec] + [resident(a) for a in weights],
            out_specs=pl.BlockSpec((bb, N_pad), lambda b: (b, 0)),
            out_shape=jax.ShapeDtypeStruct((B_pad, N_pad), jnp.float32),
            compiler_params=pltpu.CompilerParams(
                dimension_semantics=("parallel",),
                vmem_limit_bytes=vmem_limit,
            ),
        )(x, *weights)
        return jax.block_until_ready(out)

    try:
        out = run(True)
    except Exception:
        # pipeline_mode=pl.Buffered(1) not supported by this jax/Mosaic build:
        # fall back to default double-buffered resident specs (the budget
        # already counts weights 2x, so this still fits vmem_limit).
        out = run(False)

    return tuple(out[:B, offsets[i]:offsets[i] + n]
                 for i, n in enumerate(n_classes))


# ----------------------------------------------------------------------------
# Pure-JAX reference (same math, f32) for a tolerance check
# ----------------------------------------------------------------------------
def _reference_forward(x_nchw, params, n_classes):
    B, C, H, W = x_nchw.shape
    pooled = jnp.mean(x_nchw.reshape(B, C, H * W), axis=-1)
    feat = jnp.maximum(pooled @ params["wp"] + params["bp"], 0.0)
    h = jnp.maximum(feat @ params["w1"] + params["b1"], 0.0)
    h = jnp.maximum(h @ params["w2"] + params["b2"], 0.0)
    outs = []
    for i, n in enumerate(n_classes):
        t = jnp.maximum(h @ params[f"wc1_{i}"] + params[f"bc1_{i}"], 0.0)
        outs.append(t @ params[f"wc2_{i}"] + params[f"bc2_{i}"])
    return tuple(outs)


# ----------------------------------------------------------------------------
# Deterministic synthetic parameters (shapes implied by the module __init__)
# ----------------------------------------------------------------------------
def init_params(key, in_channels, n_classes):
    def dense(k, fan_in, fan_out):
        kw, kb = jax.random.split(k)
        scale = 1.0 / jnp.sqrt(jnp.float32(fan_in))
        w = jax.random.uniform(kw, (fan_in, fan_out), jnp.float32, -scale, scale)
        b = jax.random.uniform(kb, (1, fan_out), jnp.float32, -scale, scale)
        return w, b

    keys = jax.random.split(key, 3 + 2 * len(n_classes))
    params = {}
    # backbone stand-in projection: C -> 512
    params["wp"], params["bp"] = dense(keys[0], in_channels, 512)
    # self.features
    params["w1"], params["b1"] = dense(keys[1], 512, 512)
    params["w2"], params["b2"] = dense(keys[2], 512, 512)
    # classifier heads: Linear(512,256) -> ReLU -> Linear(256, n_i)
    for i, n in enumerate(n_classes):
        params[f"wc1_{i}"], params[f"bc1_{i}"] = dense(keys[3 + 2 * i], 512, 256)
        params[f"wc2_{i}"], params[f"bc2_{i}"] = dense(keys[4 + 2 * i], 256, n)
    return params


if __name__ == "__main__":
    key = jax.random.PRNGKey(0)
    kx, kp = jax.random.split(key)

    B, C, H, W = 2, 4, 16, 16
    n_classes = [3, 7]

    x = jax.random.normal(kx, (B, C, H, W), jnp.float32)
    params = init_params(kp, C, n_classes)

    # One-time packing (cached / reused across forward calls).
    weights, meta = pack_params(params, n_classes, C, H, W)

    outs = classification_net_forward(x, weights, meta)
    outs = jax.block_until_ready(outs)

    refs = _reference_forward(x, params, n_classes)
    assert isinstance(outs, tuple) and len(outs) == len(n_classes)
    for o, r, n in zip(outs, refs, n_classes):
        assert o.shape == (B, n), o.shape
        assert bool(jnp.all(jnp.isfinite(o)))
        # bf16 matmul operands with f32 accumulation -> generous tolerance.
        assert float(jnp.max(jnp.abs(o - r))) < 0.1

    print("KERNEL_OK")
</pallas_src>

<mosaic_0001>
module attributes {stable_mosaic.version = 11 : i64} {
  func.func @kernel(%arg0: i32, %arg1: memref<8x1024xbf16, #tpu.memory_space<vmem>>, %arg2: memref<1024x512xbf16, #tpu.memory_space<vmem>>, %arg3: memref<1x512xf32, #tpu.memory_space<vmem>>, %arg4: memref<512x512xbf16, #tpu.memory_space<vmem>>, %arg5: memref<1x512xf32, #tpu.memory_space<vmem>>, %arg6: memref<512x512xbf16, #tpu.memory_space<vmem>>, %arg7: memref<1x512xf32, #tpu.memory_space<vmem>>, %arg8: memref<512x512xbf16, #tpu.memory_space<vmem>>, %arg9: memref<1x512xf32, #tpu.memory_space<vmem>>, %arg10: memref<512x128xbf16, #tpu.memory_space<vmem>>, %arg11: memref<1x128xf32, #tpu.memory_space<vmem>>, %arg12: memref<8x128xf32, #tpu.memory_space<vmem>>) attributes {dimension_semantics = [#tpu.dimension_semantics<parallel>], iteration_bounds = array<i64: 1>, scalar_prefetch = 0 : i64, scratch_operands = 0 : i64, tpu.core_type = #tpu.core_type<tc>, window_params = [{transform_indices = @transform_0, window_bounds = array<i64: 8, 1024>}, {pipeline_mode = #tpu.pipeline_mode<synchronous>, transform_indices = @transform_1, window_bounds = array<i64: 1024, 512>}, {pipeline_mode = #tpu.pipeline_mode<synchronous>, transform_indices = @transform_2, window_bounds = array<i64: 1, 512>}, {pipeline_mode = #tpu.pipeline_mode<synchronous>, transform_indices = @transform_3, window_bounds = array<i64: 512, 512>}, {pipeline_mode = #tpu.pipeline_mode<synchronous>, transform_indices = @transform_4, window_bounds = array<i64: 1, 512>}, {pipeline_mode = #tpu.pipeline_mode<synchronous>, transform_indices = @transform_5, window_bounds = array<i64: 512, 512>}, {pipeline_mode = #tpu.pipeline_mode<synchronous>, transform_indices = @transform_6, window_bounds = array<i64: 1, 512>}, {pipeline_mode = #tpu.pipeline_mode<synchronous>, transform_indices = @transform_7, window_bounds = array<i64: 512, 512>}, {pipeline_mode = #tpu.pipeline_mode<synchronous>, transform_indices = @transform_8, window_bounds = array<i64: 1, 512>}, {pipeline_mode = #tpu.pipeline_mode<synchronous>, transform_indices = @transform_9, window_bounds = array<i64: 512, 128>}, {pipeline_mode = #tpu.pipeline_mode<synchronous>, transform_indices = @transform_10, window_bounds = array<i64: 1, 128>}, {transform_indices = @transform_11, window_bounds = array<i64: 8, 128>}]} {
    %c0 = arith.constant 0 : index
    %c0_0 = arith.constant 0 : index
    %0 = vector.load %arg1[%c0, %c0_0] : memref<8x1024xbf16, #tpu.memory_space<vmem>>, vector<8x1024xbf16>
    %c0_1 = arith.constant 0 : index
    %c0_2 = arith.constant 0 : index
    %1 = vector.load %arg2[%c0_1, %c0_2] : memref<1024x512xbf16, #tpu.memory_space<vmem>>, vector<1024x512xbf16>
    %cst = arith.constant dense<0.000000e+00> : vector<8x512xf32>
    %2 = tpu.matmul %0, %1, %cst {dimension_numbers = #tpu.dot_dimension_numbers<[1], [0], [0], [1], [0, 0, 1, 1], [], []>} : vector<8x1024xbf16>, vector<1024x512xbf16>, vector<8x512xf32> -> vector<8x512xf32>
    %c0_3 = arith.constant 0 : index
    %c0_4 = arith.constant 0 : index
    %3 = vector.load %arg3[%c0_3, %c0_4] : memref<1x512xf32, #tpu.memory_space<vmem>>, vector<1x512xf32>
    %4 = vector.broadcast %3 : vector<1x512xf32> to vector<8x512xf32>
    %5 = arith.addf %2, %4 : vector<8x512xf32>
    %cst_5 = arith.constant 0.000000e+00 : f32
    %6 = vector.broadcast %cst_5 : f32 to vector<8x512xf32>
    %7 = arith.maximumf %5, %6 : vector<8x512xf32>
    %8 = arith.truncf %7 : vector<8x512xf32> to vector<8x512xbf16>
    %c0_6 = arith.constant 0 : index
    %c0_7 = arith.constant 0 : index
    %9 = vector.load %arg4[%c0_6, %c0_7] : memref<512x512xbf16, #tpu.memory_space<vmem>>, vector<512x512xbf16>
    %cst_8 = arith.constant dense<0.000000e+00> : vector<8x512xf32>
    %10 = tpu.matmul %8, %9, %cst_8 {dimension_numbers = #tpu.dot_dimension_numbers<[1], [0], [0], [1], [0, 0, 1, 1], [], []>} : vector<8x512xbf16>, vector<512x512xbf16>, vector<8x512xf32> -> vector<8x512xf32>
    %c0_9 = arith.constant 0 : index
    %c0_10 = arith.constant 0 : index
    %11 = vector.load %arg5[%c0_9, %c0_10] : memref<1x512xf32, #tpu.memory_space<vmem>>, vector<1x512xf32>
    %12 = vector.broadcast %11 : vector<1x512xf32> to vector<8x512xf32>
    %13 = arith.addf %10, %12 : vector<8x512xf32>
    %cst_11 = arith.constant 0.000000e+00 : f32
    %14 = vector.broadcast %cst_11 : f32 to vector<8x512xf32>
    %15 = arith.maximumf %13, %14 : vector<8x512xf32>
    %16 = arith.truncf %15 : vector<8x512xf32> to vector<8x512xbf16>
    %c0_12 = arith.constant 0 : index
    %c0_13 = arith.constant 0 : index
    %17 = vector.load %arg6[%c0_12, %c0_13] : memref<512x512xbf16, #tpu.memory_space<vmem>>, vector<512x512xbf16>
    %cst_14 = arith.constant dense<0.000000e+00> : vector<8x512xf32>
    %18 = tpu.matmul %16, %17, %cst_14 {dimension_numbers = #tpu.dot_dimension_numbers<[1], [0], [0], [1], [0, 0, 1, 1], [], []>} : vector<8x512xbf16>, vector<512x512xbf16>, vector<8x512xf32> -> vector<8x512xf32>
    %c0_15 = arith.constant 0 : index
    %c0_16 = arith.constant 0 : index
    %19 = vector.load %arg7[%c0_15, %c0_16] : memref<1x512xf32, #tpu.memory_space<vmem>>, vector<1x512xf32>
    %20 = vector.broadcast %19 : vector<1x512xf32> to vector<8x512xf32>
    %21 = arith.addf %18, %20 : vector<8x512xf32>
    %cst_17 = arith.constant 0.000000e+00 : f32
    %22 = vector.broadcast %cst_17 : f32 to vector<8x512xf32>
    %23 = arith.maximumf %21, %22 : vector<8x512xf32>
    %24 = arith.truncf %23 : vector<8x512xf32> to vector<8x512xbf16>
    %c0_18 = arith.constant 0 : index
    %c0_19 = arith.constant 0 : index
    %25 = vector.load %arg8[%c0_18, %c0_19] : memref<512x512xbf16, #tpu.memory_space<vmem>>, vector<512x512xbf16>
    %cst_20 = arith.constant dense<0.000000e+00> : vector<8x512xf32>
    %26 = tpu.matmul %24, %25, %cst_20 {dimension_numbers = #tpu.dot_dimension_numbers<[1], [0], [0], [1], [0, 0, 1, 1], [], []>} : vector<8x512xbf16>, vector<512x512xbf16>, vector<8x512xf32> -> vector<8x512xf32>
    %c0_21 = arith.constant 0 : index
    %c0_22 = arith.constant 0 : index
    %27 = vector.load %arg9[%c0_21, %c0_22] : memref<1x512xf32, #tpu.memory_space<vmem>>, vector<1x512xf32>
    %28 = vector.broadcast %27 : vector<1x512xf32> to vector<8x512xf32>
    %29 = arith.addf %26, %28 : vector<8x512xf32>
    %cst_23 = arith.constant 0.000000e+00 : f32
    %30 = vector.broadcast %cst_23 : f32 to vector<8x512xf32>
    %31 = arith.maximumf %29, %30 : vector<8x512xf32>
    %32 = arith.truncf %31 : vector<8x512xf32> to vector<8x512xbf16>
    %c0_24 = arith.constant 0 : index
    %c0_25 = arith.constant 0 : index
    %33 = vector.load %arg10[%c0_24, %c0_25] : memref<512x128xbf16, #tpu.memory_space<vmem>>, vector<512x128xbf16>
    %cst_26 = arith.constant dense<0.000000e+00> : vector<8x128xf32>
    %34 = tpu.matmul %32, %33, %cst_26 {dimension_numbers = #tpu.dot_dimension_numbers<[1], [0], [0], [1], [0, 0, 1, 1], [], []>} : vector<8x512xbf16>, vector<512x128xbf16>, vector<8x128xf32> -> vector<8x128xf32>
    %c0_27 = arith.constant 0 : index
    %c0_28 = arith.constant 0 : index
    %35 = vector.load %arg11[%c0_27, %c0_28] : memref<1x128xf32, #tpu.memory_space<vmem>>, vector<1x128xf32>
    %36 = vector.broadcast %35 : vector<1x128xf32> to vector<8x128xf32>
    %37 = arith.addf %34, %36 : vector<8x128xf32>
    %c0_29 = arith.constant 0 : index
    %c0_30 = arith.constant 0 : index
    %38 = vector.load %arg12[%c0_29, %c0_30] : memref<8x128xf32, #tpu.memory_space<vmem>>, vector<8x128xf32>
    tpu.vector_store %arg12[%c0_29, %c0_30], %37 {strides = array<i32>} : memref<8x128xf32, #tpu.memory_space<vmem>>, vector<8x128xf32>,
    return
  }
  func.func @transform_0(%arg0: i32) -> (i32, i32) {
    %c0_i32 = arith.constant 0 : i32
    %c0_i32_0 = arith.constant 0 : i32
    return %arg0, %c0_i32 : i32, i32
  }
  func.func @transform_1(%arg0: i32) -> (i32, i32) {
    %c0_i32 = arith.constant 0 : i32
    %c0_i32_0 = arith.constant 0 : i32
    %c0_i32_1 = arith.constant 0 : i32
    return %c0_i32, %c0_i32_0 : i32, i32
  }
  func.func @transform_2(%arg0: i32) -> (i32, i32) {
    %c0_i32 = arith.constant 0 : i32
    %c0_i32_0 = arith.constant 0 : i32
    %c0_i32_1 = arith.constant 0 : i32
    return %c0_i32, %c0_i32_0 : i32, i32
  }
  func.func @transform_3(%arg0: i32) -> (i32, i32) {
    %c0_i32 = arith.constant 0 : i32
    %c0_i32_0 = arith.constant 0 : i32
    %c0_i32_1 = arith.constant 0 : i32
    return %c0_i32, %c0_i32_0 : i32, i32
  }
  func.func @transform_4(%arg0: i32) -> (i32, i32) {
    %c0_i32 = arith.constant 0 : i32
    %c0_i32_0 = arith.constant 0 : i32
    %c0_i32_1 = arith.constant 0 : i32
    return %c0_i32, %c0_i32_0 : i32, i32
  }
  func.func @transform_5(%arg0: i32) -> (i32, i32) {
    %c0_i32 = arith.constant 0 : i32
    %c0_i32_0 = arith.constant 0 : i32
    %c0_i32_1 = arith.constant 0 : i32
    return %c0_i32, %c0_i32_0 : i32, i32
  }
  func.func @transform_6(%arg0: i32) -> (i32, i32) {
    %c0_i32 = arith.constant 0 : i32
    %c0_i32_0 = arith.constant 0 : i32
    %c0_i32_1 = arith.constant 0 : i32
    return %c0_i32, %c0_i32_0 : i32, i32
  }
  func.func @transform_7(%arg0: i32) -> (i32, i32) {
    %c0_i32 = arith.constant 0 : i32
    %c0_i32_0 = arith.constant 0 : i32
    %c0_i32_1 = arith.constant 0 : i32
    return %c0_i32, %c0_i32_0 : i32, i32
  }
  func.func @transform_8(%arg0: i32) -> (i32, i32) {
    %c0_i32 = arith.constant 0 : i32
    %c0_i32_0 = arith.constant 0 : i32
    %c0_i32_1 = arith.constant 0 : i32
    return %c0_i32, %c0_i32_0 : i32, i32
  }
  func.func @transform_9(%arg0: i32) -> (i32, i32) {
    %c0_i32 = arith.constant 0 : i32
    %c0_i32_0 = arith.constant 0 : i32
    %c0_i32_1 = arith.constant 0 : i32
    return %c0_i32, %c0_i32_0 : i32, i32
  }
  func.func @transform_10(%arg0: i32) -> (i32, i32) {
    %c0_i32 = arith.constant 0 : i32
    %c0_i32_0 = arith.constant 0 : i32
    %c0_i32_1 = arith.constant 0 : i32
    return %c0_i32, %c0_i32_0 : i32, i32
  }
  func.func @transform_11(%arg0: i32) -> (i32, i32) {
    %c0_i32 = arith.constant 0 : i32
    %c0_i32_0 = arith.constant 0 : i32
    return %arg0, %c0_i32 : i32, i32
  }
}

module attributes {stable_mosaic.version = 11 : i64} {
  func.func @kernel(%arg0: i32, %arg1: memref<8x1024xbf16, #tpu.memory_space<vmem>>, %arg2: memref<1024x512xbf16, #tpu.memory_space<vmem>>, %arg3: memref<1x512xf32, #tpu.memory_space<vmem>>, %arg4: memref<512x512xbf16, #tpu.memory_space<vmem>>, %arg5: memref<1x512xf32, #tpu.memory_space<vmem>>, %arg6: memref<512x512xbf16, #tpu.memory_space<vmem>>, %arg7: memref<1x512xf32, #tpu.memory_space<vmem>>, %arg8: memref<512x512xbf16, #tpu.memory_space<vmem>>, %arg9: memref<1x512xf32, #tpu.memory_space<vmem>>, %arg10: memref<512x128xbf16, #tpu.memory_space<vmem>>, %arg11: memref<1x128xf32, #tpu.memory_space<vmem>>, %arg12: memref<8x128xf32, #tpu.memory_space<vmem>>) attributes {dimension_semantics = [#tpu.dimension_semantics<parallel>], iteration_bounds = array<i64: 1>, scalar_prefetch = 0 : i64, scratch_operands = 0 : i64, tpu.core_type = #tpu.core_type<tc>, window_params = [{transform_indices = @transform_0, window_bounds = array<i64: 8, 1024>}, {pipeline_mode = #tpu.pipeline_mode<synchronous>, transform_indices = @transform_1, window_bounds = array<i64: 1024, 512>}, {pipeline_mode = #tpu.pipeline_mode<synchronous>, transform_indices = @transform_2, window_bounds = array<i64: 1, 512>}, {pipeline_mode = #tpu.pipeline_mode<synchronous>, transform_indices = @transform_3, window_bounds = array<i64: 512, 512>}, {pipeline_mode = #tpu.pipeline_mode<synchronous>, transform_indices = @transform_4, window_bounds = array<i64: 1, 512>}, {pipeline_mode = #tpu.pipeline_mode<synchronous>, transform_indices = @transform_5, window_bounds = array<i64: 512, 512>}, {pipeline_mode = #tpu.pipeline_mode<synchronous>, transform_indices = @transform_6, window_bounds = array<i64: 1, 512>}, {pipeline_mode = #tpu.pipeline_mode<synchronous>, transform_indices = @transform_7, window_bounds = array<i64: 512, 512>}, {pipeline_mode = #tpu.pipeline_mode<synchronous>, transform_indices = @transform_8, window_bounds = array<i64: 1, 512>}, {pipeline_mode = #tpu.pipeline_mode<synchronous>, transform_indices = @transform_9, window_bounds = array<i64: 512, 128>}, {pipeline_mode = #tpu.pipeline_mode<synchronous>, transform_indices = @transform_10, window_bounds = array<i64: 1, 128>}, {transform_indices = @transform_11, window_bounds = array<i64: 8, 128>}]} {
    %c0 = arith.constant 0 : index
    %c0_0 = arith.constant 0 : index
    %0 = vector.load %arg1[%c0, %c0_0] : memref<8x1024xbf16, #tpu.memory_space<vmem>>, vector<8x1024xbf16>
    %c0_1 = arith.constant 0 : index
    %c0_2 = arith.constant 0 : index
    %1 = vector.load %arg2[%c0_1, %c0_2] : memref<1024x512xbf16, #tpu.memory_space<vmem>>, vector<1024x512xbf16>
    %cst = arith.constant dense<0.000000e+00> : vector<8x512xf32>
    %2 = tpu.matmul %0, %1, %cst {dimension_numbers = #tpu.dot_dimension_numbers<[1], [0], [0], [1], [0, 0, 1, 1], [], []>} : vector<8x1024xbf16>, vector<1024x512xbf16>, vector<8x512xf32> -> vector<8x512xf32>
    %c0_3 = arith.constant 0 : index
    %c0_4 = arith.constant 0 : index
    %3 = vector.load %arg3[%c0_3, %c0_4] : memref<1x512xf32, #tpu.memory_space<vmem>>, vector<1x512xf32>
    %4 = vector.broadcast %3 : vector<1x512xf32> to vector<8x512xf32>
    %5 = arith.addf %2, %4 : vector<8x512xf32>
    %cst_5 = arith.constant 0.000000e+00 : f32
    %6 = vector.broadcast %cst_5 : f32 to vector<8x512xf32>
    %7 = arith.maximumf %5, %6 : vector<8x512xf32>
    %8 = arith.truncf %7 : vector<8x512xf32> to vector<8x512xbf16>
    %c0_6 = arith.constant 0 : index
    %c0_7 = arith.constant 0 : index
    %9 = vector.load %arg4[%c0_6, %c0_7] : memref<512x512xbf16, #tpu.memory_space<vmem>>, vector<512x512xbf16>
    %cst_8 = arith.constant dense<0.000000e+00> : vector<8x512xf32>
    %10 = tpu.matmul %8, %9, %cst_8 {dimension_numbers = #tpu.dot_dimension_numbers<[1], [0], [0], [1], [0, 0, 1, 1], [], []>} : vector<8x512xbf16>, vector<512x512xbf16>, vector<8x512xf32> -> vector<8x512xf32>
    %c0_9 = arith.constant 0 : index
    %c0_10 = arith.constant 0 : index
    %11 = vector.load %arg5[%c0_9, %c0_10] : memref<1x512xf32, #tpu.memory_space<vmem>>, vector<1x512xf32>
    %12 = vector.broadcast %11 : vector<1x512xf32> to vector<8x512xf32>
    %13 = arith.addf %10, %12 : vector<8x512xf32>
    %cst_11 = arith.constant 0.000000e+00 : f32
    %14 = vector.broadcast %cst_11 : f32 to vector<8x512xf32>
    %15 = arith.maximumf %13, %14 : vector<8x512xf32>
    %16 = arith.truncf %15 : vector<8x512xf32> to vector<8x512xbf16>
    %c0_12 = arith.constant 0 : index
    %c0_13 = arith.constant 0 : index
    %17 = vector.load %arg6[%c0_12, %c0_13] : memref<512x512xbf16, #tpu.memory_space<vmem>>, vector<512x512xbf16>
    %cst_14 = arith.constant dense<0.000000e+00> : vector<8x512xf32>
    %18 = tpu.matmul %16, %17, %cst_14 {dimension_numbers = #tpu.dot_dimension_numbers<[1], [0], [0], [1], [0, 0, 1, 1], [], []>} : vector<8x512xbf16>, vector<512x512xbf16>, vector<8x512xf32> -> vector<8x512xf32>
    %c0_15 = arith.constant 0 : index
    %c0_16 = arith.constant 0 : index
    %19 = vector.load %arg7[%c0_15, %c0_16] : memref<1x512xf32, #tpu.memory_space<vmem>>, vector<1x512xf32>
    %20 = vector.broadcast %19 : vector<1x512xf32> to vector<8x512xf32>
    %21 = arith.addf %18, %20 : vector<8x512xf32>
    %cst_17 = arith.constant 0.000000e+00 : f32
    %22 = vector.broadcast %cst_17 : f32 to vector<8x512xf32>
    %23 = arith.maximumf %21, %22 : vector<8x512xf32>
    %24 = arith.truncf %23 : vector<8x512xf32> to vector<8x512xbf16>
    %c0_18 = arith.constant 0 : index
    %c0_19 = arith.constant 0 : index
    %25 = vector.load %arg8[%c0_18, %c0_19] : memref<512x512xbf16, #tpu.memory_space<vmem>>, vector<512x512xbf16>
    %cst_20 = arith.constant dense<0.000000e+00> : vector<8x512xf32>
    %26 = tpu.matmul %24, %25, %cst_20 {dimension_numbers = #tpu.dot_dimension_numbers<[1], [0], [0], [1], [0, 0, 1, 1], [], []>} : vector<8x512xbf16>, vector<512x512xbf16>, vector<8x512xf32> -> vector<8x512xf32>
    %c0_21 = arith.constant 0 : index
    %c0_22 = arith.constant 0 : index
    %27 = vector.load %arg9[%c0_21, %c0_22] : memref<1x512xf32, #tpu.memory_space<vmem>>, vector<1x512xf32>
    %28 = vector.broadcast %27 : vector<1x512xf32> to vector<8x512xf32>
    %29 = arith.addf %26, %28 : vector<8x512xf32>
    %cst_23 = arith.constant 0.000000e+00 : f32
    %30 = vector.broadcast %cst_23 : f32 to vector<8x512xf32>
    %31 = arith.maximumf %29, %30 : vector<8x512xf32>
    %32 = arith.truncf %31 : vector<8x512xf32> to vector<8x512xbf16>
    %c0_24 = arith.constant 0 : index
    %c0_25 = arith.constant 0 : index
    %33 = vector.load %arg10[%c0_24, %c0_25] : memref<512x128xbf16, #tpu.memory_space<vmem>>, vector<512x128xbf16>
    %cst_26 = arith.constant dense<0.000000e+00> : vector<8x128xf32>
    %34 = tpu.matmul %32, %33, %cst_26 {dimension_numbers = #tpu.dot_dimension_numbers<[1], [0], [0], [1], [0, 0, 1, 1], [], []>} : vector<8x512xbf16>, vector<512x128xbf16>, vector<8x128xf32> -> vector<8x128xf32>
    %c0_27 = arith.constant 0 : index
    %c0_28 = arith.constant 0 : index
    %35 = vector.load %arg11[%c0_27, %c0_28] : memref<1x128xf32, #tpu.memory_space<vmem>>, vector<1x128xf32>
    %36 = vector.broadcast %35 : vector<1x128xf32> to vector<8x128xf32>
    %37 = arith.addf %34, %36 : vector<8x128xf32>
    %c0_29 = arith.constant 0 : index
    %c0_30 = arith.constant 0 : index
    %38 = vector.load %arg12[%c0_29, %c0_30] : memref<8x128xf32, #tpu.memory_space<vmem>>, vector<8x128xf32>
    tpu.vector_store %arg12[%c0_29, %c0_30], %37 {strides = array<i32>} : memref<8x128xf32, #tpu.memory_space<vmem>>, vector<8x128xf32>,
    return
  }
  func.func @transform_0(%arg0: i32) -> (i32, i32) {
    %c0_i32 = arith.constant 0 : i32
    %c0_i32_0 = arith.constant 0 : i32
    return %arg0, %c0_i32 : i32, i32
  }
  func.func @transform_1(%arg0: i32) -> (i32, i32) {
    %c0_i32 = arith.constant 0 : i32
    %c0_i32_0 = arith.constant 0 : i32
    %c0_i32_1 = arith.constant 0 : i32
    return %c0_i32, %c0_i32_0 : i32, i32
  }
  func.func @transform_2(%arg0: i32) -> (i32, i32) {
    %c0_i32 = arith.constant 0 : i32
    %c0_i32_0 = arith.constant 0 : i32
    %c0_i32_1 = arith.constant 0 : i32
    return %c0_i32, %c0_i32_0 : i32, i32
  }
  func.func @transform_3(%arg0: i32) -> (i32, i32) {
    %c0_i32 = arith.constant 0 : i32
    %c0_i32_0 = arith.constant 0 : i32
    %c0_i32_1 = arith.constant 0 : i32
    return %c0_i32, %c0_i32_0 : i32, i32
  }
  func.func @transform_4(%arg0: i32) -> (i32, i32) {
    %c0_i32 = arith.constant 0 : i32
    %c0_i32_0 = arith.constant 0 : i32
    %c0_i32_1 = arith.constant 0 : i32
    return %c0_i32, %c0_i32_0 : i32, i32
  }
  func.func @transform_5(%arg0: i32) -> (i32, i32) {
    %c0_i32 = arith.constant 0 : i32
    %c0_i32_0 = arith.constant 0 : i32
    %c0_i32_1 = arith.constant 0 : i32
    return %c0_i32, %c0_i32_0 : i32, i32
  }
  func.func @transform_6(%arg0: i32) -> (i32, i32) {
    %c0_i32 = arith.constant 0 : i32
    %c0_i32_0 = arith.constant 0 : i32
    %c0_i32_1 = arith.constant 0 : i32
    return %c0_i32, %c0_i32_0 : i32, i32
  }
  func.func @transform_7(%arg0: i32) -> (i32, i32) {
    %c0_i32 = arith.constant 0 : i32
    %c0_i32_0 = arith.constant 0 : i32
    %c0_i32_1 = arith.constant 0 : i32
    return %c0_i32, %c0_i32_0 : i32, i32
  }
  func.func @transform_8(%arg0: i32) -> (i32, i32) {
    %c0_i32 = arith.constant 0 : i32
    %c0_i32_0 = arith.constant 0 : i32
    %c0_i32_1 = arith.constant 0 : i32
    return %c0_i32, %c0_i32_0 : i32, i32
  }
  func.func @transform_9(%arg0: i32) -> (i32, i32) {
    %c0_i32 = arith.constant 0 : i32
    %c0_i32_0 = arith.constant 0 : i32
    %c0_i32_1 = arith.constant 0 : i32
    return %c0_i32, %c0_i32_0 : i32, i32
  }
  func.func @transform_10(%arg0: i32) -> (i32, i32) {
    %c0_i32 = arith.constant 0 : i32
    %c0_i32_0 = arith.constant 0 : i32
    %c0_i32_1 = arith.constant 0 : i32
    return %c0_i32, %c0_i32_0 : i32, i32
  }
  func.func @transform_11(%arg0: i32) -> (i32, i32) {
    %c0_i32 = arith.constant 0 : i32
    %c0_i32_0 = arith.constant 0 : i32
    return %arg0, %c0_i32 : i32, i32
  }
}

</mosaic_0001>

<bundles_post_ra>
// kernel: tpu_custom_call.1
= control target key start
LH: loop header
LB: loop body
LE: loop exit
PB: predicated region body
PF: predicated region fallthrough
CT: control target
= control target key end

     0   :  { %16 = vsyncpa [#allocation3], 0  ;;  %s9493_s0 = inlined_call_operand.hbm [shape: bf16[8,1024], index: 0, kind: input, shape index: {}]   ;;  %s9494_s1 = inlined_call_operand.hbm [shape: bf16[1024,512], index: 1, kind: input, shape index: {}]   ;;  %s9495_s2 = inlined_call_operand.hbm [shape: f32[1,512], index: 2, kind: input, shape index: {}]   ;;  %s9496_s3 = inlined_call_operand.hbm [shape: bf16[512,512], index: 3, kind: input, shape index: {}]   ;;  %s9497_s4 = inlined_call_operand.hbm [shape: f32[1,512], index: 4, kind: input, shape index: {}]   ;;  %s9498_s5 = inlined_call_operand.hbm [shape: bf16[512,512], index: 5, kind: input, shape index: {}]   ;;  %s9499_s6 = inlined_call_operand.vmem [shape: f32[1,512], index: 6, kind: input, shape index: {}]   ;;  %s9500_s7 = inlined_call_operand.hbm [shape: bf16[512,512], index: 7, kind: input, shape index: {}]   ;;  %s9501_s8 = inlined_call_operand.hbm [shape: f32[1,512], index: 8, kind: input, shape index: {}]   ;;  %s9502_s9 = inlined_call_operand.hbm [shape: bf16[512,128], index: 9, kind: input, shape index: {}]   ;;  %s9503_s10 = inlined_call_operand.vmem [shape: f32[1,128], index: 10, kind: input, shape index: {}]   ;;  %s9504_s11 = inlined_call_operand.hbm [shape: f32[8,128], index: 11, kind: output, shape index: {}]  }
   0x1   :  { %17 = vsyncpa [#allocation6], 0 }
   0x2   :  { %18 = vsyncpa [#allocation9], 0 }
   0x3   :  { %19 = vsyncpa [#allocation12], 0 }
   0x4   :  { %20 = vsyncpa [#allocation15], 0  ;;  %s37_s19 = sshll.u32 %s9494_s1, 4  ;;  %s38_s19 = int_to_ptr.hbm [resolvable:$true] %s37_s19 }
   0x5   :  { %21 = vsyncpa [#allocation4], 0  ;;  %s9117_s20 = smov [#allocation5]   ;;  %s61_s24 = sshll.u32 %s9496_s3, 4  ;;  %s62_s24 = int_to_ptr.hbm [resolvable:$true] %s61_s24 }
   0x6   :  { %s39_s21 = sshll.u32 %s9117_s20, 4  ;;  %s9118_s25 = smov 256   ;;  %s40_s21 = int_to_ptr.vmem [resolvable:$true] %s39_s21 }
   0x7   :  { %s9119_s26 = smov 16   ;;  %s9120_s27 = smov [#allocation8]  }
   0x8   :  { %45 = dma.hbm_to_vmem [thread:$0]  %s38_s19, 32768, %s40_s21, [#allocation6], %s9118_s25, %s9118_s25, %s9119_s26  }
   0x9   :  { %s63_s28 = sshll.u32 %s9120_s27, 4  ;;  %s85_s30 = sshll.u32 %s9498_s5, 4  ;;  %s64_s28 = int_to_ptr.vmem [resolvable:$true] %s63_s28  ;;  %s86_s30 = int_to_ptr.hbm [resolvable:$true] %s85_s30 }
   0xa   :  { %69 = dma.hbm_to_vmem [thread:$0]  %s62_s24, 16384, %s64_s28, [#allocation9], %s9118_s25, %s9118_s25, %s9119_s26  }
   0xb   :  { %s114_s13 = sshll.u32 %s9501_s8, 4  ;;  %s9121_s14 = smov [#allocation11]   ;;  %s115_s13 = int_to_ptr.hbm [resolvable:$true] %s114_s13 }
   0xc   :  { %s87_s15 = sshll.u32 %s9121_s14, 4  ;;  %s9122_s16 = smov [#allocation14]   ;;  %s88_s15 = int_to_ptr.vmem [resolvable:$true] %s87_s15 }
   0xd   :  { %93 = dma.hbm_to_vmem [thread:$0]  %s86_s30, 16384, %s88_s15, [#allocation12], %s9118_s25, %s9118_s25, %s9119_s26  }
   0xe   :  { %s116_s5 = sshll.u32 %s9122_s16, 4  ;;  %s27_s19 = sshll.u32 %s9493_s0, 4  ;;  %s117_s5 = int_to_ptr.vmem [resolvable:$true] %s116_s5  ;;  %s28_s19 = int_to_ptr.hbm [resolvable:$true] %s27_s19 }
   0xf   :  { %119 = dma.hbm_to_vmem [thread:$0]  %s115_s13, 64, %s117_s5, [#allocation15]  }
  0x10   :  { %s51_s8 = sshll.u32 %s9495_s2, 4  ;;  %s9123_s22 = smov [#allocation2]   ;;  %s52_s8 = int_to_ptr.hbm [resolvable:$true] %s51_s8 }
  0x11   :  { %s29_s23 = sshll.u32 %s9123_s22, 4  ;;  %s9124_s24 = smov [#allocation7]   ;;  %s30_s23 = int_to_ptr.vmem [resolvable:$true] %s29_s23 }
  0x12   :  { %32 = dma.hbm_to_vmem [thread:$0]  %s28_s19, 512, %s30_s23, [#allocation3]  }
  0x13   :  { %s53_s27 = sshll.u32 %s9124_s24, 4  ;;  %s75_s1 = sshll.u32 %s9497_s4, 4  ;;  %s54_s27 = int_to_ptr.vmem [resolvable:$true] %s53_s27  ;;  %s76_s1 = int_to_ptr.hbm [resolvable:$true] %s75_s1 }
  0x14   :  { %56 = dma.hbm_to_vmem [thread:$0]  %s52_s8, 64, %s54_s27, [#allocation6]  }
  0x15   :  { %s100_s3 = sshll.u32 %s9500_s7, 4  ;;  %s9125_s12 = smov [#allocation10]   ;;  %s101_s3 = int_to_ptr.hbm [resolvable:$true] %s100_s3 }
  0x16   :  { %s77_s2 = sshll.u32 %s9125_s12, 4  ;;  %s9126_s13 = smov [#allocation13]   ;;  %s78_s2 = int_to_ptr.vmem [resolvable:$true] %s77_s2 }
  0x17   :  { %80 = dma.hbm_to_vmem [thread:$0]  %s76_s1, 64, %s78_s2, [#allocation9]  }
  0x18   :  { %s102_s14 = sshll.u32 %s9126_s13, 4  ;;  %s124_s5 = sshll.u32 %s9502_s9, 4  ;;  %s103_s14 = int_to_ptr.vmem [resolvable:$true] %s102_s14  ;;  %s125_s5 = int_to_ptr.hbm [resolvable:$true] %s124_s5 }
  0x19   :  { %108 = dma.hbm_to_vmem [thread:$0]  %s101_s3, 16384, %s103_s14, [#allocation12], %s9118_s25, %s9118_s25, %s9119_s26  }
  0x1a   :  { %s9127_s4 = smov [#allocation16]   ;;  %s9128_s7 = smov 64  }
  0x1b   :  { %s126_s17 = sshll.u32 %s9127_s4, 4  ;;  %s9129_s18 = smov 4   ;;  %s127_s17 = int_to_ptr.vmem [resolvable:$true] %s126_s17 }
  0x1c   :  { %132 = dma.hbm_to_vmem [thread:$0]  %s125_s5, 4096, %s127_s17, [#allocation15], %s9128_s7, %s9128_s7, %s9129_s18  }
  0x1d   :  { %9105 = dma.done.wait [#allocation3], 512  }
  0x1e   :  { %9106 = vsyncadd [#allocation3], 4294966784 }
  0x1f   :  { %9107 = dma.done.wait [#allocation6], 32832  }
  0x20   :  { %9108 = vsyncadd [#allocation6], 4294934464 }
  0x21   :  { %9109 = dma.done.wait [#allocation9], 16448  }
  0x22   :  { %9110 = vsyncadd [#allocation9], 4294950848 }
  0x23   :  { %9111 = dma.done.wait [#allocation12], 32768  }
  0x24   :  { %9112 = vsyncadd [#allocation12], 4294934528 }
  0x25   :  { %9113 = dma.done.wait [#allocation15], 4160  }
  0x26   :  { %9114 = vsyncadd [#allocation15], 4294963136  ;;  %v5603_v0 = vld [vmem:[#allocation5 + $0xe0] sm:$0xf]  ;;  %v8207_v1 = vld [vmem:[#allocation5 + $0xec] sm:$0xf0] }
  0x27   :  { %v5731_v2 = vld [vmem:[#allocation5 + $0x1e0] sm:$0xf]  ;;  %v5604_v3 = vor.u32 %v8207_v1, %v5603_v0  ;;  %v8239_v4 = vld [vmem:[#allocation5 + $0x1ec] sm:$0xf0]  ;;  %s9130_s19 = smov [#allocation17]   ;;  %s5475_s22 = sshll.u32 %s9504_s11, 4  ;;  %s5476_s22 = int_to_ptr.hbm [resolvable:$true] %s5475_s22 }
  0x28   :  { %v5859_v5 = vld [vmem:[#allocation5 + $0x2e0] sm:$0xf]  ;;  %v8271_v6 = vld [vmem:[#allocation5 + $0x2ec] sm:$0xf0]  ;;  %v5732_v7 = vor.u32 %v8239_v4, %v5731_v2  ;;  %s5473_s20 = sshll.u32 %s9130_s19, 4  ;;  %s5474_s20 = int_to_ptr.vmem [resolvable:$true] %s5473_s20 }
  0x29   :  { %v5860_v8 = vor.u32 %v8271_v6, %v5859_v5  ;;  %v5987_v9 = vld [vmem:[#allocation5 + $0x3e0] sm:$0xf]  ;;  %v8303_v10 = vld [vmem:[#allocation5 + $0x3ec] sm:$0xf0]  ;;  %1749 = vmatpush.bf16.msra.mxu0 %v5604_v3 }
  0x2a   :  { %v5587_v11 = vld [vmem:[#allocation5 + $0xc0] sm:$0xf]  ;;  %v5988_v12 = vor.u32 %v8303_v10, %v5987_v9  ;;  %v8203_v13 = vld [vmem:[#allocation5 + $0xcc] sm:$0xf0]  ;;  %1762 = vmatpush.bf16.msra.mxu1 %v5732_v7 }
  0x2b   :  { %v5715_v14 = vld [vmem:[#allocation5 + $0x1c0] sm:$0xf]  ;;  %v8235_v15 = vld [vmem:[#allocation5 + $0x1cc] sm:$0xf0]  ;;  %1775 = vmatpush.bf16.msra.mxu2 %v5860_v8  ;;  %v5588_v16 = vor.u32 %v8203_v13, %v5587_v11 }
  0x2c   :  { %v5716_v17 = vor.u32 %v8235_v15, %v5715_v14  ;;  %v5843_v18 = vld [vmem:[#allocation5 + $0x2c0] sm:$0xf]  ;;  %v8267_v19 = vld [vmem:[#allocation5 + $0x2cc] sm:$0xf0]  ;;  %1788 = vmatpush.bf16.msra.mxu3 %v5988_v12 }
  0x2d   :  { %v5971_v20 = vld [vmem:[#allocation5 + $0x3c0] sm:$0xf]  ;;  %v5844_v21 = vor.u32 %v8267_v19, %v5843_v18  ;;  %v8299_v22 = vld [vmem:[#allocation5 + $0x3cc] sm:$0xf0]  ;;  %1750 = vmatpush.bf16.msra.mxu0 %v5588_v16 }
  0x2e   :  { %v5571_v23 = vld [vmem:[#allocation5 + $0xa0] sm:$0xf]  ;;  %v8199_v24 = vld [vmem:[#allocation5 + $0xac] sm:$0xf0]  ;;  %v5972_v25 = vor.u32 %v8299_v22, %v5971_v20  ;;  %1763 = vmatpush.bf16.msra.mxu1 %v5716_v17 }
  0x2f   :  { %v5699_v26 = vld [vmem:[#allocation5 + $0x1a0] sm:$0xf]  ;;  %v8231_v27 = vld [vmem:[#allocation5 + $0x1ac] sm:$0xf0]  ;;  %v5572_v29 = vor.u32 %v8199_v24, %v5571_v23  ;;  %1776 = vmatpush.bf16.msra.mxu2 %v5844_v21 }
  0x30   :  { %v5827_v28 = vld [vmem:[#allocation5 + $0x2a0] sm:$0xf]  ;;  %v8263_v30 = vld [vmem:[#allocation5 + $0x2ac] sm:$0xf0]  ;;  %v5700_v33 = vor.u32 %v8231_v27, %v5699_v26  ;;  %1789 = vmatpush.bf16.msra.mxu3 %v5972_v25 }
  0x31   :  { %v5955_v31 = vld [vmem:[#allocation5 + $0x3a0] sm:$0xf]  ;;  %v8295_v32 = vld [vmem:[#allocation5 + $0x3ac] sm:$0xf0]  ;;  %v5828_v34 = vor.u32 %v8263_v30, %v5827_v28  ;;  %1751 = vmatpush.bf16.msra.mxu0 %v5572_v29 }
  0x32   :  { %v5555_v35 = vld [vmem:[#allocation5 + $0x80] sm:$0xf]  ;;  %v8195_v36 = vld [vmem:[#allocation5 + $0x8c] sm:$0xf0]  ;;  %v5956_v38 = vor.u32 %v8295_v32, %v5955_v31  ;;  %1764 = vmatpush.bf16.msra.mxu1 %v5700_v33 }
  0x33   :  { %v5683_v37 = vld [vmem:[#allocation5 + $0x180] sm:$0xf]  ;;  %v8227_v39 = vld [vmem:[#allocation5 + $0x18c] sm:$0xf0]  ;;  %v5556_v44 = vor.u32 %v8195_v36, %v5555_v35  ;;  %1777 = vmatpush.bf16.msra.mxu2 %v5828_v34 }
  0x34   :  { %v5811_v40 = vld [vmem:[#allocation5 + $0x280] sm:$0xf]  ;;  %v8259_v41 = vld [vmem:[#allocation5 + $0x28c] sm:$0xf0]  ;;  %v5684_v45 = vor.u32 %v8227_v39, %v5683_v37  ;;  %1790 = vmatpush.bf16.msra.mxu3 %v5956_v38 }
  0x35   :  { %v5939_v42 = vld [vmem:[#allocation5 + $0x380] sm:$0xf]  ;;  %v8291_v43 = vld [vmem:[#allocation5 + $0x38c] sm:$0xf0]  ;;  %v5812_v46 = vor.u32 %v8259_v41, %v5811_v40  ;;  %1752 = vmatpush.bf16.msra.mxu0 %v5556_v44 }
  0x36   :  { %v5539_v47 = vld [vmem:[#allocation5 + $0x60] sm:$0xf]  ;;  %v8191_v48 = vld [vmem:[#allocation5 + $0x6c] sm:$0xf0]  ;;  %v5940_v50 = vor.u32 %v8291_v43, %v5939_v42  ;;  %1765 = vmatpush.bf16.msra.mxu1 %v5684_v45 }
  0x37   :  { %v5667_v49 = vld [vmem:[#allocation5 + $0x160] sm:$0xf]  ;;  %v8223_v51 = vld [vmem:[#allocation5 + $0x16c] sm:$0xf0]  ;;  %v5540_v56 = vor.u32 %v8191_v48, %v5539_v47  ;;  %1778 = vmatpush.bf16.msra.mxu2 %v5812_v46 }
  0x38   :  { %v5795_v52 = vld [vmem:[#allocation5 + $0x260] sm:$0xf]  ;;  %v8255_v53 = vld [vmem:[#allocation5 + $0x26c] sm:$0xf0]  ;;  %v5668_v57 = vor.u32 %v8223_v51, %v5667_v49  ;;  %1791 = vmatpush.bf16.msra.mxu3 %v5940_v50 }
  0x39   :  { %v5923_v54 = vld [vmem:[#allocation5 + $0x360] sm:$0xf]  ;;  %v8287_v55 = vld [vmem:[#allocation5 + $0x36c] sm:$0xf0]  ;;  %v5796_v58 = vor.u32 %v8255_v53, %v5795_v52  ;;  %1753 = vmatpush.bf16.msra.mxu0 %v5540_v56 }
  0x3a   :  { %v5523_v59 = vld [vmem:[#allocation5 + $0x40] sm:$0xf]  ;;  %v8187_v60 = vld [vmem:[#allocation5 + $0x4c] sm:$0xf0]  ;;  %v5924_v62 = vor.u32 %v8287_v55, %v5923_v54  ;;  %1766 = vmatpush.bf16.msra.mxu1 %v5668_v57 }
  0x3b   :  { %v5651_v61 = vld [vmem:[#allocation5 + $0x140] sm:$0xf]  ;;  %v8219_v63 = vld [vmem:[#allocation5 + $0x14c] sm:$0xf0]  ;;  %v5524_v4 = vor.u32 %v8187_v60, %v5523_v59  ;;  %1779 = vmatpush.bf16.msra.mxu2 %v5796_v58 }
  0x3c   :  { %v5779_v0 = vld [vmem:[#allocation5 + $0x240] sm:$0xf]  ;;  %v8251_v1 = vld [vmem:[#allocation5 + $0x24c] sm:$0xf0]  ;;  %v5652_v5 = vor.u32 %v8219_v63, %v5651_v61  ;;  %1792 = vmatpush.bf16.msra.mxu3 %v5924_v62 }
  0x3d   :  { %v5907_v2 = vld [vmem:[#allocation5 + $0x340] sm:$0xf]  ;;  %v8283_v3 = vld [vmem:[#allocation5 + $0x34c] sm:$0xf0]  ;;  %v5780_v6 = vor.u32 %v8251_v1, %v5779_v0  ;;  %1754 = vmatpush.bf16.msra.mxu0 %v5524_v4 }
  0x3e   :  { %v5507_v7 = vld [vmem:[#allocation5 + $0x20] sm:$0xf]  ;;  %v8183_v8 = vld [vmem:[#allocation5 + $0x2c] sm:$0xf0]  ;;  %v5908_v10 = vor.u32 %v8283_v3, %v5907_v2  ;;  %1767 = vmatpush.bf16.msra.mxu1 %v5652_v5  ;;  %v172_v2 = vld [vmem:[#allocation2 + $0x8] sm:$0xff] }
  0x3f   :  { %v5635_v9 = vld [vmem:[#allocation5 + $0x120] sm:$0xf]  ;;  %v8215_v11 = vld [vmem:[#allocation5 + $0x12c] sm:$0xf0]  ;;  %v5508_v16 = vor.u32 %v8183_v8, %v5507_v7  ;;  %1780 = vmatpush.bf16.msra.mxu2 %v5780_v6  ;;  %v447_v8 = vunpack.c.l.b16 %v172_v2 }
  0x40   :  { %v5763_v12 = vld [vmem:[#allocation5 + $0x220] sm:$0xf]  ;;  %v8247_v13 = vld [vmem:[#allocation5 + $0x22c] sm:$0xf0]  ;;  %v5636_v19 = vor.u32 %v8215_v11, %v5635_v9  ;;  %1793 = vmatpush.bf16.msra.mxu3 %v5908_v10  ;;  %v448_v10 = vunpack.c.h.b16 %v172_v2 }
  0x41   :  { %v5891_v14 = vld [vmem:[#allocation5 + $0x320] sm:$0xf]  ;;  %v8279_v15 = vld [vmem:[#allocation5 + $0x32c] sm:$0xf0]  ;;  %v5764_v20 = vor.u32 %v8247_v13, %v5763_v12  ;;  %1755 = vmatpush.bf16.msra.mxu0 %v5508_v16 }
  0x42   :  { %v5491_v17 = vld [vmem:[#allocation5] sm:$0xf]  ;;  %v8179_v18 = vld [vmem:[#allocation5 + $0xc] sm:$0xf0]  ;;  %v5892_v24 = vor.u32 %v8279_v15, %v5891_v14  ;;  %1768 = vmatpush.bf16.msra.mxu1 %v5636_v19 }
  0x43   :  { %v5619_v21 = vld [vmem:[#allocation5 + $0x100] sm:$0xf]  ;;  %v8211_v22 = vld [vmem:[#allocation5 + $0x10c] sm:$0xf0]  ;;  %v5492_v31 = vor.u32 %v8179_v18, %v5491_v17  ;;  %1781 = vmatpush.bf16.msra.mxu2 %v5764_v20  ;;  %v9230_v18 = vpack.c.b16 %v447_v8, %v447_v8  ;;  %v9234_v20 = vpack.c.b16 %v448_v10, %v448_v10  ;;  %v8205_v8 = vld [vmem:[#allocation5 + $0xe4] sm:$0xf] }
  0x44   :  { %v5747_v23 = vld [vmem:[#allocation5 + $0x200] sm:$0xf]  ;;  %v8243_v25 = vld [vmem:[#allocation5 + $0x20c] sm:$0xf0]  ;;  %v5620_v35 = vor.u32 %v8211_v22, %v5619_v21  ;;  %1794 = vmatpush.bf16.msra.mxu3 %v5892_v24  ;;  %v8237_v10 = vld [vmem:[#allocation5 + $0x1e4] sm:$0xf] }
  0x45   :  { %v5875_v26 = vld [vmem:[#allocation5 + $0x300] sm:$0xf]  ;;  %v8275_v27 = vld [vmem:[#allocation5 + $0x30c] sm:$0xf0]  ;;  %v5748_v36 = vor.u32 %v8243_v25, %v5747_v23  ;;  %1756 = vmatpush.bf16.msra.mxu0 %v5492_v31 }
  0x46   :  { %v6115_v28 = vld [vmem:[#allocation5 + $0x4e0] sm:$0xf]  ;;  %v8335_v29 = vld [vmem:[#allocation5 + $0x4ec] sm:$0xf0]  ;;  %v5876_v39 = vor.u32 %v8275_v27, %v5875_v26  ;;  %1769 = vmatpush.bf16.msra.mxu1 %v5620_v35 }
  0x47   :  { %v6243_v30 = vld [vmem:[#allocation5 + $0x5e0] sm:$0xf]  ;;  %v8367_v32 = vld [vmem:[#allocation5 + $0x5ec] sm:$0xf0]  ;;  %v6116_v40 = vor.u32 %v8335_v29, %v6115_v28  ;;  %1782 = vmatpush.bf16.msra.mxu2 %v5748_v36 }
  0x48   :  { %v6371_v33 = vld [vmem:[#allocation5 + $0x6e0] sm:$0xf]  ;;  %v8399_v34 = vld [vmem:[#allocation5 + $0x6ec] sm:$0xf0]  ;;  %v6244_v41 = vor.u32 %v8367_v32, %v6243_v30  ;;  %1795 = vmatpush.bf16.msra.mxu3 %v5876_v39 }
  0x49   :  { %v6499_v37 = vld [vmem:[#allocation5 + $0x7e0] sm:$0xf]  ;;  %v8431_v38 = vld [vmem:[#allocation5 + $0x7ec] sm:$0xf0]  ;;  %v6372_v42 = vor.u32 %v8399_v34, %v6371_v33  ;;  %1801 = vmatpush.bf16.msrb.mxu0 %v6116_v40 }
  0x4a   :  { %v6099_v43 = vld [vmem:[#allocation5 + $0x4c0] sm:$0xf]  ;;  %v8331_v44 = vld [vmem:[#allocation5 + $0x4cc] sm:$0xf0]  ;;  %v6500_v46 = vor.u32 %v8431_v38, %v6499_v37  ;;  %1814 = vmatpush.bf16.msrb.mxu1 %v6244_v41  ;;  %1783 = vmatmul.bf16.vlgmr.msra.gmra.mxu2 %v9230_v18 }
  0x4b   :  { %v6227_v45 = vld [vmem:[#allocation5 + $0x5c0] sm:$0xf]  ;;  %v8363_v47 = vld [vmem:[#allocation5 + $0x5cc] sm:$0xf0]  ;;  %v6100_v52 = vor.u32 %v8331_v44, %v6099_v43  ;;  %1827 = vmatpush.bf16.msrb.mxu2 %v6372_v42  ;;  %1796 = vmatmul.bf16.vlgmr.msra.gmra.mxu3 %v9234_v20 }
  0x4c   :  { %v6355_v48 = vld [vmem:[#allocation5 + $0x6c0] sm:$0xf]  ;;  %v8395_v49 = vld [vmem:[#allocation5 + $0x6cc] sm:$0xf0]  ;;  %v6228_v54 = vor.u32 %v8363_v47, %v6227_v45  ;;  %1840 = vmatpush.bf16.msrb.mxu3 %v6500_v46 }
  0x4d   :  { %v6483_v50 = vld [vmem:[#allocation5 + $0x7c0] sm:$0xf]  ;;  %v8427_v51 = vld [vmem:[#allocation5 + $0x7cc] sm:$0xf0]  ;;  %v6356_v55 = vor.u32 %v8395_v49, %v6355_v48  ;;  %1802 = vmatpush.bf16.msrb.mxu0 %v6100_v52 }
  0x4e   :  { %v6083_v53 = vld [vmem:[#allocation5 + $0x4a0] sm:$0xf]  ;;  %v8327_v56 = vld [vmem:[#allocation5 + $0x4ac] sm:$0xf0]  ;;  %v6484_v59 = vor.u32 %v8427_v51, %v6483_v50  ;;  %1815 = vmatpush.bf16.msrb.mxu1 %v6228_v54 }
  0x4f   :  { %v6211_v57 = vld [vmem:[#allocation5 + $0x5a0] sm:$0xf]  ;;  %v8359_v58 = vld [vmem:[#allocation5 + $0x5ac] sm:$0xf0]  ;;  %v6084_v0 = vor.u32 %v8327_v56, %v6083_v53  ;;  %1828 = vmatpush.bf16.msrb.mxu2 %v6356_v55 }
  0x50   :  { %v6339_v60 = vld [vmem:[#allocation5 + $0x6a0] sm:$0xf]  ;;  %v8391_v61 = vld [vmem:[#allocation5 + $0x6ac] sm:$0xf0]  ;;  %v6212_v1 = vor.u32 %v8359_v58, %v6211_v57  ;;  %1841 = vmatpush.bf16.msrb.mxu3 %v6484_v59 }
  0x51   :  { %v6467_v62 = vld [vmem:[#allocation5 + $0x7a0] sm:$0xf]  ;;  %v8423_v63 = vld [vmem:[#allocation5 + $0x7ac] sm:$0xf0]  ;;  %v6340_v4 = vor.u32 %v8391_v61, %v6339_v60  ;;  %1803 = vmatpush.bf16.msrb.mxu0 %v6084_v0 }
  0x52   :  { %v171_v3 = vld [vmem:[#allocation2] sm:$0xff]  ;;  %v8323_v6 = vld [vmem:[#allocation5 + $0x48c] sm:$0xf0]  ;;  %v6468_v11 = vor.u32 %v8423_v63, %v6467_v62  ;;  %1816 = vmatpush.bf16.msrb.mxu1 %v6212_v1 }
  0x53   :  { %v6067_v5 = vld [vmem:[#allocation5 + $0x480] sm:$0xf]  ;;  %v445_v9 = vunpack.c.l.b16 %v171_v3  ;;  %v8355_v12 = vld [vmem:[#allocation5 + $0x58c] sm:$0xf0]  ;;  %v446_v15 = vunpack.c.h.b16 %v171_v3  ;;  %1829 = vmatpush.bf16.msrb.mxu2 %v6340_v4  ;;  %v174_v3 = vld [vmem:[#allocation2 + $0x18] sm:$0xff] }
  0x54   :  { %v6195_v7 = vld [vmem:[#allocation5 + $0x580] sm:$0xf]  ;;  %v8387_v14 = vld [vmem:[#allocation5 + $0x68c] sm:$0xf0]  ;;  %v6068_v21 = vor.u32 %v8323_v6, %v6067_v5  ;;  %1842 = vmatpush.bf16.msrb.mxu3 %v6468_v11 }
  0x55   :  { %v6323_v13 = vld [vmem:[#allocation5 + $0x680] sm:$0xf]  ;;  %v8419_v17 = vld [vmem:[#allocation5 + $0x78c] sm:$0xf0]  ;;  %v9232_v19 = vpack.c.b16 %v445_v9, %v445_v9  ;;  %v9236_v22 = vpack.c.b16 %v446_v15, %v446_v15  ;;  %v6196_v23 = vor.u32 %v8355_v12, %v6195_v7  ;;  %v5605_v9 = vld [vmem:[#allocation5 + $0xf0] sm:$0xf0]  ;;  %v451_v15 = vunpack.c.l.b16 %v174_v3 }
  0x56   :  { %v6451_v16 = vld [vmem:[#allocation5 + $0x780] sm:$0xf]  ;;  %v6324_v24 = vor.u32 %v8387_v14, %v6323_v13  ;;  %v8319_v26 = vld [vmem:[#allocation5 + $0x46c] sm:$0xf0]  ;;  %1804 = vmatpush.bf16.msrb.mxu0 %v6068_v21  ;;  %v5733_v12 = vld [vmem:[#allocation5 + $0x1f0] sm:$0xf0] }
  0x57   :  { %v6051_v25 = vld [vmem:[#allocation5 + $0x460] sm:$0xf]  ;;  %v6452_v28 = vor.u32 %v8419_v17, %v6451_v16  ;;  %v8351_v29 = vld [vmem:[#allocation5 + $0x56c] sm:$0xf0]  ;;  %1757 = vmatmul.bf16.vlgmr.msra.gmra.mxu0 %v9232_v19  ;;  %1770 = vmatmul.bf16.vlgmr.msra.gmra.mxu1 %v9236_v22  ;;  %v8269_v13 = vld [vmem:[#allocation5 + $0x2e4] sm:$0xf] }
  0x58   :  { %v6179_v27 = vld [vmem:[#allocation5 + $0x560] sm:$0xf]  ;;  %v8383_v31 = vld [vmem:[#allocation5 + $0x66c] sm:$0xf0]  ;;  %v6052_v34 = vor.u32 %v8319_v26, %v6051_v25  ;;  %1817 = vmatpush.bf16.msrb.mxu1 %v6196_v23  ;;  %1830 = vmatpush.bf16.msrb.mxu2 %v6324_v24  ;;  %v5861_v14 = vld [vmem:[#allocation5 + $0x2f0] sm:$0xf0]  ;;  %v452_v25 = vunpack.c.h.b16 %v174_v3 }
  0x59   :  { %v6307_v30 = vld [vmem:[#allocation5 + $0x660] sm:$0xf]  ;;  %v8415_v33 = vld [vmem:[#allocation5 + $0x76c] sm:$0xf0]  ;;  %v6180_v35 = vor.u32 %v8351_v29, %v6179_v27  ;;  %1843 = vmatpush.bf16.msrb.mxu3 %v6452_v28  ;;  %v8301_v21 = vld [vmem:[#allocation5 + $0x3e4] sm:$0xf]  ;;  %v5608_v27 = vor.u32 %v8205_v8, %v5605_v9  ;;  %v5736_v29 = vor.u32 %v8237_v10, %v5733_v12 }
  0x5a   :  { %v6435_v32 = vld [vmem:[#allocation5 + $0x760] sm:$0xf]  ;;  %v6308_v36 = vor.u32 %v8383_v31, %v6307_v30  ;;  %v8315_v38 = vld [vmem:[#allocation5 + $0x44c] sm:$0xf0]  ;;  %1805 = vmatpush.bf16.msrb.mxu0 %v6052_v34  ;;  %v5989_v23 = vld [vmem:[#allocation5 + $0x3f0] sm:$0xf0]  ;;  %v5864_v30 = vor.u32 %v8269_v13, %v5861_v14 }
  0x5b   :  { %v6035_v37 = vld [vmem:[#allocation5 + $0x440] sm:$0xf]  ;;  %v6436_v40 = vor.u32 %v8415_v33, %v6435_v32  ;;  %v8347_v41 = vld [vmem:[#allocation5 + $0x54c] sm:$0xf0]  ;;  %v8201_v31 = vld [vmem:[#allocation5 + $0xc4] sm:$0xf]  ;;  %v5992_v34 = vor.u32 %v8301_v21, %v5989_v23 }
  0x5c   :  { %v6163_v39 = vld [vmem:[#allocation5 + $0x540] sm:$0xf]  ;;  %v8379_v43 = vld [vmem:[#allocation5 + $0x64c] sm:$0xf0]  ;;  %v6036_v46 = vor.u32 %v8315_v38, %v6035_v37  ;;  %1818 = vmatpush.bf16.msrb.mxu1 %v6180_v35  ;;  %1831 = vmatpush.bf16.msrb.mxu2 %v6308_v36  ;;  %v5589_v32 = vld [vmem:[#allocation5 + $0xd0] sm:$0xf0]  ;;  %v9242_v38 = vpack.c.b16 %v451_v15, %v451_v15 }
  0x5d   :  { %v6291_v42 = vld [vmem:[#allocation5 + $0x640] sm:$0xf]  ;;  %v8411_v45 = vld [vmem:[#allocation5 + $0x74c] sm:$0xf0]  ;;  %v6164_v47 = vor.u32 %v8347_v41, %v6163_v39  ;;  %1844 = vmatpush.bf16.msrb.mxu3 %v6436_v40  ;;  %v8233_v33 = vld [vmem:[#allocation5 + $0x1c4] sm:$0xf] }
  0x5e   :  { %v6419_v44 = vld [vmem:[#allocation5 + $0x740] sm:$0xf]  ;;  %v6292_v48 = vor.u32 %v8379_v43, %v6291_v42  ;;  %v8311_v50 = vld [vmem:[#allocation5 + $0x42c] sm:$0xf0]  ;;  %1806 = vmatpush.bf16.msrb.mxu0 %v6036_v46  ;;  %v5717_v35 = vld [vmem:[#allocation5 + $0x1d0] sm:$0xf0]  ;;  %v9246_v42 = vpack.c.b16 %v452_v25, %v452_v25  ;;  %v5592_v43 = vor.u32 %v8201_v31, %v5589_v32 }
  0x5f   :  { %v6019_v49 = vld [vmem:[#allocation5 + $0x420] sm:$0xf]  ;;  %v6420_v52 = vor.u32 %v8411_v45, %v6419_v44  ;;  %v8343_v53 = vld [vmem:[#allocation5 + $0x52c] sm:$0xf0]  ;;  %v8265_v36 = vld [vmem:[#allocation5 + $0x2c4] sm:$0xf]  ;;  %v5720_v45 = vor.u32 %v8233_v33, %v5717_v35 }
  0x60   :  { %v6147_v51 = vld [vmem:[#allocation5 + $0x520] sm:$0xf]  ;;  %v8375_v55 = vld [vmem:[#allocation5 + $0x62c] sm:$0xf0]  ;;  %v6020_v59 = vor.u32 %v8311_v50, %v6019_v49  ;;  %1819 = vmatpush.bf16.msrb.mxu1 %v6164_v47  ;;  %1832 = vmatpush.bf16.msrb.mxu2 %v6292_v48  ;;  %v5845_v37 = vld [vmem:[#allocation5 + $0x2d0] sm:$0xf0] }
  0x61   :  { %v6275_v54 = vld [vmem:[#allocation5 + $0x620] sm:$0xf]  ;;  %v8407_v57 = vld [vmem:[#allocation5 + $0x72c] sm:$0xf0]  ;;  %v6148_v63 = vor.u32 %v8343_v53, %v6147_v51  ;;  %1845 = vmatpush.bf16.msrb.mxu3 %v6420_v52  ;;  %v8297_v39 = vld [vmem:[#allocation5 + $0x3c4] sm:$0xf]  ;;  %v5848_v46 = vor.u32 %v8265_v36, %v5845_v37 }
  0x62   :  { %v6403_v56 = vld [vmem:[#allocation5 + $0x720] sm:$0xf]  ;;  %v8307_v60 = vld [vmem:[#allocation5 + $0x40c] sm:$0xf0]  ;;  %v6276_v0 = vor.u32 %v8375_v55, %v6275_v54  ;;  %1807 = vmatpush.bf16.msrb.mxu0 %v6020_v59  ;;  %v5973_v40 = vld [vmem:[#allocation5 + $0x3d0] sm:$0xf0] }
  0x63   :  { %v6003_v58 = vld [vmem:[#allocation5 + $0x400] sm:$0xf]  ;;  %v8339_v62 = vld [vmem:[#allocation5 + $0x50c] sm:$0xf0]  ;;  %v6404_v4 = vor.u32 %v8407_v57, %v6403_v56  ;;  %v8197_v47 = vld [vmem:[#allocation5 + $0xa4] sm:$0xf]  ;;  %v5976_v50 = vor.u32 %v8297_v39, %v5973_v40 }
  0x64   :  { %v6131_v61 = vld [vmem:[#allocation5 + $0x500] sm:$0xf]  ;;  %v8371_v2 = vld [vmem:[#allocation5 + $0x60c] sm:$0xf0]  ;;  %v6004_v11 = vor.u32 %v8307_v60, %v6003_v58  ;;  %1820 = vmatpush.bf16.msrb.mxu1 %v6148_v63  ;;  %1833 = vmatpush.bf16.msrb.mxu2 %v6276_v0  ;;  %v5573_v48 = vld [vmem:[#allocation5 + $0xb0] sm:$0xf0] }
  0x65   :  { %v6259_v1 = vld [vmem:[#allocation5 + $0x600] sm:$0xf]  ;;  %v8403_v6 = vld [vmem:[#allocation5 + $0x70c] sm:$0xf0]  ;;  %v6132_v16 = vor.u32 %v8339_v62, %v6131_v61  ;;  %1846 = vmatpush.bf16.msrb.mxu3 %v6404_v4  ;;  %v8229_v49 = vld [vmem:[#allocation5 + $0x1a4] sm:$0xf]  ;;  %v5576_v56 = vor.u32 %v8197_v47, %v5573_v48 }
  0x66   :  { %v6387_v5 = vld [vmem:[#allocation5 + $0x700] sm:$0xf]  ;;  %v173_v7 = vld [vmem:[#allocation2 + $0x10] sm:$0xff]  ;;  %v6260_v17 = vor.u32 %v8371_v2, %v6259_v1  ;;  %1808 = vmatpush.bf16.msrb.mxu0 %v6004_v11  ;;  %v8261_v52 = vld [vmem:[#allocation5 + $0x2a4] sm:$0xf] }
  0x67   :  { %v449_v24 = vunpack.c.l.b16 %v173_v7  ;;  %v6388_v26 = vor.u32 %v8403_v6, %v6387_v5  ;;  %v450_v28 = vunpack.c.h.b16 %v173_v7  ;;  %v5701_v51 = vld [vmem:[#allocation5 + $0x1b0] sm:$0xf0]  ;;  %v8293_v54 = vld [vmem:[#allocation5 + $0x3a4] sm:$0xf] }
  0x68   :  { %1821 = vmatpush.bf16.msrb.mxu1 %v6132_v16  ;;  %1834 = vmatpush.bf16.msrb.mxu2 %v6260_v17  ;;  %v5829_v53 = vld [vmem:[#allocation5 + $0x2b0] sm:$0xf0]  ;;  %v5704_v57 = vor.u32 %v8229_v49, %v5701_v51  ;;  %v8193_v59 = vld [vmem:[#allocation5 + $0x84] sm:$0xf] }
  0x69   :  { %v9244_v41 = vpack.c.b16 %v449_v24, %v449_v24  ;;  %1847 = vmatpush.bf16.msrb.mxu3 %v6388_v26  ;;  %v9248_v44 = vpack.c.b16 %v450_v28, %v450_v28  ;;  %v5957_v55 = vld [vmem:[#allocation5 + $0x3b0] sm:$0xf0]  ;;  %v5832_v58 = vor.u32 %v8261_v52, %v5829_v53  ;;  %v8225_v61 = vld [vmem:[#allocation5 + $0x184] sm:$0xf] }
  0x6a   :  { %1853 = vmatpush.bf16.msra.mxu0 %v5608_v27  ;;  %v5557_v60 = vld [vmem:[#allocation5 + $0x90] sm:$0xf0]  ;;  %v5960_v62 = vor.u32 %v8293_v54, %v5957_v55  ;;  %v8257_v0 = vld [vmem:[#allocation5 + $0x284] sm:$0xf] }
  0x6b   :  { %1835 = vmatmul.bf16.vlgmr.msrb.gmra.mxu2 %v9242_v38  ;;  %1809 = vmatmul.bf16.vlgmr.msrb.gmra.mxu0 %v9244_v41  ;;  %v5685_v63 = vld [vmem:[#allocation5 + $0x190] sm:$0xf0]  ;;  %v8289_v2 = vld [vmem:[#allocation5 + $0x384] sm:$0xf]  ;;  %v5560_v4 = vor.u32 %v8193_v59, %v5557_v60 }
  0x6c   :  { %1866 = vmatpush.bf16.msra.mxu1 %v5736_v29  ;;  %1879 = vmatpush.bf16.msra.mxu2 %v5864_v30  ;;  %v5813_v1 = vld [vmem:[#allocation5 + $0x290] sm:$0xf0]  ;;  %v5688_v5 = vor.u32 %v8225_v61, %v5685_v63  ;;  %v8189_v7 = vld [vmem:[#allocation5 + $0x64] sm:$0xf] }
  0x6d   :  { %1892 = vmatpush.bf16.msra.mxu3 %v5992_v34  ;;  %1822 = vmatmul.bf16.vlgmr.msrb.gmra.mxu1 %v9248_v44  ;;  %v5941_v3 = vld [vmem:[#allocation5 + $0x390] sm:$0xf0]  ;;  %v5816_v6 = vor.u32 %v8257_v0, %v5813_v1  ;;  %v8221_v9 = vld [vmem:[#allocation5 + $0x164] sm:$0xf] }
  0x6e   :  { %1848 = vmatmul.bf16.vlgmr.msrb.gmra.mxu3 %v9246_v42  ;;  %1854 = vmatpush.bf16.msra.mxu0 %v5592_v43  ;;  %v5541_v8 = vld [vmem:[#allocation5 + $0x70] sm:$0xf0]  ;;  %v5944_v10 = vor.u32 %v8289_v2, %v5941_v3  ;;  %v8253_v12 = vld [vmem:[#allocation5 + $0x264] sm:$0xf] }
  0x6f   :  { %v5669_v11 = vld [vmem:[#allocation5 + $0x170] sm:$0xf0]  ;;  %v8285_v14 = vld [vmem:[#allocation5 + $0x364] sm:$0xf]  ;;  %v5544_v16 = vor.u32 %v8189_v7, %v5541_v8 }
  0x70   :  { %1867 = vmatpush.bf16.msra.mxu1 %v5720_v45  ;;  %1880 = vmatpush.bf16.msra.mxu2 %v5848_v46  ;;  %v5797_v13 = vld [vmem:[#allocation5 + $0x270] sm:$0xf0]  ;;  %v5672_v17 = vor.u32 %v8221_v9, %v5669_v11  ;;  %v8185_v23 = vld [vmem:[#allocation5 + $0x44] sm:$0xf] }
  0x71   :  { %1893 = vmatpush.bf16.msra.mxu3 %v5976_v50  ;;  %v5925_v15 = vld [vmem:[#allocation5 + $0x370] sm:$0xf0]  ;;  %v5800_v21 = vor.u32 %v8253_v12, %v5797_v13  ;;  %v8217_v25 = vld [vmem:[#allocation5 + $0x144] sm:$0xf] }
  0x72   :  { %1855 = vmatpush.bf16.msra.mxu0 %v5576_v56  ;;  %v5525_v24 = vld [vmem:[#allocation5 + $0x50] sm:$0xf0]  ;;  %v5928_v26 = vor.u32 %v8285_v14, %v5925_v15  ;;  %v8249_v28 = vld [vmem:[#allocation5 + $0x244] sm:$0xf] }
  0x73   :  { %v5653_v27 = vld [vmem:[#allocation5 + $0x150] sm:$0xf0]  ;;  %v8281_v30 = vld [vmem:[#allocation5 + $0x344] sm:$0xf]  ;;  %v5528_v32 = vor.u32 %v8185_v23, %v5525_v24 }
  0x74   :  { %1868 = vmatpush.bf16.msra.mxu1 %v5704_v57  ;;  %1881 = vmatpush.bf16.msra.mxu2 %v5832_v58  ;;  %v5781_v29 = vld [vmem:[#allocation5 + $0x250] sm:$0xf0]  ;;  %v5656_v33 = vor.u32 %v8217_v25, %v5653_v27  ;;  %v8181_v35 = vld [vmem:[#allocation5 + $0x24] sm:$0xf] }
  0x75   :  { %1894 = vmatpush.bf16.msra.mxu3 %v5960_v62  ;;  %v5909_v31 = vld [vmem:[#allocation5 + $0x350] sm:$0xf0]  ;;  %v5784_v34 = vor.u32 %v8249_v28, %v5781_v29  ;;  %v8213_v37 = vld [vmem:[#allocation5 + $0x124] sm:$0xf] }
  0x76   :  { %1856 = vmatpush.bf16.msra.mxu0 %v5560_v4  ;;  %v5509_v36 = vld [vmem:[#allocation5 + $0x30] sm:$0xf0]  ;;  %v5912_v39 = vor.u32 %v8281_v30, %v5909_v31  ;;  %v8245_v43 = vld [vmem:[#allocation5 + $0x224] sm:$0xf] }
  0x77   :  { %v5637_v40 = vld [vmem:[#allocation5 + $0x130] sm:$0xf0]  ;;  %v8277_v46 = vld [vmem:[#allocation5 + $0x324] sm:$0xf]  ;;  %v5512_v48 = vor.u32 %v8181_v35, %v5509_v36 }
  0x78   :  { %1869 = vmatpush.bf16.msra.mxu1 %v5688_v5  ;;  %1882 = vmatpush.bf16.msra.mxu2 %v5816_v6  ;;  %v5765_v45 = vld [vmem:[#allocation5 + $0x230] sm:$0xf0]  ;;  %v8177_v49 = vld [vmem:[#allocation5 + $0x4] sm:$0xf]  ;;  %v5640_v51 = vor.u32 %v8213_v37, %v5637_v40 }
  0x79   :  { %1895 = vmatpush.bf16.msra.mxu3 %v5944_v10  ;;  %v5893_v47 = vld [vmem:[#allocation5 + $0x330] sm:$0xf0]  ;;  %v5768_v52 = vor.u32 %v8245_v43, %v5765_v45  ;;  %v8209_v53 = vld [vmem:[#allocation5 + $0x104] sm:$0xf] }
  0x7a   :  { %1857 = vmatpush.bf16.msra.mxu0 %v5544_v16  ;;  %v5493_v50 = vld [vmem:[#allocation5 + $0x10] sm:$0xf0]  ;;  %v8241_v55 = vld [vmem:[#allocation5 + $0x204] sm:$0xf]  ;;  %v5896_v56 = vor.u32 %v8277_v46, %v5893_v47 }
  0x7b   :  { %v5621_v54 = vld [vmem:[#allocation5 + $0x110] sm:$0xf0]  ;;  %v8273_v58 = vld [vmem:[#allocation5 + $0x304] sm:$0xf]  ;;  %v5496_v63 = vor.u32 %v8177_v49, %v5493_v50 }
  0x7c   :  { %1870 = vmatpush.bf16.msra.mxu1 %v5672_v17  ;;  %1883 = vmatpush.bf16.msra.mxu2 %v5800_v21  ;;  %v5749_v57 = vld [vmem:[#allocation5 + $0x210] sm:$0xf0]  ;;  %v8333_v60 = vld [vmem:[#allocation5 + $0x4e4] sm:$0xf]  ;;  %v5624_v3 = vor.u32 %v8209_v53, %v5621_v54 }
  0x7d   :  { %1896 = vmatpush.bf16.msra.mxu3 %v5928_v26  ;;  %v5877_v59 = vld [vmem:[#allocation5 + $0x310] sm:$0xf0]  ;;  %v8365_v62 = vld [vmem:[#allocation5 + $0x5e4] sm:$0xf]  ;;  %v5752_v4 = vor.u32 %v8241_v55, %v5749_v57 }
  0x7e   :  { %1858 = vmatpush.bf16.msra.mxu0 %v5528_v32  ;;  %v6117_v61 = vld [vmem:[#allocation5 + $0x4f0] sm:$0xf0]  ;;  %v8397_v1 = vld [vmem:[#allocation5 + $0x6e4] sm:$0xf]  ;;  %v5880_v7 = vor.u32 %v8273_v58, %v5877_v59 }
  0x7f   :  { %v6245_v0 = vld [vmem:[#allocation5 + $0x5f0] sm:$0xf0]  ;;  %v8429_v5 = vld [vmem:[#allocation5 + $0x7e4] sm:$0xf]  ;;  %v6120_v8 = vor.u32 %v8333_v60, %v6117_v61 }
  0x80   :  { %1871 = vmatpush.bf16.msra.mxu1 %v5656_v33  ;;  %1884 = vmatpush.bf16.msra.mxu2 %v5784_v34  ;;  %v6373_v2 = vld [vmem:[#allocation5 + $0x6f0] sm:$0xf0]  ;;  %v6248_v9 = vor.u32 %v8365_v62, %v6245_v0  ;;  %v8329_v11 = vld [vmem:[#allocation5 + $0x4c4] sm:$0xf] }
  0x81   :  { %1897 = vmatpush.bf16.msra.mxu3 %v5912_v39  ;;  %v6501_v6 = vld [vmem:[#allocation5 + $0x7f0] sm:$0xf0]  ;;  %v6376_v10 = vor.u32 %v8397_v1, %v6373_v2  ;;  %v8361_v13 = vld [vmem:[#allocation5 + $0x5c4] sm:$0xf] }
  0x82   :  { %1859 = vmatpush.bf16.msra.mxu0 %v5512_v48  ;;  %v6101_v12 = vld [vmem:[#allocation5 + $0x4d0] sm:$0xf0]  ;;  %v6504_v14 = vor.u32 %v8429_v5, %v6501_v6  ;;  %v8393_v16 = vld [vmem:[#allocation5 + $0x6c4] sm:$0xf] }
  0x83   :  { %v6229_v15 = vld [vmem:[#allocation5 + $0x5d0] sm:$0xf0]  ;;  %v8425_v21 = vld [vmem:[#allocation5 + $0x7c4] sm:$0xf]  ;;  %v6104_v24 = vor.u32 %v8329_v11, %v6101_v12 }
  0x84   :  { %1872 = vmatpush.bf16.msra.mxu1 %v5640_v51  ;;  %1885 = vmatpush.bf16.msra.mxu2 %v5768_v52  ;;  %v6357_v17 = vld [vmem:[#allocation5 + $0x6d0] sm:$0xf0]  ;;  %v6232_v25 = vor.u32 %v8361_v13, %v6229_v15  ;;  %v8325_v27 = vld [vmem:[#allocation5 + $0x4a4] sm:$0xf] }
  0x85   :  { %1898 = vmatpush.bf16.msra.mxu3 %v5896_v56  ;;  %v6485_v23 = vld [vmem:[#allocation5 + $0x7d0] sm:$0xf0]  ;;  %v6360_v26 = vor.u32 %v8393_v16, %v6357_v17  ;;  %v8357_v29 = vld [vmem:[#allocation5 + $0x5a4] sm:$0xf] }
  0x86   :  { %1860 = vmatpush.bf16.msra.mxu0 %v5496_v63  ;;  %v6085_v28 = vld [vmem:[#allocation5 + $0x4b0] sm:$0xf0]  ;;  %v6488_v30 = vor.u32 %v8425_v21, %v6485_v23  ;;  %v8389_v32 = vld [vmem:[#allocation5 + $0x6a4] sm:$0xf] }
  0x87   :  { %v6213_v31 = vld [vmem:[#allocation5 + $0x5b0] sm:$0xf0]  ;;  %v8421_v34 = vld [vmem:[#allocation5 + $0x7a4] sm:$0xf]  ;;  %v6088_v36 = vor.u32 %v8325_v27, %v6085_v28 }
  0x88   :  { %1873 = vmatpush.bf16.msra.mxu1 %v5624_v3  ;;  %1886 = vmatpush.bf16.msra.mxu2 %v5752_v4  ;;  %v6341_v33 = vld [vmem:[#allocation5 + $0x6b0] sm:$0xf0]  ;;  %v6216_v37 = vor.u32 %v8357_v29, %v6213_v31  ;;  %v8321_v40 = vld [vmem:[#allocation5 + $0x484] sm:$0xf] }
  0x89   :  { %1899 = vmatpush.bf16.msra.mxu3 %v5880_v7  ;;  %v6469_v35 = vld [vmem:[#allocation5 + $0x7b0] sm:$0xf0]  ;;  %1861 = vmatmul.bf16.vlgmr.msra.gmra.mxu0 %v9232_v19  ;;  %v6344_v39 = vor.u32 %v8389_v32, %v6341_v33  ;;  %v8353_v45 = vld [vmem:[#allocation5 + $0x584] sm:$0xf] }
  0x8a   :  { %1905 = vmatpush.bf16.msrb.mxu0 %v6120_v8  ;;  %v6069_v43 = vld [vmem:[#allocation5 + $0x490] sm:$0xf0]  ;;  %v6472_v46 = vor.u32 %v8421_v34, %v6469_v35  ;;  %v8385_v48 = vld [vmem:[#allocation5 + $0x684] sm:$0xf] }
  0x8b   :  { %1887 = vmatmul.bf16.vlgmr.msra.gmra.mxu2 %v9230_v18  ;;  %1874 = vmatmul.bf16.vlgmr.msra.gmra.mxu1 %v9236_v22  ;;  %v6197_v47 = vld [vmem:[#allocation5 + $0x590] sm:$0xf0]  ;;  %v8417_v50 = vld [vmem:[#allocation5 + $0x784] sm:$0xf]  ;;  %v6072_v52 = vor.u32 %v8321_v40, %v6069_v43  ;;  %v5611_v43 = vld [vmem:[#allocation5 + $0xe8] sm:$0xf] }
  0x8c   :  { %1918 = vmatpush.bf16.msrb.mxu1 %v6248_v9  ;;  %1931 = vmatpush.bf16.msrb.mxu2 %v6376_v10  ;;  %v6325_v49 = vld [vmem:[#allocation5 + $0x690] sm:$0xf0]  ;;  %v6200_v53 = vor.u32 %v8353_v45, %v6197_v47  ;;  %v8317_v55 = vld [vmem:[#allocation5 + $0x464] sm:$0xf]  ;;  %v8208_v45 = vld [vmem:[#allocation5 + $0xf4] sm:$0xf0] }
  0x8d   :  { %1944 = vmatpush.bf16.msrb.mxu3 %v6504_v14  ;;  %v6453_v51 = vld [vmem:[#allocation5 + $0x790] sm:$0xf0]  ;;  %v6328_v54 = vor.u32 %v8385_v48, %v6325_v49  ;;  %v8349_v57 = vld [vmem:[#allocation5 + $0x564] sm:$0xf]  ;;  %v8240_v48 = vld [vmem:[#allocation5 + $0x1f4] sm:$0xf0] }
  0x8e   :  { %1900 = vmatmul.bf16.vlgmr.msra.gmra.mxu3 %v9234_v20  ;;  %1906 = vmatpush.bf16.msrb.mxu0 %v6104_v24  ;;  %v6053_v56 = vld [vmem:[#allocation5 + $0x470] sm:$0xf0]  ;;  %v6456_v58 = vor.u32 %v8417_v50, %v6453_v51  ;;  %v8381_v60 = vld [vmem:[#allocation5 + $0x664] sm:$0xf]  ;;  %v5867_v49 = vld [vmem:[#allocation5 + $0x2e8] sm:$0xf] }
  0x8f   :  { %v6181_v59 = vld [vmem:[#allocation5 + $0x570] sm:$0xf0]  ;;  %v8413_v62 = vld [vmem:[#allocation5 + $0x764] sm:$0xf]  ;;  %v6056_v0 = vor.u32 %v8317_v55, %v6053_v56  ;;  %v8272_v50 = vld [vmem:[#allocation5 + $0x2f4] sm:$0xf0]  ;;  %v5612_v56 = vor.u32 %v8208_v45, %v5611_v43 }
  0x90   :  { %1919 = vmatpush.bf16.msrb.mxu1 %v6232_v25  ;;  %1932 = vmatpush.bf16.msrb.mxu2 %v6360_v26  ;;  %v6309_v61 = vld [vmem:[#allocation5 + $0x670] sm:$0xf0]  ;;  %v6184_v1 = vor.u32 %v8349_v57, %v6181_v59  ;;  %v8313_v3 = vld [vmem:[#allocation5 + $0x444] sm:$0xf]  ;;  %v5595_v59 = vld [vmem:[#allocation5 + $0xc8] sm:$0xf] }
  0x91   :  { %1945 = vmatpush.bf16.msrb.mxu3 %v6488_v30  ;;  %v6437_v63 = vld [vmem:[#allocation5 + $0x770] sm:$0xf0]  ;;  %v6312_v2 = vor.u32 %v8381_v60, %v6309_v61  ;;  %v8345_v5 = vld [vmem:[#allocation5 + $0x544] sm:$0xf]  ;;  %v8204_v60 = vld [vmem:[#allocation5 + $0xd4] sm:$0xf0] }
  0x92   :  { %1907 = vmatpush.bf16.msrb.mxu0 %v6088_v36  ;;  %v6037_v4 = vld [vmem:[#allocation5 + $0x450] sm:$0xf0]  ;;  %v6440_v6 = vor.u32 %v8413_v62, %v6437_v63  ;;  %v8377_v8 = vld [vmem:[#allocation5 + $0x644] sm:$0xf]  ;;  %v5723_v61 = vld [vmem:[#allocation5 + $0x1c8] sm:$0xf] }
  0x93   :  { %v6165_v7 = vld [vmem:[#allocation5 + $0x550] sm:$0xf0]  ;;  %v8409_v10 = vld [vmem:[#allocation5 + $0x744] sm:$0xf]  ;;  %v6040_v12 = vor.u32 %v8313_v3, %v6037_v4  ;;  %v8236_v63 = vld [vmem:[#allocation5 + $0x1d4] sm:$0xf0]  ;;  %v5596_v4 = vor.u32 %v8204_v60, %v5595_v59 }
  0x94   :  { %1920 = vmatpush.bf16.msrb.mxu1 %v6216_v37  ;;  %1933 = vmatpush.bf16.msrb.mxu2 %v6344_v39  ;;  %v6293_v9 = vld [vmem:[#allocation5 + $0x650] sm:$0xf0]  ;;  %v6168_v13 = vor.u32 %v8345_v5, %v6165_v7  ;;  %v8309_v15 = vld [vmem:[#allocation5 + $0x424] sm:$0xf]  ;;  %v8300_v3 = vld [vmem:[#allocation5 + $0x3d4] sm:$0xf0]  ;;  %v5724_v5 = vor.u32 %v8236_v63, %v5723_v61 }
  0x95   :  { %1946 = vmatpush.bf16.msrb.mxu3 %v6472_v46  ;;  %v6421_v11 = vld [vmem:[#allocation5 + $0x750] sm:$0xf0]  ;;  %v6296_v14 = vor.u32 %v8377_v8, %v6293_v9  ;;  %v8341_v17 = vld [vmem:[#allocation5 + $0x524] sm:$0xf]  ;;  %v5739_v46 = vld [vmem:[#allocation5 + $0x1e8] sm:$0xf] }
  0x96   :  { %1908 = vmatpush.bf16.msrb.mxu0 %v6072_v52  ;;  %v6021_v16 = vld [vmem:[#allocation5 + $0x430] sm:$0xf0]  ;;  %v6424_v21 = vor.u32 %v8409_v10, %v6421_v11  ;;  %v8373_v24 = vld [vmem:[#allocation5 + $0x624] sm:$0xf]  ;;  %v5740_v57 = vor.u32 %v8240_v48, %v5739_v46  ;;  %v5579_v7 = vld [vmem:[#allocation5 + $0xa8] sm:$0xf] }
  0x97   :  { %v6149_v23 = vld [vmem:[#allocation5 + $0x530] sm:$0xf0]  ;;  %v8405_v26 = vld [vmem:[#allocation5 + $0x724] sm:$0xf]  ;;  %v6024_v28 = vor.u32 %v8309_v15, %v6021_v16  ;;  %v8200_v8 = vld [vmem:[#allocation5 + $0xb4] sm:$0xf0] }
  0x98   :  { %1921 = vmatpush.bf16.msrb.mxu1 %v6200_v53  ;;  %1934 = vmatpush.bf16.msrb.mxu2 %v6328_v54  ;;  %v6277_v25 = vld [vmem:[#allocation5 + $0x630] sm:$0xf0]  ;;  %v8305_v29 = vld [vmem:[#allocation5 + $0x404] sm:$0xf]  ;;  %v6152_v31 = vor.u32 %v8341_v17, %v6149_v23  ;;  %v5995_v53 = vld [vmem:[#allocation5 + $0x3e8] sm:$0xf]  ;;  %v5580_v16 = vor.u32 %v8200_v8, %v5579_v7 }
  0x99   :  { %1947 = vmatpush.bf16.msrb.mxu3 %v6456_v58  ;;  %v6405_v27 = vld [vmem:[#allocation5 + $0x730] sm:$0xf0]  ;;  %v6280_v32 = vor.u32 %v8373_v24, %v6277_v25  ;;  %v8337_v33 = vld [vmem:[#allocation5 + $0x504] sm:$0xf]  ;;  %v8304_v54 = vld [vmem:[#allocation5 + $0x3f4] sm:$0xf0]  ;;  %v5868_v58 = vor.u32 %v8272_v50, %v5867_v49 }
  0x9a   :  { %1909 = vmatpush.bf16.msrb.mxu0 %v6056_v0  ;;  %v6005_v30 = vld [vmem:[#allocation5 + $0x410] sm:$0xf0]  ;;  %v8369_v35 = vld [vmem:[#allocation5 + $0x604] sm:$0xf]  ;;  %v6408_v36 = vor.u32 %v8405_v26, %v6405_v27  ;;  %v5996_v62 = vor.u32 %v8304_v54, %v5995_v53  ;;  %v5851_v0 = vld [vmem:[#allocation5 + $0x2c8] sm:$0xf] }
  0x9b   :  { %v6133_v34 = vld [vmem:[#allocation5 + $0x510] sm:$0xf0]  ;;  %v8401_v39 = vld [vmem:[#allocation5 + $0x704] sm:$0xf]  ;;  %v6008_v47 = vor.u32 %v8305_v29, %v6005_v30  ;;  %v5707_v9 = vld [vmem:[#allocation5 + $0x1a8] sm:$0xf] }
  0x9c   :  { %1922 = vmatpush.bf16.msrb.mxu1 %v6184_v1  ;;  %1935 = vmatpush.bf16.msrb.mxu2 %v6312_v2  ;;  %v6261_v37 = vld [vmem:[#allocation5 + $0x610] sm:$0xf0]  ;;  %v6136_v51 = vor.u32 %v8337_v33, %v6133_v34  ;;  %v8268_v1 = vld [vmem:[#allocation5 + $0x2d4] sm:$0xf0]  ;;  %v5979_v2 = vld [vmem:[#allocation5 + $0x3c8] sm:$0xf] }
  0x9d   :  { %1948 = vmatpush.bf16.msrb.mxu3 %v6440_v6  ;;  %v6389_v40 = vld [vmem:[#allocation5 + $0x710] sm:$0xf0]  ;;  %v6264_v52 = vor.u32 %v8369_v35, %v6261_v37  ;;  %v5852_v6 = vor.u32 %v8268_v1, %v5851_v0  ;;  %v5980_v10 = vor.u32 %v8300_v3, %v5979_v2  ;;  %v8232_v11 = vld [vmem:[#allocation5 + $0x1b4] sm:$0xf0]  ;;  %v5563_v23 = vld [vmem:[#allocation5 + $0x88] sm:$0xf] }
  0x9e   :  { %1910 = vmatpush.bf16.msrb.mxu0 %v6040_v12  ;;  %v6392_v55 = vor.u32 %v8401_v39, %v6389_v40  ;;  %v5835_v12 = vld [vmem:[#allocation5 + $0x2a8] sm:$0xf]  ;;  %v8296_v15 = vld [vmem:[#allocation5 + $0x3b4] sm:$0xf0]  ;;  %v5708_v17 = vor.u32 %v8232_v11, %v5707_v9 }
  0x9f   :  { %v8196_v24 = vld [vmem:[#allocation5 + $0x94] sm:$0xf0]  ;;  %v5691_v25 = vld [vmem:[#allocation5 + $0x188] sm:$0xf] }
  0xa0   :  { %1923 = vmatpush.bf16.msrb.mxu1 %v6168_v13  ;;  %1936 = vmatpush.bf16.msrb.mxu2 %v6296_v14  ;;  %v8264_v13 = vld [vmem:[#allocation5 + $0x2b4] sm:$0xf0]  ;;  %v5963_v14 = vld [vmem:[#allocation5 + $0x3a8] sm:$0xf] }
  0xa1   :  { %1949 = vmatpush.bf16.msrb.mxu3 %v6424_v21  ;;  %v5836_v21 = vor.u32 %v8264_v13, %v5835_v12  ;;  %v5964_v26 = vor.u32 %v8296_v15, %v5963_v14  ;;  %v8228_v27 = vld [vmem:[#allocation5 + $0x194] sm:$0xf0]  ;;  %v5947_v30 = vld [vmem:[#allocation5 + $0x388] sm:$0xf] }
  0xa2   :  { %1911 = vmatpush.bf16.msrb.mxu0 %v6024_v28  ;;  %v5819_v28 = vld [vmem:[#allocation5 + $0x288] sm:$0xf]  ;;  %v8260_v29 = vld [vmem:[#allocation5 + $0x294] sm:$0xf0]  ;;  %v5692_v33 = vor.u32 %v8228_v27, %v5691_v25 }
  0xa3   :  { %v5820_v34 = vor.u32 %v8260_v29, %v5819_v28  ;;  %v5547_v35 = vld [vmem:[#allocation5 + $0x68] sm:$0xf]  ;;  %v8224_v40 = vld [vmem:[#allocation5 + $0x174] sm:$0xf0] }
  0xa4   :  { %1924 = vmatpush.bf16.msrb.mxu1 %v6152_v31  ;;  %1937 = vmatpush.bf16.msrb.mxu2 %v6280_v32  ;;  %v8292_v31 = vld [vmem:[#allocation5 + $0x394] sm:$0xf0]  ;;  %v5564_v32 = vor.u32 %v8196_v24, %v5563_v23  ;;  %v5675_v37 = vld [vmem:[#allocation5 + $0x168] sm:$0xf] }
  0xa5   :  { %1950 = vmatpush.bf16.msrb.mxu3 %v6408_v36  ;;  %v8192_v36 = vld [vmem:[#allocation5 + $0x74] sm:$0xf0]  ;;  %v5948_v39 = vor.u32 %v8292_v31, %v5947_v30  ;;  %v5803_v43 = vld [vmem:[#allocation5 + $0x268] sm:$0xf]  ;;  %v5676_v49 = vor.u32 %v8224_v40, %v5675_v37 }
  0xa6   :  { %1912 = vmatpush.bf16.msrb.mxu0 %v6008_v47  ;;  %v8256_v45 = vld [vmem:[#allocation5 + $0x274] sm:$0xf0]  ;;  %v5931_v46 = vld [vmem:[#allocation5 + $0x368] sm:$0xf]  ;;  %v5548_v48 = vor.u32 %v8192_v36, %v5547_v35 }
  0xa7   :  { %v8288_v47 = vld [vmem:[#allocation5 + $0x374] sm:$0xf0]  ;;  %v5804_v50 = vor.u32 %v8256_v45, %v5803_v43  ;;  %v5659_v53 = vld [vmem:[#allocation5 + $0x148] sm:$0xf] }
  0xa8   :  { %1925 = vmatpush.bf16.msrb.mxu1 %v6136_v51  ;;  %1938 = vmatpush.bf16.msrb.mxu2 %v6264_v52  ;;  %v5531_v51 = vld [vmem:[#allocation5 + $0x48] sm:$0xf]  ;;  %v8188_v52 = vld [vmem:[#allocation5 + $0x54] sm:$0xf0]  ;;  %v5932_v54 = vor.u32 %v8288_v47, %v5931_v46 }
  0xa9   :  { %1951 = vmatpush.bf16.msrb.mxu3 %v6392_v55  ;;  %1913 = vmatmul.bf16.vlgmr.msrb.gmra.mxu0 %v9244_v41  ;;  %v8220_v55 = vld [vmem:[#allocation5 + $0x154] sm:$0xf0]  ;;  %v5532_v60 = vor.u32 %v8188_v52, %v5531_v51  ;;  %v5515_v63 = vld [vmem:[#allocation5 + $0x28] sm:$0xf] }
  0xaa   :  { %1957 = vmatpush.bf16.msra.mxu0 %v5612_v56  ;;  %v5787_v56 = vld [vmem:[#allocation5 + $0x248] sm:$0xf]  ;;  %v8284_v59 = vld [vmem:[#allocation5 + $0x354] sm:$0xf0]  ;;  %v5660_v61 = vor.u32 %v8220_v55, %v5659_v53 }
  0xab   :  { %1939 = vmatmul.bf16.vlgmr.msrb.gmra.mxu2 %v9242_v38  ;;  %1926 = vmatmul.bf16.vlgmr.msrb.gmra.mxu1 %v9248_v44  ;;  %v8184_v0 = vld [vmem:[#allocation5 + $0x34] sm:$0xf0]  ;;  %v5643_v1 = vld [vmem:[#allocation5 + $0x128] sm:$0xf] }
  0xac   :  { %1970 = vmatpush.bf16.msra.mxu1 %v5740_v57  ;;  %1983 = vmatpush.bf16.msra.mxu2 %v5868_v58  ;;  %v8252_v57 = vld [vmem:[#allocation5 + $0x254] sm:$0xf0]  ;;  %v5915_v58 = vld [vmem:[#allocation5 + $0x348] sm:$0xf]  ;;  %v5516_v8 = vor.u32 %v8184_v0, %v5515_v63 }
  0xad   :  { %1996 = vmatpush.bf16.msra.mxu3 %v5996_v62  ;;  %v5788_v62 = vor.u32 %v8252_v57, %v5787_v56  ;;  %v5916_v2 = vor.u32 %v8284_v59, %v5915_v58  ;;  %v8216_v3 = vld [vmem:[#allocation5 + $0x134] sm:$0xf0]  ;;  %v5499_v9 = vld [vmem:[#allocation5 + $0x8] sm:$0xf] }
  0xae   :  { %1952 = vmatmul.bf16.vlgmr.msrb.gmra.mxu3 %v9246_v42  ;;  %1958 = vmatpush.bf16.msra.mxu0 %v5596_v4  ;;  %v5771_v4 = vld [vmem:[#allocation5 + $0x228] sm:$0xf]  ;;  %v8280_v7 = vld [vmem:[#allocation5 + $0x334] sm:$0xf0]  ;;  %v5644_v11 = vor.u32 %v8216_v3, %v5643_v1 }
  0xaf   :  { %v5627_v13 = vld [vmem:[#allocation5 + $0x108] sm:$0xf]  ;;  %v8212_v14 = vld [vmem:[#allocation5 + $0x114] sm:$0xf0] }
  0xb0   :  { %1971 = vmatpush.bf16.msra.mxu1 %v5724_v5  ;;  %1984 = vmatpush.bf16.msra.mxu2 %v5852_v6  ;;  %v8248_v5 = vld [vmem:[#allocation5 + $0x234] sm:$0xf0]  ;;  %v5899_v6 = vld [vmem:[#allocation5 + $0x328] sm:$0xf]  ;;  %v5628_v31 = vor.u32 %v8212_v14, %v5627_v13 }
  0xb1   :  { %1997 = vmatpush.bf16.msra.mxu3 %v5980_v10  ;;  %v8180_v10 = vld [vmem:[#allocation5 + $0x14] sm:$0xf0]  ;;  %v5772_v12 = vor.u32 %v8248_v5, %v5771_v4  ;;  %v5755_v15 = vld [vmem:[#allocation5 + $0x208] sm:$0xf] }
  0xb2   :  { %1959 = vmatpush.bf16.msra.mxu0 %v5580_v16  ;;  %v5900_v16 = vor.u32 %v8280_v7, %v5899_v6  ;;  %v8276_v23 = vld [vmem:[#allocation5 + $0x314] sm:$0xf0]  ;;  %v6123_v24 = vld [vmem:[#allocation5 + $0x4e8] sm:$0xf]  ;;  %v5500_v27 = vor.u32 %v8180_v10, %v5499_v9 }
  0xb3   :  { %v8336_v25 = vld [vmem:[#allocation5 + $0x4f4] sm:$0xf0]  ;;  %v6379_v29 = vld [vmem:[#allocation5 + $0x6e8] sm:$0xf] }
  0xb4   :  { %1972 = vmatpush.bf16.msra.mxu1 %v5708_v17  ;;  %1985 = vmatpush.bf16.msra.mxu2 %v5836_v21  ;;  %v8244_v17 = vld [vmem:[#allocation5 + $0x214] sm:$0xf0]  ;;  %v5883_v21 = vld [vmem:[#allocation5 + $0x308] sm:$0xf]  ;;  %v6124_v36 = vor.u32 %v8336_v25, %v6123_v24 }
  0xb5   :  { %1998 = vmatpush.bf16.msra.mxu3 %v5964_v26  ;;  %v6251_v26 = vld [vmem:[#allocation5 + $0x5e8] sm:$0xf]  ;;  %v8368_v28 = vld [vmem:[#allocation5 + $0x5f4] sm:$0xf0]  ;;  %v5884_v35 = vor.u32 %v8276_v23, %v5883_v21 }
  0xb6   :  { %1960 = vmatpush.bf16.msra.mxu0 %v5564_v32  ;;  %v8400_v30 = vld [vmem:[#allocation5 + $0x6f4] sm:$0xf0]  ;;  %v5756_v32 = vor.u32 %v8244_v17, %v5755_v15  ;;  %v6252_v37 = vor.u32 %v8368_v28, %v6251_v26  ;;  %v6107_v40 = vld [vmem:[#allocation5 + $0x4c8] sm:$0xf]  ;;  %v9266_v26 = vld [vmem:[#allocation7] sm:$0xf] }
  0xb7   :  { %v8332_v43 = vld [vmem:[#allocation5 + $0x4d4] sm:$0xf0]  ;;  %v6235_v45 = vld [vmem:[#allocation5 + $0x5c8] sm:$0xf] }
  0xb8   :  { %1973 = vmatpush.bf16.msra.mxu1 %v5692_v33  ;;  %1986 = vmatpush.bf16.msra.mxu2 %v5820_v34  ;;  %v6507_v33 = vld [vmem:[#allocation5 + $0x7e8] sm:$0xf]  ;;  %v8432_v34 = vld [vmem:[#allocation5 + $0x7f4] sm:$0xf0]  ;;  %v6108_v52 = vor.u32 %v8332_v43, %v6107_v40 }
  0xb9   :  { %1999 = vmatpush.bf16.msra.mxu3 %v5948_v39  ;;  %v6380_v39 = vor.u32 %v8400_v30, %v6379_v29  ;;  %v6508_v46 = vor.u32 %v8432_v34, %v6507_v33  ;;  %v8364_v47 = vld [vmem:[#allocation5 + $0x5d4] sm:$0xf0]  ;;  %v6091_v55 = vld [vmem:[#allocation5 + $0x4a8] sm:$0xf] }
  0xba   :  { %1961 = vmatpush.bf16.msra.mxu0 %v5548_v48  ;;  %v6363_v48 = vld [vmem:[#allocation5 + $0x6c8] sm:$0xf]  ;;  %v8428_v51 = vld [vmem:[#allocation5 + $0x7d4] sm:$0xf0]  ;;  %v6236_v53 = vor.u32 %v8364_v47, %v6235_v45 }
  0xbb   :  { %v8328_v56 = vld [vmem:[#allocation5 + $0x4b4] sm:$0xf0]  ;;  %v6219_v57 = vld [vmem:[#allocation5 + $0x5a8] sm:$0xf] }
  0xbc   :  { %1974 = vmatpush.bf16.msra.mxu1 %v5676_v49  ;;  %1987 = vmatpush.bf16.msra.mxu2 %v5804_v50  ;;  %v8396_v49 = vld [vmem:[#allocation5 + $0x6d4] sm:$0xf0]  ;;  %v6491_v50 = vld [vmem:[#allocation5 + $0x7c8] sm:$0xf]  ;;  %v6092_v0 = vor.u32 %v8328_v56, %v6091_v55 }
  0xbd   :  { %2000 = vmatpush.bf16.msra.mxu3 %v5932_v54  ;;  %v6364_v54 = vor.u32 %v8396_v49, %v6363_v48  ;;  %v6492_v58 = vor.u32 %v8428_v51, %v6491_v50  ;;  %v8360_v59 = vld [vmem:[#allocation5 + $0x5b4] sm:$0xf0]  ;;  %v6075_v3 = vld [vmem:[#allocation5 + $0x488] sm:$0xf] }
  0xbe   :  { %1962 = vmatpush.bf16.msra.mxu0 %v5532_v60  ;;  %v6347_v60 = vld [vmem:[#allocation5 + $0x6a8] sm:$0xf]  ;;  %v8424_v63 = vld [vmem:[#allocation5 + $0x7b4] sm:$0xf0]  ;;  %v6220_v1 = vor.u32 %v8360_v59, %v6219_v57 }
  0xbf   :  { %v8324_v4 = vld [vmem:[#allocation5 + $0x494] sm:$0xf0]  ;;  %v6203_v5 = vld [vmem:[#allocation5 + $0x588] sm:$0xf] }
  0xc0   :  { %1975 = vmatpush.bf16.msra.mxu1 %v5660_v61  ;;  %1988 = vmatpush.bf16.msra.mxu2 %v5788_v62  ;;  %v8392_v61 = vld [vmem:[#allocation5 + $0x6b4] sm:$0xf0]  ;;  %v6475_v62 = vld [vmem:[#allocation5 + $0x7a8] sm:$0xf] }
  0xc1   :  { %2001 = vmatpush.bf16.msra.mxu3 %v5916_v2  ;;  %v6348_v2 = vor.u32 %v8392_v61, %v6347_v60  ;;  %v6476_v6 = vor.u32 %v8424_v63, %v6475_v62  ;;  %v8356_v7 = vld [vmem:[#allocation5 + $0x594] sm:$0xf0]  ;;  %v6459_v10 = vld [vmem:[#allocation5 + $0x788] sm:$0xf] }
  0xc2   :  { %1963 = vmatpush.bf16.msra.mxu0 %v5516_v8  ;;  %v6331_v8 = vld [vmem:[#allocation5 + $0x688] sm:$0xf]  ;;  %v8388_v9 = vld [vmem:[#allocation5 + $0x694] sm:$0xf0]  ;;  %v6204_v14 = vor.u32 %v8356_v7, %v6203_v5 }
  0xc3   :  { %v6059_v13 = vld [vmem:[#allocation5 + $0x468] sm:$0xf]  ;;  %v6332_v15 = vor.u32 %v8388_v9, %v6331_v8  ;;  %v8352_v21 = vld [vmem:[#allocation5 + $0x574] sm:$0xf0] }
  0xc4   :  { %1976 = vmatpush.bf16.msra.mxu1 %v5644_v11  ;;  %1989 = vmatpush.bf16.msra.mxu2 %v5772_v12  ;;  %v8420_v11 = vld [vmem:[#allocation5 + $0x794] sm:$0xf0]  ;;  %v6076_v12 = vor.u32 %v8324_v4, %v6075_v3  ;;  %v6187_v17 = vld [vmem:[#allocation5 + $0x568] sm:$0xf] }
  0xc5   :  { %2002 = vmatpush.bf16.msra.mxu3 %v5900_v16  ;;  %v8320_v16 = vld [vmem:[#allocation5 + $0x474] sm:$0xf0]  ;;  %v6460_v23 = vor.u32 %v8420_v11, %v6459_v10  ;;  %v6315_v24 = vld [vmem:[#allocation5 + $0x668] sm:$0xf] }
  0xc6   :  { %1964 = vmatpush.bf16.msra.mxu0 %v5500_v27  ;;  %v8384_v25 = vld [vmem:[#allocation5 + $0x674] sm:$0xf0]  ;;  %v6443_v27 = vld [vmem:[#allocation5 + $0x768] sm:$0xf]  ;;  %v6060_v29 = vor.u32 %v8320_v16, %v6059_v13  ;;  %v8206_v13 = vld [vmem:[#allocation5 + $0xec] sm:$0xf] }
  0xc7   :  { %v8416_v28 = vld [vmem:[#allocation5 + $0x774] sm:$0xf0]  ;;  %v6043_v30 = vld [vmem:[#allocation5 + $0x448] sm:$0xf] }
  0xc8   :  { %1977 = vmatpush.bf16.msra.mxu1 %v5628_v31  ;;  %1990 = vmatpush.bf16.msra.mxu2 %v5756_v32  ;;  %v6188_v31 = vor.u32 %v8352_v21, %v6187_v17  ;;  %v6316_v32 = vor.u32 %v8384_v25, %v6315_v24  ;;  %v8316_v33 = vld [vmem:[#allocation5 + $0x454] sm:$0xf0]  ;;  %v6171_v34 = vld [vmem:[#allocation5 + $0x548] sm:$0xf]  ;;  %v5741_v17 = vld [vmem:[#allocation5 + $0x1f8] sm:$0xf0] }
  0xc9   :  { %2003 = vmatpush.bf16.msra.mxu3 %v5884_v35  ;;  %1965 = vmatmul.bf16.vlgmr.msra.gmra.mxu0 %v9232_v19  ;;  %v433_v35 = vperm.slane %v9266_v26, 0  ;;  %v8380_v40 = vld [vmem:[#allocation5 + $0x654] sm:$0xf0]  ;;  %v6427_v43 = vld [vmem:[#allocation5 + $0x748] sm:$0xf] }
  0xca   :  { %2009 = vmatpush.bf16.msrb.mxu0 %v6124_v36  ;;  %v6444_v36 = vor.u32 %v8416_v28, %v6443_v27  ;;  %v8412_v45 = vld [vmem:[#allocation5 + $0x754] sm:$0xf0]  ;;  %v6027_v50 = vld [vmem:[#allocation5 + $0x428] sm:$0xf]  ;;  %v8270_v21 = vld [vmem:[#allocation5 + $0x2ec] sm:$0xf] }
  0xcb   :  { %1991 = vmatmul.bf16.vlgmr.msra.gmra.mxu2 %v9230_v18  ;;  %1978 = vmatmul.bf16.vlgmr.msra.gmra.mxu1 %v9236_v22  ;;  %v8312_v51 = vld [vmem:[#allocation5 + $0x434] sm:$0xf0]  ;;  %v6428_v55 = vor.u32 %v8412_v45, %v6427_v43  ;;  %v6283_v57 = vld [vmem:[#allocation5 + $0x628] sm:$0xf]  ;;  %v5725_v43 = vld [vmem:[#allocation5 + $0x1d8] sm:$0xf0] }
  0xcc   :  { %2022 = vmatpush.bf16.msrb.mxu1 %v6252_v37  ;;  %2035 = vmatpush.bf16.msrb.mxu2 %v6380_v39  ;;  %v8348_v37 = vld [vmem:[#allocation5 + $0x554] sm:$0xf0]  ;;  %v6299_v39 = vld [vmem:[#allocation5 + $0x648] sm:$0xf]  ;;  %v6028_v62 = vor.u32 %v8312_v51, %v6027_v50  ;;  %v8266_v45 = vld [vmem:[#allocation5 + $0x2cc] sm:$0xf] }
  0xcd   :  { %2048 = vmatpush.bf16.msrb.mxu3 %v6508_v46  ;;  %v6044_v46 = vor.u32 %v8316_v33, %v6043_v30  ;;  %v6172_v48 = vor.u32 %v8348_v37, %v6171_v34  ;;  %v6300_v49 = vor.u32 %v8380_v40, %v6299_v39  ;;  %v8344_v56 = vld [vmem:[#allocation5 + $0x534] sm:$0xf0]  ;;  %v6411_v59 = vld [vmem:[#allocation5 + $0x728] sm:$0xf]  ;;  %v5997_v30 = vld [vmem:[#allocation5 + $0x3f8] sm:$0xf0] }
  0xce   :  { %2004 = vmatmul.bf16.vlgmr.msra.gmra.mxu3 %v9234_v20  ;;  %2010 = vmatpush.bf16.msrb.mxu0 %v6108_v52  ;;  %v6155_v52 = vld [vmem:[#allocation5 + $0x528] sm:$0xf]  ;;  %v8408_v60 = vld [vmem:[#allocation5 + $0x734] sm:$0xf0]  ;;  %v5597_v37 = vld [vmem:[#allocation5 + $0xd8] sm:$0xf0] }
  0xcf   :  { %v6011_v63 = vld [vmem:[#allocation5 + $0x408] sm:$0xf]  ;;  %v8340_v4 = vld [vmem:[#allocation5 + $0x514] sm:$0xf0]  ;;  %v6412_v7 = vor.u32 %v8408_v60, %v6411_v59  ;;  %v8234_v39 = vld [vmem:[#allocation5 + $0x1cc] sm:$0xf] }
  0xd0   :  { %2023 = vmatpush.bf16.msrb.mxu1 %v6236_v53  ;;  %2036 = vmatpush.bf16.msrb.mxu2 %v6364_v54  ;;  %v6139_v3 = vld [vmem:[#allocation5 + $0x508] sm:$0xf]  ;;  %v8372_v8 = vld [vmem:[#allocation5 + $0x614] sm:$0xf0]  ;;  %v8262_v59 = vld [vmem:[#allocation5 + $0x2ac] sm:$0xf] }
  0xd1   :  { %2049 = vmatpush.bf16.msrb.mxu3 %v6492_v58  ;;  %v8376_v58 = vld [vmem:[#allocation5 + $0x634] sm:$0xf0]  ;;  %v6267_v5 = vld [vmem:[#allocation5 + $0x608] sm:$0xf]  ;;  %v6140_v27 = vor.u32 %v8340_v4, %v6139_v3  ;;  %v5837_v60 = vld [vmem:[#allocation5 + $0x2b8] sm:$0xf0] }
  0xd2   :  { %2011 = vmatpush.bf16.msrb.mxu0 %v6092_v0  ;;  %v8308_v0 = vld [vmem:[#allocation5 + $0x414] sm:$0xf0]  ;;  %v6395_v9 = vld [vmem:[#allocation5 + $0x708] sm:$0xf]  ;;  %v6268_v28 = vor.u32 %v8372_v8, %v6267_v5  ;;  %v5565_v3 = vld [vmem:[#allocation5 + $0x98] sm:$0xf0] }
  0xd3   :  { %v8404_v10 = vld [vmem:[#allocation5 + $0x714] sm:$0xf0]  ;;  %v6012_v16 = vor.u32 %v8308_v0, %v6011_v63  ;;  %v8226_v4 = vld [vmem:[#allocation5 + $0x18c] sm:$0xf]  ;;  %v5821_v8 = vld [vmem:[#allocation5 + $0x298] sm:$0xf0] }
  0xd4   :  { %2024 = vmatpush.bf16.msrb.mxu1 %v6220_v1  ;;  %2037 = vmatpush.bf16.msrb.mxu2 %v6348_v2  ;;  %v1758_v47 = vpop.f32.mrf.mxu0  ;;  %v1771_v54 = vpop.f32.mrf.mxu1  ;;  %v6156_v1 = vor.u32 %v8344_v56, %v6155_v52  ;;  %v6284_v2 = vor.u32 %v8376_v58, %v6283_v57  ;;  %v5728_v52 = vor.u32 %v8234_v39, %v5725_v43  ;;  %v8230_v56 = vld [vmem:[#allocation5 + $0x1ac] sm:$0xf]  ;;  %v5709_v58 = vld [vmem:[#allocation5 + $0x1b8] sm:$0xf0] }
  0xd5   :  { %2050 = vmatpush.bf16.msrb.mxu3 %v6476_v6  ;;  %v1759_v53 = vadd.f32 %v1758_v47, %v433_v35  ;;  %v1784_v6 = vpop.f32.mrf.mxu2  ;;  %v8298_v47 = vld [vmem:[#allocation5 + $0x3cc] sm:$0xf]  ;;  %v5712_v0 = vor.u32 %v8230_v56, %v5709_v58  ;;  %v5661_v43 = vld [vmem:[#allocation5 + $0x158] sm:$0xf0] }
  0xd6   :  { %2012 = vmatpush.bf16.msrb.mxu0 %v6076_v12  ;;  %v1797_v12 = vpop.f32.mrf.mxu3  ;;  %v8218_v39 = vld [vmem:[#allocation5 + $0x14c] sm:$0xf] }
  0xd7   :  { %v1772_v61 = vadd.f32 %v1771_v54, %v1759_v53  ;;  %v8198_v54 = vld [vmem:[#allocation5 + $0xac] sm:$0xf] }
  0xd8   :  { %2025 = vmatpush.bf16.msrb.mxu1 %v6204_v14  ;;  %2038 = vmatpush.bf16.msrb.mxu2 %v6332_v15  ;;  %v5613_v14 = vld [vmem:[#allocation5 + $0xf8] sm:$0xf0]  ;;  %v8238_v15 = vld [vmem:[#allocation5 + $0x1ec] sm:$0xf] }
  0xd9   :  { %2051 = vmatpush.bf16.msrb.mxu3 %v6460_v23  ;;  %v1785_v11 = vadd.f32 %v1784_v6, %v1772_v61  ;;  %v5869_v23 = vld [vmem:[#allocation5 + $0x2f8] sm:$0xf0]  ;;  %v5616_v33 = vor.u32 %v8206_v13, %v5613_v14  ;;  %v5744_v34 = vor.u32 %v8238_v15, %v5741_v17  ;;  %v8294_v61 = vld [vmem:[#allocation5 + $0x3ac] sm:$0xf] }
  0xda   :  { %2013 = vmatpush.bf16.msrb.mxu0 %v6060_v29  ;;  %v8302_v29 = vld [vmem:[#allocation5 + $0x3ec] sm:$0xf]  ;;  %v5872_v35 = vor.u32 %v8270_v21, %v5869_v23  ;;  %v5693_v6 = vld [vmem:[#allocation5 + $0x198] sm:$0xf0] }
  0xdb   :  { %v9269_v24 = vadd.f32 %v1797_v12, %v1785_v11  ;;  %v6000_v40 = vor.u32 %v8302_v29, %v5997_v30  ;;  %v5696_v13 = vor.u32 %v8226_v4, %v5693_v6  ;;  %v8190_v15 = vld [vmem:[#allocation5 + $0x6c] sm:$0xf]  ;;  %v5805_v29 = vld [vmem:[#allocation5 + $0x278] sm:$0xf0] }
  0xdc   :  { %2026 = vmatpush.bf16.msrb.mxu1 %v6188_v31  ;;  %2039 = vmatpush.bf16.msrb.mxu2 %v6316_v32  ;;  %v1760_v25 = vpop.f32.mrf.mxu0  ;;  %v1773_v31 = vpop.f32.mrf.mxu1  ;;  %v6396_v32 = vor.u32 %v8404_v10, %v6395_v9  ;;  %v8290_v9 = vld [vmem:[#allocation5 + $0x38c] sm:$0xf]  ;;  %v5949_v10 = vld [vmem:[#allocation5 + $0x398] sm:$0xf0] }
  0xdd   :  { %2052 = vmatpush.bf16.msrb.mxu3 %v6444_v36  ;;  %v8202_v36 = vld [vmem:[#allocation5 + $0xcc] sm:$0xf]  ;;  %v5952_v25 = vor.u32 %v8290_v9, %v5949_v10  ;;  %v5933_v31 = vld [vmem:[#allocation5 + $0x378] sm:$0xf0] }
  0xde   :  { %2014 = vmatpush.bf16.msrb.mxu0 %v6044_v46  ;;  %v5853_v46 = vld [vmem:[#allocation5 + $0x2d8] sm:$0xf0]  ;;  %v5600_v50 = vor.u32 %v8202_v36, %v5597_v37  ;;  %v1799_v51 = vpop.f32.mrf.mxu3  ;;  %v8222_v17 = vld [vmem:[#allocation5 + $0x16c] sm:$0xf] }
  0xdf   :  { %v5856_v53 = vor.u32 %v8266_v45, %v5853_v46  ;;  %v8286_v30 = vld [vmem:[#allocation5 + $0x36c] sm:$0xf]  ;;  %v5533_v37 = vld [vmem:[#allocation5 + $0x58] sm:$0xf0] }
  0xe0   :  { %2027 = vmatpush.bf16.msrb.mxu1 %v6172_v48  ;;  %2040 = vmatpush.bf16.msrb.mxu2 %v6300_v49  ;;  %v5981_v48 = vld [vmem:[#allocation5 + $0x3d8] sm:$0xf0]  ;;  %v1786_v49 = vpop.f32.mrf.mxu2  ;;  %v8186_v36 = vld [vmem:[#allocation5 + $0x4c] sm:$0xf] }
  0xe1   :  { %2053 = vmatpush.bf16.msrb.mxu3 %v6428_v55  ;;  %v5581_v55 = vld [vmem:[#allocation5 + $0xb8] sm:$0xf0]  ;;  %v5984_v57 = vor.u32 %v8298_v47, %v5981_v48  ;;  %v8250_v45 = vld [vmem:[#allocation5 + $0x24c] sm:$0xf]  ;;  %v5536_v51 = vor.u32 %v8186_v36, %v5533_v37 }
  0xe2   :  { %2015 = vmatpush.bf16.msrb.mxu0 %v6028_v62  ;;  %v5965_v62 = vld [vmem:[#allocation5 + $0x3b8] sm:$0xf0]  ;;  %v5584_v63 = vor.u32 %v8198_v54, %v5581_v55  ;;  %v8282_v49 = vld [vmem:[#allocation5 + $0x34c] sm:$0xf]  ;;  %v5664_v54 = vor.u32 %v8218_v39, %v5661_v43 }
  0xe3   :  { %v5968_v5 = vor.u32 %v8294_v61, %v5965_v62  ;;  %v5789_v46 = vld [vmem:[#allocation5 + $0x258] sm:$0xf0]  ;;  %v8182_v56 = vld [vmem:[#allocation5 + $0x2c] sm:$0xf] }
  0xe4   :  { %2028 = vmatpush.bf16.msrb.mxu1 %v6156_v1  ;;  %2041 = vmatpush.bf16.msrb.mxu2 %v6284_v2  ;;  %v5840_v1 = vor.u32 %v8262_v59, %v5837_v60  ;;  %v8194_v2 = vld [vmem:[#allocation5 + $0x8c] sm:$0xf]  ;;  %v5792_v55 = vor.u32 %v8250_v45, %v5789_v46  ;;  %v5645_v61 = vld [vmem:[#allocation5 + $0x138] sm:$0xf0] }
  0xe5   :  { %2054 = vmatpush.bf16.msrb.mxu3 %v6412_v7  ;;  %v8258_v7 = vld [vmem:[#allocation5 + $0x28c] sm:$0xf]  ;;  %v5568_v11 = vor.u32 %v8194_v2, %v5565_v3  ;;  %v5501_v4 = vld [vmem:[#allocation5 + $0x18] sm:$0xf0] }
  0xe6   :  { %2016 = vmatpush.bf16.msrb.mxu0 %v6012_v16  ;;  %v5824_v14 = vor.u32 %v8258_v7, %v5821_v8  ;;  %v5549_v16 = vld [vmem:[#allocation5 + $0x78] sm:$0xf0]  ;;  %v8214_v58 = vld [vmem:[#allocation5 + $0x12c] sm:$0xf] }
  0xe7   :  { %v8246_v62 = vld [vmem:[#allocation5 + $0x22c] sm:$0xf]  ;;  %v5629_v8 = vld [vmem:[#allocation5 + $0x118] sm:$0xf0] }
  0xe8   :  { %2029 = vmatpush.bf16.msrb.mxu1 %v6140_v27  ;;  %2042 = vmatpush.bf16.msrb.mxu2 %v6268_v28  ;;  %v1810_v12 = vpop.f32.mrf.mxu0  ;;  %v5677_v27 = vld [vmem:[#allocation5 + $0x178] sm:$0xf0]  ;;  %v8254_v28 = vld [vmem:[#allocation5 + $0x26c] sm:$0xf] }
  0xe9   :  { %2055 = vmatpush.bf16.msrb.mxu3 %v6396_v32  ;;  %2017 = vmatmul.bf16.vlgmr.msrb.gmra.mxu0 %v9244_v41  ;;  %v1811_v21 = vadd.f32 %v1810_v12, %v9269_v24  ;;  %v5936_v24 = vor.u32 %v8286_v30, %v5933_v31  ;;  %v8178_v3 = vld [vmem:[#allocation5 + $0xc] sm:$0xf]  ;;  %v5757_v12 = vld [vmem:[#allocation5 + $0x218] sm:$0xf0] }
  0xea   :  { %2061 = vmatpush.bf16.msra.mxu0 %v5616_v33  ;;  %v1823_v23 = vpop.f32.mrf.mxu1  ;;  %v5552_v33 = vor.u32 %v8190_v15, %v5549_v16  ;;  %v8210_v7 = vld [vmem:[#allocation5 + $0x10c] sm:$0xf]  ;;  %v6109_v39 = vld [vmem:[#allocation5 + $0x4d8] sm:$0xf0] }
  0xeb   :  { %2043 = vmatmul.bf16.vlgmr.msrb.gmra.mxu2 %v9242_v38  ;;  %2030 = vmatmul.bf16.vlgmr.msrb.gmra.mxu1 %v9248_v44  ;;  %v1824_v32 = vadd.f32 %v1823_v23, %v1811_v21  ;;  %v8242_v9 = vld [vmem:[#allocation5 + $0x20c] sm:$0xf]  ;;  %v5504_v23 = vor.u32 %v8178_v3, %v5501_v4  ;;  %v6237_v43 = vld [vmem:[#allocation5 + $0x5d8] sm:$0xf0] }
  0xec   :  { %2074 = vmatpush.bf16.msra.mxu1 %v5744_v34  ;;  %2087 = vmatpush.bf16.msra.mxu2 %v5872_v35  ;;  %v5680_v34 = vor.u32 %v8222_v17, %v5677_v27  ;;  %v5808_v35 = vor.u32 %v8254_v28, %v5805_v29  ;;  %v8334_v16 = vld [vmem:[#allocation5 + $0x4ec] sm:$0xf]  ;;  %v6125_v17 = vld [vmem:[#allocation5 + $0x4f8] sm:$0xf0]  ;;  %v5632_v29 = vor.u32 %v8210_v7, %v5629_v8 }
  0xed   :  { %2100 = vmatpush.bf16.msra.mxu3 %v6000_v40  ;;  %v8366_v21 = vld [vmem:[#allocation5 + $0x5ec] sm:$0xf]  ;;  %v6381_v28 = vld [vmem:[#allocation5 + $0x6f8] sm:$0xf0]  ;;  %v5760_v30 = vor.u32 %v8242_v9, %v5757_v12 }
  0xee   :  { %2056 = vmatmul.bf16.vlgmr.msrb.gmra.mxu3 %v9246_v42  ;;  %2062 = vmatpush.bf16.msra.mxu0 %v5600_v50  ;;  %v1836_v40 = vpop.f32.mrf.mxu2  ;;  %v5917_v50 = vld [vmem:[#allocation5 + $0x358] sm:$0xf0]  ;;  %v8398_v27 = vld [vmem:[#allocation5 + $0x6ec] sm:$0xf] }
  0xef   :  { %v1837_v47 = vadd.f32 %v1836_v40, %v1824_v32  ;;  %v5920_v60 = vor.u32 %v8282_v49, %v5917_v50  ;;  %v8430_v31 = vld [vmem:[#allocation5 + $0x7ec] sm:$0xf]  ;;  %v6509_v32 = vld [vmem:[#allocation5 + $0x7f8] sm:$0xf0]  ;;  %v6384_v36 = vor.u32 %v8398_v27, %v6381_v28 }
  0xf0   :  { %2075 = vmatpush.bf16.msra.mxu1 %v5728_v52  ;;  %2088 = vmatpush.bf16.msra.mxu2 %v5856_v53  ;;  %v1812_v53 = vpop.f32.mrf.mxu0  ;;  %v8330_v37 = vld [vmem:[#allocation5 + $0x4cc] sm:$0xf]  ;;  %v6365_v46 = vld [vmem:[#allocation5 + $0x6d8] sm:$0xf0] }
  0xf1   :  { %2101 = vmatpush.bf16.msra.mxu3 %v5984_v57  ;;  %v1849_v48 = vpop.f32.mrf.mxu3  ;;  %v5517_v57 = vld [vmem:[#allocation5 + $0x38] sm:$0xf0]  ;;  %v8362_v40 = vld [vmem:[#allocation5 + $0x5cc] sm:$0xf]  ;;  %v6112_v49 = vor.u32 %v8330_v37, %v6109_v39 }
  0xf2   :  { %2063 = vmatpush.bf16.msra.mxu0 %v5584_v63  ;;  %v9276_v52 = vadd.f32 %v1849_v48, %v1837_v47  ;;  %v1825_v59 = vpop.f32.mrf.mxu1  ;;  %v5773_v63 = vld [vmem:[#allocation5 + $0x238] sm:$0xf0]  ;;  %v5520_v2 = vor.u32 %v8182_v56, %v5517_v57  ;;  %v8394_v45 = vld [vmem:[#allocation5 + $0x6cc] sm:$0xf]  ;;  %v6240_v50 = vor.u32 %v8362_v40, %v6237_v43 }
  0xf3   :  { %v5776_v6 = vor.u32 %v8246_v62, %v5773_v63  ;;  %v8426_v47 = vld [vmem:[#allocation5 + $0x7cc] sm:$0xf]  ;;  %v6493_v48 = vld [vmem:[#allocation5 + $0x7d8] sm:$0xf0] }
  0xf4   :  { %2076 = vmatpush.bf16.msra.mxu1 %v5712_v0  ;;  %2089 = vmatpush.bf16.msra.mxu2 %v5840_v1  ;;  %v8278_v0 = vld [vmem:[#allocation5 + $0x32c] sm:$0xf]  ;;  %v5901_v1 = vld [vmem:[#allocation5 + $0x338] sm:$0xf0]  ;;  %v6496_v56 = vor.u32 %v8426_v47, %v6493_v48 }
  0xf5   :  { %2102 = vmatpush.bf16.msra.mxu3 %v5968_v5  ;;  %v5648_v5 = vor.u32 %v8214_v58, %v5645_v61  ;;  %v8326_v53 = vld [vmem:[#allocation5 + $0x4ac] sm:$0xf]  ;;  %v6221_v57 = vld [vmem:[#allocation5 + $0x5b8] sm:$0xf0] }
  0xf6   :  { %2064 = vmatpush.bf16.msra.mxu0 %v5568_v11  ;;  %v1838_v10 = vpop.f32.mrf.mxu2  ;;  %v5904_v11 = vor.u32 %v8278_v0, %v5901_v1  ;;  %v8390_v58 = vld [vmem:[#allocation5 + $0x6ac] sm:$0xf]  ;;  %v6349_v59 = vld [vmem:[#allocation5 + $0x6b8] sm:$0xf0] }
  0xf7   :  { %v6477_v61 = vld [vmem:[#allocation5 + $0x7b8] sm:$0xf0]  ;;  %v6352_v0 = vor.u32 %v8390_v58, %v6349_v59  ;;  %v8322_v1 = vld [vmem:[#allocation5 + $0x48c] sm:$0xf]  ;;  %v434_v58 = vperm.slane %v9266_v26, 1 }
  0xf8   :  { %2077 = vmatpush.bf16.msra.mxu1 %v5696_v13  ;;  %2090 = vmatpush.bf16.msra.mxu2 %v5824_v14  ;;  %v8274_v13 = vld [vmem:[#allocation5 + $0x30c] sm:$0xf]  ;;  %v5885_v14 = vld [vmem:[#allocation5 + $0x318] sm:$0xf0]  ;;  %v8463_v26 = vld [vmem:[#allocation8 + $0xec] sm:$0xf0] }
  0xf9   :  { %2103 = vmatpush.bf16.msra.mxu3 %v5952_v25  ;;  %v1851_v15 = vpop.f32.mrf.mxu3  ;;  %v6253_v25 = vld [vmem:[#allocation5 + $0x5f8] sm:$0xf0]  ;;  %v8418_v7 = vld [vmem:[#allocation5 + $0x78c] sm:$0xf] }
  0xfa   :  { %2065 = vmatpush.bf16.msra.mxu0 %v5552_v33  ;;  %v5888_v33 = vor.u32 %v8274_v13, %v5885_v14  ;;  %v6205_v4 = vld [vmem:[#allocation5 + $0x598] sm:$0xf0]  ;;  %v8318_v10 = vld [vmem:[#allocation5 + $0x46c] sm:$0xf] }
  0xfb   :  { %v8350_v12 = vld [vmem:[#allocation5 + $0x56c] sm:$0xf]  ;;  %v6189_v15 = vld [vmem:[#allocation5 + $0x578] sm:$0xf0] }
  0xfc   :  { %2078 = vmatpush.bf16.msra.mxu1 %v5680_v34  ;;  %2091 = vmatpush.bf16.msra.mxu2 %v5808_v35  ;;  %v6128_v34 = vor.u32 %v8334_v16, %v6125_v17  ;;  %v6256_v35 = vor.u32 %v8366_v21, %v6253_v25  ;;  %v8382_v16 = vld [vmem:[#allocation5 + $0x66c] sm:$0xf]  ;;  %v6317_v17 = vld [vmem:[#allocation5 + $0x678] sm:$0xf0]  ;;  %v6192_v27 = vor.u32 %v8350_v12, %v6189_v15 }
  0xfd   :  { %2104 = vmatpush.bf16.msra.mxu3 %v5936_v24  ;;  %v6512_v24 = vor.u32 %v8430_v31, %v6509_v32  ;;  %v8414_v21 = vld [vmem:[#allocation5 + $0x76c] sm:$0xf]  ;;  %v6320_v28 = vor.u32 %v8382_v16, %v6317_v17  ;;  %v6429_v40 = vld [vmem:[#allocation5 + $0x758] sm:$0xf0]  ;;  %v6883_v16 = vld [vmem:[#allocation8 + $0x2e0] sm:$0xf] }
  0xfe   :  { %2066 = vmatpush.bf16.msra.mxu0 %v5536_v51  ;;  %v6368_v51 = vor.u32 %v8394_v45, %v6365_v46  ;;  %v8346_v31 = vld [vmem:[#allocation5 + $0x54c] sm:$0xf]  ;;  %v6029_v48 = vld [vmem:[#allocation5 + $0x438] sm:$0xf0]  ;;  %v8527_v17 = vld [vmem:[#allocation8 + $0x2ec] sm:$0xf0] }
  0xff   :  { %v8410_v39 = vld [vmem:[#allocation5 + $0x74c] sm:$0xf] }
 0x100   :  { %2079 = vmatpush.bf16.msra.mxu1 %v5664_v54  ;;  %2092 = vmatpush.bf16.msra.mxu2 %v5792_v55  ;;  %v6093_v54 = vld [vmem:[#allocation5 + $0x4b8] sm:$0xf0]  ;;  %v8358_v55 = vld [vmem:[#allocation5 + $0x5ac] sm:$0xf] }
 0x101   :  { %2105 = vmatpush.bf16.msra.mxu3 %v5920_v60  ;;  %v8422_v60 = vld [vmem:[#allocation5 + $0x7ac] sm:$0xf]  ;;  %v6096_v62 = vor.u32 %v8326_v53, %v6093_v54  ;;  %v6224_v63 = vor.u32 %v8358_v55, %v6221_v57  ;;  %v6157_v53 = vld [vmem:[#allocation5 + $0x538] sm:$0xf0] }
 0x102   :  { %2067 = vmatpush.bf16.msra.mxu0 %v5520_v2  ;;  %v6077_v2 = vld [vmem:[#allocation5 + $0x498] sm:$0xf0]  ;;  %v6480_v3 = vor.u32 %v8422_v60, %v6477_v61  ;;  %v8310_v47 = vld [vmem:[#allocation5 + $0x42c] sm:$0xf] }
 0x103   :  { %v8374_v54 = vld [vmem:[#allocation5 + $0x62c] sm:$0xf]  ;;  %v6285_v55 = vld [vmem:[#allocation5 + $0x638] sm:$0xf0]  ;;  %v6032_v59 = vor.u32 %v8310_v47, %v6029_v48  ;;  %v6579_v47 = vld [vmem:[#allocation8 + $0x80] sm:$0xf] }
 0x104   :  { %2080 = vmatpush.bf16.msra.mxu1 %v5648_v5  ;;  %2093 = vmatpush.bf16.msra.mxu2 %v5776_v6  ;;  %v8386_v5 = vld [vmem:[#allocation5 + $0x68c] sm:$0xf]  ;;  %v6333_v6 = vld [vmem:[#allocation5 + $0x698] sm:$0xf0]  ;;  %v8451_v48 = vld [vmem:[#allocation8 + $0x8c] sm:$0xf0] }
 0x105   :  { %2106 = vmatpush.bf16.msra.mxu3 %v5904_v11  ;;  %v6336_v9 = vor.u32 %v8386_v5, %v6333_v6  ;;  %v6061_v11 = vld [vmem:[#allocation5 + $0x478] sm:$0xf0]  ;;  %v8306_v60 = vld [vmem:[#allocation5 + $0x40c] sm:$0xf] }
 0x106   :  { %2068 = vmatpush.bf16.msra.mxu0 %v5504_v23  ;;  %v9282_v8 = vpop.f32.mrf.mxu0  ;;  %v6445_v23 = vld [vmem:[#allocation5 + $0x778] sm:$0xf0]  ;;  %v6064_v25 = vor.u32 %v8318_v10, %v6061_v11  ;;  %v8402_v5 = vld [vmem:[#allocation5 + $0x70c] sm:$0xf]  ;;  %v8495_v10 = vld [vmem:[#allocation8 + $0x1ec] sm:$0xf0] }
 0x107   :  { %v6413_v57 = vld [vmem:[#allocation5 + $0x738] sm:$0xf0] }
 0x108   :  { %2081 = vmatpush.bf16.msra.mxu1 %v5632_v29  ;;  %2094 = vmatpush.bf16.msra.mxu2 %v5760_v30  ;;  %v9284_v13 = vpop.f32.mrf.mxu1  ;;  %v8314_v29 = vld [vmem:[#allocation5 + $0x44c] sm:$0xf]  ;;  %v6045_v30 = vld [vmem:[#allocation5 + $0x458] sm:$0xf0] }
 0x109   :  { %2107 = vmatpush.bf16.msra.mxu3 %v5888_v33  ;;  %2069 = vmatmul.bf16.vlgmr.msra.gmra.mxu0 %v9232_v19  ;;  %v6461_v19 = vld [vmem:[#allocation5 + $0x798] sm:$0xf0]  ;;  %v6448_v33 = vor.u32 %v8414_v21, %v6445_v23 }
 0x10a   :  { %2113 = vmatpush.bf16.msrb.mxu0 %v6128_v34  ;;  %v6464_v14 = vor.u32 %v8418_v7, %v6461_v19  ;;  %v6173_v34 = vld [vmem:[#allocation5 + $0x558] sm:$0xf0]  ;;  %v6627_v19 = vld [vmem:[#allocation8 + $0xe0] sm:$0xf] }
 0x10b   :  { %2095 = vmatmul.bf16.vlgmr.msra.gmra.mxu2 %v9230_v18  ;;  %2082 = vmatmul.bf16.vlgmr.msra.gmra.mxu1 %v9236_v22  ;;  %v8354_v18 = vld [vmem:[#allocation5 + $0x58c] sm:$0xf]  ;;  %v6176_v45 = vor.u32 %v8346_v31, %v6173_v34  ;;  %v6397_v7 = vld [vmem:[#allocation5 + $0x718] sm:$0xf0]  ;;  %v6628_v15 = vor.u32 %v8463_v26, %v6627_v19  ;;  %v6867_v31 = vld [vmem:[#allocation8 + $0x2c0] sm:$0xf] }
 0x10c   :  { %2126 = vmatpush.bf16.msrb.mxu1 %v6256_v35  ;;  %2139 = vmatpush.bf16.msrb.mxu2 %v6384_v36  ;;  %v6208_v22 = vor.u32 %v8354_v18, %v6205_v4  ;;  %v8378_v35 = vld [vmem:[#allocation5 + $0x64c] sm:$0xf]  ;;  %v6301_v36 = vld [vmem:[#allocation5 + $0x658] sm:$0xf0] }
 0x10d   :  { %2152 = vmatpush.bf16.msrb.mxu3 %v6512_v24  ;;  %v6048_v24 = vor.u32 %v8314_v29, %v6045_v30  ;;  %v6304_v46 = vor.u32 %v8378_v35, %v6301_v36  ;;  %v6269_v4 = vld [vmem:[#allocation5 + $0x618] sm:$0xf0]  ;;  %v6884_v29 = vor.u32 %v8527_v17, %v6883_v16  ;;  %v8455_v36 = vld [vmem:[#allocation8 + $0xac] sm:$0xf0] }
 0x10e   :  { %2108 = vmatmul.bf16.vlgmr.msra.gmra.mxu3 %v9234_v20  ;;  %2114 = vmatpush.bf16.msrb.mxu0 %v6112_v49  ;;  %v6080_v20 = vor.u32 %v8322_v1, %v6077_v2  ;;  %v9286_v32 = vpop.f32.mrf.mxu2  ;;  %v1864_v43 = vpop.f32.mrf.mxu0  ;;  %v8342_v49 = vld [vmem:[#allocation5 + $0x52c] sm:$0xf]  ;;  %v6141_v1 = vld [vmem:[#allocation5 + $0x518] sm:$0xf0]  ;;  %v8471_v16 = vld [vmem:[#allocation8 + $0x12c] sm:$0xf0] }
 0x10f   :  { %v6160_v61 = vor.u32 %v8342_v49, %v6157_v53  ;;  %v6707_v49 = vld [vmem:[#allocation8 + $0x180] sm:$0xf]  ;;  %v8515_v53 = vld [vmem:[#allocation8 + $0x28c] sm:$0xf0] }
 0x110   :  { %2127 = vmatpush.bf16.msrb.mxu1 %v6240_v50  ;;  %2140 = vmatpush.bf16.msrb.mxu2 %v6368_v51  ;;  %v1877_v50 = vpop.f32.mrf.mxu1  ;;  %v6432_v51 = vor.u32 %v8410_v39, %v6429_v40  ;;  %v6723_v39 = vld [vmem:[#allocation8 + $0x1a0] sm:$0xf]  ;;  %v8487_v40 = vld [vmem:[#allocation8 + $0x1ac] sm:$0xf0] }
 0x111   :  { %2153 = vmatpush.bf16.msrb.mxu3 %v6496_v56  ;;  %v9288_v37 = vpop.f32.mrf.mxu3  ;;  %v8406_v56 = vld [vmem:[#allocation5 + $0x72c] sm:$0xf]  ;;  %v6580_v50 = vor.u32 %v8451_v48, %v6579_v47  ;;  %v8525_v48 = vld [vmem:[#allocation8 + $0x2e4] sm:$0xf] }
 0x112   :  { %2115 = vmatpush.bf16.msrb.mxu0 %v6096_v62  ;;  %v6288_v62 = vor.u32 %v8374_v54, %v6285_v55  ;;  %v6416_v18 = vor.u32 %v8406_v56, %v6413_v57  ;;  %v6563_v55 = vld [vmem:[#allocation8 + $0x60] sm:$0xf]  ;;  %v8447_v56 = vld [vmem:[#allocation8 + $0x6c] sm:$0xf0] }
 0x114   :  { %2128 = vmatpush.bf16.msrb.mxu1 %v6224_v63  ;;  %2141 = vmatpush.bf16.msrb.mxu2 %v6352_v0  ;;  %v6013_v63 = vld [vmem:[#allocation5 + $0x418] sm:$0xf0]  ;;  %v8338_v0 = vld [vmem:[#allocation5 + $0x50c] sm:$0xf] }
 0x115   :  { %2154 = vmatpush.bf16.msrb.mxu3 %v6480_v3  ;;  %v8370_v3 = vld [vmem:[#allocation5 + $0x60c] sm:$0xf]  ;;  %v6144_v11 = vor.u32 %v8338_v0, %v6141_v1  ;;  %v8511_v0 = vld [vmem:[#allocation8 + $0x26c] sm:$0xf0] }
 0x116   :  { %2116 = vmatpush.bf16.msrb.mxu0 %v6080_v20  ;;  %v1890_v2 = vpop.f32.mrf.mxu2  ;;  %v1863_v20 = vadd.f32 %v9282_v8, %v434_v58  ;;  %v6272_v12 = vor.u32 %v8370_v3, %v6269_v4  ;;  %v6739_v8 = vld [vmem:[#allocation8 + $0x1c0] sm:$0xf] }
 0x117   :  { %v6547_v2 = vld [vmem:[#allocation8 + $0x40] sm:$0xf] }
 0x118   :  { %2129 = vmatpush.bf16.msrb.mxu1 %v6208_v22  ;;  %2142 = vmatpush.bf16.msrb.mxu2 %v6336_v9  ;;  %v6016_v22 = vor.u32 %v8306_v60, %v6013_v63  ;;  %v6755_v9 = vld [vmem:[#allocation8 + $0x1e0] sm:$0xf]  ;;  %v1876_v23 = vadd.f32 %v9284_v13, %v1863_v20 }
 0x119   :  { %2155 = vmatpush.bf16.msrb.mxu3 %v6464_v14  ;;  %v1903_v6 = vpop.f32.mrf.mxu3  ;;  %v6400_v14 = vor.u32 %v8402_v5, %v6397_v7  ;;  %v6756_v21 = vor.u32 %v8495_v10, %v6755_v9  ;;  %v6595_v13 = vld [vmem:[#allocation8 + $0xa0] sm:$0xf]  ;;  %v8475_v5 = vld [vmem:[#allocation8 + $0x14c] sm:$0xf0] }
 0x11a   :  { %2117 = vmatpush.bf16.msrb.mxu0 %v6064_v25  ;;  %v6611_v25 = vld [vmem:[#allocation8 + $0xc0] sm:$0xf]  ;;  %v1889_v35 = vadd.f32 %v9286_v32, %v1876_v23  ;;  %v6596_v43 = vor.u32 %v8455_v36, %v6595_v13  ;;  %v6724_v32 = vor.u32 %v8487_v40, %v6723_v39  ;;  %v8507_v9 = vld [vmem:[#allocation8 + $0x24c] sm:$0xf0]  ;;  %v8493_v36 = vld [vmem:[#allocation8 + $0x1e4] sm:$0xf] }
 0x11b   :  { %v6819_v63 = vld [vmem:[#allocation8 + $0x260] sm:$0xf]  ;;  %v6757_v39 = vld [vmem:[#allocation8 + $0x1f0] sm:$0xf0] }
 0x11c   :  { %2130 = vmatpush.bf16.msrb.mxu1 %v6192_v27  ;;  %2143 = vmatpush.bf16.msrb.mxu2 %v6320_v28  ;;  %v8459_v27 = vld [vmem:[#allocation8 + $0xcc] sm:$0xf0]  ;;  %v6675_v4 = vld [vmem:[#allocation8 + $0x140] sm:$0xf]  ;;  %v6820_v7 = vor.u32 %v8511_v0, %v6819_v63 }
 0x11d   :  { %2156 = vmatpush.bf16.msrb.mxu3 %v6448_v33  ;;  %v8491_v28 = vld [vmem:[#allocation8 + $0x1cc] sm:$0xf0]  ;;  %v6612_v30 = vor.u32 %v8459_v27, %v6611_v25  ;;  %v6676_v10 = vor.u32 %v8475_v5, %v6675_v4  ;;  %v6787_v25 = vld [vmem:[#allocation8 + $0x220] sm:$0xf]  ;;  %v6581_v4 = vld [vmem:[#allocation8 + $0x90] sm:$0xf0] }
 0x11e   :  { %2118 = vmatpush.bf16.msrb.mxu0 %v6048_v24  ;;  %v8523_v33 = vld [vmem:[#allocation8 + $0x2cc] sm:$0xf0]  ;;  %v6740_v34 = vor.u32 %v8491_v28, %v6739_v8  ;;  %v6515_v28 = vld [vmem:[#allocation8] sm:$0xf]  ;;  %v8481_v5 = vld [vmem:[#allocation8 + $0x184] sm:$0xf] }
 0x11f   :  { %v6868_v24 = vor.u32 %v8523_v33, %v6867_v31  ;;  %v8503_v27 = vld [vmem:[#allocation8 + $0x22c] sm:$0xf0] }
 0x120   :  { %2131 = vmatpush.bf16.msrb.mxu1 %v6176_v45  ;;  %2144 = vmatpush.bf16.msrb.mxu2 %v6304_v46  ;;  %v6851_v45 = vld [vmem:[#allocation8 + $0x2a0] sm:$0xf]  ;;  %v8519_v46 = vld [vmem:[#allocation8 + $0x2ac] sm:$0xf0]  ;;  %v6788_v40 = vor.u32 %v8503_v27, %v6787_v25  ;;  %v8441_v27 = vld [vmem:[#allocation8 + $0x44] sm:$0xf] }
 0x121   :  { %2157 = vmatpush.bf16.msrb.mxu3 %v6432_v51  ;;  %v8467_v33 = vld [vmem:[#allocation8 + $0x10c] sm:$0xf0] }
 0x122   :  { %2119 = vmatpush.bf16.msrb.mxu0 %v6032_v59  ;;  %v6691_v59 = vld [vmem:[#allocation8 + $0x160] sm:$0xf] }
 0x124   :  { %2132 = vmatpush.bf16.msrb.mxu1 %v6160_v61  ;;  %2145 = vmatpush.bf16.msrb.mxu2 %v6288_v62  ;;  %v6564_v61 = vor.u32 %v8447_v56, %v6563_v55 }
 0x125   :  { %2158 = vmatpush.bf16.msrb.mxu3 %v6416_v18  ;;  %v8443_v18 = vld [vmem:[#allocation8 + $0x4c] sm:$0xf0] }
 0x126   :  { %2120 = vmatpush.bf16.msrb.mxu0 %v6016_v22  ;;  %v1914_v51 = vpop.f32.mrf.mxu0  ;;  %v6548_v19 = vor.u32 %v8443_v18, %v6547_v2  ;;  %v6803_v22 = vld [vmem:[#allocation8 + $0x240] sm:$0xf]  ;;  %v6853_v2 = vld [vmem:[#allocation8 + $0x2b0] sm:$0xf0] }
 0x127   :  { %v6804_v17 = vor.u32 %v8507_v9, %v6803_v22  ;;  %v8445_v9 = vld [vmem:[#allocation8 + $0x64] sm:$0xf] }
 0x128   :  { %2133 = vmatpush.bf16.msrb.mxu1 %v6144_v11  ;;  %2146 = vmatpush.bf16.msrb.mxu2 %v6272_v12  ;;  %v1927_v58 = vpop.f32.mrf.mxu1  ;;  %v6531_v11 = vld [vmem:[#allocation8 + $0x20] sm:$0xf]  ;;  %v8439_v12 = vld [vmem:[#allocation8 + $0x2c] sm:$0xf0] }
 0x129   :  { %2159 = vmatpush.bf16.msrb.mxu3 %v6400_v14  ;;  %2121 = vmatmul.bf16.vlgmr.msrb.gmra.mxu0 %v9244_v41  ;;  %v1902_v41 = vadd.f32 %v9288_v37, %v1889_v35  ;;  %v8479_v37 = vld [vmem:[#allocation8 + $0x16c] sm:$0xf0]  ;;  %v6532_v23 = vor.u32 %v8439_v12, %v6531_v11  ;;  %v6629_v35 = vld [vmem:[#allocation8 + $0xf0] sm:$0xf0]  ;;  %v8477_v12 = vld [vmem:[#allocation8 + $0x164] sm:$0xf] }
 0x12a   :  { %2951 = vmatpush.bf16.msra.mxu0 %v6628_v15  ;;  %v6692_v1 = vor.u32 %v8479_v37, %v6691_v59  ;;  %v6659_v15 = vld [vmem:[#allocation8 + $0x120] sm:$0xf]  ;;  %v8453_v37 = vld [vmem:[#allocation8 + $0xa4] sm:$0xf] }
 0x12b   :  { %2134 = vmatmul.bf16.vlgmr.msrb.gmra.mxu1 %v9248_v44  ;;  %2147 = vmatmul.bf16.vlgmr.msrb.gmra.mxu2 %v9242_v38  ;;  %v8483_v44 = vld [vmem:[#allocation8 + $0x18c] sm:$0xf0]  ;;  %v6852_v38 = vor.u32 %v8519_v46, %v6851_v45  ;;  %v1915_v57 = vadd.f32 %v1914_v51, %v1902_v41  ;;  %v6660_v8 = vor.u32 %v8471_v16, %v6659_v15  ;;  %v6771_v45 = vld [vmem:[#allocation8 + $0x200] sm:$0xf]  ;;  %v2165_v41 = vmax.f32 %v9276_v52, 0.0 }
 0x12c   :  { %2964 = vmatpush.bf16.msra.mxu1 %v6756_v21  ;;  %2160 = vmatmul.bf16.vlgmr.msrb.gmra.mxu3 %v9246_v42  ;;  %v6835_v42 = vld [vmem:[#allocation8 + $0x280] sm:$0xf]  ;;  %v6708_v54 = vor.u32 %v8483_v44, %v6707_v49  ;;  %v8499_v46 = vld [vmem:[#allocation8 + $0x20c] sm:$0xf0]  ;;  %v6885_v49 = vld [vmem:[#allocation8 + $0x2f0] sm:$0xf0]  ;;  %v6760_v44 = vor.u32 %v8493_v36, %v6757_v39 }
 0x12d   :  { %2977 = vmatpush.bf16.msra.mxu2 %v6884_v29  ;;  %v6836_v60 = vor.u32 %v8515_v53, %v6835_v42  ;;  %v1928_v62 = vadd.f32 %v1927_v58, %v1915_v57  ;;  %v8435_v29 = vld [vmem:[#allocation8 + $0xc] sm:$0xf0]  ;;  %v8489_v51 = vld [vmem:[#allocation8 + $0x1c4] sm:$0xf]  ;;  %v6741_v42 = vld [vmem:[#allocation8 + $0x1d0] sm:$0xf0]  ;;  %v6772_v53 = vor.u32 %v8499_v46, %v6771_v45  ;;  %v6888_v55 = vor.u32 %v8525_v48, %v6885_v49 }
 0x12e   :  { %2952 = vmatpush.bf16.msra.mxu0 %v6612_v30  ;;  %v1940_v3 = vpop.f32.mrf.mxu2  ;;  %v1916_v20 = vpop.f32.mrf.mxu0  ;;  %v6643_v30 = vld [vmem:[#allocation8 + $0x100] sm:$0xf]  ;;  %v9302_v56 = vpack.c.bf16 %v2165_v41, %v2165_v41  ;;  %v8521_v57 = vld [vmem:[#allocation8 + $0x2c4] sm:$0xf]  ;;  %v6869_v58 = vld [vmem:[#allocation8 + $0x2d0] sm:$0xf0]  ;;  %v6744_v59 = vor.u32 %v8489_v51, %v6741_v42 }
 0x12f   :  { %v1941_v26 = vadd.f32 %v1940_v3, %v1928_v62  ;;  %v6725_v62 = vld [vmem:[#allocation8 + $0x1b0] sm:$0xf0]  ;;  %v6872_v63 = vor.u32 %v8521_v57, %v6869_v58  ;;  %v8449_v3 = vld [vmem:[#allocation8 + $0x84] sm:$0xf]  ;;  %v9312_v41 = vld [vmem:[#allocation7] sm:$0xf] }
 0x130   :  { %2965 = vmatpush.bf16.msra.mxu1 %v6740_v34  ;;  %v1929_v14 = vpop.f32.mrf.mxu1  ;;  %v8461_v34 = vld [vmem:[#allocation8 + $0xe4] sm:$0xf]  ;;  %v6837_v20 = vld [vmem:[#allocation8 + $0x290] sm:$0xf0]  ;;  %v6635_v57 = vld [vmem:[#allocation8 + $0xe8] sm:$0xf] }
 0x131   :  { %2978 = vmatpush.bf16.msra.mxu2 %v6868_v24  ;;  %v1953_v6 = vpop.f32.mrf.mxu3  ;;  %v6632_v47 = vor.u32 %v8461_v34, %v6629_v35  ;;  %v6693_v14 = vld [vmem:[#allocation8 + $0x170] sm:$0xf0]  ;;  %v8505_v35 = vld [vmem:[#allocation8 + $0x244] sm:$0xf]  ;;  %v8464_v58 = vld [vmem:[#allocation8 + $0xf4] sm:$0xf0] }
 0x132   :  { %2953 = vmatpush.bf16.msra.mxu0 %v6596_v43  ;;  %v1954_v21 = vadd.f32 %v1953_v6, %v1941_v26  ;;  %v6516_v43 = vor.u32 %v8435_v29, %v6515_v28  ;;  %v6709_v6 = vld [vmem:[#allocation8 + $0x190] sm:$0xf0]  ;;  %v8513_v26 = vld [vmem:[#allocation8 + $0x284] sm:$0xf]  ;;  %v6696_v25 = vor.u32 %v8477_v12, %v6693_v14  ;;  %v6979_v14 = vld [vmem:[#allocation8 + $0x3a0] sm:$0xf] }
 0x133   :  { %v6712_v22 = vor.u32 %v8481_v5, %v6709_v6  ;;  %v6840_v16 = vor.u32 %v8513_v26, %v6837_v20  ;;  %v8473_v28 = vld [vmem:[#allocation8 + $0x144] sm:$0xf]  ;;  %v6677_v29 = vld [vmem:[#allocation8 + $0x150] sm:$0xf0]  ;;  %v6995_v5 = vld [vmem:[#allocation8 + $0x3c0] sm:$0xf] }
 0x134   :  { %2966 = vmatpush.bf16.msra.mxu1 %v6724_v32  ;;  %v2166_v24 = vmax.f32 %v1954_v21, 0.0  ;;  %v6644_v32 = vor.u32 %v8467_v33, %v6643_v30  ;;  %v8509_v21 = vld [vmem:[#allocation8 + $0x264] sm:$0xf]  ;;  %v6680_v36 = vor.u32 %v8473_v28, %v6677_v29  ;;  %v6661_v45 = vld [vmem:[#allocation8 + $0x130] sm:$0xf0] }
 0x135   :  { %2979 = vmatpush.bf16.msra.mxu2 %v6852_v38  ;;  %v8457_v38 = vld [vmem:[#allocation8 + $0xc4] sm:$0xf]  ;;  %v8555_v6 = vld [vmem:[#allocation8 + $0x3cc] sm:$0xf0]  ;;  %v8460_v26 = vld [vmem:[#allocation8 + $0xd4] sm:$0xf0] }
 0x136   :  { %2954 = vmatpush.bf16.msra.mxu0 %v6580_v50  ;;  %v1942_v31 = vpop.f32.mrf.mxu2  ;;  %v6613_v50 = vld [vmem:[#allocation8 + $0xd0] sm:$0xf0]  ;;  %v8437_v39 = vld [vmem:[#allocation8 + $0x24] sm:$0xf]  ;;  %v6996_v20 = vor.u32 %v8555_v6, %v6995_v5  ;;  %v6963_v29 = vld [vmem:[#allocation8 + $0x380] sm:$0xf] }
 0x137   :  { %v6616_v52 = vor.u32 %v8457_v38, %v6613_v50  ;;  %v8501_v38 = vld [vmem:[#allocation8 + $0x224] sm:$0xf]  ;;  %v6789_v50 = vld [vmem:[#allocation8 + $0x230] sm:$0xf0]  ;;  %v6667_v5 = vld [vmem:[#allocation8 + $0x128] sm:$0xf] }
 0x138   :  { %2967 = vmatpush.bf16.msra.mxu1 %v6708_v54  ;;  %v9300_v54 = vpack.c.bf16 %v2166_v24, %v2166_v24  ;;  %v8465_v42 = vld [vmem:[#allocation8 + $0x104] sm:$0xf] }
 0x139   :  { %2980 = vmatpush.bf16.msra.mxu2 %v6836_v60  ;;  %v1955_v13 = vpop.f32.mrf.mxu3  ;;  %v6597_v60 = vld [vmem:[#allocation8 + $0xb0] sm:$0xf0] }
 0x13a   :  { %2955 = vmatpush.bf16.msra.mxu0 %v6564_v61  ;;  %v8485_v61 = vld [vmem:[#allocation8 + $0x1a4] sm:$0xf]  ;;  %v6600_v0 = vor.u32 %v8453_v37, %v6597_v60  ;;  %v6805_v13 = vld [vmem:[#allocation8 + $0x250] sm:$0xf0]  ;;  %v6763_v60 = vld [vmem:[#allocation8 + $0x1e8] sm:$0xf] }
 0x13b   :  { %v6728_v18 = vor.u32 %v8485_v61, %v6725_v62  ;;  %v6808_v48 = vor.u32 %v8505_v35, %v6805_v13  ;;  %v8496_v61 = vld [vmem:[#allocation8 + $0x1f4] sm:$0xf0]  ;;  %v6587_v35 = vld [vmem:[#allocation8 + $0x88] sm:$0xf] }
 0x13c   :  { %2968 = vmatpush.bf16.msra.mxu1 %v6692_v1  ;;  %v8517_v1 = vld [vmem:[#allocation8 + $0x2a4] sm:$0xf]  ;;  %v8452_v13 = vld [vmem:[#allocation8 + $0x94] sm:$0xf0] }
 0x13d   :  { %2981 = vmatpush.bf16.msra.mxu2 %v6820_v7  ;;  %v6856_v7 = vor.u32 %v8517_v1, %v6853_v2  ;;  %v8497_v2 = vld [vmem:[#allocation8 + $0x204] sm:$0xf] }
 0x13e   :  { %2956 = vmatpush.bf16.msra.mxu0 %v6548_v19  ;;  %v6584_v19 = vor.u32 %v8449_v3, %v6581_v4  ;;  %v6636_v4 = vor.u32 %v8464_v58, %v6635_v57  ;;  %v6555_v57 = vld [vmem:[#allocation8 + $0x48] sm:$0xf]  ;;  %v8444_v58 = vld [vmem:[#allocation8 + $0x54] sm:$0xf0] }
 0x140   :  { %2969 = vmatpush.bf16.msra.mxu1 %v6676_v10  ;;  %v6565_v10 = vld [vmem:[#allocation8 + $0x70] sm:$0xf0] }
 0x141   :  { %2982 = vmatpush.bf16.msra.mxu2 %v6804_v17  ;;  %v6568_v17 = vor.u32 %v8445_v9, %v6565_v10  ;;  %v8492_v9 = vld [vmem:[#allocation8 + $0x1d4] sm:$0xf0] }
 0x142   :  { %2957 = vmatpush.bf16.msra.mxu0 %v6532_v23  ;;  %v6821_v23 = vld [vmem:[#allocation8 + $0x270] sm:$0xf0] }
 0x143   :  { %v6824_v33 = vor.u32 %v8509_v21, %v6821_v23  ;;  %v6603_v21 = vld [vmem:[#allocation8 + $0xa8] sm:$0xf]  ;;  %v8456_v23 = vld [vmem:[#allocation8 + $0xb4] sm:$0xf0] }
 0x144   :  { %2970 = vmatpush.bf16.msra.mxu1 %v6660_v8  ;;  %v6549_v8 = vld [vmem:[#allocation8 + $0x50] sm:$0xf0] }
 0x145   :  { %2983 = vmatpush.bf16.msra.mxu2 %v6788_v40  ;;  %v6552_v34 = vor.u32 %v8441_v27, %v6549_v8  ;;  %v6533_v40 = vld [vmem:[#allocation8 + $0x30] sm:$0xf0]  ;;  %v6731_v27 = vld [vmem:[#allocation8 + $0x1a8] sm:$0xf]  ;;  %v8488_v8 = vld [vmem:[#allocation8 + $0x1b4] sm:$0xf0] }
 0x146   :  { %2958 = vmatpush.bf16.msra.mxu0 %v6516_v43  ;;  %v1966_v11 = vpop.f32.mrf.mxu0  ;;  %v8469_v43 = vld [vmem:[#allocation8 + $0x124] sm:$0xf]  ;;  %v6536_v49 = vor.u32 %v8437_v39, %v6533_v40  ;;  %v6715_v39 = vld [vmem:[#allocation8 + $0x188] sm:$0xf]  ;;  %v8484_v40 = vld [vmem:[#allocation8 + $0x194] sm:$0xf0] }
 0x147   :  { %v6664_v51 = vor.u32 %v8469_v43, %v6661_v45  ;;  %v6588_v43 = vor.u32 %v8452_v13, %v6587_v35  ;;  %v8543_v45 = vld [vmem:[#allocation8 + $0x36c] sm:$0xf0]  ;;  %v7013_v35 = vld [vmem:[#allocation8 + $0x3f0] sm:$0xf0]  ;;  %v6765_v13 = vld [vmem:[#allocation8 + $0x1f8] sm:$0xf0] }
 0x148   :  { %2971 = vmatpush.bf16.msra.mxu1 %v6644_v32  ;;  %v9306_v15 = vpop.f32.mrf.mxu1  ;;  %v435_v32 = vperm.slane %v9312_v41, 2 }
 0x149   :  { %2959 = vmatmul.bf16.vlgmr.msra.gmra.mxu0 %v9302_v56  ;;  %2984 = vmatpush.bf16.msra.mxu2 %v6772_v53  ;;  %v7011_v53 = vld [vmem:[#allocation8 + $0x3e0] sm:$0xf] }
 0x14a   :  { %3003 = vmatpush.bf16.msrb.mxu0 %v6632_v47  ;;  %v8433_v47 = vld [vmem:[#allocation8 + $0x4] sm:$0xf] }
 0x14b   :  { %2972 = vmatmul.bf16.vlgmr.msra.gmra.mxu1 %v9300_v54 }
 0x14c   :  { %3016 = vmatpush.bf16.msrb.mxu1 %v6760_v44  ;;  %v6517_v44 = vld [vmem:[#allocation8 + $0x10] sm:$0xf0] }
 0x14d   :  { %3029 = vmatpush.bf16.msrb.mxu2 %v6888_v55  ;;  %v8559_v55 = vld [vmem:[#allocation8 + $0x3ec] sm:$0xf0]  ;;  %v6520_v1 = vor.u32 %v8433_v47, %v6517_v44  ;;  %v8448_v47 = vld [vmem:[#allocation8 + $0x74] sm:$0xf0]  ;;  %v6699_v44 = vld [vmem:[#allocation8 + $0x168] sm:$0xf] }
 0x14e   :  { %3004 = vmatpush.bf16.msrb.mxu0 %v6616_v52  ;;  %v9308_v30 = vpop.f32.mrf.mxu2  ;;  %v1968_v24 = vpop.f32.mrf.mxu0  ;;  %v6645_v52 = vld [vmem:[#allocation8 + $0x110] sm:$0xf0]  ;;  %v7012_v37 = vor.u32 %v8559_v55, %v7011_v53  ;;  %v6931_v53 = vld [vmem:[#allocation8 + $0x340] sm:$0xf] }
 0x14f   :  { %v6648_v3 = vor.u32 %v8465_v42, %v6645_v52 }
 0x150   :  { %3017 = vmatpush.bf16.msrb.mxu1 %v6744_v59  ;;  %v1981_v46 = vpop.f32.mrf.mxu1  ;;  %2990 = vmatpush.bf16.msra.mxu3 %v7012_v37  ;;  %v6683_v37 = vld [vmem:[#allocation8 + $0x148] sm:$0xf] }
 0x151   :  { %3030 = vmatpush.bf16.msrb.mxu2 %v6872_v63  ;;  %v9310_v31 = vpop.f32.mrf.mxu3  ;;  %v6792_v63 = vor.u32 %v8501_v38, %v6789_v50  ;;  %v6716_v46 = vor.u32 %v8484_v40, %v6715_v39  ;;  %v8480_v38 = vld [vmem:[#allocation8 + $0x174] sm:$0xf0] }
 0x152   :  { %3005 = vmatpush.bf16.msrb.mxu0 %v6600_v0  ;;  %v1967_v0 = vadd.f32 %v1966_v11, %v435_v32  ;;  %v6571_v32 = vld [vmem:[#allocation8 + $0x68] sm:$0xf]  ;;  %v6700_v52 = vor.u32 %v8480_v38, %v6699_v44  ;;  %v8524_v39 = vld [vmem:[#allocation8 + $0x2d4] sm:$0xf0]  ;;  %v8458_v44 = vld [vmem:[#allocation8 + $0xcc] sm:$0xf] }
 0x153   :  { %v6572_v42 = vor.u32 %v8448_v47, %v6571_v32  ;;  %v8553_v32 = vld [vmem:[#allocation8 + $0x3c4] sm:$0xf]  ;;  %v6997_v47 = vld [vmem:[#allocation8 + $0x3d0] sm:$0xf0]  ;;  %v6621_v38 = vld [vmem:[#allocation8 + $0xd8] sm:$0xf0] }
 0x154   :  { %3018 = vmatpush.bf16.msrb.mxu1 %v6728_v18  ;;  %v6773_v18 = vld [vmem:[#allocation8 + $0x210] sm:$0xf0]  ;;  %v1980_v12 = vadd.f32 %v9306_v15, %v1967_v0  ;;  %2991 = vmatpush.bf16.msra.mxu3 %v6996_v20  ;;  %v6604_v15 = vor.u32 %v8456_v23, %v6603_v21  ;;  %v6556_v0 = vor.u32 %v8444_v58, %v6555_v57  ;;  %v8528_v20 = vld [vmem:[#allocation8 + $0x2f4] sm:$0xf0]  ;;  %v8531_v21 = vld [vmem:[#allocation8 + $0x30c] sm:$0xf0] }
 0x155   :  { %3031 = vmatpush.bf16.msrb.mxu2 %v6856_v7  ;;  %v6764_v7 = vor.u32 %v8496_v61, %v6763_v60  ;;  %v6776_v10 = vor.u32 %v8497_v2, %v6773_v18  ;;  %v8476_v60 = vld [vmem:[#allocation8 + $0x154] sm:$0xf0]  ;;  %v8535_v2 = vld [vmem:[#allocation8 + $0x32c] sm:$0xf0]  ;;  %v6981_v57 = vld [vmem:[#allocation8 + $0x3b0] sm:$0xf0] }
 0x156   :  { %3006 = vmatpush.bf16.msrb.mxu0 %v6584_v19  ;;  %v1994_v59 = vpop.f32.mrf.mxu2  ;;  %v6619_v19 = vld [vmem:[#allocation8 + $0xc8] sm:$0xf]  ;;  %v1993_v28 = vadd.f32 %v9308_v30, %v1980_v12  ;;  %v6947_v30 = vld [vmem:[#allocation8 + $0x360] sm:$0xf]  ;;  %v6684_v18 = vor.u32 %v8476_v60, %v6683_v37  ;;  %v8454_v37 = vld [vmem:[#allocation8 + $0xac] sm:$0xf] }
 0x157   :  { %v6620_v11 = vor.u32 %v8460_v26, %v6619_v19  ;;  %v8472_v19 = vld [vmem:[#allocation8 + $0x134] sm:$0xf0]  ;;  %v6891_v26 = vld [vmem:[#allocation8 + $0x2e8] sm:$0xf]  ;;  %v6605_v60 = vld [vmem:[#allocation8 + $0xb8] sm:$0xf0] }
 0x158   :  { %3019 = vmatpush.bf16.msrb.mxu1 %v6712_v22  ;;  %v6747_v22 = vld [vmem:[#allocation8 + $0x1c8] sm:$0xf]  ;;  %v2006_v24 = vadd.f32 %v9310_v31, %v1993_v28  ;;  %v8539_v31 = vld [vmem:[#allocation8 + $0x34c] sm:$0xf0]  ;;  %v6668_v23 = vor.u32 %v8472_v19, %v6667_v5  ;;  %v8482_v19 = vld [vmem:[#allocation8 + $0x18c] sm:$0xf] }
 0x159   :  { %3032 = vmatpush.bf16.msrb.mxu2 %v6840_v16  ;;  %v2007_v62 = vpop.f32.mrf.mxu3  ;;  %v8551_v16 = vld [vmem:[#allocation8 + $0x3ac] sm:$0xf0]  ;;  %v6932_v59 = vor.u32 %v8539_v31, %v6931_v53  ;;  %v8520_v53 = vld [vmem:[#allocation8 + $0x2b4] sm:$0xf0]  ;;  %v7000_v31 = vor.u32 %v8553_v32, %v6997_v47 }
 0x15a   :  { %3007 = vmatpush.bf16.msrb.mxu0 %v6568_v17  ;;  %v6748_v17 = vor.u32 %v8492_v9, %v6747_v22  ;;  %v6523_v9 = vld [vmem:[#allocation8 + $0x8] sm:$0xf] }
 0x15c   :  { %3020 = vmatpush.bf16.msrb.mxu1 %v6696_v25  ;;  %v6980_v25 = vor.u32 %v8551_v16, %v6979_v14  ;;  %v6651_v16 = vld [vmem:[#allocation8 + $0x108] sm:$0xf] }
 0x15d   :  { %3033 = vmatpush.bf16.msrb.mxu2 %v6824_v33  ;;  %v8547_v33 = vld [vmem:[#allocation8 + $0x38c] sm:$0xf0] }
 0x15e   :  { %3008 = vmatpush.bf16.msrb.mxu0 %v6552_v34  ;;  %2992 = vmatpush.bf16.msra.mxu3 %v6980_v25  ;;  %v6732_v34 = vor.u32 %v8488_v8, %v6731_v27  ;;  %v6892_v25 = vor.u32 %v8528_v20, %v6891_v26  ;;  %v8468_v27 = vld [vmem:[#allocation8 + $0x114] sm:$0xf0]  ;;  %v8462_v8 = vld [vmem:[#allocation8 + $0xec] sm:$0xf]  ;;  %v6717_v26 = vld [vmem:[#allocation8 + $0x198] sm:$0xf0] }
 0x15f   :  { %v6827_v20 = vld [vmem:[#allocation8 + $0x268] sm:$0xf] }
 0x160   :  { %3021 = vmatpush.bf16.msrb.mxu1 %v6680_v36  ;;  %v6964_v36 = vor.u32 %v8547_v33, %v6963_v29  ;;  %v6637_v33 = vld [vmem:[#allocation8 + $0xf8] sm:$0xf0] }
 0x161   :  { %3034 = vmatpush.bf16.msrb.mxu2 %v6808_v48  ;;  %v6948_v48 = vor.u32 %v8543_v45, %v6947_v30  ;;  %v6652_v45 = vor.u32 %v8468_v27, %v6651_v16  ;;  %v6811_v27 = vld [vmem:[#allocation8 + $0x248] sm:$0xf] }
 0x162   :  { %3009 = vmatpush.bf16.msrb.mxu0 %v6536_v49  ;;  %2993 = vmatpush.bf16.msra.mxu3 %v6964_v36  ;;  %v6875_v36 = vld [vmem:[#allocation8 + $0x2c8] sm:$0xf] }
 0x164   :  { %3022 = vmatpush.bf16.msrb.mxu1 %v6664_v51 }
 0x165   :  { %3035 = vmatpush.bf16.msrb.mxu2 %v6792_v63 }
 0x166   :  { %3010 = vmatpush.bf16.msrb.mxu0 %v6520_v1  ;;  %v2018_v49 = vpop.f32.mrf.mxu0  ;;  %2994 = vmatpush.bf16.msra.mxu3 %v6948_v48  ;;  %v6915_v1 = vld [vmem:[#allocation8 + $0x320] sm:$0xf] }
 0x167   :  { %v2019_v50 = vadd.f32 %v2018_v49, %v2006_v24  ;;  %v6916_v6 = vor.u32 %v8535_v2, %v6915_v1  ;;  %v6876_v49 = vor.u32 %v8524_v39, %v6875_v36  ;;  %v8545_v2 = vld [vmem:[#allocation8 + $0x384] sm:$0xf] }
 0x168   :  { %3023 = vmatpush.bf16.msrb.mxu1 %v6648_v3  ;;  %v2031_v51 = vpop.f32.mrf.mxu1  ;;  %v6539_v3 = vld [vmem:[#allocation8 + $0x28] sm:$0xf] }
 0x169   :  { %3011 = vmatmul.bf16.vlgmr.msrb.gmra.mxu0 %v9302_v56  ;;  %3036 = vmatpush.bf16.msrb.mxu2 %v6776_v10  ;;  %v2032_v55 = vadd.f32 %v2031_v51, %v2019_v50  ;;  %v8436_v10 = vld [vmem:[#allocation8 + $0x14] sm:$0xf0]  ;;  %v8490_v50 = vld [vmem:[#allocation8 + $0x1cc] sm:$0xf]  ;;  %v6749_v51 = vld [vmem:[#allocation8 + $0x1d8] sm:$0xf0] }
 0x16a   :  { %3055 = vmatpush.bf16.msra.mxu0 %v6636_v4  ;;  %2995 = vmatpush.bf16.msra.mxu3 %v6932_v59  ;;  %v8440_v4 = vld [vmem:[#allocation8 + $0x34] sm:$0xf0]  ;;  %v6752_v58 = vor.u32 %v8490_v50, %v6749_v51 }
 0x16b   :  { %3024 = vmatmul.bf16.vlgmr.msrb.gmra.mxu1 %v9300_v54  ;;  %v6540_v14 = vor.u32 %v8440_v4, %v6539_v3  ;;  %v6608_v3 = vor.u32 %v8454_v37, %v6605_v60  ;;  %v8526_v37 = vld [vmem:[#allocation8 + $0x2ec] sm:$0xf]  ;;  %v6893_v60 = vld [vmem:[#allocation8 + $0x2f8] sm:$0xf0] }
 0x16c   :  { %3068 = vmatpush.bf16.msra.mxu1 %v6764_v7 }
 0x16e   :  { %3056 = vmatpush.bf16.msra.mxu0 %v6620_v11  ;;  %v2044_v61 = vpop.f32.mrf.mxu2  ;;  %v2020_v22 = vpop.f32.mrf.mxu0  ;;  %2996 = vmatpush.bf16.msra.mxu3 %v6916_v6  ;;  %v8450_v6 = vld [vmem:[#allocation8 + $0x8c] sm:$0xf] }
 0x16f   :  { %v2045_v62 = vadd.f32 %v2044_v61, %v2032_v55  ;;  %v6624_v55 = vor.u32 %v8458_v44, %v6621_v38  ;;  %v8486_v61 = vld [vmem:[#allocation8 + $0x1ac] sm:$0xf]  ;;  %v8512_v22 = vld [vmem:[#allocation8 + $0x274] sm:$0xf0]  ;;  %v6917_v44 = vld [vmem:[#allocation8 + $0x330] sm:$0xf0] }
 0x170   :  { %3069 = vmatpush.bf16.msra.mxu1 %v6748_v17  ;;  %v2033_v12 = vpop.f32.mrf.mxu1  ;;  %v6899_v17 = vld [vmem:[#allocation8 + $0x300] sm:$0xf]  ;;  %v6828_v16 = vor.u32 %v8512_v22, %v6827_v20  ;;  %v6877_v20 = vld [vmem:[#allocation8 + $0x2d8] sm:$0xf0] }
 0x171   :  { %v2057_v63 = vpop.f32.mrf.mxu3  ;;  %v6900_v28 = vor.u32 %v8531_v21, %v6899_v17  ;;  %v8541_v12 = vld [vmem:[#allocation8 + $0x364] sm:$0xf]  ;;  %v8446_v17 = vld [vmem:[#allocation8 + $0x6c] sm:$0xf]  ;;  %v6573_v21 = vld [vmem:[#allocation8 + $0x78] sm:$0xf0] }
 0x172   :  { %3057 = vmatpush.bf16.msra.mxu0 %v6604_v15  ;;  %v2058_v7 = vadd.f32 %v2057_v63, %v2045_v62  ;;  %v8557_v15 = vld [vmem:[#allocation8 + $0x3e4] sm:$0xf]  ;;  %v6733_v62 = vld [vmem:[#allocation8 + $0x1b8] sm:$0xf0]  ;;  %v6843_v63 = vld [vmem:[#allocation8 + $0x288] sm:$0xf] }
 0x173   :  { %2997 = vmatpush.bf16.msra.mxu3 %v6900_v28  ;;  %v7016_v24 = vor.u32 %v8557_v15, %v7013_v35  ;;  %v6736_v4 = vor.u32 %v8486_v61, %v6733_v62  ;;  %v8537_v35 = vld [vmem:[#allocation8 + $0x344] sm:$0xf] }
 0x174   :  { %3070 = vmatpush.bf16.msra.mxu1 %v6732_v34  ;;  %v2167_v11 = vmax.f32 %v2058_v7, 0.0  ;;  %v8494_v34 = vld [vmem:[#allocation8 + $0x1ec] sm:$0xf]  ;;  %v6589_v7 = vld [vmem:[#allocation8 + $0x98] sm:$0xf0] }
 0x175   :  { %v6768_v48 = vor.u32 %v8494_v34, %v6765_v13  ;;  %v6933_v13 = vld [vmem:[#allocation8 + $0x350] sm:$0xf0] }
 0x176   :  { %3058 = vmatpush.bf16.msra.mxu0 %v6588_v43  ;;  %v9320_v29 = vpack.c.bf16 %v2167_v11, %v2167_v11  ;;  %v2046_v40 = vpop.f32.mrf.mxu2  ;;  %v6524_v43 = vor.u32 %v8436_v10, %v6523_v9  ;;  %v6592_v10 = vor.u32 %v8450_v6, %v6589_v7  ;;  %v6949_v11 = vld [vmem:[#allocation8 + $0x370] sm:$0xf0]  ;;  %v6936_v32 = vor.u32 %v8537_v35, %v6933_v13  ;;  %v6653_v6 = vld [vmem:[#allocation8 + $0x118] sm:$0xf0] }
 0x177   :  { %3042 = vmatpush.bf16.msrb.mxu3 %v7016_v24  ;;  %v6952_v28 = vor.u32 %v8541_v12, %v6949_v11  ;;  %v8442_v40 = vld [vmem:[#allocation8 + $0x4c] sm:$0xf]  ;;  %v6557_v24 = vld [vmem:[#allocation8 + $0x58] sm:$0xf0] }
 0x178   :  { %3071 = vmatpush.bf16.msra.mxu1 %v6716_v46  ;;  %2985 = vmatmul.bf16.vlgmr.msra.gmra.mxu2 %v9320_v29  ;;  %v6640_v46 = vor.u32 %v8462_v8, %v6637_v33  ;;  %v8508_v8 = vld [vmem:[#allocation8 + $0x254] sm:$0xf0]  ;;  %v6576_v33 = vor.u32 %v8446_v17, %v6573_v21  ;;  %v6560_v47 = vor.u32 %v8442_v40, %v6557_v24  ;;  %v6861_v17 = vld [vmem:[#allocation8 + $0x2b8] sm:$0xf0]  ;;  %v8502_v24 = vld [vmem:[#allocation8 + $0x22c] sm:$0xf] }
 0x179   :  { %v2059_v30 = vpop.f32.mrf.mxu3  ;;  %3081 = vmatpush.bf16.msra.mxu2 %v6892_v25  ;;  %v6701_v25 = vld [vmem:[#allocation8 + $0x178] sm:$0xf0]  ;;  %v6812_v39 = vor.u32 %v8508_v8, %v6811_v27 }
 0x17a   :  { %3059 = vmatpush.bf16.msra.mxu0 %v6572_v42  ;;  %v6859_v42 = vld [vmem:[#allocation8 + $0x2a8] sm:$0xf]  ;;  %v6685_v30 = vld [vmem:[#allocation8 + $0x158] sm:$0xf0] }
 0x17b   :  { %v6860_v59 = vor.u32 %v8520_v53, %v6859_v42  ;;  %3043 = vmatpush.bf16.msrb.mxu3 %v7000_v31  ;;  %v8438_v42 = vld [vmem:[#allocation8 + $0x2c] sm:$0xf]  ;;  %v6541_v53 = vld [vmem:[#allocation8 + $0x38] sm:$0xf0] }
 0x17c   :  { %3072 = vmatpush.bf16.msra.mxu1 %v6700_v52  ;;  %v8549_v52 = vld [vmem:[#allocation8 + $0x3a4] sm:$0xf]  ;;  %v8470_v31 = vld [vmem:[#allocation8 + $0x12c] sm:$0xf]  ;;  %v6544_v61 = vor.u32 %v8438_v42, %v6541_v53 }
 0x17d   :  { %3082 = vmatpush.bf16.msra.mxu2 %v6876_v49  ;;  %v6984_v1 = vor.u32 %v8549_v52, %v6981_v57  ;;  %v8533_v49 = vld [vmem:[#allocation8 + $0x324] sm:$0xf]  ;;  %v6779_v52 = vld [vmem:[#allocation8 + $0x208] sm:$0xf]  ;;  %v8500_v57 = vld [vmem:[#allocation8 + $0x214] sm:$0xf0] }
 0x17e   :  { %3060 = vmatpush.bf16.msra.mxu0 %v6556_v0  ;;  %v8516_v0 = vld [vmem:[#allocation8 + $0x294] sm:$0xf0] }
 0x17f   :  { %v6844_v5 = vor.u32 %v8516_v0, %v6843_v63  ;;  %3044 = vmatpush.bf16.msrb.mxu3 %v6984_v1  ;;  %v8529_v63 = vld [vmem:[#allocation8 + $0x304] sm:$0xf]  ;;  %v6901_v0 = vld [vmem:[#allocation8 + $0x310] sm:$0xf0] }
 0x180   :  { %3073 = vmatpush.bf16.msra.mxu1 %v6684_v18  ;;  %v6965_v18 = vld [vmem:[#allocation8 + $0x390] sm:$0xf0]  ;;  %v6904_v7 = vor.u32 %v8529_v63, %v6901_v0  ;;  %v6971_v63 = vld [vmem:[#allocation8 + $0x388] sm:$0xf]  ;;  %v8548_v0 = vld [vmem:[#allocation8 + $0x394] sm:$0xf0] }
 0x181   :  { %3083 = vmatpush.bf16.msra.mxu2 %v6860_v59  ;;  %v6968_v9 = vor.u32 %v8545_v2, %v6965_v18  ;;  %v6780_v2 = vor.u32 %v8500_v57, %v6779_v52  ;;  %v8434_v18 = vld [vmem:[#allocation8 + $0xc] sm:$0xf]  ;;  %v7003_v52 = vld [vmem:[#allocation8 + $0x3c8] sm:$0xf]  ;;  %v8556_v57 = vld [vmem:[#allocation8 + $0x3d4] sm:$0xf0] }
 0x182   :  { %3061 = vmatpush.bf16.msra.mxu0 %v6540_v14  ;;  %v6720_v14 = vor.u32 %v8482_v19, %v6717_v26  ;;  %v436_v19 = vperm.slane %v9312_v41, 3  ;;  %v8522_v26 = vld [vmem:[#allocation8 + $0x2cc] sm:$0xf] }
 0x183   :  { %3045 = vmatpush.bf16.msrb.mxu3 %v6968_v9  ;;  %v6880_v11 = vor.u32 %v8522_v26, %v6877_v20 }
 0x184   :  { %3074 = vmatpush.bf16.msra.mxu1 %v6668_v23  ;;  %v8478_v23 = vld [vmem:[#allocation8 + $0x16c] sm:$0xf] }
 0x185   :  { %3084 = vmatpush.bf16.msra.mxu2 %v6844_v5  ;;  %v6704_v36 = vor.u32 %v8478_v23, %v6701_v25  ;;  %v8466_v5 = vld [vmem:[#allocation8 + $0x10c] sm:$0xf]  ;;  %v6845_v25 = vld [vmem:[#allocation8 + $0x298] sm:$0xf0] }
 0x186   :  { %3062 = vmatpush.bf16.msra.mxu0 %v6524_v43  ;;  %v9326_v15 = vpop.f32.mrf.mxu0  ;;  %v8474_v43 = vld [vmem:[#allocation8 + $0x14c] sm:$0xf] }
 0x187   :  { %3046 = vmatpush.bf16.msrb.mxu3 %v6952_v28  ;;  %v6688_v38 = vor.u32 %v8474_v43, %v6685_v30  ;;  %v8514_v23 = vld [vmem:[#allocation8 + $0x28c] sm:$0xf]  ;;  %v6797_v43 = vld [vmem:[#allocation8 + $0x238] sm:$0xf0] }
 0x188   :  { %3075 = vmatpush.bf16.msra.mxu1 %v6652_v45  ;;  %3037 = vmatmul.bf16.vlgmr.msrb.gmra.mxu2 %v9320_v29  ;;  %v9328_v34 = vpop.f32.mrf.mxu1  ;;  %v6795_v45 = vld [vmem:[#allocation8 + $0x228] sm:$0xf]  ;;  %v6848_v27 = vor.u32 %v8514_v23, %v6845_v25  ;;  %v8510_v28 = vld [vmem:[#allocation8 + $0x26c] sm:$0xf] }
 0x189   :  { %3063 = vmatmul.bf16.vlgmr.msra.gmra.mxu0 %v9302_v56  ;;  %3085 = vmatpush.bf16.msra.mxu2 %v6828_v16  ;;  %v8518_v16 = vld [vmem:[#allocation8 + $0x2ac] sm:$0xf] }
 0x18a   :  { %3107 = vmatpush.bf16.msrb.mxu0 %v6640_v46  ;;  %v8504_v46 = vld [vmem:[#allocation8 + $0x234] sm:$0xf0]  ;;  %v6864_v41 = vor.u32 %v8518_v16, %v6861_v17 }
 0x18b   :  { %3076 = vmatmul.bf16.vlgmr.msra.gmra.mxu1 %v9300_v54  ;;  %v6796_v50 = vor.u32 %v8504_v46, %v6795_v45  ;;  %3047 = vmatpush.bf16.msrb.mxu3 %v6936_v32  ;;  %v6800_v45 = vor.u32 %v8502_v24, %v6797_v43  ;;  %v8532_v16 = vld [vmem:[#allocation8 + $0x314] sm:$0xf0] }
 0x18c   :  { %3120 = vmatpush.bf16.msrb.mxu1 %v6768_v48 }
 0x18d   :  { %3086 = vmatpush.bf16.msra.mxu2 %v6812_v39  ;;  %v6813_v39 = vld [vmem:[#allocation8 + $0x258] sm:$0xf0] }
 0x18e   :  { %3108 = vmatpush.bf16.msrb.mxu0 %v6624_v55  ;;  %v9330_v48 = vpop.f32.mrf.mxu2  ;;  %v6669_v55 = vld [vmem:[#allocation8 + $0x138] sm:$0xf0]  ;;  %v2072_v59 = vpop.f32.mrf.mxu0 }
 0x18f   :  { %v6672_v1 = vor.u32 %v8470_v31, %v6669_v55 }
 0x190   :  { %3121 = vmatpush.bf16.msrb.mxu1 %v6752_v58  ;;  %v6920_v58 = vor.u32 %v8533_v49, %v6917_v44  ;;  %v2085_v62 = vpop.f32.mrf.mxu1  ;;  %v6781_v49 = vld [vmem:[#allocation8 + $0x218] sm:$0xf0] }
 0x191   :  { %v2109_v51 = vpop.f32.mrf.mxu3  ;;  %3087 = vmatpush.bf16.msra.mxu2 %v6796_v50  ;;  %v7019_v50 = vld [vmem:[#allocation8 + $0x3e8] sm:$0xf] }
 0x192   :  { %3109 = vmatpush.bf16.msrb.mxu0 %v6608_v3  ;;  %v6525_v3 = vld [vmem:[#allocation8 + $0x18] sm:$0xf0]  ;;  %3048 = vmatpush.bf16.msrb.mxu3 %v6920_v58 }
 0x193   :  { %v6528_v22 = vor.u32 %v8434_v18, %v6525_v3  ;;  %v6955_v18 = vld [vmem:[#allocation8 + $0x368] sm:$0xf]  ;;  %v8544_v3 = vld [vmem:[#allocation8 + $0x374] sm:$0xf0] }
 0x194   :  { %3122 = vmatpush.bf16.msrb.mxu1 %v6736_v4  ;;  %v6896_v4 = vor.u32 %v8526_v37, %v6893_v60  ;;  %v7004_v37 = vor.u32 %v8556_v57, %v7003_v52  ;;  %v6987_v60 = vld [vmem:[#allocation8 + $0x3a8] sm:$0xf]  ;;  %v7107_v52 = vld [vmem:[#allocation11 + $0xa0] sm:$0xf]  ;;  %v8583_v57 = vld [vmem:[#allocation11 + $0xac] sm:$0xf0] }
 0x195   :  { %3088 = vmatpush.bf16.msra.mxu2 %v6780_v2  ;;  %v6972_v2 = vor.u32 %v8548_v0, %v6971_v63  ;;  %v7091_v63 = vld [vmem:[#allocation11 + $0x80] sm:$0xf]  ;;  %v8579_v0 = vld [vmem:[#allocation11 + $0x8c] sm:$0xf0] }
 0x196   :  { %3110 = vmatpush.bf16.msrb.mxu0 %v6592_v10  ;;  %v2098_v9 = vpop.f32.mrf.mxu2  ;;  %v6656_v10 = vor.u32 %v8466_v5, %v6653_v6  ;;  %3049 = vmatpush.bf16.msrb.mxu3 %v6904_v7  ;;  %v6956_v5 = vor.u32 %v8544_v3, %v6955_v18  ;;  %v6939_v7 = vld [vmem:[#allocation8 + $0x348] sm:$0xf]  ;;  %v7267_v18 = vld [vmem:[#allocation11 + $0x1e0] sm:$0xf]  ;;  %v8623_v3 = vld [vmem:[#allocation11 + $0x1ec] sm:$0xf0] }
 0x197   :  { %v6923_v9 = vld [vmem:[#allocation8 + $0x328] sm:$0xf] }
 0x198   :  { %3123 = vmatpush.bf16.msrb.mxu1 %v6720_v14  ;;  %v2071_v14 = vadd.f32 %v9326_v15, %v436_v19  ;;  %3089 = vmatmul.bf16.vlgmr.msra.gmra.mxu2 %v9320_v29  ;;  %v6829_v15 = vld [vmem:[#allocation8 + $0x278] sm:$0xf0]  ;;  %v8540_v19 = vld [vmem:[#allocation8 + $0x354] sm:$0xf0] }
 0x199   :  { %v2111_v12 = vpop.f32.mrf.mxu3  ;;  %3133 = vmatpush.bf16.msrb.mxu2 %v6896_v4 }
 0x19a   :  { %3111 = vmatpush.bf16.msrb.mxu0 %v6576_v33  ;;  %v2084_v21 = vadd.f32 %v9328_v34, %v2071_v14  ;;  %v6832_v33 = vor.u32 %v8510_v28, %v6829_v15  ;;  %v6907_v14 = vld [vmem:[#allocation8 + $0x308] sm:$0xf]  ;;  %v8550_v15 = vld [vmem:[#allocation8 + $0x3ac] sm:$0xf] }
 0x19b   :  { %v6908_v23 = vor.u32 %v8532_v16, %v6907_v14  ;;  %v8567_v14 = vld [vmem:[#allocation11 + $0x2c] sm:$0xf0]  ;;  %v7235_v16 = vld [vmem:[#allocation11 + $0x1a0] sm:$0xf] }
 0x19c   :  { %3124 = vmatpush.bf16.msrb.mxu1 %v6704_v36  ;;  %v2097_v8 = vadd.f32 %v9330_v48, %v2084_v21  ;;  %v8506_v36 = vld [vmem:[#allocation8 + $0x24c] sm:$0xf]  ;;  %v7021_v21 = vld [vmem:[#allocation8 + $0x3f8] sm:$0xf0] }
 0x19d   :  { %3134 = vmatpush.bf16.msrb.mxu2 %v6880_v11  ;;  %v8498_v48 = vld [vmem:[#allocation8 + $0x20c] sm:$0xf] }
 0x19e   :  { %3112 = vmatpush.bf16.msrb.mxu0 %v6560_v47  ;;  %v2110_v35 = vadd.f32 %v2109_v51, %v2097_v8  ;;  %v8560_v51 = vld [vmem:[#allocation8 + $0x3f4] sm:$0xf0]  ;;  %v6784_v42 = vor.u32 %v8498_v48, %v6781_v49  ;;  %v7005_v8 = vld [vmem:[#allocation8 + $0x3d8] sm:$0xf0]  ;;  %v7139_v48 = vld [vmem:[#allocation11 + $0xe0] sm:$0xf] }
 0x19f   :  { %v7020_v31 = vor.u32 %v8560_v51, %v7019_v50  ;;  %v8591_v49 = vld [vmem:[#allocation11 + $0xec] sm:$0xf0]  ;;  %v7123_v51 = vld [vmem:[#allocation11 + $0xc0] sm:$0xf] }
 0x1a0   :  { %3125 = vmatpush.bf16.msrb.mxu1 %v6688_v38  ;;  %v7140_v50 = vor.u32 %v8591_v49, %v7139_v48 }
 0x1a1   :  { %3135 = vmatpush.bf16.msrb.mxu2 %v6864_v41  ;;  %v8558_v41 = vld [vmem:[#allocation8 + $0x3ec] sm:$0xf] }
 0x1a2   :  { %3113 = vmatpush.bf16.msrb.mxu0 %v6544_v61  ;;  %v8552_v61 = vld [vmem:[#allocation8 + $0x3b4] sm:$0xf0]  ;;  %v7024_v25 = vor.u32 %v8558_v41, %v7021_v21 }
 0x1a3   :  { %v6988_v62 = vor.u32 %v8552_v61, %v6987_v60  ;;  %v7108_v61 = vor.u32 %v8583_v57, %v7107_v52  ;;  %v7109_v52 = vld [vmem:[#allocation11 + $0xb0] sm:$0xf0] }
 0x1a4   :  { %3126 = vmatpush.bf16.msrb.mxu1 %v6672_v1  ;;  %v9343_v1 = vld [vmem:[#allocation10] sm:$0xf] }
 0x1a5   :  { %3136 = vmatpush.bf16.msrb.mxu2 %v6848_v27  ;;  %v2303_v4 = vperm.slane %v9343_v1, 0  ;;  %v8554_v27 = vld [vmem:[#allocation8 + $0x3cc] sm:$0xf] }
 0x1a6   :  { %3114 = vmatpush.bf16.msrb.mxu0 %v6528_v22  ;;  %v2122_v13 = vpop.f32.mrf.mxu0  ;;  %v6940_v22 = vor.u32 %v8540_v19, %v6939_v7  ;;  %v7008_v28 = vor.u32 %v8554_v27, %v7005_v8  ;;  %v7059_v19 = vld [vmem:[#allocation11 + $0x40] sm:$0xf] }
 0x1a7   :  { %v2123_v34 = vadd.f32 %v2122_v13, %v2110_v35  ;;  %v8546_v13 = vld [vmem:[#allocation8 + $0x38c] sm:$0xf]  ;;  %v7027_v8 = vld [vmem:[#allocation11] sm:$0xf] }
 0x1a8   :  { %3127 = vmatpush.bf16.msrb.mxu1 %v6656_v10  ;;  %v2135_v40 = vpop.f32.mrf.mxu1  ;;  %v8536_v10 = vld [vmem:[#allocation8 + $0x334] sm:$0xf0] }
 0x1a9   :  { %3115 = vmatmul.bf16.vlgmr.msrb.gmra.mxu0 %v9302_v56  ;;  %3137 = vmatpush.bf16.msrb.mxu2 %v6832_v33  ;;  %v6816_v56 = vor.u32 %v8506_v36, %v6813_v39  ;;  %v2136_v30 = vadd.f32 %v2135_v40, %v2123_v34  ;;  %v6924_v12 = vor.u32 %v8536_v10, %v6923_v9  ;;  %v6989_v33 = vld [vmem:[#allocation8 + $0x3b8] sm:$0xf0]  ;;  %v8542_v40 = vld [vmem:[#allocation8 + $0x36c] sm:$0xf] }
 0x1aa   :  { %v6992_v35 = vor.u32 %v8550_v15, %v6989_v33  ;;  %v6973_v36 = vld [vmem:[#allocation8 + $0x398] sm:$0xf0]  ;;  %3945 = vmatpush.bf16.msra.mxu0 %v7140_v50  ;;  %v7219_v15 = vld [vmem:[#allocation11 + $0x180] sm:$0xf]  ;;  %v8603_v50 = vld [vmem:[#allocation11 + $0x14c] sm:$0xf0] }
 0x1ab   :  { %3128 = vmatmul.bf16.vlgmr.msrb.gmra.mxu1 %v9300_v54  ;;  %v6976_v39 = vor.u32 %v8546_v13, %v6973_v36  ;;  %v6957_v34 = vld [vmem:[#allocation8 + $0x378] sm:$0xf0] }
 0x1ac   :  { %v6960_v24 = vor.u32 %v8542_v40, %v6957_v34  ;;  %v7141_v40 = vld [vmem:[#allocation11 + $0xf0] sm:$0xf0] }
 0x1ad   :  { %3138 = vmatpush.bf16.msrb.mxu2 %v6816_v56  ;;  %v2304_v56 = vperm.slane %v9343_v1, 1 }
 0x1ae   :  { %v2148_v54 = vpop.f32.mrf.mxu2  ;;  %v2124_v47 = vpop.f32.mrf.mxu0 }
 0x1af   :  { %v2149_v46 = vadd.f32 %v2148_v54, %v2136_v30  ;;  %v2161_v32 = vpop.f32.mrf.mxu3  ;;  %v8538_v30 = vld [vmem:[#allocation8 + $0x34c] sm:$0xf]  ;;  %v6941_v54 = vld [vmem:[#allocation8 + $0x358] sm:$0xf0] }
 0x1b0   :  { %v2137_v44 = vpop.f32.mrf.mxu1  ;;  %v6944_v47 = vor.u32 %v8538_v30, %v6941_v54 }
 0x1b1   :  { %v2162_v38 = vadd.f32 %v2161_v32, %v2149_v46  ;;  %3139 = vmatpush.bf16.msrb.mxu2 %v6800_v45  ;;  %v8534_v44 = vld [vmem:[#allocation8 + $0x32c] sm:$0xf] }
 0x1b3   :  { %v2168_v53 = vmax.f32 %v2162_v38, 0.0  ;;  %v6925_v38 = vld [vmem:[#allocation8 + $0x338] sm:$0xf0] }
 0x1b5   :  { %v9339_v55 = vpack.c.bf16 %v2168_v53, %v2168_v53  ;;  %3140 = vmatpush.bf16.msrb.mxu2 %v6784_v42  ;;  %v8587_v42 = vld [vmem:[#allocation11 + $0xcc] sm:$0xf0]  ;;  %v6928_v53 = vor.u32 %v8534_v44, %v6925_v38  ;;  %v7187_v38 = vld [vmem:[#allocation11 + $0x140] sm:$0xf] }
 0x1b6   :  { %v2150_v58 = vpop.f32.mrf.mxu2  ;;  %v7188_v57 = vor.u32 %v8603_v50, %v7187_v38  ;;  %v8609_v38 = vld [vmem:[#allocation11 + $0x184] sm:$0xf] }
 0x1b7   :  { %v2163_v59 = vpop.f32.mrf.mxu3  ;;  %2998 = vmatmul.bf16.vlgmr.msra.gmra.mxu3 %v9339_v55 }
 0x1b8   :  { %3094 = vmatpush.bf16.msra.mxu3 %v7020_v31  ;;  %3141 = vmatmul.bf16.vlgmr.msrb.gmra.mxu2 %v9320_v29  ;;  %v7124_v31 = vor.u32 %v8587_v42, %v7123_v51  ;;  %v8530_v59 = vld [vmem:[#allocation8 + $0x30c] sm:$0xf]  ;;  %v7379_v51 = vld [vmem:[#allocation11 + $0x2c0] sm:$0xf] }
 0x1ba   :  { %3946 = vmatpush.bf16.msra.mxu0 %v7124_v31  ;;  %v8581_v31 = vld [vmem:[#allocation11 + $0xa4] sm:$0xf] }
 0x1bc   :  { %3095 = vmatpush.bf16.msra.mxu3 %v7004_v37  ;;  %v6909_v37 = vld [vmem:[#allocation8 + $0x318] sm:$0xf0] }
 0x1be   :  { %3947 = vmatpush.bf16.msra.mxu0 %v7108_v61  ;;  %v7363_v61 = vld [vmem:[#allocation11 + $0x2a0] sm:$0xf] }
 0x1c0   :  { %3096 = vmatpush.bf16.msra.mxu3 %v6988_v62  ;;  %v6912_v62 = vor.u32 %v8530_v59, %v6909_v37  ;;  %v7171_v59 = vld [vmem:[#allocation11 + $0x120] sm:$0xf]  ;;  %v7112_v37 = vor.u32 %v8581_v31, %v7109_v52 }
 0x1c1   :  { %v7283_v52 = vld [vmem:[#allocation11 + $0x200] sm:$0xf] }
 0x1c4   :  { %3097 = vmatpush.bf16.msra.mxu3 %v6972_v2  ;;  %v7092_v2 = vor.u32 %v8579_v0, %v7091_v63  ;;  %v8577_v63 = vld [vmem:[#allocation11 + $0x84] sm:$0xf]  ;;  %v7093_v0 = vld [vmem:[#allocation11 + $0x90] sm:$0xf0] }
 0x1c6   :  { %v2960_v6 = vpop.f32.mrf.mxu0  ;;  %3948 = vmatpush.bf16.msra.mxu0 %v7092_v2 }
 0x1c7   :  { %v2961_v29 = vadd.f32 %v2960_v6, %v2303_v4  ;;  %3050 = vmatmul.bf16.vlgmr.msrb.gmra.mxu3 %v9339_v55  ;;  %v7075_v4 = vld [vmem:[#allocation11 + $0x60] sm:$0xf]  ;;  %v7268_v6 = vor.u32 %v8623_v3, %v7267_v18 }
 0x1c8   :  { %v2973_v26 = vpop.f32.mrf.mxu1  ;;  %3098 = vmatpush.bf16.msra.mxu3 %v6956_v5  ;;  %v8575_v5 = vld [vmem:[#allocation11 + $0x6c] sm:$0xf0]  ;;  %v7155_v3 = vld [vmem:[#allocation11 + $0x100] sm:$0xf] }
 0x1c9   :  { %v9347_v20 = vadd.f32 %v2973_v26, %v2961_v29  ;;  %3958 = vmatpush.bf16.msra.mxu1 %v7268_v6  ;;  %v7076_v7 = vor.u32 %v8575_v5, %v7075_v4  ;;  %v8571_v29 = vld [vmem:[#allocation11 + $0x4c] sm:$0xf0]  ;;  %v7251_v26 = vld [vmem:[#allocation11 + $0x1c0] sm:$0xf]  ;;  %v7096_v6 = vor.u32 %v8577_v63, %v7093_v0  ;;  %v8653_v0 = vld [vmem:[#allocation11 + $0x2e4] sm:$0xf] }
 0x1ca   :  { %v7060_v9 = vor.u32 %v8571_v29, %v7059_v19  ;;  %v8595_v4 = vld [vmem:[#allocation11 + $0x10c] sm:$0xf0]  ;;  %v8573_v29 = vld [vmem:[#allocation11 + $0x64] sm:$0xf] }
 0x1cb   :  { %3949 = vmatpush.bf16.msra.mxu0 %v7076_v7  ;;  %v7347_v7 = vld [vmem:[#allocation11 + $0x280] sm:$0xf]  ;;  %v8643_v19 = vld [vmem:[#allocation11 + $0x28c] sm:$0xf0] }
 0x1cc   :  { %3099 = vmatpush.bf16.msra.mxu3 %v6940_v22  ;;  %v8619_v22 = vld [vmem:[#allocation11 + $0x1cc] sm:$0xf0] }
 0x1cd   :  { %v7252_v10 = vor.u32 %v8619_v22, %v7251_v26  ;;  %v7077_v26 = vld [vmem:[#allocation11 + $0x70] sm:$0xf0]  ;;  %v8621_v22 = vld [vmem:[#allocation11 + $0x1e4] sm:$0xf] }
 0x1ce   :  { %v2962_v11 = vpop.f32.mrf.mxu0 }
 0x1cf   :  { %3959 = vmatpush.bf16.msra.mxu1 %v7252_v10  ;;  %3950 = vmatpush.bf16.msra.mxu0 %v7060_v9  ;;  %v7043_v11 = vld [vmem:[#allocation11 + $0x20] sm:$0xf]  ;;  %v7269_v9 = vld [vmem:[#allocation11 + $0x1f0] sm:$0xf0]  ;;  %v7156_v10 = vor.u32 %v8595_v4, %v7155_v3 }
 0x1d0   :  { %v2975_v17 = vpop.f32.mrf.mxu1  ;;  %3100 = vmatpush.bf16.msra.mxu3 %v6924_v12  ;;  %v2305_v12 = vperm.slane %v9343_v1, 2  ;;  %v7044_v41 = vor.u32 %v8567_v14, %v7043_v11  ;;  %v7080_v11 = vor.u32 %v8573_v29, %v7077_v26  ;;  %v7272_v14 = vor.u32 %v8621_v22, %v7269_v9  ;;  %v8601_v29 = vld [vmem:[#allocation11 + $0x144] sm:$0xf]  ;;  %v7189_v26 = vld [vmem:[#allocation11 + $0x150] sm:$0xf0] }
 0x1d1   :  { %v8649_v22 = vld [vmem:[#allocation11 + $0x2c4] sm:$0xf] }
 0x1d3   :  { %3951 = vmatpush.bf16.msra.mxu0 %v7044_v41  ;;  %v8639_v41 = vld [vmem:[#allocation11 + $0x26c] sm:$0xf0] }
 0x1d4   :  { %3101 = vmatpush.bf16.msra.mxu3 %v6908_v23 }
 0x1d7   :  { %3102 = vmatmul.bf16.vlgmr.msra.gmra.mxu3 %v9339_v55 }
 0x1d8   :  { %3146 = vmatpush.bf16.msrb.mxu3 %v7024_v25 }
 0x1dc   :  { %3147 = vmatpush.bf16.msrb.mxu3 %v7008_v28  ;;  %v8563_v28 = vld [vmem:[#allocation11 + $0xc] sm:$0xf0] }
 0x1dd   :  { %v7028_v33 = vor.u32 %v8563_v28, %v7027_v8 }
 0x1df   :  { %3952 = vmatpush.bf16.msra.mxu0 %v7028_v33  ;;  %v2306_v33 = vperm.slane %v9343_v1, 3 }
 0x1e0   :  { %3148 = vmatpush.bf16.msrb.mxu3 %v6992_v35  ;;  %v8611_v35 = vld [vmem:[#allocation11 + $0x18c] sm:$0xf0] }
 0x1e1   :  { %v7220_v36 = vor.u32 %v8611_v35, %v7219_v15  ;;  %v7315_v35 = vld [vmem:[#allocation11 + $0x240] sm:$0xf] }
 0x1e4   :  { %3149 = vmatpush.bf16.msrb.mxu3 %v6976_v39  ;;  %v8589_v39 = vld [vmem:[#allocation11 + $0xe4] sm:$0xf] }
 0x1e5   :  { %v7144_v34 = vor.u32 %v8589_v39, %v7141_v40  ;;  %v8565_v40 = vld [vmem:[#allocation11 + $0x24] sm:$0xf] }
 0x1e6   :  { %v3012_v43 = vpop.f32.mrf.mxu0 }
 0x1e7   :  { %v3013_v45 = vadd.f32 %v3012_v43, %v2304_v56  ;;  %3997 = vmatpush.bf16.msrb.mxu0 %v7144_v34  ;;  %v7203_v56 = vld [vmem:[#allocation11 + $0x160] sm:$0xf]  ;;  %v7045_v34 = vld [vmem:[#allocation11 + $0x30] sm:$0xf0] }
 0x1e8   :  { %v3025_v46 = vpop.f32.mrf.mxu1  ;;  %3150 = vmatpush.bf16.msrb.mxu3 %v6960_v24  ;;  %v8607_v24 = vld [vmem:[#allocation11 + $0x16c] sm:$0xf0]  ;;  %v7395_v43 = vld [vmem:[#allocation11 + $0x2e0] sm:$0xf] }
 0x1e9   :  { %v9351_v32 = vadd.f32 %v3025_v46, %v3013_v45  ;;  %v7204_v54 = vor.u32 %v8607_v24, %v7203_v56  ;;  %v8655_v45 = vld [vmem:[#allocation11 + $0x2ec] sm:$0xf0]  ;;  %v8585_v46 = vld [vmem:[#allocation11 + $0xc4] sm:$0xf]  ;;  %v7048_v24 = vor.u32 %v8565_v40, %v7045_v34  ;;  %v7349_v34 = vld [vmem:[#allocation11 + $0x290] sm:$0xf0] }
 0x1ea   :  { %v7396_v49 = vor.u32 %v8655_v45, %v7395_v43  ;;  %v8613_v56 = vld [vmem:[#allocation11 + $0x1a4] sm:$0xf]  ;;  %v7237_v43 = vld [vmem:[#allocation11 + $0x1b0] sm:$0xf0] }
 0x1ec   :  { %3151 = vmatpush.bf16.msrb.mxu3 %v6944_v47  ;;  %v7125_v47 = vld [vmem:[#allocation11 + $0xd0] sm:$0xf0]  ;;  %3971 = vmatpush.bf16.msra.mxu2 %v7396_v49  ;;  %v8561_v49 = vld [vmem:[#allocation11 + $0x4] sm:$0xf] }
 0x1ed   :  { %v7128_v44 = vor.u32 %v8585_v46, %v7125_v47  ;;  %v7299_v47 = vld [vmem:[#allocation11 + $0x220] sm:$0xf] }
 0x1ee   :  { %v3014_v58 = vpop.f32.mrf.mxu0 }
 0x1ef   :  { %3998 = vmatpush.bf16.msrb.mxu0 %v7128_v44  ;;  %v7029_v44 = vld [vmem:[#allocation11 + $0x10] sm:$0xf0] }
 0x1f0   :  { %v3027_v60 = vpop.f32.mrf.mxu1  ;;  %3152 = vmatpush.bf16.msrb.mxu3 %v6928_v53  ;;  %v8651_v53 = vld [vmem:[#allocation11 + $0x2cc] sm:$0xf0] }
 0x1f1   :  { %v7380_v58 = vor.u32 %v8651_v53, %v7379_v51  ;;  %v8599_v60 = vld [vmem:[#allocation11 + $0x12c] sm:$0xf0]  ;;  %v7221_v53 = vld [vmem:[#allocation11 + $0x190] sm:$0xf0] }
 0x1f2   :  { %v7172_v2 = vor.u32 %v8599_v60, %v7171_v59  ;;  %v7224_v31 = vor.u32 %v8609_v38, %v7221_v53  ;;  %v8605_v60 = vld [vmem:[#allocation11 + $0x164] sm:$0xf]  ;;  %v7427_v53 = vld [vmem:[#allocation11 + $0x320] sm:$0xf] }
 0x1f3   :  { %3972 = vmatpush.bf16.msra.mxu2 %v7380_v58  ;;  %3999 = vmatpush.bf16.msrb.mxu0 %v7112_v37  ;;  %v7523_v58 = vld [vmem:[#allocation11 + $0x3e0] sm:$0xf]  ;;  %v8687_v37 = vld [vmem:[#allocation11 + $0x3ec] sm:$0xf0] }
 0x1f4   :  { %3153 = vmatpush.bf16.msrb.mxu3 %v6912_v62  ;;  %v8647_v62 = vld [vmem:[#allocation11 + $0x2ac] sm:$0xf0] }
 0x1f5   :  { %v7364_v18 = vor.u32 %v8647_v62, %v7363_v61  ;;  %v7205_v61 = vld [vmem:[#allocation11 + $0x170] sm:$0xf0]  ;;  %v7524_v62 = vor.u32 %v8687_v37, %v7523_v58  ;;  %v8629_v58 = vld [vmem:[#allocation11 + $0x224] sm:$0xf] }
 0x1f6   :  { %v7208_v63 = vor.u32 %v8605_v60, %v7205_v61  ;;  %v7147_v60 = vld [vmem:[#allocation11 + $0xe8] sm:$0xf]  ;;  %v8592_v61 = vld [vmem:[#allocation11 + $0xf4] sm:$0xf0] }
 0x1f7   :  { %3154 = vmatmul.bf16.vlgmr.msrb.gmra.mxu3 %v9339_v55  ;;  %v8615_v55 = vld [vmem:[#allocation11 + $0x1ac] sm:$0xf0]  ;;  %3973 = vmatpush.bf16.msra.mxu2 %v7364_v18 }
 0x1f8   :  { %v7236_v23 = vor.u32 %v8615_v55, %v7235_v16  ;;  %4000 = vmatpush.bf16.msrb.mxu0 %v7096_v6  ;;  %v7331_v16 = vld [vmem:[#allocation11 + $0x260] sm:$0xf]  ;;  %v8569_v55 = vld [vmem:[#allocation11 + $0x44] sm:$0xf]  ;;  %3984 = vmatpush.bf16.msra.mxu3 %v7524_v62 }
 0x1f9   :  { %v7507_v6 = vld [vmem:[#allocation11 + $0x3c0] sm:$0xf] }
 0x1fa   :  { %3960 = vmatpush.bf16.msra.mxu1 %v7236_v23  ;;  %v8617_v23 = vld [vmem:[#allocation11 + $0x1c4] sm:$0xf] }
 0x1fb   :  { %v9355_v17 = vpop.f32.mrf.mxu2 }
 0x1fc   :  { %4001 = vmatpush.bf16.msrb.mxu0 %v7080_v11 }
 0x1fe   :  { %3961 = vmatpush.bf16.msra.mxu1 %v7220_v36  ;;  %v8635_v36 = vld [vmem:[#allocation11 + $0x24c] sm:$0xf0] }
 0x1ff   :  { %v7316_v39 = vor.u32 %v8635_v36, %v7315_v35  ;;  %v8593_v35 = vld [vmem:[#allocation11 + $0x104] sm:$0xf]  ;;  %v7157_v36 = vld [vmem:[#allocation11 + $0x110] sm:$0xf0] }
 0x200   :  { %v7160_v40 = vor.u32 %v8593_v35, %v7157_v36 }
 0x202   :  { %3962 = vmatpush.bf16.msra.mxu1 %v7204_v54  ;;  %v7240_v54 = vor.u32 %v8613_v56, %v7237_v43  ;;  %v8671_v43 = vld [vmem:[#allocation11 + $0x36c] sm:$0xf0] }
 0x203   :  { %v2988_v30 = vpop.f32.mrf.mxu2 }
 0x206   :  { %v3064_v21 = vpop.f32.mrf.mxu0  ;;  %3963 = vmatpush.bf16.msra.mxu1 %v7188_v57  ;;  %v8627_v57 = vld [vmem:[#allocation11 + $0x20c] sm:$0xf0] }
 0x207   :  { %v3065_v25 = vadd.f32 %v3064_v21, %v2305_v12  ;;  %v7348_v12 = vor.u32 %v8643_v19, %v7347_v7  ;;  %v7061_v21 = vld [vmem:[#allocation11 + $0x50] sm:$0xf0]  ;;  %v7284_v59 = vor.u32 %v8627_v57, %v7283_v52  ;;  %v8683_v7 = vld [vmem:[#allocation11 + $0x3cc] sm:$0xf0] }
 0x208   :  { %v3077_v27 = vpop.f32.mrf.mxu1  ;;  %v7064_v28 = vor.u32 %v8569_v55, %v7061_v21  ;;  %v7508_v19 = vor.u32 %v8683_v7, %v7507_v6  ;;  %v8597_v55 = vld [vmem:[#allocation11 + $0x124] sm:$0xf]  ;;  %v7173_v21 = vld [vmem:[#allocation11 + $0x130] sm:$0xf0] }
 0x209   :  { %v9357_v13 = vadd.f32 %v3077_v27, %v3065_v25  ;;  %v7253_v25 = vld [vmem:[#allocation11 + $0x1d0] sm:$0xf0]  ;;  %3974 = vmatpush.bf16.msra.mxu2 %v7348_v12  ;;  %v7332_v27 = vor.u32 %v8639_v41, %v7331_v16  ;;  %v8679_v16 = vld [vmem:[#allocation11 + $0x3ac] sm:$0xf0]  ;;  %v8685_v6 = vld [vmem:[#allocation11 + $0x3e4] sm:$0xf] }
 0x20a   :  { %3964 = vmatpush.bf16.msra.mxu1 %v7172_v2  ;;  %v7256_v15 = vor.u32 %v8617_v23, %v7253_v25  ;;  %4002 = vmatpush.bf16.msrb.mxu0 %v7064_v28  ;;  %v7397_v2 = vld [vmem:[#allocation11 + $0x2f0] sm:$0xf0]  ;;  %v8645_v23 = vld [vmem:[#allocation11 + $0x2a4] sm:$0xf]  ;;  %v7176_v25 = vor.u32 %v8597_v55, %v7173_v21  ;;  %v7475_v28 = vld [vmem:[#allocation11 + $0x380] sm:$0xf] }
 0x20b   :  { %v9359_v5 = vpop.f32.mrf.mxu2  ;;  %v7400_v3 = vor.u32 %v8653_v0, %v7397_v2  ;;  %v7381_v12 = vld [vmem:[#allocation11 + $0x2d0] sm:$0xf0]  ;;  %3985 = vmatpush.bf16.msra.mxu3 %v7508_v19  ;;  %v7411_v2 = vld [vmem:[#allocation11 + $0x300] sm:$0xf]  ;;  %v7131_v19 = vld [vmem:[#allocation11 + $0xc8] sm:$0xf] }
 0x20c   :  { %v7384_v11 = vor.u32 %v8649_v22, %v7381_v12  ;;  %v7525_v22 = vld [vmem:[#allocation11 + $0x3f0] sm:$0xf0] }
 0x20d   :  { %3975 = vmatpush.bf16.msra.mxu2 %v7332_v27  ;;  %v7365_v27 = vld [vmem:[#allocation11 + $0x2b0] sm:$0xf0] }
 0x20e   :  { %v3066_v48 = vpop.f32.mrf.mxu0  ;;  %3965 = vmatpush.bf16.msra.mxu1 %v7156_v10  ;;  %4003 = vmatpush.bf16.msrb.mxu0 %v7048_v24  ;;  %v7192_v10 = vor.u32 %v8601_v29, %v7189_v26  ;;  %v7459_v24 = vld [vmem:[#allocation11 + $0x360] sm:$0xf]  ;;  %v8588_v29 = vld [vmem:[#allocation11 + $0xd4] sm:$0xf0] }
 0x20f   :  { %v8631_v48 = vld [vmem:[#allocation11 + $0x22c] sm:$0xf0]  ;;  %v7132_v12 = vor.u32 %v8588_v29, %v7131_v19  ;;  %v8590_v19 = vld [vmem:[#allocation11 + $0xec] sm:$0xf]  ;;  %v7149_v29 = vld [vmem:[#allocation11 + $0xf8] sm:$0xf0] }
 0x210   :  { %v3079_v42 = vpop.f32.mrf.mxu1  ;;  %v7300_v1 = vor.u32 %v8631_v48, %v7299_v47  ;;  %v7443_v47 = vld [vmem:[#allocation11 + $0x340] sm:$0xf]  ;;  %v8667_v48 = vld [vmem:[#allocation11 + $0x34c] sm:$0xf0] }
 0x211   :  { %3976 = vmatpush.bf16.msra.mxu2 %v7316_v39  ;;  %v7032_v42 = vor.u32 %v8561_v49, %v7029_v44  ;;  %v8641_v39 = vld [vmem:[#allocation11 + $0x284] sm:$0xf]  ;;  %v7317_v44 = vld [vmem:[#allocation11 + $0x250] sm:$0xf0] }
 0x212   :  { %4010 = vmatpush.bf16.msrb.mxu1 %v7272_v14  ;;  %v7491_v14 = vld [vmem:[#allocation11 + $0x3a0] sm:$0xf]  ;;  %v7352_v56 = vor.u32 %v8641_v39, %v7349_v34  ;;  %v8633_v49 = vld [vmem:[#allocation11 + $0x244] sm:$0xf]  ;;  %v7083_v39 = vld [vmem:[#allocation11 + $0x68] sm:$0xf] }
 0x213   :  { %v3040_v8 = vpop.f32.mrf.mxu2  ;;  %4004 = vmatpush.bf16.msrb.mxu0 %v7032_v42  ;;  %v7492_v41 = vor.u32 %v8679_v16, %v7491_v14  ;;  %v7320_v38 = vor.u32 %v8633_v49, %v7317_v44  ;;  %v2987_v42 = vadd.f32 %v9355_v17, %v9347_v20  ;;  %v8625_v17 = vld [vmem:[#allocation11 + $0x204] sm:$0xf]  ;;  %v8584_v14 = vld [vmem:[#allocation11 + $0xb4] sm:$0xf0]  ;;  %v7275_v34 = vld [vmem:[#allocation11 + $0x1e8] sm:$0xf] }
 0x214   :  { %v7368_v8 = vor.u32 %v8645_v23, %v7365_v27  ;;  %v8681_v16 = vld [vmem:[#allocation11 + $0x3c4] sm:$0xf]  ;;  %v8580_v27 = vld [vmem:[#allocation11 + $0x94] sm:$0xf0]  ;;  %v7259_v49 = vld [vmem:[#allocation11 + $0x1c8] sm:$0xf] }
 0x215   :  { %3977 = vmatpush.bf16.msra.mxu2 %v7300_v1  ;;  %3986 = vmatpush.bf16.msra.mxu3 %v7492_v41  ;;  %v7444_v1 = vor.u32 %v8667_v48, %v7443_v47  ;;  %v7509_v41 = vld [vmem:[#allocation11 + $0x3d0] sm:$0xf0]  ;;  %v7067_v48 = vld [vmem:[#allocation11 + $0x48] sm:$0xf]  ;;  %v8669_v44 = vld [vmem:[#allocation11 + $0x364] sm:$0xf] }
 0x216   :  { %4011 = vmatpush.bf16.msrb.mxu1 %v7256_v15  ;;  %v8675_v15 = vld [vmem:[#allocation11 + $0x38c] sm:$0xf0]  ;;  %v7512_v21 = vor.u32 %v8681_v16, %v7509_v41  ;;  %v7152_v41 = vor.u32 %v8590_v19, %v7149_v29 }
 0x219   :  { %3978 = vmatpush.bf16.msra.mxu2 %v7284_v59  ;;  %v7301_v59 = vld [vmem:[#allocation11 + $0x230] sm:$0xf0] }
 0x21a   :  { %4012 = vmatpush.bf16.msrb.mxu1 %v7240_v54  ;;  %v8637_v54 = vld [vmem:[#allocation11 + $0x264] sm:$0xf]  ;;  %v7304_v62 = vor.u32 %v8629_v58, %v7301_v59  ;;  %v8568_v58 = vld [vmem:[#allocation11 + $0x34] sm:$0xf0]  ;;  %v7243_v59 = vld [vmem:[#allocation11 + $0x1a8] sm:$0xf] }
 0x21b   :  { %v9364_v51 = vpop.f32.mrf.mxu2 }
 0x21d   :  { %4023 = vmatpush.bf16.msrb.mxu2 %v7400_v3  ;;  %v7148_v3 = vor.u32 %v8592_v61, %v7147_v60  ;;  %v8665_v60 = vld [vmem:[#allocation11 + $0x344] sm:$0xf]  ;;  %v7445_v61 = vld [vmem:[#allocation11 + $0x350] sm:$0xf0] }
 0x21e   :  { %4013 = vmatpush.bf16.msrb.mxu1 %v7224_v31  ;;  %v8663_v31 = vld [vmem:[#allocation11 + $0x32c] sm:$0xf0] }
 0x21f   :  { %v7428_v57 = vor.u32 %v8663_v31, %v7427_v53 }
 0x221   :  { %4024 = vmatpush.bf16.msrb.mxu2 %v7384_v11  ;;  %v7115_v11 = vld [vmem:[#allocation11 + $0xa8] sm:$0xf] }
 0x222   :  { %4014 = vmatpush.bf16.msrb.mxu1 %v7208_v63  ;;  %v7116_v23 = vor.u32 %v8584_v14, %v7115_v11  ;;  %v7211_v11 = vld [vmem:[#allocation11 + $0x168] sm:$0xf]  ;;  %v8608_v14 = vld [vmem:[#allocation11 + $0x174] sm:$0xf0] }
 0x223   :  { %v3092_v9 = vpop.f32.mrf.mxu2 }
 0x224   :  { %v7528_v9 = vor.u32 %v8685_v6, %v7525_v22  ;;  %v7429_v6 = vld [vmem:[#allocation11 + $0x330] sm:$0xf0]  ;;  %v3091_v22 = vadd.f32 %v9364_v51, %v9357_v13  ;;  %v7212_v13 = vor.u32 %v8608_v14, %v7211_v11  ;;  %v8614_v11 = vld [vmem:[#allocation11 + $0x1ac] sm:$0xf]  ;;  %v7245_v14 = vld [vmem:[#allocation11 + $0x1b8] sm:$0xf0] }
 0x225   :  { %4025 = vmatpush.bf16.msrb.mxu2 %v7368_v8  ;;  %v8677_v8 = vld [vmem:[#allocation11 + $0x3a4] sm:$0xf] }
 0x226   :  { %v3116_v30 = vpop.f32.mrf.mxu0  ;;  %4015 = vmatpush.bf16.msrb.mxu1 %v7192_v10 }
 0x227   :  { %v3117_v45 = vadd.f32 %v3116_v30, %v2306_v33  ;;  %v7476_v33 = vor.u32 %v8675_v15, %v7475_v28  ;;  %v7460_v30 = vor.u32 %v8671_v43, %v7459_v24  ;;  %v7493_v28 = vld [vmem:[#allocation11 + $0x3b0] sm:$0xf0]  ;;  %v8624_v24 = vld [vmem:[#allocation11 + $0x1f4] sm:$0xf0]  ;;  %v8673_v43 = vld [vmem:[#allocation11 + $0x384] sm:$0xf] }
 0x228   :  { %v3129_v46 = vpop.f32.mrf.mxu1  ;;  %v7496_v15 = vor.u32 %v8677_v8, %v7493_v28  ;;  %v7276_v47 = vor.u32 %v8624_v24, %v7275_v34  ;;  %v7133_v8 = vld [vmem:[#allocation11 + $0xd8] sm:$0xf0]  ;;  %v8652_v34 = vld [vmem:[#allocation11 + $0x2d4] sm:$0xf0] }
 0x229   :  { %v9362_v50 = vadd.f32 %v3129_v46, %v3117_v45  ;;  %3987 = vmatpush.bf16.msra.mxu3 %v7476_v33  ;;  %4026 = vmatpush.bf16.msrb.mxu2 %v7352_v56  ;;  %v7333_v45 = vld [vmem:[#allocation11 + $0x270] sm:$0xf0]  ;;  %v3039_v33 = vadd.f32 %v9359_v5, %v9351_v32  ;;  %v8620_v5 = vld [vmem:[#allocation11 + $0x1d4] sm:$0xf0]  ;;  %v7117_v24 = vld [vmem:[#allocation11 + $0xb8] sm:$0xf0] }
 0x22a   :  { %4016 = vmatpush.bf16.msrb.mxu1 %v7176_v25  ;;  %v7336_v46 = vor.u32 %v8637_v54, %v7333_v45  ;;  %v7099_v25 = vld [vmem:[#allocation11 + $0x88] sm:$0xf] }
 0x22b   :  { %v7100_v36 = vor.u32 %v8580_v27, %v7099_v25  ;;  %v8656_v25 = vld [vmem:[#allocation11 + $0x2f4] sm:$0xf0]  ;;  %v8586_v27 = vld [vmem:[#allocation11 + $0xcc] sm:$0xf] }
 0x22d   :  { %3988 = vmatpush.bf16.msra.mxu3 %v7460_v30  ;;  %4027 = vmatpush.bf16.msrb.mxu2 %v7336_v46  ;;  %v7477_v30 = vld [vmem:[#allocation11 + $0x390] sm:$0xf0] }
 0x22e   :  { %v3118_v18 = vpop.f32.mrf.mxu0  ;;  %4017 = vmatpush.bf16.msrb.mxu1 %v7160_v40  ;;  %v8576_v40 = vld [vmem:[#allocation11 + $0x74] sm:$0xf0]  ;;  %v7480_v54 = vor.u32 %v8673_v43, %v7477_v30 }
 0x22f   :  { %v8659_v18 = vld [vmem:[#allocation11 + $0x30c] sm:$0xf0]  ;;  %v7084_v46 = vor.u32 %v8576_v40, %v7083_v39  ;;  %v8604_v39 = vld [vmem:[#allocation11 + $0x154] sm:$0xf0]  ;;  %v7387_v40 = vld [vmem:[#allocation11 + $0x2c8] sm:$0xf] }
 0x230   :  { %v3131_v4 = vpop.f32.mrf.mxu1  ;;  %v7412_v20 = vor.u32 %v8659_v18, %v7411_v2  ;;  %v7035_v18 = vld [vmem:[#allocation11 + $0x8] sm:$0xf] }
 0x231   :  { %3989 = vmatpush.bf16.msra.mxu3 %v7444_v1  ;;  %4028 = vmatpush.bf16.msrb.mxu2 %v7320_v38  ;;  %v7285_v4 = vld [vmem:[#allocation11 + $0x210] sm:$0xf0]  ;;  %v8572_v1 = vld [vmem:[#allocation11 + $0x54] sm:$0xf0] }
 0x232   :  { %v7288_v26 = vor.u32 %v8625_v17, %v7285_v4  ;;  %v7461_v38 = vld [vmem:[#allocation11 + $0x370] sm:$0xf0]  ;;  %v7068_v31 = vor.u32 %v8572_v1, %v7067_v48  ;;  %v8612_v17 = vld [vmem:[#allocation11 + $0x194] sm:$0xf0]  ;;  %v8661_v4 = vld [vmem:[#allocation11 + $0x324] sm:$0xf] }
 0x233   :  { %v7371_v48 = vld [vmem:[#allocation11 + $0x2a8] sm:$0xf]  ;;  %v8648_v1 = vld [vmem:[#allocation11 + $0x2b4] sm:$0xf0] }
 0x235   :  { %3990 = vmatpush.bf16.msra.mxu3 %v7428_v57  ;;  %4029 = vmatpush.bf16.msrb.mxu2 %v7304_v62  ;;  %v7051_v57 = vld [vmem:[#allocation11 + $0x28] sm:$0xf]  ;;  %v7448_v62 = vor.u32 %v8665_v60, %v7445_v61  ;;  %v7277_v60 = vld [vmem:[#allocation11 + $0x1f8] sm:$0xf0] }
 0x239   :  { %3991 = vmatpush.bf16.msra.mxu3 %v7412_v20  ;;  %4030 = vmatpush.bf16.msrb.mxu2 %v7288_v26  ;;  %v7227_v20 = vld [vmem:[#allocation11 + $0x188] sm:$0xf]  ;;  %v7432_v26 = vor.u32 %v8661_v4, %v7429_v6  ;;  %v8618_v4 = vld [vmem:[#allocation11 + $0x1cc] sm:$0xf]  ;;  %v7261_v6 = vld [vmem:[#allocation11 + $0x1d8] sm:$0xf0] }
 0x23a   :  { %v2999_v52 = vpop.f32.mrf.mxu3 }
 0x23b   :  { %v3000_v37 = vadd.f32 %v2999_v52, %v2987_v42  ;;  %v9368_v63 = vpop.f32.mrf.mxu2  ;;  %v7464_v42 = vor.u32 %v8669_v44, %v7461_v38  ;;  %v7260_v52 = vor.u32 %v8620_v5, %v7259_v49  ;;  %v8578_v49 = vld [vmem:[#allocation11 + $0x8c] sm:$0xf]  ;;  %v7101_v5 = vld [vmem:[#allocation11 + $0x98] sm:$0xf0]  ;;  %v7372_v38 = vor.u32 %v8648_v1, %v7371_v48 }
 0x23d   :  { %v3159_v0 = vmax.f32 %v3000_v37, 0.0  ;;  %4036 = vmatpush.bf16.msrb.mxu3 %v7528_v9  ;;  %v8616_v37 = vld [vmem:[#allocation11 + $0x1b4] sm:$0xf0] }
 0x23e   :  { %v7244_v2 = vor.u32 %v8616_v37, %v7243_v59  ;;  %v7085_v59 = vld [vmem:[#allocation11 + $0x78] sm:$0xf0]  ;;  %v8622_v37 = vld [vmem:[#allocation11 + $0x1ec] sm:$0xf] }
 0x23f   :  { %v9370_v7 = vpack.c.bf16 %v3159_v0, %v3159_v0  ;;  %v7052_v0 = vor.u32 %v8568_v58, %v7051_v57  ;;  %v8644_v57 = vld [vmem:[#allocation11 + $0x294] sm:$0xf0]  ;;  %v8574_v58 = vld [vmem:[#allocation11 + $0x6c] sm:$0xf] }
 0x241   :  { %3953 = vmatmul.bf16.vlgmr.msra.gmra.mxu0 %v9370_v7  ;;  %4037 = vmatpush.bf16.msrb.mxu3 %v7512_v21  ;;  %v8657_v21 = vld [vmem:[#allocation11 + $0x304] sm:$0xf] }
 0x242   :  { %4049 = vmatpush.bf16.msra.mxu0 %v7148_v3  ;;  %v3001_v10 = vpop.f32.mrf.mxu3  ;;  %v8564_v3 = vld [vmem:[#allocation11 + $0x14] sm:$0xf0] }
 0x243   :  { %v3144_v55 = vpop.f32.mrf.mxu2  ;;  %v7036_v10 = vor.u32 %v8564_v3, %v7035_v18  ;;  %v7280_v18 = vor.u32 %v8622_v37, %v7277_v60  ;;  %v8640_v3 = vld [vmem:[#allocation11 + $0x274] sm:$0xf0]  ;;  %v8598_v60 = vld [vmem:[#allocation11 + $0x12c] sm:$0xf] }
 0x244   :  { %v7403_v55 = vld [vmem:[#allocation11 + $0x2e8] sm:$0xf]  ;;  %v8680_v37 = vld [vmem:[#allocation11 + $0x3b4] sm:$0xf0] }
 0x245   :  { %4038 = vmatpush.bf16.msrb.mxu3 %v7496_v15 }
 0x246   :  { %4050 = vmatpush.bf16.msra.mxu0 %v7132_v12  ;;  %v7228_v12 = vor.u32 %v8612_v17, %v7227_v20  ;;  %v8570_v20 = vld [vmem:[#allocation11 + $0x4c] sm:$0xf]  ;;  %v7069_v17 = vld [vmem:[#allocation11 + $0x58] sm:$0xf0] }
 0x247   :  { %v7072_v29 = vor.u32 %v8570_v20, %v7069_v17  ;;  %v8676_v20 = vld [vmem:[#allocation11 + $0x394] sm:$0xf0]  ;;  %v8594_v17 = vld [vmem:[#allocation11 + $0x10c] sm:$0xf] }
 0x249   :  { %4039 = vmatpush.bf16.msrb.mxu3 %v7480_v54  ;;  %v7388_v54 = vor.u32 %v8652_v34, %v7387_v40 }
 0x24a   :  { %4051 = vmatpush.bf16.msra.mxu0 %v7116_v23  ;;  %v3051_v35 = vpop.f32.mrf.mxu3  ;;  %v7413_v23 = vld [vmem:[#allocation11 + $0x310] sm:$0xf0] }
 0x24b   :  { %v3052_v56 = vadd.f32 %v3051_v35, %v3039_v33  ;;  %v7416_v28 = vor.u32 %v8657_v21, %v7413_v23  ;;  %v7404_v33 = vor.u32 %v8656_v25, %v7403_v55  ;;  %v7136_v35 = vor.u32 %v8586_v27, %v7133_v8  ;;  %v7307_v55 = vld [vmem:[#allocation11 + $0x228] sm:$0xf]  ;;  %v8632_v23 = vld [vmem:[#allocation11 + $0x234] sm:$0xf0]  ;;  %v8562_v25 = vld [vmem:[#allocation11 + $0xc] sm:$0xf] }
 0x24c   :  { %v7248_v21 = vor.u32 %v8614_v11, %v7245_v14  ;;  %v7037_v27 = vld [vmem:[#allocation11 + $0x18] sm:$0xf0]  ;;  %v8610_v8 = vld [vmem:[#allocation11 + $0x18c] sm:$0xf] }
 0x24d   :  { %v3160_v45 = vmax.f32 %v3052_v56, 0.0  ;;  %4040 = vmatpush.bf16.msrb.mxu3 %v7464_v42  ;;  %v8582_v56 = vld [vmem:[#allocation11 + $0xac] sm:$0xf]  ;;  %v7104_v42 = vor.u32 %v8578_v49, %v7101_v5  ;;  %v7515_v49 = vld [vmem:[#allocation11 + $0x3c8] sm:$0xf] }
 0x24e   :  { %4052 = vmatpush.bf16.msra.mxu0 %v7100_v36  ;;  %v7195_v36 = vld [vmem:[#allocation11 + $0x148] sm:$0xf]  ;;  %v8684_v5 = vld [vmem:[#allocation11 + $0x3d4] sm:$0xf0]  ;;  %v7341_v11 = vld [vmem:[#allocation11 + $0x278] sm:$0xf0] }
 0x24f   :  { %v9375_v32 = vpack.c.bf16 %v3160_v45, %v3160_v45  ;;  %v7196_v30 = vor.u32 %v8604_v39, %v7195_v36  ;;  %v7120_v45 = vor.u32 %v8582_v56, %v7117_v24  ;;  %v7291_v36 = vld [vmem:[#allocation11 + $0x208] sm:$0xf]  ;;  %v8628_v39 = vld [vmem:[#allocation11 + $0x214] sm:$0xf0] }
 0x250   :  { %v7531_v56 = vld [vmem:[#allocation11 + $0x3e8] sm:$0xf]  ;;  %v8688_v24 = vld [vmem:[#allocation11 + $0x3f4] sm:$0xf0] }
 0x251   :  { %3966 = vmatmul.bf16.vlgmr.msra.gmra.mxu1 %v9375_v32  ;;  %4005 = vmatmul.bf16.vlgmr.msrb.gmra.mxu0 %v9370_v7 }
 0x252   :  { %4053 = vmatpush.bf16.msra.mxu0 %v7084_v46  ;;  %4062 = vmatpush.bf16.msra.mxu1 %v7276_v47  ;;  %v3053_v53 = vpop.f32.mrf.mxu3  ;;  %v7179_v46 = vld [vmem:[#allocation11 + $0x128] sm:$0xf]  ;;  %v8600_v47 = vld [vmem:[#allocation11 + $0x134] sm:$0xf0] }
 0x253   :  { %4041 = vmatpush.bf16.msrb.mxu3 %v7448_v62  ;;  %v7180_v44 = vor.u32 %v8600_v47, %v7179_v46  ;;  %v7163_v53 = vld [vmem:[#allocation11 + $0x108] sm:$0xf] }
 0x256   :  { %4054 = vmatpush.bf16.msra.mxu0 %v7068_v31  ;;  %4063 = vmatpush.bf16.msra.mxu1 %v7260_v52  ;;  %v8596_v31 = vld [vmem:[#allocation11 + $0x114] sm:$0xf0]  ;;  %v7355_v52 = vld [vmem:[#allocation11 + $0x288] sm:$0xf] }
 0x257   :  { %4042 = vmatpush.bf16.msrb.mxu3 %v7432_v26  ;;  %v7164_v61 = vor.u32 %v8596_v31, %v7163_v53  ;;  %v7356_v62 = vor.u32 %v8644_v57, %v7355_v52  ;;  %v7323_v26 = vld [vmem:[#allocation11 + $0x248] sm:$0xf]  ;;  %v7389_v53 = vld [vmem:[#allocation11 + $0x2d8] sm:$0xf0]  ;;  %v7516_v52 = vor.u32 %v8684_v5, %v7515_v49 }
 0x258   :  { %v7485_v49 = vld [vmem:[#allocation11 + $0x398] sm:$0xf0] }
 0x25a   :  { %4055 = vmatpush.bf16.msra.mxu0 %v7052_v0  ;;  %4064 = vmatpush.bf16.msra.mxu1 %v7244_v2  ;;  %v3103_v9 = vpop.f32.mrf.mxu3  ;;  %v7088_v0 = vor.u32 %v8574_v58, %v7085_v59  ;;  %v7339_v2 = vld [vmem:[#allocation11 + $0x268] sm:$0xf] }
 0x25b   :  { %v3104_v16 = vadd.f32 %v3103_v9, %v3091_v22  ;;  %4043 = vmatpush.bf16.msrb.mxu3 %v7416_v28  ;;  %v7340_v19 = vor.u32 %v8640_v3, %v7339_v2  ;;  %v7264_v22 = vor.u32 %v8618_v4, %v7261_v6  ;;  %v8636_v9 = vld [vmem:[#allocation11 + $0x254] sm:$0xf0]  ;;  %v7229_v28 = vld [vmem:[#allocation11 + $0x198] sm:$0xf0]  ;;  %v7499_v59 = vld [vmem:[#allocation11 + $0x3a8] sm:$0xf] }
 0x25c   :  { %v7232_v34 = vor.u32 %v8610_v8, %v7229_v28  ;;  %v7500_v2 = vor.u32 %v8680_v37, %v7499_v59  ;;  %v7483_v3 = vld [vmem:[#allocation11 + $0x388] sm:$0xf]  ;;  %v7165_v4 = vld [vmem:[#allocation11 + $0x118] sm:$0xf0]  ;;  %v8642_v6 = vld [vmem:[#allocation11 + $0x28c] sm:$0xf] }
 0x25d   :  { %v3161_v15 = vmax.f32 %v3104_v16, 0.0  ;;  %v7324_v16 = vor.u32 %v8636_v9, %v7323_v26  ;;  %v7168_v26 = vor.u32 %v8594_v17, %v7165_v4  ;;  %v7467_v9 = vld [vmem:[#allocation11 + $0x368] sm:$0xf]  ;;  %v8664_v28 = vld [vmem:[#allocation11 + $0x334] sm:$0xf0] }
 0x25e   :  { %4056 = vmatpush.bf16.msra.mxu0 %v7036_v10  ;;  %4065 = vmatpush.bf16.msra.mxu1 %v7228_v12  ;;  %v8566_v10 = vld [vmem:[#allocation11 + $0x2c] sm:$0xf]  ;;  %v7053_v12 = vld [vmem:[#allocation11 + $0x38] sm:$0xf0]  ;;  %v7435_v8 = vld [vmem:[#allocation11 + $0x328] sm:$0xf] }
 0x25f   :  { %v9381_v51 = vpack.c.bf16 %v3161_v15, %v3161_v15  ;;  %v3143_v15 = vadd.f32 %v9368_v63, %v9362_v50  ;;  %v7292_v50 = vor.u32 %v8628_v39, %v7291_v36  ;;  %v7532_v63 = vor.u32 %v8688_v24, %v7531_v56  ;;  %v7419_v36 = vld [vmem:[#allocation11 + $0x308] sm:$0xf]  ;;  %v8660_v39 = vld [vmem:[#allocation11 + $0x314] sm:$0xf0]  ;;  %v8686_v56 = vld [vmem:[#allocation11 + $0x3ec] sm:$0xf] }
 0x260   :  { %v7533_v24 = vld [vmem:[#allocation11 + $0x3f8] sm:$0xf0]  ;;  %v8662_v37 = vld [vmem:[#allocation11 + $0x32c] sm:$0xf]  ;;  %v7603_v4 = vld [vmem:[#allocation13 + $0x80] sm:$0xf] }
 0x261   :  { %3979 = vmatmul.bf16.vlgmr.msra.gmra.mxu2 %v9381_v51  ;;  %4018 = vmatmul.bf16.vlgmr.msrb.gmra.mxu1 %v9375_v32 }
 0x262   :  { %4101 = vmatpush.bf16.msrb.mxu0 %v7152_v41  ;;  %4066 = vmatpush.bf16.msra.mxu1 %v7212_v13  ;;  %v3105_v43 = vpop.f32.mrf.mxu3  ;;  %v7056_v41 = vor.u32 %v8566_v10, %v7053_v12  ;;  %v8672_v10 = vld [vmem:[#allocation11 + $0x374] sm:$0xf0]  ;;  %v8638_v12 = vld [vmem:[#allocation11 + $0x26c] sm:$0xf] }
 0x263   :  { %4057 = vmatmul.bf16.vlgmr.msra.gmra.mxu0 %v9370_v7  ;;  %4075 = vmatpush.bf16.msra.mxu2 %v7404_v33  ;;  %v7308_v33 = vor.u32 %v8632_v23, %v7307_v55  ;;  %v8606_v43 = vld [vmem:[#allocation11 + $0x16c] sm:$0xf]  ;;  %v7468_v14 = vor.u32 %v8672_v10, %v7467_v9  ;;  %v8668_v55 = vld [vmem:[#allocation11 + $0x354] sm:$0xf0]  ;;  %v7325_v23 = vld [vmem:[#allocation11 + $0x258] sm:$0xf0] }
 0x264   :  { %v8751_v9 = vld [vmem:[#allocation13 + $0x1ec] sm:$0xf0] }
 0x266   :  { %4102 = vmatpush.bf16.msrb.mxu0 %v7136_v35  ;;  %4067 = vmatpush.bf16.msra.mxu1 %v7196_v30  ;;  %v7040_v35 = vor.u32 %v8562_v25, %v7037_v27  ;;  %v7213_v30 = vld [vmem:[#allocation11 + $0x178] sm:$0xf0] }
 0x267   :  { %4076 = vmatpush.bf16.msra.mxu2 %v7388_v54  ;;  %v8654_v54 = vld [vmem:[#allocation11 + $0x2ec] sm:$0xf]  ;;  %v7216_v48 = vor.u32 %v8606_v43, %v7213_v30  ;;  %v7420_v43 = vor.u32 %v8660_v39, %v7419_v36  ;;  %v7536_v30 = vor.u32 %v8686_v56, %v7533_v24  ;;  %v7731_v36 = vld [vmem:[#allocation13 + $0x180] sm:$0xf]  ;;  %v7653_v56 = vld [vmem:[#allocation13 + $0xf0] sm:$0xf0] }
 0x26a   :  { %4103 = vmatpush.bf16.msrb.mxu0 %v7120_v45  ;;  %4068 = vmatpush.bf16.msra.mxu1 %v7180_v44  ;;  %v7405_v45 = vld [vmem:[#allocation11 + $0x2f8] sm:$0xf0]  ;;  %v8602_v44 = vld [vmem:[#allocation11 + $0x14c] sm:$0xf] }
 0x26b   :  { %4077 = vmatpush.bf16.msra.mxu2 %v7372_v38  ;;  %v7408_v1 = vor.u32 %v8654_v54, %v7405_v45  ;;  %v7197_v38 = vld [vmem:[#allocation11 + $0x158] sm:$0xf0]  ;;  %v8682_v54 = vld [vmem:[#allocation11 + $0x3cc] sm:$0xf] }
 0x26c   :  { %v7200_v57 = vor.u32 %v8602_v44, %v7197_v38  ;;  %v7517_v45 = vld [vmem:[#allocation11 + $0x3d8] sm:$0xf0]  ;;  %v8670_v44 = vld [vmem:[#allocation11 + $0x36c] sm:$0xf] }
 0x26d   :  { %v7469_v38 = vld [vmem:[#allocation11 + $0x378] sm:$0xf0] }
 0x26e   :  { %4104 = vmatpush.bf16.msrb.mxu0 %v7104_v42  ;;  %4069 = vmatpush.bf16.msra.mxu1 %v7164_v61  ;;  %v8650_v42 = vld [vmem:[#allocation11 + $0x2cc] sm:$0xf]  ;;  %v7181_v61 = vld [vmem:[#allocation11 + $0x138] sm:$0xf0] }
 0x26f   :  { %4078 = vmatpush.bf16.msra.mxu2 %v7356_v62  ;;  %v7392_v58 = vor.u32 %v8650_v42, %v7389_v53  ;;  %v8646_v62 = vld [vmem:[#allocation11 + $0x2ac] sm:$0xf]  ;;  %v7651_v42 = vld [vmem:[#allocation13 + $0xe0] sm:$0xf]  ;;  %v8719_v53 = vld [vmem:[#allocation13 + $0xec] sm:$0xf0] }
 0x271   :  { %4031 = vmatmul.bf16.vlgmr.msrb.gmra.mxu2 %v9381_v51  ;;  %4070 = vmatmul.bf16.vlgmr.msra.gmra.mxu1 %v9375_v32 }
 0x272   :  { %4105 = vmatpush.bf16.msrb.mxu0 %v7088_v0  ;;  %4114 = vmatpush.bf16.msrb.mxu1 %v7280_v18  ;;  %v7373_v0 = vld [vmem:[#allocation11 + $0x2b8] sm:$0xf0] }
 0x273   :  { %4079 = vmatpush.bf16.msra.mxu2 %v7340_v19  ;;  %v7376_v18 = vor.u32 %v8646_v62, %v7373_v0  ;;  %v7357_v19 = vld [vmem:[#allocation11 + $0x298] sm:$0xf0] }
 0x276   :  { %4106 = vmatpush.bf16.msrb.mxu0 %v7072_v29  ;;  %4115 = vmatpush.bf16.msrb.mxu1 %v7264_v22  ;;  %v7484_v29 = vor.u32 %v8676_v20, %v7483_v3  ;;  %v7360_v22 = vor.u32 %v8642_v6, %v7357_v19  ;;  %v7421_v3 = vld [vmem:[#allocation11 + $0x318] sm:$0xf0]  ;;  %v8707_v6 = vld [vmem:[#allocation13 + $0x8c] sm:$0xf0]  ;;  %v7587_v19 = vld [vmem:[#allocation13 + $0x60] sm:$0xf] }
 0x277   :  { %4080 = vmatpush.bf16.msra.mxu2 %v7324_v16  ;;  %v7344_v16 = vor.u32 %v8638_v12, %v7341_v11 }
 0x27a   :  { %v3155_v13 = vpop.f32.mrf.mxu3  ;;  %4107 = vmatpush.bf16.msrb.mxu0 %v7056_v41  ;;  %4116 = vmatpush.bf16.msrb.mxu1 %v7248_v21  ;;  %v7451_v41 = vld [vmem:[#allocation11 + $0x348] sm:$0xf]  ;;  %v8634_v21 = vld [vmem:[#allocation11 + $0x24c] sm:$0xf] }
 0x27b   :  { %v3156_v40 = vadd.f32 %v3155_v13, %v3143_v15  ;;  %4081 = vmatpush.bf16.msra.mxu2 %v7308_v33  ;;  %v7452_v25 = vor.u32 %v8668_v55, %v7451_v41  ;;  %v7328_v27 = vor.u32 %v8634_v21, %v7325_v23  ;;  %v8630_v15 = vld [vmem:[#allocation11 + $0x22c] sm:$0xf]  ;;  %v7309_v13 = vld [vmem:[#allocation11 + $0x238] sm:$0xf0]  ;;  %v7436_v33 = vor.u32 %v8664_v28, %v7435_v8  ;;  %v7763_v41 = vld [vmem:[#allocation13 + $0x1c0] sm:$0xf] }
 0x27c   :  { %v8747_v21 = vld [vmem:[#allocation13 + $0x1cc] sm:$0xf0]  ;;  %v7747_v8 = vld [vmem:[#allocation13 + $0x1a0] sm:$0xf] }
 0x27d   :  { %v3162_v46 = vmax.f32 %v3156_v40, 0.0  ;;  %v8626_v40 = vld [vmem:[#allocation11 + $0x20c] sm:$0xf]  ;;  %v7764_v23 = vor.u32 %v8747_v21, %v7763_v41  ;;  %v7843_v41 = vld [vmem:[#allocation13 + $0x260] sm:$0xf] }
 0x27e   :  { %4108 = vmatpush.bf16.msrb.mxu0 %v7040_v35  ;;  %4117 = vmatpush.bf16.msrb.mxu1 %v7232_v34  ;;  %v7312_v35 = vor.u32 %v8630_v15, %v7309_v13  ;;  %v7293_v34 = vld [vmem:[#allocation11 + $0x218] sm:$0xf0]  ;;  %v8743_v15 = vld [vmem:[#allocation13 + $0x1ac] sm:$0xf0]  ;;  %v8697_v21 = vld [vmem:[#allocation13 + $0x44] sm:$0xf] }
 0x27f   :  { %v9390_v47 = vpack.c.bf16 %v3162_v46, %v3162_v46  ;;  %4082 = vmatpush.bf16.msra.mxu2 %v7292_v50  ;;  %v7520_v46 = vor.u32 %v8682_v54, %v7517_v45  ;;  %v8678_v50 = vld [vmem:[#allocation11 + $0x3ac] sm:$0xf]  ;;  %v7907_v54 = vld [vmem:[#allocation13 + $0x2e0] sm:$0xf] }
 0x281   :  { %3992 = vmatmul.bf16.vlgmr.msra.gmra.mxu3 %v9390_v47  ;;  %4109 = vmatmul.bf16.vlgmr.msrb.gmra.mxu0 %v9370_v7  ;;  %v7184_v7 = vor.u32 %v8598_v60, %v7181_v61  ;;  %v7635_v60 = vld [vmem:[#allocation13 + $0xc0] sm:$0xf]  ;;  %v8715_v61 = vld [vmem:[#allocation13 + $0xcc] sm:$0xf0] }
 0x282   :  { %4088 = vmatpush.bf16.msra.mxu3 %v7532_v63  ;;  %v3157_v31 = vpop.f32.mrf.mxu3  ;;  %4118 = vmatpush.bf16.msrb.mxu1 %v7216_v48  ;;  %v7501_v63 = vld [vmem:[#allocation11 + $0x3b8] sm:$0xf0]  ;;  %v7636_v0 = vor.u32 %v8715_v61, %v7635_v60  ;;  %v7875_v60 = vld [vmem:[#allocation13 + $0x2a0] sm:$0xf] }
 0x283   :  { %4127 = vmatpush.bf16.msrb.mxu2 %v7408_v1  ;;  %v7504_v48 = vor.u32 %v8678_v50, %v7501_v63  ;;  %v8674_v1 = vld [vmem:[#allocation11 + $0x38c] sm:$0xf]  ;;  %v7652_v31 = vor.u32 %v8719_v53, %v7651_v42  ;;  %v8713_v50 = vld [vmem:[#allocation13 + $0xc4] sm:$0xf]  ;;  %v7637_v63 = vld [vmem:[#allocation13 + $0xd0] sm:$0xf0] }
 0x284   :  { %4083 = vmatmul.bf16.vlgmr.msra.gmra.mxu2 %v9381_v51  ;;  %v7488_v5 = vor.u32 %v8674_v1, %v7485_v49  ;;  %v7891_v42 = vld [vmem:[#allocation13 + $0x2c0] sm:$0xf] }
 0x285   :  { %4939 = vmatpush.bf16.msra.mxu0 %v7652_v31  ;;  %v8779_v31 = vld [vmem:[#allocation13 + $0x2cc] sm:$0xf0] }
 0x286   :  { %4089 = vmatpush.bf16.msra.mxu3 %v7516_v52  ;;  %4119 = vmatpush.bf16.msrb.mxu1 %v7200_v57  ;;  %v7472_v52 = vor.u32 %v8670_v44, %v7469_v38  ;;  %v8666_v57 = vld [vmem:[#allocation11 + $0x34c] sm:$0xf]  ;;  %v7699_v44 = vld [vmem:[#allocation13 + $0x140] sm:$0xf]  ;;  %v8731_v38 = vld [vmem:[#allocation13 + $0x14c] sm:$0xf0] }
 0x287   :  { %4128 = vmatpush.bf16.msrb.mxu2 %v7392_v58  ;;  %v7453_v58 = vld [vmem:[#allocation11 + $0x358] sm:$0xf0]  ;;  %v7700_v53 = vor.u32 %v8731_v38, %v7699_v44  ;;  %v7733_v44 = vld [vmem:[#allocation13 + $0x190] sm:$0xf0] }
 0x288   :  { %v7456_v59 = vor.u32 %v8666_v57, %v7453_v58  ;;  %v7621_v57 = vld [vmem:[#allocation13 + $0xb0] sm:$0xf0]  ;;  %v7892_v58 = vor.u32 %v8779_v31, %v7891_v42  ;;  %v8755_v31 = vld [vmem:[#allocation13 + $0x20c] sm:$0xf0] }
 0x289   :  { %4940 = vmatpush.bf16.msra.mxu0 %v7636_v0  ;;  %v8705_v0 = vld [vmem:[#allocation13 + $0x84] sm:$0xf] }
 0x28a   :  { %4090 = vmatpush.bf16.msra.mxu3 %v7500_v2  ;;  %4120 = vmatpush.bf16.msrb.mxu1 %v7184_v7  ;;  %v7619_v2 = vld [vmem:[#allocation13 + $0xa0] sm:$0xf]  ;;  %v8711_v7 = vld [vmem:[#allocation13 + $0xac] sm:$0xf0] }
 0x28b   :  { %4129 = vmatpush.bf16.msrb.mxu2 %v7376_v18  ;;  %v8658_v18 = vld [vmem:[#allocation11 + $0x30c] sm:$0xf]  ;;  %v7620_v20 = vor.u32 %v8711_v7, %v7619_v2  ;;  %v7605_v2 = vld [vmem:[#allocation13 + $0x90] sm:$0xf0] }
 0x28c   :  { %v7424_v17 = vor.u32 %v8658_v18, %v7421_v3 }
 0x28d   :  { %4941 = vmatpush.bf16.msra.mxu0 %v7620_v20  ;;  %v7608_v20 = vor.u32 %v8705_v0, %v7605_v2 }
 0x28e   :  { %4091 = vmatpush.bf16.msra.mxu3 %v7484_v29  ;;  %4121 = vmatpush.bf16.msrb.mxu1 %v7168_v26  ;;  %v7604_v29 = vor.u32 %v8707_v6, %v7603_v4  ;;  %v8703_v26 = vld [vmem:[#allocation13 + $0x6c] sm:$0xf0]  ;;  %v7859_v6 = vld [vmem:[#allocation13 + $0x280] sm:$0xf] }
 0x28f   :  { %4130 = vmatpush.bf16.msrb.mxu2 %v7360_v22  ;;  %v7779_v22 = vld [vmem:[#allocation13 + $0x1e0] sm:$0xf]  ;;  %v7588_v12 = vor.u32 %v8703_v26, %v7587_v19  ;;  %v8723_v4 = vld [vmem:[#allocation13 + $0x10c] sm:$0xf0] }
 0x290   :  { %v7780_v10 = vor.u32 %v8751_v9, %v7779_v22  ;;  %v8771_v19 = vld [vmem:[#allocation13 + $0x28c] sm:$0xf0]  ;;  %v8701_v22 = vld [vmem:[#allocation13 + $0x64] sm:$0xf]  ;;  %v7589_v9 = vld [vmem:[#allocation13 + $0x70] sm:$0xf0] }
 0x291   :  { %4044 = vmatmul.bf16.vlgmr.msrb.gmra.mxu3 %v9390_v47  ;;  %4122 = vmatmul.bf16.vlgmr.msrb.gmra.mxu1 %v9375_v32  ;;  %v7296_v32 = vor.u32 %v8626_v40, %v7293_v34  ;;  %v8739_v40 = vld [vmem:[#allocation13 + $0x18c] sm:$0xf0]  ;;  %v8717_v34 = vld [vmem:[#allocation13 + $0xe4] sm:$0xf]  ;;  %v7860_v26 = vor.u32 %v8771_v19, %v7859_v6 }
 0x292   :  { %4092 = vmatpush.bf16.msra.mxu3 %v7468_v14  ;;  %4942 = vmatpush.bf16.msra.mxu0 %v7604_v29  ;;  %v7571_v14 = vld [vmem:[#allocation13 + $0x40] sm:$0xf]  ;;  %v7732_v24 = vor.u32 %v8739_v40, %v7731_v36  ;;  %v7557_v40 = vld [vmem:[#allocation13 + $0x30] sm:$0xf0] }
 0x293   :  { %4131 = vmatpush.bf16.msrb.mxu2 %v7344_v16  ;;  %4952 = vmatpush.bf16.msra.mxu1 %v7780_v10  ;;  %v8699_v16 = vld [vmem:[#allocation13 + $0x4c] sm:$0xf0]  ;;  %v8749_v10 = vld [vmem:[#allocation13 + $0x1e4] sm:$0xf] }
 0x294   :  { %v7572_v55 = vor.u32 %v8699_v16, %v7571_v14  ;;  %v7781_v14 = vld [vmem:[#allocation13 + $0x1f0] sm:$0xf0] }
 0x295   :  { %v7784_v16 = vor.u32 %v8749_v10, %v7781_v14  ;;  %v7685_v14 = vld [vmem:[#allocation13 + $0x130] sm:$0xf0] }
 0x296   :  { %4093 = vmatpush.bf16.msra.mxu3 %v7452_v25  ;;  %4943 = vmatpush.bf16.msra.mxu0 %v7588_v12  ;;  %v7555_v25 = vld [vmem:[#allocation13 + $0x20] sm:$0xf]  ;;  %v7592_v12 = vor.u32 %v8701_v22, %v7589_v9  ;;  %v8807_v9 = vld [vmem:[#allocation13 + $0x3ac] sm:$0xf0] }
 0x297   :  { %4132 = vmatpush.bf16.msrb.mxu2 %v7328_v27  ;;  %4953 = vmatpush.bf16.msra.mxu1 %v7764_v23  ;;  %v8695_v27 = vld [vmem:[#allocation13 + $0x2c] sm:$0xf0]  ;;  %v8003_v22 = vld [vmem:[#allocation13 + $0x3a0] sm:$0xf] }
 0x298   :  { %v7556_v28 = vor.u32 %v8695_v27, %v7555_v25  ;;  %v7573_v25 = vld [vmem:[#allocation13 + $0x50] sm:$0xf0]  ;;  %v8745_v27 = vld [vmem:[#allocation13 + $0x1c4] sm:$0xf]  ;;  %v8004_v10 = vor.u32 %v8807_v9, %v8003_v22  ;;  %v7643_v22 = vld [vmem:[#allocation13 + $0xc8] sm:$0xf] }
 0x299   :  { %v8716_v9 = vld [vmem:[#allocation13 + $0xd4] sm:$0xf0] }
 0x29a   :  { %4094 = vmatpush.bf16.msra.mxu3 %v7436_v33  ;;  %4944 = vmatpush.bf16.msra.mxu0 %v7572_v55  ;;  %v7748_v33 = vor.u32 %v8743_v15, %v7747_v8  ;;  %v8767_v55 = vld [vmem:[#allocation13 + $0x26c] sm:$0xf0]  ;;  %v7765_v8 = vld [vmem:[#allocation13 + $0x1d0] sm:$0xf0]  ;;  %v7576_v15 = vor.u32 %v8697_v21, %v7573_v25 }
 0x29b   :  { %4133 = vmatpush.bf16.msrb.mxu2 %v7312_v35  ;;  %v8691_v35 = vld [vmem:[#allocation13 + $0xc] sm:$0xf0]  ;;  %v7844_v23 = vor.u32 %v8767_v55, %v7843_v41  ;;  %v7877_v55 = vld [vmem:[#allocation13 + $0x2b0] sm:$0xf0] }
 0x29c   :  { %4954 = vmatpush.bf16.msra.mxu1 %v7748_v33 }
 0x29e   :  { %4095 = vmatpush.bf16.msra.mxu3 %v7420_v43  ;;  %4945 = vmatpush.bf16.msra.mxu0 %v7556_v28  ;;  %v7656_v43 = vor.u32 %v8717_v34, %v7653_v56  ;;  %v8741_v34 = vld [vmem:[#allocation13 + $0x1a4] sm:$0xf] }
 0x29f   :  { %4134 = vmatpush.bf16.msrb.mxu2 %v7296_v32  ;;  %v7715_v32 = vld [vmem:[#allocation13 + $0x160] sm:$0xf] }
 0x2a0   :  { %4955 = vmatpush.bf16.msra.mxu1 %v7732_v24  ;;  %v7749_v24 = vld [vmem:[#allocation13 + $0x1b0] sm:$0xf0] }
 0x2a1   :  { %4096 = vmatmul.bf16.vlgmr.msra.gmra.mxu3 %v9390_v47 }
 0x2a2   :  { %4140 = vmatpush.bf16.msrb.mxu3 %v7536_v30  ;;  %4135 = vmatmul.bf16.vlgmr.msrb.gmra.mxu2 %v9381_v51  ;;  %v7437_v51 = vld [vmem:[#allocation11 + $0x338] sm:$0xf0]  ;;  %v8735_v30 = vld [vmem:[#allocation13 + $0x16c] sm:$0xf0] }
 0x2a3   :  { %v7440_v62 = vor.u32 %v8662_v37, %v7437_v51  ;;  %v7716_v45 = vor.u32 %v8735_v30, %v7715_v32  ;;  %v7683_v37 = vld [vmem:[#allocation13 + $0x120] sm:$0xf]  ;;  %v8727_v51 = vld [vmem:[#allocation13 + $0x12c] sm:$0xf0] }
 0x2a4   :  { %v7684_v61 = vor.u32 %v8727_v51, %v7683_v37  ;;  %v7811_v30 = vld [vmem:[#allocation13 + $0x220] sm:$0xf]  ;;  %v7717_v37 = vld [vmem:[#allocation13 + $0x170] sm:$0xf0] }
 0x2a5   :  { %4956 = vmatpush.bf16.msra.mxu1 %v7716_v45 }
 0x2a6   :  { %4141 = vmatpush.bf16.msrb.mxu3 %v7520_v46  ;;  %v8783_v46 = vld [vmem:[#allocation13 + $0x2ec] sm:$0xf0] }
 0x2a7   :  { %v7908_v49 = vor.u32 %v8783_v46, %v7907_v54  ;;  %v8759_v54 = vld [vmem:[#allocation13 + $0x22c] sm:$0xf0]  ;;  %v8689_v46 = vld [vmem:[#allocation13 + $0x4] sm:$0xf] }
 0x2a8   :  { %v7812_v45 = vor.u32 %v8759_v54, %v7811_v30  ;;  %v8765_v54 = vld [vmem:[#allocation13 + $0x264] sm:$0xf] }
 0x2a9   :  { %4965 = vmatpush.bf16.msra.mxu2 %v7908_v49  ;;  %4957 = vmatpush.bf16.msra.mxu1 %v7700_v53  ;;  %v7795_v53 = vld [vmem:[#allocation13 + $0x200] sm:$0xf] }
 0x2aa   :  { %4142 = vmatpush.bf16.msrb.mxu3 %v7504_v48 }
 0x2ad   :  { %4966 = vmatpush.bf16.msra.mxu2 %v7892_v58  ;;  %4958 = vmatpush.bf16.msra.mxu1 %v7684_v61  ;;  %v8815_v58 = vld [vmem:[#allocation13 + $0x3ec] sm:$0xf0]  ;;  %v8781_v61 = vld [vmem:[#allocation13 + $0x2e4] sm:$0xf] }
 0x2ae   :  { %4143 = vmatpush.bf16.msrb.mxu3 %v7488_v5  ;;  %v7640_v5 = vor.u32 %v8713_v50, %v7637_v63  ;;  %v7541_v50 = vld [vmem:[#allocation13 + $0x10] sm:$0xf0]  ;;  %v8737_v63 = vld [vmem:[#allocation13 + $0x184] sm:$0xf] }
 0x2af   :  { %v7736_v42 = vor.u32 %v8737_v63, %v7733_v44  ;;  %v8795_v44 = vld [vmem:[#allocation13 + $0x34c] sm:$0xf0] }
 0x2b2   :  { %4144 = vmatpush.bf16.msrb.mxu3 %v7472_v52  ;;  %v8709_v52 = vld [vmem:[#allocation13 + $0xa4] sm:$0xf] }
 0x2b6   :  { %4145 = vmatpush.bf16.msrb.mxu3 %v7456_v59  ;;  %v7624_v59 = vor.u32 %v8709_v52, %v7621_v57  ;;  %v8035_v52 = vld [vmem:[#allocation13 + $0x3e0] sm:$0xf]  ;;  %v7796_v57 = vor.u32 %v8755_v31, %v7795_v53  ;;  %v7829_v53 = vld [vmem:[#allocation13 + $0x250] sm:$0xf0] }
 0x2b7   :  { %v8036_v51 = vor.u32 %v8815_v58, %v8035_v52  ;;  %v7939_v58 = vld [vmem:[#allocation13 + $0x320] sm:$0xf] }
 0x2ba   :  { %4146 = vmatpush.bf16.msrb.mxu3 %v7440_v62  ;;  %v8775_v62 = vld [vmem:[#allocation13 + $0x2ac] sm:$0xf0] }
 0x2bb   :  { %v7876_v3 = vor.u32 %v8775_v62, %v7875_v60  ;;  %v7909_v62 = vld [vmem:[#allocation13 + $0x2f0] sm:$0xf0] }
 0x2bc   :  { %v7912_v0 = vor.u32 %v8781_v61, %v7909_v62  ;;  %v7659_v62 = vld [vmem:[#allocation13 + $0xe8] sm:$0xf] }
 0x2bd   :  { %4967 = vmatpush.bf16.msra.mxu2 %v7876_v3 }
 0x2be   :  { %4147 = vmatpush.bf16.msrb.mxu3 %v7424_v17  ;;  %v9400_v11 = vpop.f32.mrf.mxu0  ;;  %v7667_v17 = vld [vmem:[#allocation13 + $0x100] sm:$0xf] }
 0x2bf   :  { %v7668_v29 = vor.u32 %v8723_v4, %v7667_v17  ;;  %v7701_v17 = vld [vmem:[#allocation13 + $0x150] sm:$0xf0]  ;;  %v8777_v4 = vld [vmem:[#allocation13 + $0x2c4] sm:$0xf] }
 0x2c1   :  { %4148 = vmatmul.bf16.vlgmr.msrb.gmra.mxu3 %v9390_v47  ;;  %v7539_v47 = vld [vmem:[#allocation13] sm:$0xf]  ;;  %4959 = vmatpush.bf16.msra.mxu1 %v7668_v29  ;;  %v7893_v29 = vld [vmem:[#allocation13 + $0x2d0] sm:$0xf0] }
 0x2c2   :  { %v7540_v39 = vor.u32 %v8691_v35, %v7539_v47  ;;  %4968 = vmatpush.bf16.msra.mxu2 %v7860_v26  ;;  %v7827_v47 = vld [vmem:[#allocation13 + $0x240] sm:$0xf]  ;;  %v8763_v35 = vld [vmem:[#allocation13 + $0x24c] sm:$0xf0]  ;;  %4978 = vmatpush.bf16.msra.mxu3 %v8036_v51  ;;  %v7896_v26 = vor.u32 %v8777_v4, %v7893_v29  ;;  %v8753_v4 = vld [vmem:[#allocation13 + $0x204] sm:$0xf] }
 0x2c3   :  { %v7828_v36 = vor.u32 %v8763_v35, %v7827_v47  ;;  %v7669_v47 = vld [vmem:[#allocation13 + $0x110] sm:$0xf0]  ;;  %v8769_v35 = vld [vmem:[#allocation13 + $0x284] sm:$0xf] }
 0x2c4   :  { %4946 = vmatpush.bf16.msra.mxu0 %v7540_v39  ;;  %v8693_v39 = vld [vmem:[#allocation13 + $0x24] sm:$0xf] }
 0x2c5   :  { %5004 = vmatpush.bf16.msrb.mxu1 %v7784_v16  ;;  %v7560_v56 = vor.u32 %v8693_v39, %v7557_v40  ;;  %v8773_v16 = vld [vmem:[#allocation13 + $0x2a4] sm:$0xf]  ;;  %v7861_v40 = vld [vmem:[#allocation13 + $0x290] sm:$0xf0] }
 0x2c6   :  { %v3956_v13 = vpop.f32.mrf.mxu0  ;;  %4969 = vmatpush.bf16.msra.mxu2 %v7844_v23  ;;  %v7880_v21 = vor.u32 %v8773_v16, %v7877_v55  ;;  %v9417_v23 = vld [vmem:[%s9499_s6] sm:$0xf]  ;;  %v8813_v29 = vld [vmem:[#allocation13 + $0x3e4] sm:$0xf]  ;;  %v7644_v55 = vor.u32 %v8716_v9, %v7643_v22 }
 0x2c7   :  { %v7768_v13 = vor.u32 %v8745_v27, %v7765_v8  ;;  %v7987_v27 = vld [vmem:[#allocation13 + $0x380] sm:$0xf]  ;;  %v8803_v8 = vld [vmem:[#allocation13 + $0x38c] sm:$0xf0]  ;;  %v3298_v16 = vperm.slane %v9417_v23, 1 }
 0x2c8   :  { %4991 = vmatpush.bf16.msrb.mxu0 %v7656_v43  ;;  %v7752_v43 = vor.u32 %v8741_v34, %v7749_v24  ;;  %v7864_v34 = vor.u32 %v8769_v35, %v7861_v40  ;;  %v7971_v24 = vld [vmem:[#allocation13 + $0x360] sm:$0xf]  ;;  %v7611_v40 = vld [vmem:[#allocation13 + $0x88] sm:$0xf] }
 0x2c9   :  { %5005 = vmatpush.bf16.msrb.mxu1 %v7768_v13  ;;  %v8721_v13 = vld [vmem:[#allocation13 + $0x104] sm:$0xf] }
 0x2ca   :  { %4970 = vmatpush.bf16.msra.mxu2 %v7828_v36  ;;  %v7672_v39 = vor.u32 %v8721_v13, %v7669_v47 }
 0x2cc   :  { %4992 = vmatpush.bf16.msrb.mxu0 %v7640_v5  ;;  %v7544_v5 = vor.u32 %v8689_v46, %v7541_v50 }
 0x2cd   :  { %5006 = vmatpush.bf16.msrb.mxu1 %v7752_v43  ;;  %v8799_v43 = vld [vmem:[#allocation13 + $0x36c] sm:$0xf0] }
 0x2ce   :  { %v9402_v48 = vpop.f32.mrf.mxu1  ;;  %v9404_v1 = vpop.f32.mrf.mxu0  ;;  %4971 = vmatpush.bf16.msra.mxu2 %v7812_v45  ;;  %v7972_v30 = vor.u32 %v8799_v43, %v7971_v24  ;;  %v7845_v45 = vld [vmem:[#allocation13 + $0x270] sm:$0xf0]  ;;  %v8805_v24 = vld [vmem:[#allocation13 + $0x3a4] sm:$0xf] }
 0x2cf   :  { %v7848_v46 = vor.u32 %v8765_v54, %v7845_v45  ;;  %v4007_v47 = vadd.f32 %v9404_v1, %v3298_v16  ;;  %v8005_v43 = vld [vmem:[#allocation13 + $0x3b0] sm:$0xf0]  ;;  %v8704_v1 = vld [vmem:[#allocation13 + $0x74] sm:$0xf0] }
 0x2d0   :  { %4993 = vmatpush.bf16.msrb.mxu0 %v7624_v59  ;;  %v8733_v59 = vld [vmem:[#allocation13 + $0x164] sm:$0xf] }
 0x2d1   :  { %5007 = vmatpush.bf16.msrb.mxu1 %v7736_v42  ;;  %v7720_v60 = vor.u32 %v8733_v59, %v7717_v37  ;;  %v8761_v42 = vld [vmem:[#allocation13 + $0x244] sm:$0xf]  ;;  %v8791_v59 = vld [vmem:[#allocation13 + $0x32c] sm:$0xf0] }
 0x2d2   :  { %4972 = vmatpush.bf16.msra.mxu2 %v7796_v57  ;;  %v7832_v52 = vor.u32 %v8761_v42, %v7829_v53  ;;  %v7940_v51 = vor.u32 %v8791_v59, %v7939_v58  ;;  %v7989_v42 = vld [vmem:[#allocation13 + $0x390] sm:$0xf0]  ;;  %v7579_v58 = vld [vmem:[#allocation13 + $0x48] sm:$0xf]  ;;  %v8700_v59 = vld [vmem:[#allocation13 + $0x54] sm:$0xf0] }
 0x2d4   :  { %4994 = vmatpush.bf16.msrb.mxu0 %v7608_v20  ;;  %v8729_v20 = vld [vmem:[#allocation13 + $0x144] sm:$0xf] }
 0x2d5   :  { %5008 = vmatpush.bf16.msrb.mxu1 %v7720_v60  ;;  %v7704_v19 = vor.u32 %v8729_v20, %v7701_v17  ;;  %v7813_v60 = vld [vmem:[#allocation13 + $0x230] sm:$0xf0] }
 0x2d6   :  { %v3969_v7 = vpop.f32.mrf.mxu1  ;;  %v4008_v18 = vpop.f32.mrf.mxu0  ;;  %5017 = vmatpush.bf16.msrb.mxu2 %v7912_v0  ;;  %v8720_v0 = vld [vmem:[#allocation13 + $0xf4] sm:$0xf0] }
 0x2d7   :  { %v8019_v7 = vld [vmem:[#allocation13 + $0x3c0] sm:$0xf]  ;;  %v8811_v18 = vld [vmem:[#allocation13 + $0x3cc] sm:$0xf0] }
 0x2d8   :  { %4995 = vmatpush.bf16.msrb.mxu0 %v7592_v12  ;;  %v8020_v3 = vor.u32 %v8811_v18, %v8019_v7  ;;  %v8725_v12 = vld [vmem:[#allocation13 + $0x124] sm:$0xf] }
 0x2d9   :  { %5009 = vmatpush.bf16.msrb.mxu1 %v7704_v19  ;;  %v7688_v41 = vor.u32 %v8725_v12, %v7685_v14  ;;  %v7797_v19 = vld [vmem:[#allocation13 + $0x210] sm:$0xf0] }
 0x2da   :  { %4979 = vmatpush.bf16.msra.mxu3 %v8020_v3  ;;  %5018 = vmatpush.bf16.msrb.mxu2 %v7896_v26  ;;  %v7923_v3 = vld [vmem:[#allocation13 + $0x300] sm:$0xf]  ;;  %v8037_v12 = vld [vmem:[#allocation13 + $0x3f0] sm:$0xf0] }
 0x2db   :  { %v8040_v14 = vor.u32 %v8813_v29, %v8037_v12  ;;  %v8692_v12 = vld [vmem:[#allocation13 + $0x14] sm:$0xf0] }
 0x2dc   :  { %4996 = vmatpush.bf16.msrb.mxu0 %v7576_v15  ;;  %v7988_v15 = vor.u32 %v8803_v8, %v7987_v27  ;;  %v8712_v27 = vld [vmem:[#allocation13 + $0xb4] sm:$0xf0]  ;;  %v8809_v8 = vld [vmem:[#allocation13 + $0x3c4] sm:$0xf] }
 0x2dd   :  { %5010 = vmatpush.bf16.msrb.mxu1 %v7688_v41 }
 0x2de   :  { %v9406_v28 = vpop.f32.mrf.mxu1  ;;  %4980 = vmatpush.bf16.msra.mxu3 %v8004_v10  ;;  %5019 = vmatpush.bf16.msrb.mxu2 %v7880_v21  ;;  %v7800_v10 = vor.u32 %v8753_v4, %v7797_v19  ;;  %v7627_v21 = vld [vmem:[#allocation13 + $0xa8] sm:$0xf]  ;;  %v7957_v4 = vld [vmem:[#allocation13 + $0x350] sm:$0xf0] }
 0x2e0   :  { %v9408_v33 = vpop.f32.mrf.mxu0  ;;  %4997 = vmatpush.bf16.msrb.mxu0 %v7560_v56  ;;  %v3297_v56 = vperm.slane %v9417_v23, 0 }
 0x2e1   :  { %5011 = vmatpush.bf16.msrb.mxu1 %v7672_v39  ;;  %v7628_v39 = vor.u32 %v8712_v27, %v7627_v21  ;;  %v7941_v21 = vld [vmem:[#allocation13 + $0x330] sm:$0xf0]  ;;  %v8718_v27 = vld [vmem:[#allocation13 + $0xec] sm:$0xf] }
 0x2e2   :  { %4981 = vmatpush.bf16.msra.mxu3 %v7988_v15  ;;  %5020 = vmatpush.bf16.msrb.mxu2 %v7864_v34  ;;  %v3955_v63 = vadd.f32 %v9400_v11, %v3297_v56  ;;  %v8757_v11 = vld [vmem:[#allocation13 + $0x224] sm:$0xf]  ;;  %v8021_v15 = vld [vmem:[#allocation13 + $0x3d0] sm:$0xf0]  ;;  %v4020_v34 = vadd.f32 %v9406_v28, %v4007_v47  ;;  %v8708_v56 = vld [vmem:[#allocation13 + $0x94] sm:$0xf0] }
 0x2e3   :  { %v8024_v13 = vor.u32 %v8809_v8, %v8021_v15  ;;  %v7661_v8 = vld [vmem:[#allocation13 + $0xf8] sm:$0xf0] }
 0x2e4   :  { %v9410_v32 = vpop.f32.mrf.mxu2  ;;  %4998 = vmatpush.bf16.msrb.mxu0 %v7544_v5  ;;  %v7955_v5 = vld [vmem:[#allocation13 + $0x340] sm:$0xf]  ;;  %v3968_v31 = vadd.f32 %v9402_v48, %v3955_v63  ;;  %v8787_v48 = vld [vmem:[#allocation13 + $0x30c] sm:$0xf0]  ;;  %v7595_v63 = vld [vmem:[#allocation13 + $0x68] sm:$0xf] }
 0x2e5   :  { %v7924_v17 = vor.u32 %v8787_v48, %v7923_v3  ;;  %v8696_v3 = vld [vmem:[#allocation13 + $0x34] sm:$0xf0]  ;;  %v7755_v48 = vld [vmem:[#allocation13 + $0x1a8] sm:$0xf] }
 0x2e6   :  { %v4021_v49 = vpop.f32.mrf.mxu1  ;;  %4982 = vmatpush.bf16.msra.mxu3 %v7972_v30  ;;  %5021 = vmatpush.bf16.msrb.mxu2 %v7848_v46  ;;  %v3981_v57 = vadd.f32 %v9410_v32, %v3968_v31  ;;  %v7660_v32 = vor.u32 %v8720_v0, %v7659_v62  ;;  %v8008_v30 = vor.u32 %v8805_v24, %v8005_v43  ;;  %v3299_v62 = vperm.slane %v9417_v23, 2  ;;  %v7915_v24 = vld [vmem:[#allocation13 + $0x2e8] sm:$0xf]  ;;  %v8785_v43 = vld [vmem:[#allocation13 + $0x304] sm:$0xf] }
 0x2e7   :  { %v7612_v46 = vor.u32 %v8708_v56, %v7611_v40  ;;  %v8736_v40 = vld [vmem:[#allocation13 + $0x174] sm:$0xf0] }
 0x2e8   :  { %v4060_v38 = vpop.f32.mrf.mxu0  ;;  %v4059_v29 = vadd.f32 %v9408_v33, %v3299_v62  ;;  %v8776_v62 = vld [vmem:[#allocation13 + $0x2b4] sm:$0xf0] }
 0x2e9   :  { %v7956_v38 = vor.u32 %v8795_v44, %v7955_v5  ;;  %v8752_v44 = vld [vmem:[#allocation13 + $0x1f4] sm:$0xf0] }
 0x2ea   :  { %5022 = vmatpush.bf16.msrb.mxu2 %v7832_v52  ;;  %v7596_v52 = vor.u32 %v8704_v1, %v7595_v63 }
 0x2eb   :  { %4983 = vmatpush.bf16.msra.mxu3 %v7956_v38  ;;  %v8801_v38 = vld [vmem:[#allocation13 + $0x384] sm:$0xf] }
 0x2ec   :  { %v3982_v2 = vpop.f32.mrf.mxu2  ;;  %v7992_v53 = vor.u32 %v8801_v38, %v7989_v42  ;;  %v7707_v38 = vld [vmem:[#allocation13 + $0x148] sm:$0xf]  ;;  %v8732_v42 = vld [vmem:[#allocation13 + $0x154] sm:$0xf0] }
 0x2ed   :  { %v7816_v2 = vor.u32 %v8757_v11, %v7813_v60  ;;  %v8797_v11 = vld [vmem:[#allocation13 + $0x364] sm:$0xf]  ;;  %v7973_v60 = vld [vmem:[#allocation13 + $0x370] sm:$0xf0] }
 0x2ee   :  { %v9412_v6 = vpop.f32.mrf.mxu1 }
 0x2ef   :  { %4984 = vmatpush.bf16.msra.mxu3 %v7940_v51  ;;  %5023 = vmatpush.bf16.msrb.mxu2 %v7816_v2  ;;  %v8748_v51 = vld [vmem:[#allocation13 + $0x1d4] sm:$0xf0]  ;;  %v7580_v2 = vor.u32 %v8700_v59, %v7579_v58  ;;  %v4072_v16 = vadd.f32 %v9412_v6, %v4059_v29  ;;  %v7664_v6 = vor.u32 %v8718_v27, %v7661_v8  ;;  %v7597_v29 = vld [vmem:[#allocation13 + $0x78] sm:$0xf0]  ;;  %v8746_v8 = vld [vmem:[#allocation13 + $0x1cc] sm:$0xf] }
 0x2f0   :  { %v7708_v58 = vor.u32 %v8732_v42, %v7707_v38  ;;  %v7581_v27 = vld [vmem:[#allocation13 + $0x58] sm:$0xf0] }
 0x2f1   :  { %v7741_v38 = vld [vmem:[#allocation13 + $0x198] sm:$0xf0] }
 0x2f3   :  { %4985 = vmatpush.bf16.msra.mxu3 %v7924_v17  ;;  %5024 = vmatpush.bf16.msrb.mxu2 %v7800_v10  ;;  %v8793_v17 = vld [vmem:[#allocation13 + $0x344] sm:$0xf]  ;;  %v7547_v10 = vld [vmem:[#allocation13 + $0x8] sm:$0xf] }
 0x2f4   :  { %v9419_v25 = vpop.f32.mrf.mxu2  ;;  %v7960_v19 = vor.u32 %v8793_v17, %v7957_v4  ;;  %v7548_v47 = vor.u32 %v8692_v12, %v7547_v10  ;;  %v7867_v17 = vld [vmem:[#allocation13 + $0x288] sm:$0xf]  ;;  %v8772_v4 = vld [vmem:[#allocation13 + $0x294] sm:$0xf0] }
 0x2f5   :  { %v4033_v54 = vadd.f32 %v9419_v25, %v4020_v34  ;;  %v7771_v25 = vld [vmem:[#allocation13 + $0x1c8] sm:$0xf]  ;;  %v7868_v12 = vor.u32 %v8772_v4, %v7867_v17  ;;  %v8778_v17 = vld [vmem:[#allocation13 + $0x2cc] sm:$0xf]  ;;  %v7901_v4 = vld [vmem:[#allocation13 + $0x2d8] sm:$0xf0] }
 0x2f6   :  { %v4073_v36 = vpop.f32.mrf.mxu1 }
 0x2f7   :  { %5030 = vmatpush.bf16.msrb.mxu3 %v8040_v14  ;;  %v7739_v14 = vld [vmem:[#allocation13 + $0x188] sm:$0xf] }
 0x2fb   :  { %5031 = vmatpush.bf16.msrb.mxu3 %v8024_v13 }
 0x2fc   :  { %v4034_v49 = vpop.f32.mrf.mxu2 }
 0x2fd   :  { %v7787_v49 = vld [vmem:[#allocation13 + $0x1e8] sm:$0xf] }
 0x2fe   :  { %v9422_v50 = vpop.f32.mrf.mxu0 }
 0x2ff   :  { %5032 = vmatpush.bf16.msrb.mxu3 %v8008_v30  ;;  %v7925_v30 = vld [vmem:[#allocation13 + $0x310] sm:$0xf0] }
 0x300   :  { %v7928_v63 = vor.u32 %v8785_v43, %v7925_v30  ;;  %v7757_v43 = vld [vmem:[#allocation13 + $0x1b8] sm:$0xf0] }
 0x303   :  { %5033 = vmatpush.bf16.msrb.mxu3 %v7992_v53  ;;  %v7899_v53 = vld [vmem:[#allocation13 + $0x2c8] sm:$0xf] }
 0x304   :  { %v3993_v37 = vpop.f32.mrf.mxu3 }
 0x305   :  { %v3994_v61 = vadd.f32 %v3993_v37, %v3981_v57  ;;  %v7788_v57 = vor.u32 %v8752_v44, %v7787_v49 }
 0x306   :  { %v4112_v7 = vpop.f32.mrf.mxu0 }
 0x307   :  { %v4153_v18 = vmax.f32 %v3994_v61, 0.0  ;;  %v9427_v20 = vpop.f32.mrf.mxu2  ;;  %v7976_v61 = vor.u32 %v8797_v11, %v7973_v60  ;;  %v7772_v7 = vor.u32 %v8748_v51, %v7771_v25  ;;  %v7691_v11 = vld [vmem:[#allocation13 + $0x128] sm:$0xf]  ;;  %v8728_v60 = vld [vmem:[#allocation13 + $0x134] sm:$0xf0] }
 0x308   :  { %v4085_v13 = vadd.f32 %v9427_v20, %v4072_v16  ;;  %v7851_v16 = vld [vmem:[#allocation13 + $0x268] sm:$0xf] }
 0x309   :  { %v9429_v26 = vpack.c.bf16 %v4153_v18, %v4153_v18  ;;  %v7563_v18 = vld [vmem:[#allocation13 + $0x28] sm:$0xf]  ;;  %5034 = vmatpush.bf16.msrb.mxu3 %v7976_v61 }
 0x30a   :  { %v7564_v22 = vor.u32 %v8696_v3, %v7563_v18  ;;  %v7883_v61 = vld [vmem:[#allocation13 + $0x2a8] sm:$0xf] }
 0x30b   :  { %4947 = vmatmul.bf16.vlgmr.msra.gmra.mxu0 %v9429_v26  ;;  %v7884_v18 = vor.u32 %v8776_v62, %v7883_v61 }
 0x30c   :  { %5043 = vmatpush.bf16.msra.mxu0 %v7660_v32  ;;  %v3995_v41 = vpop.f32.mrf.mxu3  ;;  %v8744_v32 = vld [vmem:[#allocation13 + $0x1b4] sm:$0xf0] }
 0x30d   :  { %v7756_v9 = vor.u32 %v8744_v32, %v7755_v48  ;;  %v8740_v41 = vld [vmem:[#allocation13 + $0x194] sm:$0xf0]  ;;  %5035 = vmatpush.bf16.msrb.mxu3 %v7960_v19  ;;  %v7675_v48 = vld [vmem:[#allocation13 + $0x108] sm:$0xf]  ;;  %v8702_v19 = vld [vmem:[#allocation13 + $0x6c] sm:$0xf] }
 0x30e   :  { %v9434_v35 = vpop.f32.mrf.mxu1  ;;  %v8724_v32 = vld [vmem:[#allocation13 + $0x114] sm:$0xf0] }
 0x30f   :  { %v4086_v36 = vpop.f32.mrf.mxu2  ;;  %v7676_v10 = vor.u32 %v8724_v32, %v7675_v48  ;;  %v8730_v48 = vld [vmem:[#allocation13 + $0x14c] sm:$0xf]  ;;  %v7709_v32 = vld [vmem:[#allocation13 + $0x158] sm:$0xf0] }
 0x310   :  { %5044 = vmatpush.bf16.msra.mxu0 %v7644_v55  ;;  %v8789_v55 = vld [vmem:[#allocation13 + $0x324] sm:$0xf]  ;;  %v7740_v36 = vor.u32 %v8740_v41, %v7739_v14  ;;  %v7600_v14 = vor.u32 %v8702_v19, %v7597_v29 }
 0x311   :  { %v7944_v15 = vor.u32 %v8789_v55, %v7941_v21  ;;  %v8768_v55 = vld [vmem:[#allocation13 + $0x274] sm:$0xf0]  ;;  %v8698_v21 = vld [vmem:[#allocation13 + $0x4c] sm:$0xf] }
 0x313   :  { %5036 = vmatpush.bf16.msrb.mxu3 %v7944_v15  ;;  %v7773_v15 = vld [vmem:[#allocation13 + $0x1d8] sm:$0xf0] }
 0x314   :  { %5045 = vmatpush.bf16.msra.mxu0 %v7628_v39  ;;  %v4045_v45 = vpop.f32.mrf.mxu3  ;;  %v7723_v39 = vld [vmem:[#allocation13 + $0x168] sm:$0xf] }
 0x315   :  { %v4046_v5 = vadd.f32 %v4045_v45, %v4033_v54  ;;  %v8784_v54 = vld [vmem:[#allocation13 + $0x2f4] sm:$0xf0]  ;;  %v8714_v45 = vld [vmem:[#allocation13 + $0xcc] sm:$0xf]  ;;  %v7724_v1 = vor.u32 %v8736_v40, %v7723_v39  ;;  %v7776_v39 = vor.u32 %v8746_v8, %v7773_v15  ;;  %v7995_v8 = vld [vmem:[#allocation13 + $0x388] sm:$0xf] }
 0x316   :  { %v4125_v31 = vpop.f32.mrf.mxu1  ;;  %v8764_v40 = vld [vmem:[#allocation13 + $0x254] sm:$0xf0] }
 0x317   :  { %v4154_v28 = vmax.f32 %v4046_v5, 0.0  ;;  %v7916_v5 = vor.u32 %v8784_v54, %v7915_v24  ;;  %5037 = vmatpush.bf16.msrb.mxu3 %v7928_v63  ;;  %v8710_v31 = vld [vmem:[#allocation13 + $0xac] sm:$0xf]  ;;  %v8804_v15 = vld [vmem:[#allocation13 + $0x394] sm:$0xf0] }
 0x318   :  { %5046 = vmatpush.bf16.msra.mxu0 %v7612_v46  ;;  %v7645_v46 = vld [vmem:[#allocation13 + $0xd8] sm:$0xf0]  ;;  %v8742_v24 = vld [vmem:[#allocation13 + $0x1ac] sm:$0xf] }
 0x319   :  { %v9438_v37 = vpack.c.bf16 %v4154_v28, %v4154_v28  ;;  %v7648_v44 = vor.u32 %v8714_v45, %v7645_v46  ;;  %v8780_v28 = vld [vmem:[#allocation13 + $0x2d4] sm:$0xf0]  ;;  %v7819_v45 = vld [vmem:[#allocation13 + $0x228] sm:$0xf]  ;;  %v7760_v63 = vor.u32 %v8742_v24, %v7757_v43  ;;  %v8766_v43 = vld [vmem:[#allocation13 + $0x26c] sm:$0xf] }
 0x31a   :  { %v7900_v25 = vor.u32 %v8780_v28, %v7899_v53  ;;  %v8800_v24 = vld [vmem:[#allocation13 + $0x374] sm:$0xf0] }
 0x31b   :  { %4960 = vmatmul.bf16.vlgmr.msra.gmra.mxu1 %v9438_v37  ;;  %4999 = vmatmul.bf16.vlgmr.msrb.gmra.mxu0 %v9429_v26 }
 0x31c   :  { %5047 = vmatpush.bf16.msra.mxu0 %v7596_v52  ;;  %5056 = vmatpush.bf16.msra.mxu1 %v7788_v57  ;;  %v4047_v0 = vpop.f32.mrf.mxu3  ;;  %v7629_v52 = vld [vmem:[#allocation13 + $0xb8] sm:$0xf0] }
 0x31d   :  { %v7632_v51 = vor.u32 %v8710_v31, %v7629_v52  ;;  %v8706_v0 = vld [vmem:[#allocation13 + $0x8c] sm:$0xf]  ;;  %v7803_v31 = vld [vmem:[#allocation13 + $0x208] sm:$0xf]  ;;  %v8756_v52 = vld [vmem:[#allocation13 + $0x214] sm:$0xf0] }
 0x320   :  { %5048 = vmatpush.bf16.msra.mxu0 %v7580_v2  ;;  %5057 = vmatpush.bf16.msra.mxu1 %v7772_v7  ;;  %v7613_v2 = vld [vmem:[#allocation13 + $0x98] sm:$0xf0]  ;;  %v7692_v7 = vor.u32 %v8728_v60, %v7691_v11  ;;  %v8782_v11 = vld [vmem:[#allocation13 + $0x2ec] sm:$0xf] }
 0x321   :  { %v7616_v3 = vor.u32 %v8706_v0, %v7613_v2  ;;  %v7917_v60 = vld [vmem:[#allocation13 + $0x2f8] sm:$0xf0] }
 0x324   :  { %5049 = vmatpush.bf16.msra.mxu0 %v7564_v22  ;;  %5058 = vmatpush.bf16.msra.mxu1 %v7756_v9  ;;  %v4097_v33 = vpop.f32.mrf.mxu3  ;;  %v8750_v22 = vld [vmem:[#allocation13 + $0x1ec] sm:$0xf]  ;;  %v7789_v9 = vld [vmem:[#allocation13 + $0x1f8] sm:$0xf0] }
 0x325   :  { %v4098_v34 = vadd.f32 %v4097_v33, %v4085_v13  ;;  %v9446_v56 = vpop.f32.mrf.mxu2  ;;  %v7792_v41 = vor.u32 %v8750_v22, %v7789_v9  ;;  %v3300_v13 = vperm.slane %v9417_v23, 3  ;;  %v7852_v33 = vor.u32 %v8768_v55, %v7851_v16  ;;  %v7693_v16 = vld [vmem:[#allocation13 + $0x138] sm:$0xf0] }
 0x326   :  { %v7712_v22 = vor.u32 %v8730_v48, %v7709_v32  ;;  %v7904_v9 = vor.u32 %v8778_v17, %v7901_v4  ;;  %v7885_v55 = vld [vmem:[#allocation13 + $0x2b8] sm:$0xf0]  ;;  %v8798_v48 = vld [vmem:[#allocation13 + $0x36c] sm:$0xf] }
 0x327   :  { %v4155_v20 = vmax.f32 %v4098_v34, 0.0  ;;  %v8694_v34 = vld [vmem:[#allocation13 + $0x2c] sm:$0xf]  ;;  %v4111_v30 = vadd.f32 %v9422_v50, %v3300_v13  ;;  %v7981_v32 = vld [vmem:[#allocation13 + $0x378] sm:$0xf0] }
 0x328   :  { %5050 = vmatpush.bf16.msra.mxu0 %v7548_v47  ;;  %5059 = vmatpush.bf16.msra.mxu1 %v7740_v36  ;;  %v7584_v47 = vor.u32 %v8698_v21, %v7581_v27  ;;  %v7835_v36 = vld [vmem:[#allocation13 + $0x248] sm:$0xf]  ;;  %v8722_v13 = vld [vmem:[#allocation13 + $0x10c] sm:$0xf]  ;;  %v7984_v17 = vor.u32 %v8798_v48, %v7981_v32 }
 0x329   :  { %v9448_v49 = vpack.c.bf16 %v4155_v20, %v4155_v20  ;;  %v7836_v23 = vor.u32 %v8764_v40, %v7835_v36  ;;  %v4124_v46 = vadd.f32 %v9434_v35, %v4111_v30  ;;  %v8760_v20 = vld [vmem:[#allocation13 + $0x234] sm:$0xf0]  ;;  %v8043_v35 = vld [vmem:[#allocation13 + $0x3e8] sm:$0xf]  ;;  %v7869_v36 = vld [vmem:[#allocation13 + $0x298] sm:$0xf0] }
 0x32a   :  { %v7820_v50 = vor.u32 %v8760_v20, %v7819_v45  ;;  %v7853_v30 = vld [vmem:[#allocation13 + $0x278] sm:$0xf0]  ;;  %v7963_v45 = vld [vmem:[#allocation13 + $0x348] sm:$0xf]  ;;  %v8794_v4 = vld [vmem:[#allocation13 + $0x34c] sm:$0xf] }
 0x32b   :  { %4973 = vmatmul.bf16.vlgmr.msra.gmra.mxu2 %v9448_v49  ;;  %5012 = vmatmul.bf16.vlgmr.msrb.gmra.mxu1 %v9438_v37  ;;  %v4137_v42 = vadd.f32 %v9446_v56, %v4124_v46  ;;  %v7804_v56 = vor.u32 %v8756_v52, %v7803_v31  ;;  %v8796_v46 = vld [vmem:[#allocation13 + $0x354] sm:$0xf0]  ;;  %v7837_v20 = vld [vmem:[#allocation13 + $0x258] sm:$0xf0]  ;;  %v7931_v31 = vld [vmem:[#allocation13 + $0x308] sm:$0xf] }
 0x32c   :  { %5095 = vmatpush.bf16.msrb.mxu0 %v7664_v6  ;;  %5060 = vmatpush.bf16.msra.mxu1 %v7724_v1  ;;  %v4099_v57 = vpop.f32.mrf.mxu3  ;;  %v7565_v6 = vld [vmem:[#allocation13 + $0x38] sm:$0xf0]  ;;  %v8690_v1 = vld [vmem:[#allocation13 + $0xc] sm:$0xf]  ;;  %v8788_v52 = vld [vmem:[#allocation13 + $0x314] sm:$0xf0] }
 0x32d   :  { %5051 = vmatmul.bf16.vlgmr.msra.gmra.mxu0 %v9429_v26  ;;  %5069 = vmatpush.bf16.msra.mxu2 %v7916_v5  ;;  %v4138_v59 = vpop.f32.mrf.mxu2  ;;  %v7568_v54 = vor.u32 %v8694_v34, %v7565_v6  ;;  %v7549_v5 = vld [vmem:[#allocation13 + $0x18] sm:$0xf0]  ;;  %v7979_v6 = vld [vmem:[#allocation13 + $0x368] sm:$0xf] }
 0x32e   :  { %v7552_v28 = vor.u32 %v8690_v1, %v7549_v5  ;;  %v8816_v59 = vld [vmem:[#allocation13 + $0x3f4] sm:$0xf0]  ;;  %v7964_v1 = vor.u32 %v8796_v46, %v7963_v45  ;;  %v8828_v46 = vld [vmem:[#allocation16 + $0x58] sm:$0xff] }
 0x32f   :  { %v8044_v62 = vor.u32 %v8816_v59, %v8043_v35  ;;  %v8814_v35 = vld [vmem:[#allocation13 + $0x3ec] sm:$0xf]  ;;  %v8045_v59 = vld [vmem:[#allocation13 + $0x3f8] sm:$0xf0] }
 0x330   :  { %5096 = vmatpush.bf16.msrb.mxu0 %v7648_v44  ;;  %5061 = vmatpush.bf16.msra.mxu1 %v7708_v58  ;;  %v8738_v44 = vld [vmem:[#allocation13 + $0x18c] sm:$0xf] }
 0x331   :  { %5070 = vmatpush.bf16.msra.mxu2 %v7900_v25  ;;  %v7744_v58 = vor.u32 %v8738_v44, %v7741_v38  ;;  %v8734_v25 = vld [vmem:[#allocation13 + $0x16c] sm:$0xf]  ;;  %v7947_v44 = vld [vmem:[#allocation13 + $0x328] sm:$0xf]  ;;  %v8792_v38 = vld [vmem:[#allocation13 + $0x334] sm:$0xf0] }
 0x334   :  { %5097 = vmatpush.bf16.msrb.mxu0 %v7632_v51  ;;  %5062 = vmatpush.bf16.msra.mxu1 %v7692_v7  ;;  %v7725_v51 = vld [vmem:[#allocation13 + $0x178] sm:$0xf0]  ;;  %v7920_v7 = vor.u32 %v8782_v11, %v7917_v60  ;;  %v8810_v11 = vld [vmem:[#allocation13 + $0x3cc] sm:$0xf] }
 0x335   :  { %5071 = vmatpush.bf16.msra.mxu2 %v7884_v18  ;;  %v7728_v2 = vor.u32 %v8734_v25, %v7725_v51  ;;  %v8027_v18 = vld [vmem:[#allocation13 + $0x3c8] sm:$0xf]  ;;  %v7932_v25 = vor.u32 %v8788_v52, %v7931_v31  ;;  %v8048_v51 = vor.u32 %v8814_v35, %v8045_v59  ;;  %v8029_v60 = vld [vmem:[#allocation13 + $0x3d8] sm:$0xf0]  ;;  %v9477_v31 = vld [vmem:[#allocation14] sm:$0xf] }
 0x336   :  { %v8835_v35 = vld [vmem:[#allocation16 + $0x90] sm:$0xff]  ;;  %v4292_v32 = vperm.slane %v9477_v31, 1 }
 0x338   :  { %5098 = vmatpush.bf16.msrb.mxu0 %v7616_v3  ;;  %5063 = vmatpush.bf16.msra.mxu1 %v7676_v10  ;;  %v8812_v3 = vld [vmem:[#allocation13 + $0x3d4] sm:$0xf0]  ;;  %v8011_v10 = vld [vmem:[#allocation13 + $0x3a8] sm:$0xf] }
 0x339   :  { %5072 = vmatpush.bf16.msra.mxu2 %v7868_v12  ;;  %v8028_v29 = vor.u32 %v8812_v3, %v8027_v18  ;;  %v8808_v12 = vld [vmem:[#allocation13 + $0x3b4] sm:$0xf0]  ;;  %v7997_v18 = vld [vmem:[#allocation13 + $0x398] sm:$0xf0] }
 0x33a   :  { %v8012_v21 = vor.u32 %v8808_v12, %v8011_v10  ;;  %v8786_v12 = vld [vmem:[#allocation13 + $0x30c] sm:$0xf] }
 0x33b   :  { %5025 = vmatmul.bf16.vlgmr.msrb.gmra.mxu2 %v9448_v49  ;;  %5064 = vmatmul.bf16.vlgmr.msra.gmra.mxu1 %v9438_v37 }
 0x33c   :  { %5099 = vmatpush.bf16.msrb.mxu0 %v7600_v14  ;;  %5108 = vmatpush.bf16.msrb.mxu1 %v7792_v41  ;;  %v8726_v14 = vld [vmem:[#allocation13 + $0x12c] sm:$0xf] }
 0x33d   :  { %5073 = vmatpush.bf16.msra.mxu2 %v7852_v33  ;;  %v8774_v41 = vld [vmem:[#allocation13 + $0x2ac] sm:$0xf]  ;;  %v7677_v33 = vld [vmem:[#allocation13 + $0x118] sm:$0xf0] }
 0x33e   :  { %v7888_v27 = vor.u32 %v8774_v41, %v7885_v55  ;;  %v7680_v40 = vor.u32 %v8722_v13, %v7677_v33  ;;  %v8824_v55 = vld [vmem:[#allocation16 + $0x38] sm:$0xff] }
 0x340   :  { %5100 = vmatpush.bf16.msrb.mxu0 %v7584_v47  ;;  %5109 = vmatpush.bf16.msrb.mxu1 %v7776_v39  ;;  %v8770_v47 = vld [vmem:[#allocation13 + $0x28c] sm:$0xf]  ;;  %v7996_v39 = vor.u32 %v8804_v15, %v7995_v8  ;;  %v8821_v15 = vld [vmem:[#allocation16 + $0x20] sm:$0xff] }
 0x341   :  { %5074 = vmatpush.bf16.msra.mxu2 %v7836_v23  ;;  %v7872_v34 = vor.u32 %v8770_v47, %v7869_v36  ;;  %v7980_v23 = vor.u32 %v8800_v24, %v7979_v6  ;;  %v8822_v8 = vld [vmem:[#allocation16 + $0x28] sm:$0xff]  ;;  %v8820_v47 = vld [vmem:[#allocation16 + $0x18] sm:$0xff] }
 0x342   :  { %v8832_v36 = vld [vmem:[#allocation16 + $0x78] sm:$0xff]  ;;  %v8818_v6 = vld [vmem:[#allocation16 + $0x8] sm:$0xff] }
 0x343   :  { %v8830_v24 = vld [vmem:[#allocation16 + $0x68] sm:$0xff] }
 0x344   :  { %v4149_v53 = vpop.f32.mrf.mxu3  ;;  %5101 = vmatpush.bf16.msrb.mxu0 %v7568_v54  ;;  %5110 = vmatpush.bf16.msrb.mxu1 %v7760_v63  ;;  %v7856_v54 = vor.u32 %v8766_v43, %v7853_v30  ;;  %v8762_v63 = vld [vmem:[#allocation13 + $0x24c] sm:$0xf]  ;;  %v8817_v30 = vld [vmem:[#allocation16] sm:$0xff] }
 0x345   :  { %v4150_v57 = vadd.f32 %v4149_v53, %v4137_v42  ;;  %5075 = vmatpush.bf16.msra.mxu2 %v7820_v50  ;;  %v7840_v5 = vor.u32 %v8762_v63, %v7837_v20  ;;  %v8758_v42 = vld [vmem:[#allocation13 + $0x22c] sm:$0xf]  ;;  %v7821_v53 = vld [vmem:[#allocation13 + $0x238] sm:$0xf0]  ;;  %v7948_v50 = vor.u32 %v8792_v38, %v7947_v44 }
 0x346   :  { %v8840_v63 = vld [vmem:[#allocation16 + $0xb8] sm:$0xff]  ;;  %v8826_v38 = vld [vmem:[#allocation16 + $0x48] sm:$0xff] }
 0x347   :  { %v4156_v61 = vmax.f32 %v4150_v57, 0.0  ;;  %v8754_v57 = vld [vmem:[#allocation13 + $0x20c] sm:$0xf] }
 0x348   :  { %5102 = vmatpush.bf16.msrb.mxu0 %v7552_v28  ;;  %5111 = vmatpush.bf16.msrb.mxu1 %v7744_v58  ;;  %v7824_v28 = vor.u32 %v8758_v42, %v7821_v53  ;;  %v7805_v58 = vld [vmem:[#allocation13 + $0x218] sm:$0xf0]  ;;  %v8838_v42 = vld [vmem:[#allocation16 + $0xa8] sm:$0xff] }
 0x349   :  { %v9459_v0 = vpack.c.bf16 %v4156_v61, %v4156_v61  ;;  %5076 = vmatpush.bf16.msra.mxu2 %v7804_v56  ;;  %v8032_v61 = vor.u32 %v8810_v11, %v8029_v60  ;;  %v8806_v56 = vld [vmem:[#allocation13 + $0x3ac] sm:$0xf] }
 0x34a   :  { %v8834_v60 = vld [vmem:[#allocation16 + $0x88] sm:$0xff] }
 0x34b   :  { %4986 = vmatmul.bf16.vlgmr.msra.gmra.mxu3 %v9459_v0  ;;  %5103 = vmatmul.bf16.vlgmr.msrb.gmra.mxu0 %v9429_v26  ;;  %v7696_v26 = vor.u32 %v8726_v14, %v7693_v16 }
 0x34c   :  { %5082 = vmatpush.bf16.msra.mxu3 %v8044_v62  ;;  %v4151_v19 = vpop.f32.mrf.mxu3  ;;  %5112 = vmatpush.bf16.msrb.mxu1 %v7728_v2  ;;  %v8013_v62 = vld [vmem:[#allocation13 + $0x3b8] sm:$0xf0] }
 0x34d   :  { %5121 = vmatpush.bf16.msrb.mxu2 %v7920_v7  ;;  %v8016_v2 = vor.u32 %v8806_v56, %v8013_v62  ;;  %v8802_v7 = vld [vmem:[#allocation13 + $0x38c] sm:$0xf]  ;;  %v7965_v19 = vld [vmem:[#allocation13 + $0x358] sm:$0xf0]  ;;  %5415 = vmatpush.bf16.msra.mxu0 %v8824_v55 }
 0x34e   :  { %5077 = vmatmul.bf16.vlgmr.msra.gmra.mxu2 %v9448_v49  ;;  %v8000_v3 = vor.u32 %v8802_v7, %v7997_v18  ;;  %v8833_v7 = vld [vmem:[#allocation16 + $0x80] sm:$0xff]  ;;  %v8848_v18 = vld [vmem:[#allocation16 + $0xf8] sm:$0xff] }
 0x350   :  { %5083 = vmatpush.bf16.msra.mxu3 %v8028_v29  ;;  %5113 = vmatpush.bf16.msrb.mxu1 %v7712_v22  ;;  %v7968_v29 = vor.u32 %v8794_v4, %v7965_v19  ;;  %v8790_v22 = vld [vmem:[#allocation13 + $0x32c] sm:$0xf] }
 0x351   :  { %5122 = vmatpush.bf16.msrb.mxu2 %v7904_v9  ;;  %v7949_v9 = vld [vmem:[#allocation13 + $0x338] sm:$0xf0]  ;;  %v8846_v19 = vld [vmem:[#allocation16 + $0xe8] sm:$0xff] }
 0x352   :  { %v7952_v10 = vor.u32 %v8790_v22, %v7949_v9 }
 0x354   :  { %5084 = vmatpush.bf16.msra.mxu3 %v8012_v21  ;;  %5114 = vmatpush.bf16.msrb.mxu1 %v7696_v26  ;;  %v8823_v21 = vld [vmem:[#allocation16 + $0x30] sm:$0xff] }
 0x355   :  { %5123 = vmatpush.bf16.msrb.mxu2 %v7888_v27  ;;  %5416 = vmatpush.bf16.msra.mxu0 %v8823_v21 }
 0x358   :  { %5085 = vmatpush.bf16.msra.mxu3 %v7996_v39  ;;  %5115 = vmatpush.bf16.msrb.mxu1 %v7680_v40  ;;  %v8831_v39 = vld [vmem:[#allocation16 + $0x70] sm:$0xff] }
 0x359   :  { %5124 = vmatpush.bf16.msrb.mxu2 %v7872_v34  ;;  %5417 = vmatpush.bf16.msra.mxu0 %v8822_v8  ;;  %v8843_v8 = vld [vmem:[#allocation16 + $0xd0] sm:$0xff] }
 0x35b   :  { %5038 = vmatmul.bf16.vlgmr.msrb.gmra.mxu3 %v9459_v0  ;;  %5116 = vmatmul.bf16.vlgmr.msrb.gmra.mxu1 %v9438_v37  ;;  %v7808_v37 = vor.u32 %v8754_v57, %v7805_v58  ;;  %v4291_v57 = vperm.slane %v9477_v31, 0  ;;  %v8836_v58 = vld [vmem:[#allocation16 + $0x98] sm:$0xff] }
 0x35c   :  { %5086 = vmatpush.bf16.msra.mxu3 %v7980_v23  ;;  %5428 = vmatpush.bf16.msra.mxu1 %v8832_v36  ;;  %v8829_v23 = vld [vmem:[#allocation16 + $0x60] sm:$0xff] }
 0x35d   :  { %5125 = vmatpush.bf16.msrb.mxu2 %v7856_v54  ;;  %5418 = vmatpush.bf16.msra.mxu0 %v8821_v15  ;;  %v4293_v15 = vperm.slane %v9477_v31, 2 }
 0x360   :  { %5087 = vmatpush.bf16.msra.mxu3 %v7964_v1  ;;  %5429 = vmatpush.bf16.msra.mxu1 %v8831_v39  ;;  %v8827_v1 = vld [vmem:[#allocation16 + $0x50] sm:$0xff] }
 0x361   :  { %5126 = vmatpush.bf16.msrb.mxu2 %v7840_v5  ;;  %5419 = vmatpush.bf16.msra.mxu0 %v8820_v47  ;;  %v8839_v5 = vld [vmem:[#allocation16 + $0xb0] sm:$0xff] }
 0x364   :  { %5088 = vmatpush.bf16.msra.mxu3 %v7948_v50  ;;  %5430 = vmatpush.bf16.msra.mxu1 %v8830_v24  ;;  %v8825_v50 = vld [vmem:[#allocation16 + $0x40] sm:$0xff] }
 0x365   :  { %5127 = vmatpush.bf16.msrb.mxu2 %v7824_v28  ;;  %v8837_v28 = vld [vmem:[#allocation16 + $0xa0] sm:$0xff] }
 0x368   :  { %5089 = vmatpush.bf16.msra.mxu3 %v7932_v25  ;;  %5431 = vmatpush.bf16.msra.mxu1 %v8829_v23 }
 0x369   :  { %5128 = vmatpush.bf16.msrb.mxu2 %v7808_v37 }
 0x36b   :  { %5090 = vmatmul.bf16.vlgmr.msra.gmra.mxu3 %v9459_v0 }
 0x36c   :  { %5134 = vmatpush.bf16.msrb.mxu3 %v8048_v51  ;;  %5129 = vmatmul.bf16.vlgmr.msrb.gmra.mxu2 %v9448_v49  ;;  %v7933_v49 = vld [vmem:[#allocation13 + $0x318] sm:$0xf0] }
 0x36d   :  { %v7936_v14 = vor.u32 %v8786_v12, %v7933_v49  ;;  %5432 = vmatpush.bf16.msra.mxu1 %v8828_v46  ;;  %5441 = vmatpush.bf16.msra.mxu2 %v8840_v63  ;;  %v8845_v12 = vld [vmem:[#allocation16 + $0xe0] sm:$0xff] }
 0x370   :  { %5135 = vmatpush.bf16.msrb.mxu3 %v8032_v61 }
 0x371   :  { %5433 = vmatpush.bf16.msra.mxu1 %v8827_v1  ;;  %5442 = vmatpush.bf16.msra.mxu2 %v8839_v5 }
 0x374   :  { %5136 = vmatpush.bf16.msrb.mxu3 %v8016_v2 }
 0x375   :  { %5434 = vmatpush.bf16.msra.mxu1 %v8826_v38  ;;  %5443 = vmatpush.bf16.msra.mxu2 %v8838_v42 }
 0x378   :  { %5137 = vmatpush.bf16.msrb.mxu3 %v8000_v3 }
 0x379   :  { %5435 = vmatpush.bf16.msra.mxu1 %v8825_v50  ;;  %5444 = vmatpush.bf16.msra.mxu2 %v8837_v28 }
 0x37c   :  { %5138 = vmatpush.bf16.msrb.mxu3 %v7984_v17  ;;  %v8847_v17 = vld [vmem:[#allocation16 + $0xf0] sm:$0xff] }
 0x37d   :  { %5445 = vmatpush.bf16.msra.mxu2 %v8836_v58 }
 0x380   :  { %5139 = vmatpush.bf16.msrb.mxu3 %v7968_v29 }
 0x381   :  { %5446 = vmatpush.bf16.msra.mxu2 %v8835_v35 }
 0x384   :  { %5140 = vmatpush.bf16.msrb.mxu3 %v7952_v10 }
 0x385   :  { %5447 = vmatpush.bf16.msra.mxu2 %v8834_v60 }
 0x388   :  { %5141 = vmatpush.bf16.msrb.mxu3 %v7936_v14  ;;  %v4948_v16 = vpop.f32.mrf.mxu0 }
 0x389   :  { %v4949_v25 = vadd.f32 %v4948_v16, %v4291_v57  ;;  %5448 = vmatpush.bf16.msra.mxu2 %v8833_v7  ;;  %v8863_v57 = vld [vmem:[%s9503_s10] ss:$0 sm:$0xff] }
 0x38b   :  { %5142 = vmatmul.bf16.vlgmr.msrb.gmra.mxu3 %v9459_v0  ;;  %v8819_v0 = vld [vmem:[#allocation16 + $0x10] sm:$0xff] }
 0x38c   :  { %5420 = vmatpush.bf16.msra.mxu0 %v8819_v0  ;;  %5454 = vmatpush.bf16.msra.mxu3 %v8848_v18  ;;  %v8841_v0 = vld [vmem:[#allocation16 + $0xc0] sm:$0xff] }
 0x390   :  { %v4950_v41 = vpop.f32.mrf.mxu0  ;;  %5421 = vmatpush.bf16.msra.mxu0 %v8818_v6  ;;  %5455 = vmatpush.bf16.msra.mxu3 %v8847_v17 }
 0x391   :  { %v8844_v41 = vld [vmem:[#allocation16 + $0xd8] sm:$0xff] }
 0x394   :  { %5422 = vmatpush.bf16.msra.mxu0 %v8817_v30  ;;  %5456 = vmatpush.bf16.msra.mxu3 %v8846_v19 }
 0x398   :  { %v4961_v26 = vpop.f32.mrf.mxu1  ;;  %v9469_v27 = vpop.f32.mrf.mxu0  ;;  %5457 = vmatpush.bf16.msra.mxu3 %v8845_v12 }
 0x399   :  { %v4962_v51 = vadd.f32 %v4961_v26, %v4949_v25  ;;  %v5001_v29 = vadd.f32 %v9469_v27, %v4292_v32 }
 0x39c   :  { %5458 = vmatpush.bf16.msra.mxu3 %v8844_v41 }
 0x3a0   :  { %v4963_v13 = vpop.f32.mrf.mxu1  ;;  %v5002_v33 = vpop.f32.mrf.mxu0  ;;  %5459 = vmatpush.bf16.msra.mxu3 %v8843_v8 }
 0x3a1   :  { %v8842_v33 = vld [vmem:[#allocation16 + $0xc8] sm:$0xff] }
 0x3a4   :  { %5460 = vmatpush.bf16.msra.mxu3 %v8842_v33 }
 0x3a8   :  { %v9471_v40 = vpop.f32.mrf.mxu1  ;;  %5461 = vmatpush.bf16.msra.mxu3 %v8841_v0 }
 0x3a9   :  { %v5014_v10 = vadd.f32 %v9471_v40, %v5001_v29 }
 0x3aa   :  { %v9473_v34 = vpop.f32.mrf.mxu0 }
 0x3ab   :  { %v5053_v13 = vadd.f32 %v9473_v34, %v4293_v15 }
 0x3ae   :  { %v4974_v43 = vpop.f32.mrf.mxu2 }
 0x3af   :  { %v4975_v11 = vadd.f32 %v4974_v43, %v4962_v51 }
 0x3b0   :  { %v5015_v54 = vpop.f32.mrf.mxu1 }
 0x3b1   :  { %v4294_v54 = vperm.slane %v9477_v31, 3 }
 0x3b2   :  { %v5054_v45 = vpop.f32.mrf.mxu0 }
 0x3b6   :  { %v4976_v20 = vpop.f32.mrf.mxu2 }
 0x3b8   :  { %v9475_v44 = vpop.f32.mrf.mxu1 }
 0x3b9   :  { %v5066_v47 = vadd.f32 %v9475_v44, %v5053_v13 }
 0x3be   :  { %v5026_v53 = vpop.f32.mrf.mxu2 }
 0x3bf   :  { %v5027_v49 = vadd.f32 %v5026_v53, %v5014_v10 }
 0x3c0   :  { %v5067_v52 = vpop.f32.mrf.mxu1 }
 0x3c6   :  { %v5028_v37 = vpop.f32.mrf.mxu2 }
 0x3c8   :  { %v5104_v59 = vpop.f32.mrf.mxu0 }
 0x3c9   :  { %v5105_v45 = vadd.f32 %v5104_v59, %v4294_v54 }
 0x3ce   :  { %v4987_v61 = vpop.f32.mrf.mxu3 }
 0x3cf   :  { %v4988_v56 = vadd.f32 %v4987_v61, %v4975_v11 }
 0x3d0   :  { %v5106_v62 = vpop.f32.mrf.mxu0 }
 0x3d1   :  { %v5147_v2 = vmax.f32 %v4988_v56, 0.0  ;;  %v5078_v3 = vpop.f32.mrf.mxu2 }
 0x3d2   :  { %v5079_v36 = vadd.f32 %v5078_v3, %v5066_v47 }
 0x3d3   :  { %v5151_v48 = vpack.c.bf16 %v5147_v2, %v5147_v2 }
 0x3d5   :  { %5423 = vmatmul.bf16.vlgmr.msra.gmra.mxu0 %v5151_v48 }
 0x3d6   :  { %v4989_v4 = vpop.f32.mrf.mxu3 }
 0x3d8   :  { %v5117_v22 = vpop.f32.mrf.mxu1 }
 0x3d9   :  { %v5080_v9 = vpop.f32.mrf.mxu2  ;;  %v5118_v46 = vadd.f32 %v5117_v22, %v5105_v45 }
 0x3de   :  { %v5039_v14 = vpop.f32.mrf.mxu3 }
 0x3df   :  { %v5040_v16 = vadd.f32 %v5039_v14, %v5027_v49 }
 0x3e0   :  { %v5119_v21 = vpop.f32.mrf.mxu1 }
 0x3e1   :  { %v5148_v55 = vmax.f32 %v5040_v16, 0.0 }
 0x3e3   :  { %v5152_v26 = vpack.c.bf16 %v5148_v55, %v5148_v55 }
 0x3e5   :  { %5436 = vmatmul.bf16.vlgmr.msra.gmra.mxu1 %v5152_v26 }
 0x3e6   :  { %v5041_v27 = vpop.f32.mrf.mxu3 }
 0x3ee   :  { %v5091_v39 = vpop.f32.mrf.mxu3 }
 0x3ef   :  { %v5092_v40 = vadd.f32 %v5091_v39, %v5079_v36  ;;  %v5130_v6 = vpop.f32.mrf.mxu2 }
 0x3f0   :  { %v5131_v34 = vadd.f32 %v5130_v6, %v5118_v46 }
 0x3f1   :  { %v5149_v24 = vmax.f32 %v5092_v40, 0.0 }
 0x3f3   :  { %v5153_v43 = vpack.c.bf16 %v5149_v24, %v5149_v24 }
 0x3f5   :  { %5449 = vmatmul.bf16.vlgmr.msra.gmra.mxu2 %v5153_v43 }
 0x3f6   :  { %v5093_v30 = vpop.f32.mrf.mxu3 }
 0x3f7   :  { %v5132_v23 = vpop.f32.mrf.mxu2 }
 0x40e   :  { %v5143_v63 = vpop.f32.mrf.mxu3 }
 0x40f   :  { %v5144_v20 = vadd.f32 %v5143_v63, %v5131_v34 }
 0x411   :  { %v5150_v1 = vmax.f32 %v5144_v20, 0.0 }
 0x413   :  { %v5154_v5 = vpack.c.bf16 %v5150_v1, %v5150_v1 }
 0x415   :  { %5462 = vmatmul.bf16.vlgmr.msra.gmra.mxu3 %v5154_v5 }
 0x416   :  { %v5145_v44 = vpop.f32.mrf.mxu3 }
 0x452   :  { %v5424_v38 = vpop.f32.mrf.mxu0 }
 0x453   :  { %v5425_v31 = vadd.f32 %v8863_v57, %v5424_v38 }
 0x45a   :  { %v5426_v42 = vpop.f32.mrf.mxu0 }
 0x462   :  { %v5437_v53 = vpop.f32.mrf.mxu1 }
 0x463   :  { %v5438_v58 = vadd.f32 %v5437_v53, %v5425_v31 }
 0x46a   :  { %v5439_v50 = vpop.f32.mrf.mxu1 }
 0x478   :  { %v5450_v28 = vpop.f32.mrf.mxu2 }
 0x479   :  { %v5451_v35 = vadd.f32 %v5450_v28, %v5438_v58 }
 0x480   :  { %v5452_v52 = vpop.f32.mrf.mxu2 }
 0x498   :  { %v5463_v59 = vpop.f32.mrf.mxu3 }
 0x499   :  { %v5464_v25 = vadd.f32 %v5463_v59, %v5451_v35 }
 0x49b   :  { %5467 = vst [vmem:[#allocation17] sm:$0xff] %v5464_v25 }
 0x49c   :  { %5478 = dma.vmem_to_hbm [thread:$0]  %s5474_s20, 128, %s5476_s22, [#allocation4]  }
 0x4a0   :  { %v5465_v37 = vpop.f32.mrf.mxu3 }
 0x4a1   :  { %9115 = dma.done.wait [#allocation4], 128  }
 0x4a2   :  { %9116 = vsyncadd [#allocation4], 4294967168 }
 0x4a3   :  { %5483 = vsyncpa [#allocation3], 1 }
 0x4a4   :  { %5484 = vsyncpa [#allocation6], 1 }
 0x4a5   :  { %5485 = vsyncpa [#allocation9], 1 }
 0x4a6   :  { %5486 = vsyncpa [#allocation12], 1 }
 0x4a7   :  { %5487 = vsyncpa [#allocation15], 1 }
 0x4a8   :  { %5488 = vsyncpa [#allocation4], 1 }

// kernel: tpu_custom_call.1
= control target key start
LH: loop header
LB: loop body
LE: loop exit
PB: predicated region body
PF: predicated region fallthrough
CT: control target
= control target key end

     0   :  { %16 = vsyncpa [#allocation3], 0  ;;  %s9493_s0 = inlined_call_operand.hbm [shape: bf16[8,1024], index: 0, kind: input, shape index: {}]   ;;  %s9494_s1 = inlined_call_operand.hbm [shape: bf16[1024,512], index: 1, kind: input, shape index: {}]   ;;  %s9495_s2 = inlined_call_operand.hbm [shape: f32[1,512], index: 2, kind: input, shape index: {}]   ;;  %s9496_s3 = inlined_call_operand.hbm [shape: bf16[512,512], index: 3, kind: input, shape index: {}]   ;;  %s9497_s4 = inlined_call_operand.hbm [shape: f32[1,512], index: 4, kind: input, shape index: {}]   ;;  %s9498_s5 = inlined_call_operand.hbm [shape: bf16[512,512], index: 5, kind: input, shape index: {}]   ;;  %s9499_s6 = inlined_call_operand.vmem [shape: f32[1,512], index: 6, kind: input, shape index: {}]   ;;  %s9500_s7 = inlined_call_operand.hbm [shape: bf16[512,512], index: 7, kind: input, shape index: {}]   ;;  %s9501_s8 = inlined_call_operand.hbm [shape: f32[1,512], index: 8, kind: input, shape index: {}]   ;;  %s9502_s9 = inlined_call_operand.hbm [shape: bf16[512,128], index: 9, kind: input, shape index: {}]   ;;  %s9503_s10 = inlined_call_operand.vmem [shape: f32[1,128], index: 10, kind: input, shape index: {}]   ;;  %s9504_s11 = inlined_call_operand.hbm [shape: f32[8,128], index: 11, kind: output, shape index: {}]  }
   0x1   :  { %17 = vsyncpa [#allocation6], 0 }
   0x2   :  { %18 = vsyncpa [#allocation9], 0 }
   0x3   :  { %19 = vsyncpa [#allocation12], 0 }
   0x4   :  { %20 = vsyncpa [#allocation15], 0  ;;  %s37_s19 = sshll.u32 %s9494_s1, 4  ;;  %s38_s19 = int_to_ptr.hbm [resolvable:$true] %s37_s19 }
   0x5   :  { %21 = vsyncpa [#allocation4], 0  ;;  %s9117_s20 = smov [#allocation5]   ;;  %s61_s24 = sshll.u32 %s9496_s3, 4  ;;  %s62_s24 = int_to_ptr.hbm [resolvable:$true] %s61_s24 }
   0x6   :  { %s39_s21 = sshll.u32 %s9117_s20, 4  ;;  %s9118_s25 = smov 256   ;;  %s40_s21 = int_to_ptr.vmem [resolvable:$true] %s39_s21 }
   0x7   :  { %s9119_s26 = smov 16   ;;  %s9120_s27 = smov [#allocation8]  }
   0x8   :  { %45 = dma.hbm_to_vmem [thread:$0]  %s38_s19, 32768, %s40_s21, [#allocation6], %s9118_s25, %s9118_s25, %s9119_s26  }
   0x9   :  { %s63_s28 = sshll.u32 %s9120_s27, 4  ;;  %s85_s30 = sshll.u32 %s9498_s5, 4  ;;  %s64_s28 = int_to_ptr.vmem [resolvable:$true] %s63_s28  ;;  %s86_s30 = int_to_ptr.hbm [resolvable:$true] %s85_s30 }
   0xa   :  { %69 = dma.hbm_to_vmem [thread:$0]  %s62_s24, 16384, %s64_s28, [#allocation9], %s9118_s25, %s9118_s25, %s9119_s26  }
   0xb   :  { %s114_s13 = sshll.u32 %s9501_s8, 4  ;;  %s9121_s14 = smov [#allocation11]   ;;  %s115_s13 = int_to_ptr.hbm [resolvable:$true] %s114_s13 }
   0xc   :  { %s87_s15 = sshll.u32 %s9121_s14, 4  ;;  %s9122_s16 = smov [#allocation14]   ;;  %s88_s15 = int_to_ptr.vmem [resolvable:$true] %s87_s15 }
   0xd   :  { %93 = dma.hbm_to_vmem [thread:$0]  %s86_s30, 16384, %s88_s15, [#allocation12], %s9118_s25, %s9118_s25, %s9119_s26  }
   0xe   :  { %s116_s5 = sshll.u32 %s9122_s16, 4  ;;  %s27_s19 = sshll.u32 %s9493_s0, 4  ;;  %s117_s5 = int_to_ptr.vmem [resolvable:$true] %s116_s5  ;;  %s28_s19 = int_to_ptr.hbm [resolvable:$true] %s27_s19 }
   0xf   :  { %119 = dma.hbm_to_vmem [thread:$0]  %s115_s13, 64, %s117_s5, [#allocation15]  }
  0x10   :  { %s51_s8 = sshll.u32 %s9495_s2, 4  ;;  %s9123_s22 = smov [#allocation2]   ;;  %s52_s8 = int_to_ptr.hbm [resolvable:$true] %s51_s8 }
  0x11   :  { %s29_s23 = sshll.u32 %s9123_s22, 4  ;;  %s9124_s24 = smov [#allocation7]   ;;  %s30_s23 = int_to_ptr.vmem [resolvable:$true] %s29_s23 }
  0x12   :  { %32 = dma.hbm_to_vmem [thread:$0]  %s28_s19, 512, %s30_s23, [#allocation3]  }
  0x13   :  { %s53_s27 = sshll.u32 %s9124_s24, 4  ;;  %s75_s1 = sshll.u32 %s9497_s4, 4  ;;  %s54_s27 = int_to_ptr.vmem [resolvable:$true] %s53_s27  ;;  %s76_s1 = int_to_ptr.hbm [resolvable:$true] %s75_s1 }
  0x14   :  { %56 = dma.hbm_to_vmem [thread:$0]  %s52_s8, 64, %s54_s27, [#allocation6]  }
  0x15   :  { %s100_s3 = sshll.u32 %s9500_s7, 4  ;;  %s9125_s12 = smov [#allocation10]   ;;  %s101_s3 = int_to_ptr.hbm [resolvable:$true] %s100_s3 }
  0x16   :  { %s77_s2 = sshll.u32 %s9125_s12, 4  ;;  %s9126_s13 = smov [#allocation13]   ;;  %s78_s2 = int_to_ptr.vmem [resolvable:$true] %s77_s2 }
  0x17   :  { %80 = dma.hbm_to_vmem [thread:$0]  %s76_s1, 64, %s78_s2, [#allocation9]  }
  0x18   :  { %s102_s14 = sshll.u32 %s9126_s13, 4  ;;  %s124_s5 = sshll.u32 %s9502_s9, 4  ;;  %s103_s14 = int_to_ptr.vmem [resolvable:$true] %s102_s14  ;;  %s125_s5 = int_to_ptr.hbm [resolvable:$true] %s124_s5 }
  0x19   :  { %108 = dma.hbm_to_vmem [thread:$0]  %s101_s3, 16384, %s103_s14, [#allocation12], %s9118_s25, %s9118_s25, %s9119_s26  }
  0x1a   :  { %s9127_s4 = smov [#allocation16]   ;;  %s9128_s7 = smov 64  }
  0x1b   :  { %s126_s17 = sshll.u32 %s9127_s4, 4  ;;  %s9129_s18 = smov 4   ;;  %s127_s17 = int_to_ptr.vmem [resolvable:$true] %s126_s17 }
  0x1c   :  { %132 = dma.hbm_to_vmem [thread:$0]  %s125_s5, 4096, %s127_s17, [#allocation15], %s9128_s7, %s9128_s7, %s9129_s18  }
  0x1d   :  { %9105 = dma.done.wait [#allocation3], 512  }
  0x1e   :  { %9106 = vsyncadd [#allocation3], 4294966784 }
  0x1f   :  { %9107 = dma.done.wait [#allocation6], 32832  }
  0x20   :  { %9108 = vsyncadd [#allocation6], 4294934464 }
  0x21   :  { %9109 = dma.done.wait [#allocation9], 16448  }
  0x22   :  { %9110 = vsyncadd [#allocation9], 4294950848 }
  0x23   :  { %9111 = dma.done.wait [#allocation12], 32768  }
  0x24   :  { %9112 = vsyncadd [#allocation12], 4294934528 }
  0x25   :  { %9113 = dma.done.wait [#allocation15], 4160  }
  0x26   :  { %9114 = vsyncadd [#allocation15], 4294963136  ;;  %v5603_v0 = vld [vmem:[#allocation5 + $0xe0] sm:$0xf]  ;;  %v8207_v1 = vld [vmem:[#allocation5 + $0xec] sm:$0xf0] }
  0x27   :  { %v5731_v2 = vld [vmem:[#allocation5 + $0x1e0] sm:$0xf]  ;;  %v5604_v3 = vor.u32 %v8207_v1, %v5603_v0  ;;  %v8239_v4 = vld [vmem:[#allocation5 + $0x1ec] sm:$0xf0]  ;;  %s9130_s19 = smov [#allocation17]   ;;  %s5475_s22 = sshll.u32 %s9504_s11, 4  ;;  %s5476_s22 = int_to_ptr.hbm [resolvable:$true] %s5475_s22 }
  0x28   :  { %v5859_v5 = vld [vmem:[#allocation5 + $0x2e0] sm:$0xf]  ;;  %v8271_v6 = vld [vmem:[#allocation5 + $0x2ec] sm:$0xf0]  ;;  %v5732_v7 = vor.u32 %v8239_v4, %v5731_v2  ;;  %s5473_s20 = sshll.u32 %s9130_s19, 4  ;;  %s5474_s20 = int_to_ptr.vmem [resolvable:$true] %s5473_s20 }
  0x29   :  { %v5860_v8 = vor.u32 %v8271_v6, %v5859_v5  ;;  %v5987_v9 = vld [vmem:[#allocation5 + $0x3e0] sm:$0xf]  ;;  %v8303_v10 = vld [vmem:[#allocation5 + $0x3ec] sm:$0xf0]  ;;  %1749 = vmatpush.bf16.msra.mxu0 %v5604_v3 }
  0x2a   :  { %v5587_v11 = vld [vmem:[#allocation5 + $0xc0] sm:$0xf]  ;;  %v5988_v12 = vor.u32 %v8303_v10, %v5987_v9  ;;  %v8203_v13 = vld [vmem:[#allocation5 + $0xcc] sm:$0xf0]  ;;  %1762 = vmatpush.bf16.msra.mxu1 %v5732_v7 }
  0x2b   :  { %v5715_v14 = vld [vmem:[#allocation5 + $0x1c0] sm:$0xf]  ;;  %v8235_v15 = vld [vmem:[#allocation5 + $0x1cc] sm:$0xf0]  ;;  %1775 = vmatpush.bf16.msra.mxu2 %v5860_v8  ;;  %v5588_v16 = vor.u32 %v8203_v13, %v5587_v11 }
  0x2c   :  { %v5716_v17 = vor.u32 %v8235_v15, %v5715_v14  ;;  %v5843_v18 = vld [vmem:[#allocation5 + $0x2c0] sm:$0xf]  ;;  %v8267_v19 = vld [vmem:[#allocation5 + $0x2cc] sm:$0xf0]  ;;  %1788 = vmatpush.bf16.msra.mxu3 %v5988_v12 }
  0x2d   :  { %v5971_v20 = vld [vmem:[#allocation5 + $0x3c0] sm:$0xf]  ;;  %v5844_v21 = vor.u32 %v8267_v19, %v5843_v18  ;;  %v8299_v22 = vld [vmem:[#allocation5 + $0x3cc] sm:$0xf0]  ;;  %1750 = vmatpush.bf16.msra.mxu0 %v5588_v16 }
  0x2e   :  { %v5571_v23 = vld [vmem:[#allocation5 + $0xa0] sm:$0xf]  ;;  %v8199_v24 = vld [vmem:[#allocation5 + $0xac] sm:$0xf0]  ;;  %v5972_v25 = vor.u32 %v8299_v22, %v5971_v20  ;;  %1763 = vmatpush.bf16.msra.mxu1 %v5716_v17 }
  0x2f   :  { %v5699_v26 = vld [vmem:[#allocation5 + $0x1a0] sm:$0xf]  ;;  %v8231_v27 = vld [vmem:[#allocation5 + $0x1ac] sm:$0xf0]  ;;  %v5572_v29 = vor.u32 %v8199_v24, %v5571_v23  ;;  %1776 = vmatpush.bf16.msra.mxu2 %v5844_v21 }
  0x30   :  { %v5827_v28 = vld [vmem:[#allocation5 + $0x2a0] sm:$0xf]  ;;  %v8263_v30 = vld [vmem:[#allocation5 + $0x2ac] sm:$0xf0]  ;;  %v5700_v33 = vor.u32 %v8231_v27, %v5699_v26  ;;  %1789 = vmatpush.bf16.msra.mxu3 %v5972_v25 }
  0x31   :  { %v5955_v31 = vld [vmem:[#allocation5 + $0x3a0] sm:$0xf]  ;;  %v8295_v32 = vld [vmem:[#allocation5 + $0x3ac] sm:$0xf0]  ;;  %v5828_v34 = vor.u32 %v8263_v30, %v5827_v28  ;;  %1751 = vmatpush.bf16.msra.mxu0 %v5572_v29 }
  0x32   :  { %v5555_v35 = vld [vmem:[#allocation5 + $0x80] sm:$0xf]  ;;  %v8195_v36 = vld [vmem:[#allocation5 + $0x8c] sm:$0xf0]  ;;  %v5956_v38 = vor.u32 %v8295_v32, %v5955_v31  ;;  %1764 = vmatpush.bf16.msra.mxu1 %v5700_v33 }
  0x33   :  { %v5683_v37 = vld [vmem:[#allocation5 + $0x180] sm:$0xf]  ;;  %v8227_v39 = vld [vmem:[#allocation5 + $0x18c] sm:$0xf0]  ;;  %v5556_v44 = vor.u32 %v8195_v36, %v5555_v35  ;;  %1777 = vmatpush.bf16.msra.mxu2 %v5828_v34 }
  0x34   :  { %v5811_v40 = vld [vmem:[#allocation5 + $0x280] sm:$0xf]  ;;  %v8259_v41 = vld [vmem:[#allocation5 + $0x28c] sm:$0xf0]  ;;  %v5684_v45 = vor.u32 %v8227_v39, %v5683_v37  ;;  %1790 = vmatpush.bf16.msra.mxu3 %v5956_v38 }
  0x35   :  { %v5939_v42 = vld [vmem:[#allocation5 + $0x380] sm:$0xf]  ;;  %v8291_v43 = vld [vmem:[#allocation5 + $0x38c] sm:$0xf0]  ;;  %v5812_v46 = vor.u32 %v8259_v41, %v5811_v40  ;;  %1752 = vmatpush.bf16.msra.mxu0 %v5556_v44 }
  0x36   :  { %v5539_v47 = vld [vmem:[#allocation5 + $0x60] sm:$0xf]  ;;  %v8191_v48 = vld [vmem:[#allocation5 + $0x6c] sm:$0xf0]  ;;  %v5940_v50 = vor.u32 %v8291_v43, %v5939_v42  ;;  %1765 = vmatpush.bf16.msra.mxu1 %v5684_v45 }
  0x37   :  { %v5667_v49 = vld [vmem:[#allocation5 + $0x160] sm:$0xf]  ;;  %v8223_v51 = vld [vmem:[#allocation5 + $0x16c] sm:$0xf0]  ;;  %v5540_v56 = vor.u32 %v8191_v48, %v5539_v47  ;;  %1778 = vmatpush.bf16.msra.mxu2 %v5812_v46 }
  0x38   :  { %v5795_v52 = vld [vmem:[#allocation5 + $0x260] sm:$0xf]  ;;  %v8255_v53 = vld [vmem:[#allocation5 + $0x26c] sm:$0xf0]  ;;  %v5668_v57 = vor.u32 %v8223_v51, %v5667_v49  ;;  %1791 = vmatpush.bf16.msra.mxu3 %v5940_v50 }
  0x39   :  { %v5923_v54 = vld [vmem:[#allocation5 + $0x360] sm:$0xf]  ;;  %v8287_v55 = vld [vmem:[#allocation5 + $0x36c] sm:$0xf0]  ;;  %v5796_v58 = vor.u32 %v8255_v53, %v5795_v52  ;;  %1753 = vmatpush.bf16.msra.mxu0 %v5540_v56 }
  0x3a   :  { %v5523_v59 = vld [vmem:[#allocation5 + $0x40] sm:$0xf]  ;;  %v8187_v60 = vld [vmem:[#allocation5 + $0x4c] sm:$0xf0]  ;;  %v5924_v62 = vor.u32 %v8287_v55, %v5923_v54  ;;  %1766 = vmatpush.bf16.msra.mxu1 %v5668_v57 }
  0x3b   :  { %v5651_v61 = vld [vmem:[#allocation5 + $0x140] sm:$0xf]  ;;  %v8219_v63 = vld [vmem:[#allocation5 + $0x14c] sm:$0xf0]  ;;  %v5524_v4 = vor.u32 %v8187_v60, %v5523_v59  ;;  %1779 = vmatpush.bf16.msra.mxu2 %v5796_v58 }
  0x3c   :  { %v5779_v0 = vld [vmem:[#allocation5 + $0x240] sm:$0xf]  ;;  %v8251_v1 = vld [vmem:[#allocation5 + $0x24c] sm:$0xf0]  ;;  %v5652_v5 = vor.u32 %v8219_v63, %v5651_v61  ;;  %1792 = vmatpush.bf16.msra.mxu3 %v5924_v62 }
  0x3d   :  { %v5907_v2 = vld [vmem:[#allocation5 + $0x340] sm:$0xf]  ;;  %v8283_v3 = vld [vmem:[#allocation5 + $0x34c] sm:$0xf0]  ;;  %v5780_v6 = vor.u32 %v8251_v1, %v5779_v0  ;;  %1754 = vmatpush.bf16.msra.mxu0 %v5524_v4 }
  0x3e   :  { %v5507_v7 = vld [vmem:[#allocation5 + $0x20] sm:$0xf]  ;;  %v8183_v8 = vld [vmem:[#allocation5 + $0x2c] sm:$0xf0]  ;;  %v5908_v10 = vor.u32 %v8283_v3, %v5907_v2  ;;  %1767 = vmatpush.bf16.msra.mxu1 %v5652_v5  ;;  %v172_v2 = vld [vmem:[#allocation2 + $0x8] sm:$0xff] }
  0x3f   :  { %v5635_v9 = vld [vmem:[#allocation5 + $0x120] sm:$0xf]  ;;  %v8215_v11 = vld [vmem:[#allocation5 + $0x12c] sm:$0xf0]  ;;  %v5508_v16 = vor.u32 %v8183_v8, %v5507_v7  ;;  %1780 = vmatpush.bf16.msra.mxu2 %v5780_v6  ;;  %v447_v8 = vunpack.c.l.b16 %v172_v2 }
  0x40   :  { %v5763_v12 = vld [vmem:[#allocation5 + $0x220] sm:$0xf]  ;;  %v8247_v13 = vld [vmem:[#allocation5 + $0x22c] sm:$0xf0]  ;;  %v5636_v19 = vor.u32 %v8215_v11, %v5635_v9  ;;  %1793 = vmatpush.bf16.msra.mxu3 %v5908_v10  ;;  %v448_v10 = vunpack.c.h.b16 %v172_v2 }
  0x41   :  { %v5891_v14 = vld [vmem:[#allocation5 + $0x320] sm:$0xf]  ;;  %v8279_v15 = vld [vmem:[#allocation5 + $0x32c] sm:$0xf0]  ;;  %v5764_v20 = vor.u32 %v8247_v13, %v5763_v12  ;;  %1755 = vmatpush.bf16.msra.mxu0 %v5508_v16 }
  0x42   :  { %v5491_v17 = vld [vmem:[#allocation5] sm:$0xf]  ;;  %v8179_v18 = vld [vmem:[#allocation5 + $0xc] sm:$0xf0]  ;;  %v5892_v24 = vor.u32 %v8279_v15, %v5891_v14  ;;  %1768 = vmatpush.bf16.msra.mxu1 %v5636_v19 }
  0x43   :  { %v5619_v21 = vld [vmem:[#allocation5 + $0x100] sm:$0xf]  ;;  %v8211_v22 = vld [vmem:[#allocation5 + $0x10c] sm:$0xf0]  ;;  %v5492_v31 = vor.u32 %v8179_v18, %v5491_v17  ;;  %1781 = vmatpush.bf16.msra.mxu2 %v5764_v20  ;;  %v9230_v18 = vpack.c.b16 %v447_v8, %v447_v8  ;;  %v9234_v20 = vpack.c.b16 %v448_v10, %v448_v10  ;;  %v8205_v8 = vld [vmem:[#allocation5 + $0xe4] sm:$0xf] }
  0x44   :  { %v5747_v23 = vld [vmem:[#allocation5 + $0x200] sm:$0xf]  ;;  %v8243_v25 = vld [vmem:[#allocation5 + $0x20c] sm:$0xf0]  ;;  %v5620_v35 = vor.u32 %v8211_v22, %v5619_v21  ;;  %1794 = vmatpush.bf16.msra.mxu3 %v5892_v24  ;;  %v8237_v10 = vld [vmem:[#allocation5 + $0x1e4] sm:$0xf] }
  0x45   :  { %v5875_v26 = vld [vmem:[#allocation5 + $0x300] sm:$0xf]  ;;  %v8275_v27 = vld [vmem:[#allocation5 + $0x30c] sm:$0xf0]  ;;  %v5748_v36 = vor.u32 %v8243_v25, %v5747_v23  ;;  %1756 = vmatpush.bf16.msra.mxu0 %v5492_v31 }
  0x46   :  { %v6115_v28 = vld [vmem:[#allocation5 + $0x4e0] sm:$0xf]  ;;  %v8335_v29 = vld [vmem:[#allocation5 + $0x4ec] sm:$0xf0]  ;;  %v5876_v39 = vor.u32 %v8275_v27, %v5875_v26  ;;  %1769 = vmatpush.bf16.msra.mxu1 %v5620_v35 }
  0x47   :  { %v6243_v30 = vld [vmem:[#allocation5 + $0x5e0] sm:$0xf]  ;;  %v8367_v32 = vld [vmem:[#allocation5 + $0x5ec] sm:$0xf0]  ;;  %v6116_v40 = vor.u32 %v8335_v29, %v6115_v28  ;;  %1782 = vmatpush.bf16.msra.mxu2 %v5748_v36 }
  0x48   :  { %v6371_v33 = vld [vmem:[#allocation5 + $0x6e0] sm:$0xf]  ;;  %v8399_v34 = vld [vmem:[#allocation5 + $0x6ec] sm:$0xf0]  ;;  %v6244_v41 = vor.u32 %v8367_v32, %v6243_v30  ;;  %1795 = vmatpush.bf16.msra.mxu3 %v5876_v39 }
  0x49   :  { %v6499_v37 = vld [vmem:[#allocation5 + $0x7e0] sm:$0xf]  ;;  %v8431_v38 = vld [vmem:[#allocation5 + $0x7ec] sm:$0xf0]  ;;  %v6372_v42 = vor.u32 %v8399_v34, %v6371_v33  ;;  %1801 = vmatpush.bf16.msrb.mxu0 %v6116_v40 }
  0x4a   :  { %v6099_v43 = vld [vmem:[#allocation5 + $0x4c0] sm:$0xf]  ;;  %v8331_v44 = vld [vmem:[#allocation5 + $0x4cc] sm:$0xf0]  ;;  %v6500_v46 = vor.u32 %v8431_v38, %v6499_v37  ;;  %1814 = vmatpush.bf16.msrb.mxu1 %v6244_v41  ;;  %1783 = vmatmul.bf16.vlgmr.msra.gmra.mxu2 %v9230_v18 }
  0x4b   :  { %v6227_v45 = vld [vmem:[#allocation5 + $0x5c0] sm:$0xf]  ;;  %v8363_v47 = vld [vmem:[#allocation5 + $0x5cc] sm:$0xf0]  ;;  %v6100_v52 = vor.u32 %v8331_v44, %v6099_v43  ;;  %1827 = vmatpush.bf16.msrb.mxu2 %v6372_v42  ;;  %1796 = vmatmul.bf16.vlgmr.msra.gmra.mxu3 %v9234_v20 }
  0x4c   :  { %v6355_v48 = vld [vmem:[#allocation5 + $0x6c0] sm:$0xf]  ;;  %v8395_v49 = vld [vmem:[#allocation5 + $0x6cc] sm:$0xf0]  ;;  %v6228_v54 = vor.u32 %v8363_v47, %v6227_v45  ;;  %1840 = vmatpush.bf16.msrb.mxu3 %v6500_v46 }
  0x4d   :  { %v6483_v50 = vld [vmem:[#allocation5 + $0x7c0] sm:$0xf]  ;;  %v8427_v51 = vld [vmem:[#allocation5 + $0x7cc] sm:$0xf0]  ;;  %v6356_v55 = vor.u32 %v8395_v49, %v6355_v48  ;;  %1802 = vmatpush.bf16.msrb.mxu0 %v6100_v52 }
  0x4e   :  { %v6083_v53 = vld [vmem:[#allocation5 + $0x4a0] sm:$0xf]  ;;  %v8327_v56 = vld [vmem:[#allocation5 + $0x4ac] sm:$0xf0]  ;;  %v6484_v59 = vor.u32 %v8427_v51, %v6483_v50  ;;  %1815 = vmatpush.bf16.msrb.mxu1 %v6228_v54 }
  0x4f   :  { %v6211_v57 = vld [vmem:[#allocation5 + $0x5a0] sm:$0xf]  ;;  %v8359_v58 = vld [vmem:[#allocation5 + $0x5ac] sm:$0xf0]  ;;  %v6084_v0 = vor.u32 %v8327_v56, %v6083_v53  ;;  %1828 = vmatpush.bf16.msrb.mxu2 %v6356_v55 }
  0x50   :  { %v6339_v60 = vld [vmem:[#allocation5 + $0x6a0] sm:$0xf]  ;;  %v8391_v61 = vld [vmem:[#allocation5 + $0x6ac] sm:$0xf0]  ;;  %v6212_v1 = vor.u32 %v8359_v58, %v6211_v57  ;;  %1841 = vmatpush.bf16.msrb.mxu3 %v6484_v59 }
  0x51   :  { %v6467_v62 = vld [vmem:[#allocation5 + $0x7a0] sm:$0xf]  ;;  %v8423_v63 = vld [vmem:[#allocation5 + $0x7ac] sm:$0xf0]  ;;  %v6340_v4 = vor.u32 %v8391_v61, %v6339_v60  ;;  %1803 = vmatpush.bf16.msrb.mxu0 %v6084_v0 }
  0x52   :  { %v171_v3 = vld [vmem:[#allocation2] sm:$0xff]  ;;  %v8323_v6 = vld [vmem:[#allocation5 + $0x48c] sm:$0xf0]  ;;  %v6468_v11 = vor.u32 %v8423_v63, %v6467_v62  ;;  %1816 = vmatpush.bf16.msrb.mxu1 %v6212_v1 }
  0x53   :  { %v6067_v5 = vld [vmem:[#allocation5 + $0x480] sm:$0xf]  ;;  %v445_v9 = vunpack.c.l.b16 %v171_v3  ;;  %v8355_v12 = vld [vmem:[#allocation5 + $0x58c] sm:$0xf0]  ;;  %v446_v15 = vunpack.c.h.b16 %v171_v3  ;;  %1829 = vmatpush.bf16.msrb.mxu2 %v6340_v4  ;;  %v174_v3 = vld [vmem:[#allocation2 + $0x18] sm:$0xff] }
  0x54   :  { %v6195_v7 = vld [vmem:[#allocation5 + $0x580] sm:$0xf]  ;;  %v8387_v14 = vld [vmem:[#allocation5 + $0x68c] sm:$0xf0]  ;;  %v6068_v21 = vor.u32 %v8323_v6, %v6067_v5  ;;  %1842 = vmatpush.bf16.msrb.mxu3 %v6468_v11 }
  0x55   :  { %v6323_v13 = vld [vmem:[#allocation5 + $0x680] sm:$0xf]  ;;  %v8419_v17 = vld [vmem:[#allocation5 + $0x78c] sm:$0xf0]  ;;  %v9232_v19 = vpack.c.b16 %v445_v9, %v445_v9  ;;  %v9236_v22 = vpack.c.b16 %v446_v15, %v446_v15  ;;  %v6196_v23 = vor.u32 %v8355_v12, %v6195_v7  ;;  %v5605_v9 = vld [vmem:[#allocation5 + $0xf0] sm:$0xf0]  ;;  %v451_v15 = vunpack.c.l.b16 %v174_v3 }
  0x56   :  { %v6451_v16 = vld [vmem:[#allocation5 + $0x780] sm:$0xf]  ;;  %v6324_v24 = vor.u32 %v8387_v14, %v6323_v13  ;;  %v8319_v26 = vld [vmem:[#allocation5 + $0x46c] sm:$0xf0]  ;;  %1804 = vmatpush.bf16.msrb.mxu0 %v6068_v21  ;;  %v5733_v12 = vld [vmem:[#allocation5 + $0x1f0] sm:$0xf0] }
  0x57   :  { %v6051_v25 = vld [vmem:[#allocation5 + $0x460] sm:$0xf]  ;;  %v6452_v28 = vor.u32 %v8419_v17, %v6451_v16  ;;  %v8351_v29 = vld [vmem:[#allocation5 + $0x56c] sm:$0xf0]  ;;  %1757 = vmatmul.bf16.vlgmr.msra.gmra.mxu0 %v9232_v19  ;;  %1770 = vmatmul.bf16.vlgmr.msra.gmra.mxu1 %v9236_v22  ;;  %v8269_v13 = vld [vmem:[#allocation5 + $0x2e4] sm:$0xf] }
  0x58   :  { %v6179_v27 = vld [vmem:[#allocation5 + $0x560] sm:$0xf]  ;;  %v8383_v31 = vld [vmem:[#allocation5 + $0x66c] sm:$0xf0]  ;;  %v6052_v34 = vor.u32 %v8319_v26, %v6051_v25  ;;  %1817 = vmatpush.bf16.msrb.mxu1 %v6196_v23  ;;  %1830 = vmatpush.bf16.msrb.mxu2 %v6324_v24  ;;  %v5861_v14 = vld [vmem:[#allocation5 + $0x2f0] sm:$0xf0]  ;;  %v452_v25 = vunpack.c.h.b16 %v174_v3 }
  0x59   :  { %v6307_v30 = vld [vmem:[#allocation5 + $0x660] sm:$0xf]  ;;  %v8415_v33 = vld [vmem:[#allocation5 + $0x76c] sm:$0xf0]  ;;  %v6180_v35 = vor.u32 %v8351_v29, %v6179_v27  ;;  %1843 = vmatpush.bf16.msrb.mxu3 %v6452_v28  ;;  %v8301_v21 = vld [vmem:[#allocation5 + $0x3e4] sm:$0xf]  ;;  %v5608_v27 = vor.u32 %v8205_v8, %v5605_v9  ;;  %v5736_v29 = vor.u32 %v8237_v10, %v5733_v12 }
  0x5a   :  { %v6435_v32 = vld [vmem:[#allocation5 + $0x760] sm:$0xf]  ;;  %v6308_v36 = vor.u32 %v8383_v31, %v6307_v30  ;;  %v8315_v38 = vld [vmem:[#allocation5 + $0x44c] sm:$0xf0]  ;;  %1805 = vmatpush.bf16.msrb.mxu0 %v6052_v34  ;;  %v5989_v23 = vld [vmem:[#allocation5 + $0x3f0] sm:$0xf0]  ;;  %v5864_v30 = vor.u32 %v8269_v13, %v5861_v14 }
  0x5b   :  { %v6035_v37 = vld [vmem:[#allocation5 + $0x440] sm:$0xf]  ;;  %v6436_v40 = vor.u32 %v8415_v33, %v6435_v32  ;;  %v8347_v41 = vld [vmem:[#allocation5 + $0x54c] sm:$0xf0]  ;;  %v8201_v31 = vld [vmem:[#allocation5 + $0xc4] sm:$0xf]  ;;  %v5992_v34 = vor.u32 %v8301_v21, %v5989_v23 }
  0x5c   :  { %v6163_v39 = vld [vmem:[#allocation5 + $0x540] sm:$0xf]  ;;  %v8379_v43 = vld [vmem:[#allocation5 + $0x64c] sm:$0xf0]  ;;  %v6036_v46 = vor.u32 %v8315_v38, %v6035_v37  ;;  %1818 = vmatpush.bf16.msrb.mxu1 %v6180_v35  ;;  %1831 = vmatpush.bf16.msrb.mxu2 %v6308_v36  ;;  %v5589_v32 = vld [vmem:[#allocation5 + $0xd0] sm:$0xf0]  ;;  %v9242_v38 = vpack.c.b16 %v451_v15, %v451_v15 }
  0x5d   :  { %v6291_v42 = vld [vmem:[#allocation5 + $0x640] sm:$0xf]  ;;  %v8411_v45 = vld [vmem:[#allocation5 + $0x74c] sm:$0xf0]  ;;  %v6164_v47 = vor.u32 %v8347_v41, %v6163_v39  ;;  %1844 = vmatpush.bf16.msrb.mxu3 %v6436_v40  ;;  %v8233_v33 = vld [vmem:[#allocation5 + $0x1c4] sm:$0xf] }
  0x5e   :  { %v6419_v44 = vld [vmem:[#allocation5 + $0x740] sm:$0xf]  ;;  %v6292_v48 = vor.u32 %v8379_v43, %v6291_v42  ;;  %v8311_v50 = vld [vmem:[#allocation5 + $0x42c] sm:$0xf0]  ;;  %1806 = vmatpush.bf16.msrb.mxu0 %v6036_v46  ;;  %v5717_v35 = vld [vmem:[#allocation5 + $0x1d0] sm:$0xf0]  ;;  %v9246_v42 = vpack.c.b16 %v452_v25, %v452_v25  ;;  %v5592_v43 = vor.u32 %v8201_v31, %v5589_v32 }
  0x5f   :  { %v6019_v49 = vld [vmem:[#allocation5 + $0x420] sm:$0xf]  ;;  %v6420_v52 = vor.u32 %v8411_v45, %v6419_v44  ;;  %v8343_v53 = vld [vmem:[#allocation5 + $0x52c] sm:$0xf0]  ;;  %v8265_v36 = vld [vmem:[#allocation5 + $0x2c4] sm:$0xf]  ;;  %v5720_v45 = vor.u32 %v8233_v33, %v5717_v35 }
  0x60   :  { %v6147_v51 = vld [vmem:[#allocation5 + $0x520] sm:$0xf]  ;;  %v8375_v55 = vld [vmem:[#allocation5 + $0x62c] sm:$0xf0]  ;;  %v6020_v59 = vor.u32 %v8311_v50, %v6019_v49  ;;  %1819 = vmatpush.bf16.msrb.mxu1 %v6164_v47  ;;  %1832 = vmatpush.bf16.msrb.mxu2 %v6292_v48  ;;  %v5845_v37 = vld [vmem:[#allocation5 + $0x2d0] sm:$0xf0] }
  0x61   :  { %v6275_v54 = vld [vmem:[#allocation5 + $0x620] sm:$0xf]  ;;  %v8407_v57 = vld [vmem:[#allocation5 + $0x72c] sm:$0xf0]  ;;  %v6148_v63 = vor.u32 %v8343_v53, %v6147_v51  ;;  %1845 = vmatpush.bf16.msrb.mxu3 %v6420_v52  ;;  %v8297_v39 = vld [vmem:[#allocation5 + $0x3c4] sm:$0xf]  ;;  %v5848_v46 = vor.u32 %v8265_v36, %v5845_v37 }
  0x62   :  { %v6403_v56 = vld [vmem:[#allocation5 + $0x720] sm:$0xf]  ;;  %v8307_v60 = vld [vmem:[#allocation5 + $0x40c] sm:$0xf0]  ;;  %v6276_v0 = vor.u32 %v8375_v55, %v6275_v54  ;;  %1807 = vmatpush.bf16.msrb.mxu0 %v6020_v59  ;;  %v5973_v40 = vld [vmem:[#allocation5 + $0x3d0] sm:$0xf0] }
  0x63   :  { %v6003_v58 = vld [vmem:[#allocation5 + $0x400] sm:$0xf]  ;;  %v8339_v62 = vld [vmem:[#allocation5 + $0x50c] sm:$0xf0]  ;;  %v6404_v4 = vor.u32 %v8407_v57, %v6403_v56  ;;  %v8197_v47 = vld [vmem:[#allocation5 + $0xa4] sm:$0xf]  ;;  %v5976_v50 = vor.u32 %v8297_v39, %v5973_v40 }
  0x64   :  { %v6131_v61 = vld [vmem:[#allocation5 + $0x500] sm:$0xf]  ;;  %v8371_v2 = vld [vmem:[#allocation5 + $0x60c] sm:$0xf0]  ;;  %v6004_v11 = vor.u32 %v8307_v60, %v6003_v58  ;;  %1820 = vmatpush.bf16.msrb.mxu1 %v6148_v63  ;;  %1833 = vmatpush.bf16.msrb.mxu2 %v6276_v0  ;;  %v5573_v48 = vld [vmem:[#allocation5 + $0xb0] sm:$0xf0] }
  0x65   :  { %v6259_v1 = vld [vmem:[#allocation5 + $0x600] sm:$0xf]  ;;  %v8403_v6 = vld [vmem:[#allocation5 + $0x70c] sm:$0xf0]  ;;  %v6132_v16 = vor.u32 %v8339_v62, %v6131_v61  ;;  %1846 = vmatpush.bf16.msrb.mxu3 %v6404_v4  ;;  %v8229_v49 = vld [vmem:[#allocation5 + $0x1a4] sm:$0xf]  ;;  %v5576_v56 = vor.u32 %v8197_v47, %v5573_v48 }
  0x66   :  { %v6387_v5 = vld [vmem:[#allocation5 + $0x700] sm:$0xf]  ;;  %v173_v7 = vld [vmem:[#allocation2 + $0x10] sm:$0xff]  ;;  %v6260_v17 = vor.u32 %v8371_v2, %v6259_v1  ;;  %1808 = vmatpush.bf16.msrb.mxu0 %v6004_v11  ;;  %v8261_v52 = vld [vmem:[#allocation5 + $0x2a4] sm:$0xf] }
  0x67   :  { %v449_v24 = vunpack.c.l.b16 %v173_v7  ;;  %v6388_v26 = vor.u32 %v8403_v6, %v6387_v5  ;;  %v450_v28 = vunpack.c.h.b16 %v173_v7  ;;  %v5701_v51 = vld [vmem:[#allocation5 + $0x1b0] sm:$0xf0]  ;;  %v8293_v54 = vld [vmem:[#allocation5 + $0x3a4] sm:$0xf] }
  0x68   :  { %1821 = vmatpush.bf16.msrb.mxu1 %v6132_v16  ;;  %1834 = vmatpush.bf16.msrb.mxu2 %v6260_v17  ;;  %v5829_v53 = vld [vmem:[#allocation5 + $0x2b0] sm:$0xf0]  ;;  %v5704_v57 = vor.u32 %v8229_v49, %v5701_v51  ;;  %v8193_v59 = vld [vmem:[#allocation5 + $0x84] sm:$0xf] }
  0x69   :  { %v9244_v41 = vpack.c.b16 %v449_v24, %v449_v24  ;;  %1847 = vmatpush.bf16.msrb.mxu3 %v6388_v26  ;;  %v9248_v44 = vpack.c.b16 %v450_v28, %v450_v28  ;;  %v5957_v55 = vld [vmem:[#allocation5 + $0x3b0] sm:$0xf0]  ;;  %v5832_v58 = vor.u32 %v8261_v52, %v5829_v53  ;;  %v8225_v61 = vld [vmem:[#allocation5 + $0x184] sm:$0xf] }
  0x6a   :  { %1853 = vmatpush.bf16.msra.mxu0 %v5608_v27  ;;  %v5557_v60 = vld [vmem:[#allocation5 + $0x90] sm:$0xf0]  ;;  %v5960_v62 = vor.u32 %v8293_v54, %v5957_v55  ;;  %v8257_v0 = vld [vmem:[#allocation5 + $0x284] sm:$0xf] }
  0x6b   :  { %1835 = vmatmul.bf16.vlgmr.msrb.gmra.mxu2 %v9242_v38  ;;  %1809 = vmatmul.bf16.vlgmr.msrb.gmra.mxu0 %v9244_v41  ;;  %v5685_v63 = vld [vmem:[#allocation5 + $0x190] sm:$0xf0]  ;;  %v8289_v2 = vld [vmem:[#allocation5 + $0x384] sm:$0xf]  ;;  %v5560_v4 = vor.u32 %v8193_v59, %v5557_v60 }
  0x6c   :  { %1866 = vmatpush.bf16.msra.mxu1 %v5736_v29  ;;  %1879 = vmatpush.bf16.msra.mxu2 %v5864_v30  ;;  %v5813_v1 = vld [vmem:[#allocation5 + $0x290] sm:$0xf0]  ;;  %v5688_v5 = vor.u32 %v8225_v61, %v5685_v63  ;;  %v8189_v7 = vld [vmem:[#allocation5 + $0x64] sm:$0xf] }
  0x6d   :  { %1892 = vmatpush.bf16.msra.mxu3 %v5992_v34  ;;  %1822 = vmatmul.bf16.vlgmr.msrb.gmra.mxu1 %v9248_v44  ;;  %v5941_v3 = vld [vmem:[#allocation5 + $0x390] sm:$0xf0]  ;;  %v5816_v6 = vor.u32 %v8257_v0, %v5813_v1  ;;  %v8221_v9 = vld [vmem:[#allocation5 + $0x164] sm:$0xf] }
  0x6e   :  { %1848 = vmatmul.bf16.vlgmr.msrb.gmra.mxu3 %v9246_v42  ;;  %1854 = vmatpush.bf16.msra.mxu0 %v5592_v43  ;;  %v5541_v8 = vld [vmem:[#allocation5 + $0x70] sm:$0xf0]  ;;  %v5944_v10 = vor.u32 %v8289_v2, %v5941_v3  ;;  %v8253_v12 = vld [vmem:[#allocation5 + $0x264] sm:$0xf] }
  0x6f   :  { %v5669_v11 = vld [vmem:[#allocation5 + $0x170] sm:$0xf0]  ;;  %v8285_v14 = vld [vmem:[#allocation5 + $0x364] sm:$0xf]  ;;  %v5544_v16 = vor.u32 %v8189_v7, %v5541_v8 }
  0x70   :  { %1867 = vmatpush.bf16.msra.mxu1 %v5720_v45  ;;  %1880 = vmatpush.bf16.msra.mxu2 %v5848_v46  ;;  %v5797_v13 = vld [vmem:[#allocation5 + $0x270] sm:$0xf0]  ;;  %v5672_v17 = vor.u32 %v8221_v9, %v5669_v11  ;;  %v8185_v23 = vld [vmem:[#allocation5 + $0x44] sm:$0xf] }
  0x71   :  { %1893 = vmatpush.bf16.msra.mxu3 %v5976_v50  ;;  %v5925_v15 = vld [vmem:[#allocation5 + $0x370] sm:$0xf0]  ;;  %v5800_v21 = vor.u32 %v8253_v12, %v5797_v13  ;;  %v8217_v25 = vld [vmem:[#allocation5 + $0x144] sm:$0xf] }
  0x72   :  { %1855 = vmatpush.bf16.msra.mxu0 %v5576_v56  ;;  %v5525_v24 = vld [vmem:[#allocation5 + $0x50] sm:$0xf0]  ;;  %v5928_v26 = vor.u32 %v8285_v14, %v5925_v15  ;;  %v8249_v28 = vld [vmem:[#allocation5 + $0x244] sm:$0xf] }
  0x73   :  { %v5653_v27 = vld [vmem:[#allocation5 + $0x150] sm:$0xf0]  ;;  %v8281_v30 = vld [vmem:[#allocation5 + $0x344] sm:$0xf]  ;;  %v5528_v32 = vor.u32 %v8185_v23, %v5525_v24 }
  0x74   :  { %1868 = vmatpush.bf16.msra.mxu1 %v5704_v57  ;;  %1881 = vmatpush.bf16.msra.mxu2 %v5832_v58  ;;  %v5781_v29 = vld [vmem:[#allocation5 + $0x250] sm:$0xf0]  ;;  %v5656_v33 = vor.u32 %v8217_v25, %v5653_v27  ;;  %v8181_v35 = vld [vmem:[#allocation5 + $0x24] sm:$0xf] }
  0x75   :  { %1894 = vmatpush.bf16.msra.mxu3 %v5960_v62  ;;  %v5909_v31 = vld [vmem:[#allocation5 + $0x350] sm:$0xf0]  ;;  %v5784_v34 = vor.u32 %v8249_v28, %v5781_v29  ;;  %v8213_v37 = vld [vmem:[#allocation5 + $0x124] sm:$0xf] }
  0x76   :  { %1856 = vmatpush.bf16.msra.mxu0 %v5560_v4  ;;  %v5509_v36 = vld [vmem:[#allocation5 + $0x30] sm:$0xf0]  ;;  %v5912_v39 = vor.u32 %v8281_v30, %v5909_v31  ;;  %v8245_v43 = vld [vmem:[#allocation5 + $0x224] sm:$0xf] }
  0x77   :  { %v5637_v40 = vld [vmem:[#allocation5 + $0x130] sm:$0xf0]  ;;  %v8277_v46 = vld [vmem:[#allocation5 + $0x324] sm:$0xf]  ;;  %v5512_v48 = vor.u32 %v8181_v35, %v5509_v36 }
  0x78   :  { %1869 = vmatpush.bf16.msra.mxu1 %v5688_v5  ;;  %1882 = vmatpush.bf16.msra.mxu2 %v5816_v6  ;;  %v5765_v45 = vld [vmem:[#allocation5 + $0x230] sm:$0xf0]  ;;  %v8177_v49 = vld [vmem:[#allocation5 + $0x4] sm:$0xf]  ;;  %v5640_v51 = vor.u32 %v8213_v37, %v5637_v40 }
  0x79   :  { %1895 = vmatpush.bf16.msra.mxu3 %v5944_v10  ;;  %v5893_v47 = vld [vmem:[#allocation5 + $0x330] sm:$0xf0]  ;;  %v5768_v52 = vor.u32 %v8245_v43, %v5765_v45  ;;  %v8209_v53 = vld [vmem:[#allocation5 + $0x104] sm:$0xf] }
  0x7a   :  { %1857 = vmatpush.bf16.msra.mxu0 %v5544_v16  ;;  %v5493_v50 = vld [vmem:[#allocation5 + $0x10] sm:$0xf0]  ;;  %v8241_v55 = vld [vmem:[#allocation5 + $0x204] sm:$0xf]  ;;  %v5896_v56 = vor.u32 %v8277_v46, %v5893_v47 }
  0x7b   :  { %v5621_v54 = vld [vmem:[#allocation5 + $0x110] sm:$0xf0]  ;;  %v8273_v58 = vld [vmem:[#allocation5 + $0x304] sm:$0xf]  ;;  %v5496_v63 = vor.u32 %v8177_v49, %v5493_v50 }
  0x7c   :  { %1870 = vmatpush.bf16.msra.mxu1 %v5672_v17  ;;  %1883 = vmatpush.bf16.msra.mxu2 %v5800_v21  ;;  %v5749_v57 = vld [vmem:[#allocation5 + $0x210] sm:$0xf0]  ;;  %v8333_v60 = vld [vmem:[#allocation5 + $0x4e4] sm:$0xf]  ;;  %v5624_v3 = vor.u32 %v8209_v53, %v5621_v54 }
  0x7d   :  { %1896 = vmatpush.bf16.msra.mxu3 %v5928_v26  ;;  %v5877_v59 = vld [vmem:[#allocation5 + $0x310] sm:$0xf0]  ;;  %v8365_v62 = vld [vmem:[#allocation5 + $0x5e4] sm:$0xf]  ;;  %v5752_v4 = vor.u32 %v8241_v55, %v5749_v57 }
  0x7e   :  { %1858 = vmatpush.bf16.msra.mxu0 %v5528_v32  ;;  %v6117_v61 = vld [vmem:[#allocation5 + $0x4f0] sm:$0xf0]  ;;  %v8397_v1 = vld [vmem:[#allocation5 + $0x6e4] sm:$0xf]  ;;  %v5880_v7 = vor.u32 %v8273_v58, %v5877_v59 }
  0x7f   :  { %v6245_v0 = vld [vmem:[#allocation5 + $0x5f0] sm:$0xf0]  ;;  %v8429_v5 = vld [vmem:[#allocation5 + $0x7e4] sm:$0xf]  ;;  %v6120_v8 = vor.u32 %v8333_v60, %v6117_v61 }
  0x80   :  { %1871 = vmatpush.bf16.msra.mxu1 %v5656_v33  ;;  %1884 = vmatpush.bf16.msra.mxu2 %v5784_v34  ;;  %v6373_v2 = vld [vmem:[#allocation5 + $0x6f0] sm:$0xf0]  ;;  %v6248_v9 = vor.u32 %v8365_v62, %v6245_v0  ;;  %v8329_v11 = vld [vmem:[#allocation5 + $0x4c4] sm:$0xf] }
  0x81   :  { %1897 = vmatpush.bf16.msra.mxu3 %v5912_v39  ;;  %v6501_v6 = vld [vmem:[#allocation5 + $0x7f0] sm:$0xf0]  ;;  %v6376_v10 = vor.u32 %v8397_v1, %v6373_v2  ;;  %v8361_v13 = vld [vmem:[#allocation5 + $0x5c4] sm:$0xf] }
  0x82   :  { %1859 = vmatpush.bf16.msra.mxu0 %v5512_v48  ;;  %v6101_v12 = vld [vmem:[#allocation5 + $0x4d0] sm:$0xf0]  ;;  %v6504_v14 = vor.u32 %v8429_v5, %v6501_v6  ;;  %v8393_v16 = vld [vmem:[#allocation5 + $0x6c4] sm:$0xf] }
  0x83   :  { %v6229_v15 = vld [vmem:[#allocation5 + $0x5d0] sm:$0xf0]  ;;  %v8425_v21 = vld [vmem:[#allocation5 + $0x7c4] sm:$0xf]  ;;  %v6104_v24 = vor.u32 %v8329_v11, %v6101_v12 }
  0x84   :  { %1872 = vmatpush.bf16.msra.mxu1 %v5640_v51  ;;  %1885 = vmatpush.bf16.msra.mxu2 %v5768_v52  ;;  %v6357_v17 = vld [vmem:[#allocation5 + $0x6d0] sm:$0xf0]  ;;  %v6232_v25 = vor.u32 %v8361_v13, %v6229_v15  ;;  %v8325_v27 = vld [vmem:[#allocation5 + $0x4a4] sm:$0xf] }
  0x85   :  { %1898 = vmatpush.bf16.msra.mxu3 %v5896_v56  ;;  %v6485_v23 = vld [vmem:[#allocation5 + $0x7d0] sm:$0xf0]  ;;  %v6360_v26 = vor.u32 %v8393_v16, %v6357_v17  ;;  %v8357_v29 = vld [vmem:[#allocation5 + $0x5a4] sm:$0xf] }
  0x86   :  { %1860 = vmatpush.bf16.msra.mxu0 %v5496_v63  ;;  %v6085_v28 = vld [vmem:[#allocation5 + $0x4b0] sm:$0xf0]  ;;  %v6488_v30 = vor.u32 %v8425_v21, %v6485_v23  ;;  %v8389_v32 = vld [vmem:[#allocation5 + $0x6a4] sm:$0xf] }
  0x87   :  { %v6213_v31 = vld [vmem:[#allocation5 + $0x5b0] sm:$0xf0]  ;;  %v8421_v34 = vld [vmem:[#allocation5 + $0x7a4] sm:$0xf]  ;;  %v6088_v36 = vor.u32 %v8325_v27, %v6085_v28 }
  0x88   :  { %1873 = vmatpush.bf16.msra.mxu1 %v5624_v3  ;;  %1886 = vmatpush.bf16.msra.mxu2 %v5752_v4  ;;  %v6341_v33 = vld [vmem:[#allocation5 + $0x6b0] sm:$0xf0]  ;;  %v6216_v37 = vor.u32 %v8357_v29, %v6213_v31  ;;  %v8321_v40 = vld [vmem:[#allocation5 + $0x484] sm:$0xf] }
  0x89   :  { %1899 = vmatpush.bf16.msra.mxu3 %v5880_v7  ;;  %v6469_v35 = vld [vmem:[#allocation5 + $0x7b0] sm:$0xf0]  ;;  %1861 = vmatmul.bf16.vlgmr.msra.gmra.mxu0 %v9232_v19  ;;  %v6344_v39 = vor.u32 %v8389_v32, %v6341_v33  ;;  %v8353_v45 = vld [vmem:[#allocation5 + $0x584] sm:$0xf] }
  0x8a   :  { %1905 = vmatpush.bf16.msrb.mxu0 %v6120_v8  ;;  %v6069_v43 = vld [vmem:[#allocation5 + $0x490] sm:$0xf0]  ;;  %v6472_v46 = vor.u32 %v8421_v34, %v6469_v35  ;;  %v8385_v48 = vld [vmem:[#allocation5 + $0x684] sm:$0xf] }
  0x8b   :  { %1887 = vmatmul.bf16.vlgmr.msra.gmra.mxu2 %v9230_v18  ;;  %1874 = vmatmul.bf16.vlgmr.msra.gmra.mxu1 %v9236_v22  ;;  %v6197_v47 = vld [vmem:[#allocation5 + $0x590] sm:$0xf0]  ;;  %v8417_v50 = vld [vmem:[#allocation5 + $0x784] sm:$0xf]  ;;  %v6072_v52 = vor.u32 %v8321_v40, %v6069_v43  ;;  %v5611_v43 = vld [vmem:[#allocation5 + $0xe8] sm:$0xf] }
  0x8c   :  { %1918 = vmatpush.bf16.msrb.mxu1 %v6248_v9  ;;  %1931 = vmatpush.bf16.msrb.mxu2 %v6376_v10  ;;  %v6325_v49 = vld [vmem:[#allocation5 + $0x690] sm:$0xf0]  ;;  %v6200_v53 = vor.u32 %v8353_v45, %v6197_v47  ;;  %v8317_v55 = vld [vmem:[#allocation5 + $0x464] sm:$0xf]  ;;  %v8208_v45 = vld [vmem:[#allocation5 + $0xf4] sm:$0xf0] }
  0x8d   :  { %1944 = vmatpush.bf16.msrb.mxu3 %v6504_v14  ;;  %v6453_v51 = vld [vmem:[#allocation5 + $0x790] sm:$0xf0]  ;;  %v6328_v54 = vor.u32 %v8385_v48, %v6325_v49  ;;  %v8349_v57 = vld [vmem:[#allocation5 + $0x564] sm:$0xf]  ;;  %v8240_v48 = vld [vmem:[#allocation5 + $0x1f4] sm:$0xf0] }
  0x8e   :  { %1900 = vmatmul.bf16.vlgmr.msra.gmra.mxu3 %v9234_v20  ;;  %1906 = vmatpush.bf16.msrb.mxu0 %v6104_v24  ;;  %v6053_v56 = vld [vmem:[#allocation5 + $0x470] sm:$0xf0]  ;;  %v6456_v58 = vor.u32 %v8417_v50, %v6453_v51  ;;  %v8381_v60 = vld [vmem:[#allocation5 + $0x664] sm:$0xf]  ;;  %v5867_v49 = vld [vmem:[#allocation5 + $0x2e8] sm:$0xf] }
  0x8f   :  { %v6181_v59 = vld [vmem:[#allocation5 + $0x570] sm:$0xf0]  ;;  %v8413_v62 = vld [vmem:[#allocation5 + $0x764] sm:$0xf]  ;;  %v6056_v0 = vor.u32 %v8317_v55, %v6053_v56  ;;  %v8272_v50 = vld [vmem:[#allocation5 + $0x2f4] sm:$0xf0]  ;;  %v5612_v56 = vor.u32 %v8208_v45, %v5611_v43 }
  0x90   :  { %1919 = vmatpush.bf16.msrb.mxu1 %v6232_v25  ;;  %1932 = vmatpush.bf16.msrb.mxu2 %v6360_v26  ;;  %v6309_v61 = vld [vmem:[#allocation5 + $0x670] sm:$0xf0]  ;;  %v6184_v1 = vor.u32 %v8349_v57, %v6181_v59  ;;  %v8313_v3 = vld [vmem:[#allocation5 + $0x444] sm:$0xf]  ;;  %v5595_v59 = vld [vmem:[#allocation5 + $0xc8] sm:$0xf] }
  0x91   :  { %1945 = vmatpush.bf16.msrb.mxu3 %v6488_v30  ;;  %v6437_v63 = vld [vmem:[#allocation5 + $0x770] sm:$0xf0]  ;;  %v6312_v2 = vor.u32 %v8381_v60, %v6309_v61  ;;  %v8345_v5 = vld [vmem:[#allocation5 + $0x544] sm:$0xf]  ;;  %v8204_v60 = vld [vmem:[#allocation5 + $0xd4] sm:$0xf0] }
  0x92   :  { %1907 = vmatpush.bf16.msrb.mxu0 %v6088_v36  ;;  %v6037_v4 = vld [vmem:[#allocation5 + $0x450] sm:$0xf0]  ;;  %v6440_v6 = vor.u32 %v8413_v62, %v6437_v63  ;;  %v8377_v8 = vld [vmem:[#allocation5 + $0x644] sm:$0xf]  ;;  %v5723_v61 = vld [vmem:[#allocation5 + $0x1c8] sm:$0xf] }
  0x93   :  { %v6165_v7 = vld [vmem:[#allocation5 + $0x550] sm:$0xf0]  ;;  %v8409_v10 = vld [vmem:[#allocation5 + $0x744] sm:$0xf]  ;;  %v6040_v12 = vor.u32 %v8313_v3, %v6037_v4  ;;  %v8236_v63 = vld [vmem:[#allocation5 + $0x1d4] sm:$0xf0]  ;;  %v5596_v4 = vor.u32 %v8204_v60, %v5595_v59 }
  0x94   :  { %1920 = vmatpush.bf16.msrb.mxu1 %v6216_v37  ;;  %1933 = vmatpush.bf16.msrb.mxu2 %v6344_v39  ;;  %v6293_v9 = vld [vmem:[#allocation5 + $0x650] sm:$0xf0]  ;;  %v6168_v13 = vor.u32 %v8345_v5, %v6165_v7  ;;  %v8309_v15 = vld [vmem:[#allocation5 + $0x424] sm:$0xf]  ;;  %v8300_v3 = vld [vmem:[#allocation5 + $0x3d4] sm:$0xf0]  ;;  %v5724_v5 = vor.u32 %v8236_v63, %v5723_v61 }
  0x95   :  { %1946 = vmatpush.bf16.msrb.mxu3 %v6472_v46  ;;  %v6421_v11 = vld [vmem:[#allocation5 + $0x750] sm:$0xf0]  ;;  %v6296_v14 = vor.u32 %v8377_v8, %v6293_v9  ;;  %v8341_v17 = vld [vmem:[#allocation5 + $0x524] sm:$0xf]  ;;  %v5739_v46 = vld [vmem:[#allocation5 + $0x1e8] sm:$0xf] }
  0x96   :  { %1908 = vmatpush.bf16.msrb.mxu0 %v6072_v52  ;;  %v6021_v16 = vld [vmem:[#allocation5 + $0x430] sm:$0xf0]  ;;  %v6424_v21 = vor.u32 %v8409_v10, %v6421_v11  ;;  %v8373_v24 = vld [vmem:[#allocation5 + $0x624] sm:$0xf]  ;;  %v5740_v57 = vor.u32 %v8240_v48, %v5739_v46  ;;  %v5579_v7 = vld [vmem:[#allocation5 + $0xa8] sm:$0xf] }
  0x97   :  { %v6149_v23 = vld [vmem:[#allocation5 + $0x530] sm:$0xf0]  ;;  %v8405_v26 = vld [vmem:[#allocation5 + $0x724] sm:$0xf]  ;;  %v6024_v28 = vor.u32 %v8309_v15, %v6021_v16  ;;  %v8200_v8 = vld [vmem:[#allocation5 + $0xb4] sm:$0xf0] }
  0x98   :  { %1921 = vmatpush.bf16.msrb.mxu1 %v6200_v53  ;;  %1934 = vmatpush.bf16.msrb.mxu2 %v6328_v54  ;;  %v6277_v25 = vld [vmem:[#allocation5 + $0x630] sm:$0xf0]  ;;  %v8305_v29 = vld [vmem:[#allocation5 + $0x404] sm:$0xf]  ;;  %v6152_v31 = vor.u32 %v8341_v17, %v6149_v23  ;;  %v5995_v53 = vld [vmem:[#allocation5 + $0x3e8] sm:$0xf]  ;;  %v5580_v16 = vor.u32 %v8200_v8, %v5579_v7 }
  0x99   :  { %1947 = vmatpush.bf16.msrb.mxu3 %v6456_v58  ;;  %v6405_v27 = vld [vmem:[#allocation5 + $0x730] sm:$0xf0]  ;;  %v6280_v32 = vor.u32 %v8373_v24, %v6277_v25  ;;  %v8337_v33 = vld [vmem:[#allocation5 + $0x504] sm:$0xf]  ;;  %v8304_v54 = vld [vmem:[#allocation5 + $0x3f4] sm:$0xf0]  ;;  %v5868_v58 = vor.u32 %v8272_v50, %v5867_v49 }
  0x9a   :  { %1909 = vmatpush.bf16.msrb.mxu0 %v6056_v0  ;;  %v6005_v30 = vld [vmem:[#allocation5 + $0x410] sm:$0xf0]  ;;  %v8369_v35 = vld [vmem:[#allocation5 + $0x604] sm:$0xf]  ;;  %v6408_v36 = vor.u32 %v8405_v26, %v6405_v27  ;;  %v5996_v62 = vor.u32 %v8304_v54, %v5995_v53  ;;  %v5851_v0 = vld [vmem:[#allocation5 + $0x2c8] sm:$0xf] }
  0x9b   :  { %v6133_v34 = vld [vmem:[#allocation5 + $0x510] sm:$0xf0]  ;;  %v8401_v39 = vld [vmem:[#allocation5 + $0x704] sm:$0xf]  ;;  %v6008_v47 = vor.u32 %v8305_v29, %v6005_v30  ;;  %v5707_v9 = vld [vmem:[#allocation5 + $0x1a8] sm:$0xf] }
  0x9c   :  { %1922 = vmatpush.bf16.msrb.mxu1 %v6184_v1  ;;  %1935 = vmatpush.bf16.msrb.mxu2 %v6312_v2  ;;  %v6261_v37 = vld [vmem:[#allocation5 + $0x610] sm:$0xf0]  ;;  %v6136_v51 = vor.u32 %v8337_v33, %v6133_v34  ;;  %v8268_v1 = vld [vmem:[#allocation5 + $0x2d4] sm:$0xf0]  ;;  %v5979_v2 = vld [vmem:[#allocation5 + $0x3c8] sm:$0xf] }
  0x9d   :  { %1948 = vmatpush.bf16.msrb.mxu3 %v6440_v6  ;;  %v6389_v40 = vld [vmem:[#allocation5 + $0x710] sm:$0xf0]  ;;  %v6264_v52 = vor.u32 %v8369_v35, %v6261_v37  ;;  %v5852_v6 = vor.u32 %v8268_v1, %v5851_v0  ;;  %v5980_v10 = vor.u32 %v8300_v3, %v5979_v2  ;;  %v8232_v11 = vld [vmem:[#allocation5 + $0x1b4] sm:$0xf0]  ;;  %v5563_v23 = vld [vmem:[#allocation5 + $0x88] sm:$0xf] }
  0x9e   :  { %1910 = vmatpush.bf16.msrb.mxu0 %v6040_v12  ;;  %v6392_v55 = vor.u32 %v8401_v39, %v6389_v40  ;;  %v5835_v12 = vld [vmem:[#allocation5 + $0x2a8] sm:$0xf]  ;;  %v8296_v15 = vld [vmem:[#allocation5 + $0x3b4] sm:$0xf0]  ;;  %v5708_v17 = vor.u32 %v8232_v11, %v5707_v9 }
  0x9f   :  { %v8196_v24 = vld [vmem:[#allocation5 + $0x94] sm:$0xf0]  ;;  %v5691_v25 = vld [vmem:[#allocation5 + $0x188] sm:$0xf] }
  0xa0   :  { %1923 = vmatpush.bf16.msrb.mxu1 %v6168_v13  ;;  %1936 = vmatpush.bf16.msrb.mxu2 %v6296_v14  ;;  %v8264_v13 = vld [vmem:[#allocation5 + $0x2b4] sm:$0xf0]  ;;  %v5963_v14 = vld [vmem:[#allocation5 + $0x3a8] sm:$0xf] }
  0xa1   :  { %1949 = vmatpush.bf16.msrb.mxu3 %v6424_v21  ;;  %v5836_v21 = vor.u32 %v8264_v13, %v5835_v12  ;;  %v5964_v26 = vor.u32 %v8296_v15, %v5963_v14  ;;  %v8228_v27 = vld [vmem:[#allocation5 + $0x194] sm:$0xf0]  ;;  %v5947_v30 = vld [vmem:[#allocation5 + $0x388] sm:$0xf] }
  0xa2   :  { %1911 = vmatpush.bf16.msrb.mxu0 %v6024_v28  ;;  %v5819_v28 = vld [vmem:[#allocation5 + $0x288] sm:$0xf]  ;;  %v8260_v29 = vld [vmem:[#allocation5 + $0x294] sm:$0xf0]  ;;  %v5692_v33 = vor.u32 %v8228_v27, %v5691_v25 }
  0xa3   :  { %v5820_v34 = vor.u32 %v8260_v29, %v5819_v28  ;;  %v5547_v35 = vld [vmem:[#allocation5 + $0x68] sm:$0xf]  ;;  %v8224_v40 = vld [vmem:[#allocation5 + $0x174] sm:$0xf0] }
  0xa4   :  { %1924 = vmatpush.bf16.msrb.mxu1 %v6152_v31  ;;  %1937 = vmatpush.bf16.msrb.mxu2 %v6280_v32  ;;  %v8292_v31 = vld [vmem:[#allocation5 + $0x394] sm:$0xf0]  ;;  %v5564_v32 = vor.u32 %v8196_v24, %v5563_v23  ;;  %v5675_v37 = vld [vmem:[#allocation5 + $0x168] sm:$0xf] }
  0xa5   :  { %1950 = vmatpush.bf16.msrb.mxu3 %v6408_v36  ;;  %v8192_v36 = vld [vmem:[#allocation5 + $0x74] sm:$0xf0]  ;;  %v5948_v39 = vor.u32 %v8292_v31, %v5947_v30  ;;  %v5803_v43 = vld [vmem:[#allocation5 + $0x268] sm:$0xf]  ;;  %v5676_v49 = vor.u32 %v8224_v40, %v5675_v37 }
  0xa6   :  { %1912 = vmatpush.bf16.msrb.mxu0 %v6008_v47  ;;  %v8256_v45 = vld [vmem:[#allocation5 + $0x274] sm:$0xf0]  ;;  %v5931_v46 = vld [vmem:[#allocation5 + $0x368] sm:$0xf]  ;;  %v5548_v48 = vor.u32 %v8192_v36, %v5547_v35 }
  0xa7   :  { %v8288_v47 = vld [vmem:[#allocation5 + $0x374] sm:$0xf0]  ;;  %v5804_v50 = vor.u32 %v8256_v45, %v5803_v43  ;;  %v5659_v53 = vld [vmem:[#allocation5 + $0x148] sm:$0xf] }
  0xa8   :  { %1925 = vmatpush.bf16.msrb.mxu1 %v6136_v51  ;;  %1938 = vmatpush.bf16.msrb.mxu2 %v6264_v52  ;;  %v5531_v51 = vld [vmem:[#allocation5 + $0x48] sm:$0xf]  ;;  %v8188_v52 = vld [vmem:[#allocation5 + $0x54] sm:$0xf0]  ;;  %v5932_v54 = vor.u32 %v8288_v47, %v5931_v46 }
  0xa9   :  { %1951 = vmatpush.bf16.msrb.mxu3 %v6392_v55  ;;  %1913 = vmatmul.bf16.vlgmr.msrb.gmra.mxu0 %v9244_v41  ;;  %v8220_v55 = vld [vmem:[#allocation5 + $0x154] sm:$0xf0]  ;;  %v5532_v60 = vor.u32 %v8188_v52, %v5531_v51  ;;  %v5515_v63 = vld [vmem:[#allocation5 + $0x28] sm:$0xf] }
  0xaa   :  { %1957 = vmatpush.bf16.msra.mxu0 %v5612_v56  ;;  %v5787_v56 = vld [vmem:[#allocation5 + $0x248] sm:$0xf]  ;;  %v8284_v59 = vld [vmem:[#allocation5 + $0x354] sm:$0xf0]  ;;  %v5660_v61 = vor.u32 %v8220_v55, %v5659_v53 }
  0xab   :  { %1939 = vmatmul.bf16.vlgmr.msrb.gmra.mxu2 %v9242_v38  ;;  %1926 = vmatmul.bf16.vlgmr.msrb.gmra.mxu1 %v9248_v44  ;;  %v8184_v0 = vld [vmem:[#allocation5 + $0x34] sm:$0xf0]  ;;  %v5643_v1 = vld [vmem:[#allocation5 + $0x128] sm:$0xf] }
  0xac   :  { %1970 = vmatpush.bf16.msra.mxu1 %v5740_v57  ;;  %1983 = vmatpush.bf16.msra.mxu2 %v5868_v58  ;;  %v8252_v57 = vld [vmem:[#allocation5 + $0x254] sm:$0xf0]  ;;  %v5915_v58 = vld [vmem:[#allocation5 + $0x348] sm:$0xf]  ;;  %v5516_v8 = vor.u32 %v8184_v0, %v5515_v63 }
  0xad   :  { %1996 = vmatpush.bf16.msra.mxu3 %v5996_v62  ;;  %v5788_v62 = vor.u32 %v8252_v57, %v5787_v56  ;;  %v5916_v2 = vor.u32 %v8284_v59, %v5915_v58  ;;  %v8216_v3 = vld [vmem:[#allocation5 + $0x134] sm:$0xf0]  ;;  %v5499_v9 = vld [vmem:[#allocation5 + $0x8] sm:$0xf] }
  0xae   :  { %1952 = vmatmul.bf16.vlgmr.msrb.gmra.mxu3 %v9246_v42  ;;  %1958 = vmatpush.bf16.msra.mxu0 %v5596_v4  ;;  %v5771_v4 = vld [vmem:[#allocation5 + $0x228] sm:$0xf]  ;;  %v8280_v7 = vld [vmem:[#allocation5 + $0x334] sm:$0xf0]  ;;  %v5644_v11 = vor.u32 %v8216_v3, %v5643_v1 }
  0xaf   :  { %v5627_v13 = vld [vmem:[#allocation5 + $0x108] sm:$0xf]  ;;  %v8212_v14 = vld [vmem:[#allocation5 + $0x114] sm:$0xf0] }
  0xb0   :  { %1971 = vmatpush.bf16.msra.mxu1 %v5724_v5  ;;  %1984 = vmatpush.bf16.msra.mxu2 %v5852_v6  ;;  %v8248_v5 = vld [vmem:[#allocation5 + $0x234] sm:$0xf0]  ;;  %v5899_v6 = vld [vmem:[#allocation5 + $0x328] sm:$0xf]  ;;  %v5628_v31 = vor.u32 %v8212_v14, %v5627_v13 }
  0xb1   :  { %1997 = vmatpush.bf16.msra.mxu3 %v5980_v10  ;;  %v8180_v10 = vld [vmem:[#allocation5 + $0x14] sm:$0xf0]  ;;  %v5772_v12 = vor.u32 %v8248_v5, %v5771_v4  ;;  %v5755_v15 = vld [vmem:[#allocation5 + $0x208] sm:$0xf] }
  0xb2   :  { %1959 = vmatpush.bf16.msra.mxu0 %v5580_v16  ;;  %v5900_v16 = vor.u32 %v8280_v7, %v5899_v6  ;;  %v8276_v23 = vld [vmem:[#allocation5 + $0x314] sm:$0xf0]  ;;  %v6123_v24 = vld [vmem:[#allocation5 + $0x4e8] sm:$0xf]  ;;  %v5500_v27 = vor.u32 %v8180_v10, %v5499_v9 }
  0xb3   :  { %v8336_v25 = vld [vmem:[#allocation5 + $0x4f4] sm:$0xf0]  ;;  %v6379_v29 = vld [vmem:[#allocation5 + $0x6e8] sm:$0xf] }
  0xb4   :  { %1972 = vmatpush.bf16.msra.mxu1 %v5708_v17  ;;  %1985 = vmatpush.bf16.msra.mxu2 %v5836_v21  ;;  %v8244_v17 = vld [vmem:[#allocation5 + $0x214] sm:$0xf0]  ;;  %v5883_v21 = vld [vmem:[#allocation5 + $0x308] sm:$0xf]  ;;  %v6124_v36 = vor.u32 %v8336_v25, %v6123_v24 }
  0xb5   :  { %1998 = vmatpush.bf16.msra.mxu3 %v5964_v26  ;;  %v6251_v26 = vld [vmem:[#allocation5 + $0x5e8] sm:$0xf]  ;;  %v8368_v28 = vld [vmem:[#allocation5 + $0x5f4] sm:$0xf0]  ;;  %v5884_v35 = vor.u32 %v8276_v23, %v5883_v21 }
  0xb6   :  { %1960 = vmatpush.bf16.msra.mxu0 %v5564_v32  ;;  %v8400_v30 = vld [vmem:[#allocation5 + $0x6f4] sm:$0xf0]  ;;  %v5756_v32 = vor.u32 %v8244_v17, %v5755_v15  ;;  %v6252_v37 = vor.u32 %v8368_v28, %v6251_v26  ;;  %v6107_v40 = vld [vmem:[#allocation5 + $0x4c8] sm:$0xf]  ;;  %v9266_v26 = vld [vmem:[#allocation7] sm:$0xf] }
  0xb7   :  { %v8332_v43 = vld [vmem:[#allocation5 + $0x4d4] sm:$0xf0]  ;;  %v6235_v45 = vld [vmem:[#allocation5 + $0x5c8] sm:$0xf] }
  0xb8   :  { %1973 = vmatpush.bf16.msra.mxu1 %v5692_v33  ;;  %1986 = vmatpush.bf16.msra.mxu2 %v5820_v34  ;;  %v6507_v33 = vld [vmem:[#allocation5 + $0x7e8] sm:$0xf]  ;;  %v8432_v34 = vld [vmem:[#allocation5 + $0x7f4] sm:$0xf0]  ;;  %v6108_v52 = vor.u32 %v8332_v43, %v6107_v40 }
  0xb9   :  { %1999 = vmatpush.bf16.msra.mxu3 %v5948_v39  ;;  %v6380_v39 = vor.u32 %v8400_v30, %v6379_v29  ;;  %v6508_v46 = vor.u32 %v8432_v34, %v6507_v33  ;;  %v8364_v47 = vld [vmem:[#allocation5 + $0x5d4] sm:$0xf0]  ;;  %v6091_v55 = vld [vmem:[#allocation5 + $0x4a8] sm:$0xf] }
  0xba   :  { %1961 = vmatpush.bf16.msra.mxu0 %v5548_v48  ;;  %v6363_v48 = vld [vmem:[#allocation5 + $0x6c8] sm:$0xf]  ;;  %v8428_v51 = vld [vmem:[#allocation5 + $0x7d4] sm:$0xf0]  ;;  %v6236_v53 = vor.u32 %v8364_v47, %v6235_v45 }
  0xbb   :  { %v8328_v56 = vld [vmem:[#allocation5 + $0x4b4] sm:$0xf0]  ;;  %v6219_v57 = vld [vmem:[#allocation5 + $0x5a8] sm:$0xf] }
  0xbc   :  { %1974 = vmatpush.bf16.msra.mxu1 %v5676_v49  ;;  %1987 = vmatpush.bf16.msra.mxu2 %v5804_v50  ;;  %v8396_v49 = vld [vmem:[#allocation5 + $0x6d4] sm:$0xf0]  ;;  %v6491_v50 = vld [vmem:[#allocation5 + $0x7c8] sm:$0xf]  ;;  %v6092_v0 = vor.u32 %v8328_v56, %v6091_v55 }
  0xbd   :  { %2000 = vmatpush.bf16.msra.mxu3 %v5932_v54  ;;  %v6364_v54 = vor.u32 %v8396_v49, %v6363_v48  ;;  %v6492_v58 = vor.u32 %v8428_v51, %v6491_v50  ;;  %v8360_v59 = vld [vmem:[#allocation5 + $0x5b4] sm:$0xf0]  ;;  %v6075_v3 = vld [vmem:[#allocation5 + $0x488] sm:$0xf] }
  0xbe   :  { %1962 = vmatpush.bf16.msra.mxu0 %v5532_v60  ;;  %v6347_v60 = vld [vmem:[#allocation5 + $0x6a8] sm:$0xf]  ;;  %v8424_v63 = vld [vmem:[#allocation5 + $0x7b4] sm:$0xf0]  ;;  %v6220_v1 = vor.u32 %v8360_v59, %v6219_v57 }
  0xbf   :  { %v8324_v4 = vld [vmem:[#allocation5 + $0x494] sm:$0xf0]  ;;  %v6203_v5 = vld [vmem:[#allocation5 + $0x588] sm:$0xf] }
  0xc0   :  { %1975 = vmatpush.bf16.msra.mxu1 %v5660_v61  ;;  %1988 = vmatpush.bf16.msra.mxu2 %v5788_v62  ;;  %v8392_v61 = vld [vmem:[#allocation5 + $0x6b4] sm:$0xf0]  ;;  %v6475_v62 = vld [vmem:[#allocation5 + $0x7a8] sm:$0xf] }
  0xc1   :  { %2001 = vmatpush.bf16.msra.mxu3 %v5916_v2  ;;  %v6348_v2 = vor.u32 %v8392_v61, %v6347_v60  ;;  %v6476_v6 = vor.u32 %v8424_v63, %v6475_v62  ;;  %v8356_v7 = vld [vmem:[#allocation5 + $0x594] sm:$0xf0]  ;;  %v6459_v10 = vld [vmem:[#allocation5 + $0x788] sm:$0xf] }
  0xc2   :  { %1963 = vmatpush.bf16.msra.mxu0 %v5516_v8  ;;  %v6331_v8 = vld [vmem:[#allocation5 + $0x688] sm:$0xf]  ;;  %v8388_v9 = vld [vmem:[#allocation5 + $0x694] sm:$0xf0]  ;;  %v6204_v14 = vor.u32 %v8356_v7, %v6203_v5 }
  0xc3   :  { %v6059_v13 = vld [vmem:[#allocation5 + $0x468] sm:$0xf]  ;;  %v6332_v15 = vor.u32 %v8388_v9, %v6331_v8  ;;  %v8352_v21 = vld [vmem:[#allocation5 + $0x574] sm:$0xf0] }
  0xc4   :  { %1976 = vmatpush.bf16.msra.mxu1 %v5644_v11  ;;  %1989 = vmatpush.bf16.msra.mxu2 %v5772_v12  ;;  %v8420_v11 = vld [vmem:[#allocation5 + $0x794] sm:$0xf0]  ;;  %v6076_v12 = vor.u32 %v8324_v4, %v6075_v3  ;;  %v6187_v17 = vld [vmem:[#allocation5 + $0x568] sm:$0xf] }
  0xc5   :  { %2002 = vmatpush.bf16.msra.mxu3 %v5900_v16  ;;  %v8320_v16 = vld [vmem:[#allocation5 + $0x474] sm:$0xf0]  ;;  %v6460_v23 = vor.u32 %v8420_v11, %v6459_v10  ;;  %v6315_v24 = vld [vmem:[#allocation5 + $0x668] sm:$0xf] }
  0xc6   :  { %1964 = vmatpush.bf16.msra.mxu0 %v5500_v27  ;;  %v8384_v25 = vld [vmem:[#allocation5 + $0x674] sm:$0xf0]  ;;  %v6443_v27 = vld [vmem:[#allocation5 + $0x768] sm:$0xf]  ;;  %v6060_v29 = vor.u32 %v8320_v16, %v6059_v13  ;;  %v8206_v13 = vld [vmem:[#allocation5 + $0xec] sm:$0xf] }
  0xc7   :  { %v8416_v28 = vld [vmem:[#allocation5 + $0x774] sm:$0xf0]  ;;  %v6043_v30 = vld [vmem:[#allocation5 + $0x448] sm:$0xf] }
  0xc8   :  { %1977 = vmatpush.bf16.msra.mxu1 %v5628_v31  ;;  %1990 = vmatpush.bf16.msra.mxu2 %v5756_v32  ;;  %v6188_v31 = vor.u32 %v8352_v21, %v6187_v17  ;;  %v6316_v32 = vor.u32 %v8384_v25, %v6315_v24  ;;  %v8316_v33 = vld [vmem:[#allocation5 + $0x454] sm:$0xf0]  ;;  %v6171_v34 = vld [vmem:[#allocation5 + $0x548] sm:$0xf]  ;;  %v5741_v17 = vld [vmem:[#allocation5 + $0x1f8] sm:$0xf0] }
  0xc9   :  { %2003 = vmatpush.bf16.msra.mxu3 %v5884_v35  ;;  %1965 = vmatmul.bf16.vlgmr.msra.gmra.mxu0 %v9232_v19  ;;  %v433_v35 = vperm.slane %v9266_v26, 0  ;;  %v8380_v40 = vld [vmem:[#allocation5 + $0x654] sm:$0xf0]  ;;  %v6427_v43 = vld [vmem:[#allocation5 + $0x748] sm:$0xf] }
  0xca   :  { %2009 = vmatpush.bf16.msrb.mxu0 %v6124_v36  ;;  %v6444_v36 = vor.u32 %v8416_v28, %v6443_v27  ;;  %v8412_v45 = vld [vmem:[#allocation5 + $0x754] sm:$0xf0]  ;;  %v6027_v50 = vld [vmem:[#allocation5 + $0x428] sm:$0xf]  ;;  %v8270_v21 = vld [vmem:[#allocation5 + $0x2ec] sm:$0xf] }
  0xcb   :  { %1991 = vmatmul.bf16.vlgmr.msra.gmra.mxu2 %v9230_v18  ;;  %1978 = vmatmul.bf16.vlgmr.msra.gmra.mxu1 %v9236_v22  ;;  %v8312_v51 = vld [vmem:[#allocation5 + $0x434] sm:$0xf0]  ;;  %v6428_v55 = vor.u32 %v8412_v45, %v6427_v43  ;;  %v6283_v57 = vld [vmem:[#allocation5 + $0x628] sm:$0xf]  ;;  %v5725_v43 = vld [vmem:[#allocation5 + $0x1d8] sm:$0xf0] }
  0xcc   :  { %2022 = vmatpush.bf16.msrb.mxu1 %v6252_v37  ;;  %2035 = vmatpush.bf16.msrb.mxu2 %v6380_v39  ;;  %v8348_v37 = vld [vmem:[#allocation5 + $0x554] sm:$0xf0]  ;;  %v6299_v39 = vld [vmem:[#allocation5 + $0x648] sm:$0xf]  ;;  %v6028_v62 = vor.u32 %v8312_v51, %v6027_v50  ;;  %v8266_v45 = vld [vmem:[#allocation5 + $0x2cc] sm:$0xf] }
  0xcd   :  { %2048 = vmatpush.bf16.msrb.mxu3 %v6508_v46  ;;  %v6044_v46 = vor.u32 %v8316_v33, %v6043_v30  ;;  %v6172_v48 = vor.u32 %v8348_v37, %v6171_v34  ;;  %v6300_v49 = vor.u32 %v8380_v40, %v6299_v39  ;;  %v8344_v56 = vld [vmem:[#allocation5 + $0x534] sm:$0xf0]  ;;  %v6411_v59 = vld [vmem:[#allocation5 + $0x728] sm:$0xf]  ;;  %v5997_v30 = vld [vmem:[#allocation5 + $0x3f8] sm:$0xf0] }
  0xce   :  { %2004 = vmatmul.bf16.vlgmr.msra.gmra.mxu3 %v9234_v20  ;;  %2010 = vmatpush.bf16.msrb.mxu0 %v6108_v52  ;;  %v6155_v52 = vld [vmem:[#allocation5 + $0x528] sm:$0xf]  ;;  %v8408_v60 = vld [vmem:[#allocation5 + $0x734] sm:$0xf0]  ;;  %v5597_v37 = vld [vmem:[#allocation5 + $0xd8] sm:$0xf0] }
  0xcf   :  { %v6011_v63 = vld [vmem:[#allocation5 + $0x408] sm:$0xf]  ;;  %v8340_v4 = vld [vmem:[#allocation5 + $0x514] sm:$0xf0]  ;;  %v6412_v7 = vor.u32 %v8408_v60, %v6411_v59  ;;  %v8234_v39 = vld [vmem:[#allocation5 + $0x1cc] sm:$0xf] }
  0xd0   :  { %2023 = vmatpush.bf16.msrb.mxu1 %v6236_v53  ;;  %2036 = vmatpush.bf16.msrb.mxu2 %v6364_v54  ;;  %v6139_v3 = vld [vmem:[#allocation5 + $0x508] sm:$0xf]  ;;  %v8372_v8 = vld [vmem:[#allocation5 + $0x614] sm:$0xf0]  ;;  %v8262_v59 = vld [vmem:[#allocation5 + $0x2ac] sm:$0xf] }
  0xd1   :  { %2049 = vmatpush.bf16.msrb.mxu3 %v6492_v58  ;;  %v8376_v58 = vld [vmem:[#allocation5 + $0x634] sm:$0xf0]  ;;  %v6267_v5 = vld [vmem:[#allocation5 + $0x608] sm:$0xf]  ;;  %v6140_v27 = vor.u32 %v8340_v4, %v6139_v3  ;;  %v5837_v60 = vld [vmem:[#allocation5 + $0x2b8] sm:$0xf0] }
  0xd2   :  { %2011 = vmatpush.bf16.msrb.mxu0 %v6092_v0  ;;  %v8308_v0 = vld [vmem:[#allocation5 + $0x414] sm:$0xf0]  ;;  %v6395_v9 = vld [vmem:[#allocation5 + $0x708] sm:$0xf]  ;;  %v6268_v28 = vor.u32 %v8372_v8, %v6267_v5  ;;  %v5565_v3 = vld [vmem:[#allocation5 + $0x98] sm:$0xf0] }
  0xd3   :  { %v8404_v10 = vld [vmem:[#allocation5 + $0x714] sm:$0xf0]  ;;  %v6012_v16 = vor.u32 %v8308_v0, %v6011_v63  ;;  %v8226_v4 = vld [vmem:[#allocation5 + $0x18c] sm:$0xf]  ;;  %v5821_v8 = vld [vmem:[#allocation5 + $0x298] sm:$0xf0] }
  0xd4   :  { %2024 = vmatpush.bf16.msrb.mxu1 %v6220_v1  ;;  %2037 = vmatpush.bf16.msrb.mxu2 %v6348_v2  ;;  %v1758_v47 = vpop.f32.mrf.mxu0  ;;  %v1771_v54 = vpop.f32.mrf.mxu1  ;;  %v6156_v1 = vor.u32 %v8344_v56, %v6155_v52  ;;  %v6284_v2 = vor.u32 %v8376_v58, %v6283_v57  ;;  %v5728_v52 = vor.u32 %v8234_v39, %v5725_v43  ;;  %v8230_v56 = vld [vmem:[#allocation5 + $0x1ac] sm:$0xf]  ;;  %v5709_v58 = vld [vmem:[#allocation5 + $0x1b8] sm:$0xf0] }
  0xd5   :  { %2050 = vmatpush.bf16.msrb.mxu3 %v6476_v6  ;;  %v1759_v53 = vadd.f32 %v1758_v47, %v433_v35  ;;  %v1784_v6 = vpop.f32.mrf.mxu2  ;;  %v8298_v47 = vld [vmem:[#allocation5 + $0x3cc] sm:$0xf]  ;;  %v5712_v0 = vor.u32 %v8230_v56, %v5709_v58  ;;  %v5661_v43 = vld [vmem:[#allocation5 + $0x158] sm:$0xf0] }
  0xd6   :  { %2012 = vmatpush.bf16.msrb.mxu0 %v6076_v12  ;;  %v1797_v12 = vpop.f32.mrf.mxu3  ;;  %v8218_v39 = vld [vmem:[#allocation5 + $0x14c] sm:$0xf] }
  0xd7   :  { %v1772_v61 = vadd.f32 %v1771_v54, %v1759_v53  ;;  %v8198_v54 = vld [vmem:[#allocation5 + $0xac] sm:$0xf] }
  0xd8   :  { %2025 = vmatpush.bf16.msrb.mxu1 %v6204_v14  ;;  %2038 = vmatpush.bf16.msrb.mxu2 %v6332_v15  ;;  %v5613_v14 = vld [vmem:[#allocation5 + $0xf8] sm:$0xf0]  ;;  %v8238_v15 = vld [vmem:[#allocation5 + $0x1ec] sm:$0xf] }
  0xd9   :  { %2051 = vmatpush.bf16.msrb.mxu3 %v6460_v23  ;;  %v1785_v11 = vadd.f32 %v1784_v6, %v1772_v61  ;;  %v5869_v23 = vld [vmem:[#allocation5 + $0x2f8] sm:$0xf0]  ;;  %v5616_v33 = vor.u32 %v8206_v13, %v5613_v14  ;;  %v5744_v34 = vor.u32 %v8238_v15, %v5741_v17  ;;  %v8294_v61 = vld [vmem:[#allocation5 + $0x3ac] sm:$0xf] }
  0xda   :  { %2013 = vmatpush.bf16.msrb.mxu0 %v6060_v29  ;;  %v8302_v29 = vld [vmem:[#allocation5 + $0x3ec] sm:$0xf]  ;;  %v5872_v35 = vor.u32 %v8270_v21, %v5869_v23  ;;  %v5693_v6 = vld [vmem:[#allocation5 + $0x198] sm:$0xf0] }
  0xdb   :  { %v9269_v24 = vadd.f32 %v1797_v12, %v1785_v11  ;;  %v6000_v40 = vor.u32 %v8302_v29, %v5997_v30  ;;  %v5696_v13 = vor.u32 %v8226_v4, %v5693_v6  ;;  %v8190_v15 = vld [vmem:[#allocation5 + $0x6c] sm:$0xf]  ;;  %v5805_v29 = vld [vmem:[#allocation5 + $0x278] sm:$0xf0] }
  0xdc   :  { %2026 = vmatpush.bf16.msrb.mxu1 %v6188_v31  ;;  %2039 = vmatpush.bf16.msrb.mxu2 %v6316_v32  ;;  %v1760_v25 = vpop.f32.mrf.mxu0  ;;  %v1773_v31 = vpop.f32.mrf.mxu1  ;;  %v6396_v32 = vor.u32 %v8404_v10, %v6395_v9  ;;  %v8290_v9 = vld [vmem:[#allocation5 + $0x38c] sm:$0xf]  ;;  %v5949_v10 = vld [vmem:[#allocation5 + $0x398] sm:$0xf0] }
  0xdd   :  { %2052 = vmatpush.bf16.msrb.mxu3 %v6444_v36  ;;  %v8202_v36 = vld [vmem:[#allocation5 + $0xcc] sm:$0xf]  ;;  %v5952_v25 = vor.u32 %v8290_v9, %v5949_v10  ;;  %v5933_v31 = vld [vmem:[#allocation5 + $0x378] sm:$0xf0] }
  0xde   :  { %2014 = vmatpush.bf16.msrb.mxu0 %v6044_v46  ;;  %v5853_v46 = vld [vmem:[#allocation5 + $0x2d8] sm:$0xf0]  ;;  %v5600_v50 = vor.u32 %v8202_v36, %v5597_v37  ;;  %v1799_v51 = vpop.f32.mrf.mxu3  ;;  %v8222_v17 = vld [vmem:[#allocation5 + $0x16c] sm:$0xf] }
  0xdf   :  { %v5856_v53 = vor.u32 %v8266_v45, %v5853_v46  ;;  %v8286_v30 = vld [vmem:[#allocation5 + $0x36c] sm:$0xf]  ;;  %v5533_v37 = vld [vmem:[#allocation5 + $0x58] sm:$0xf0] }
  0xe0   :  { %2027 = vmatpush.bf16.msrb.mxu1 %v6172_v48  ;;  %2040 = vmatpush.bf16.msrb.mxu2 %v6300_v49  ;;  %v5981_v48 = vld [vmem:[#allocation5 + $0x3d8] sm:$0xf0]  ;;  %v1786_v49 = vpop.f32.mrf.mxu2  ;;  %v8186_v36 = vld [vmem:[#allocation5 + $0x4c] sm:$0xf] }
  0xe1   :  { %2053 = vmatpush.bf16.msrb.mxu3 %v6428_v55  ;;  %v5581_v55 = vld [vmem:[#allocation5 + $0xb8] sm:$0xf0]  ;;  %v5984_v57 = vor.u32 %v8298_v47, %v5981_v48  ;;  %v8250_v45 = vld [vmem:[#allocation5 + $0x24c] sm:$0xf]  ;;  %v5536_v51 = vor.u32 %v8186_v36, %v5533_v37 }
  0xe2   :  { %2015 = vmatpush.bf16.msrb.mxu0 %v6028_v62  ;;  %v5965_v62 = vld [vmem:[#allocation5 + $0x3b8] sm:$0xf0]  ;;  %v5584_v63 = vor.u32 %v8198_v54, %v5581_v55  ;;  %v8282_v49 = vld [vmem:[#allocation5 + $0x34c] sm:$0xf]  ;;  %v5664_v54 = vor.u32 %v8218_v39, %v5661_v43 }
  0xe3   :  { %v5968_v5 = vor.u32 %v8294_v61, %v5965_v62  ;;  %v5789_v46 = vld [vmem:[#allocation5 + $0x258] sm:$0xf0]  ;;  %v8182_v56 = vld [vmem:[#allocation5 + $0x2c] sm:$0xf] }
  0xe4   :  { %2028 = vmatpush.bf16.msrb.mxu1 %v6156_v1  ;;  %2041 = vmatpush.bf16.msrb.mxu2 %v6284_v2  ;;  %v5840_v1 = vor.u32 %v8262_v59, %v5837_v60  ;;  %v8194_v2 = vld [vmem:[#allocation5 + $0x8c] sm:$0xf]  ;;  %v5792_v55 = vor.u32 %v8250_v45, %v5789_v46  ;;  %v5645_v61 = vld [vmem:[#allocation5 + $0x138] sm:$0xf0] }
  0xe5   :  { %2054 = vmatpush.bf16.msrb.mxu3 %v6412_v7  ;;  %v8258_v7 = vld [vmem:[#allocation5 + $0x28c] sm:$0xf]  ;;  %v5568_v11 = vor.u32 %v8194_v2, %v5565_v3  ;;  %v5501_v4 = vld [vmem:[#allocation5 + $0x18] sm:$0xf0] }
  0xe6   :  { %2016 = vmatpush.bf16.msrb.mxu0 %v6012_v16  ;;  %v5824_v14 = vor.u32 %v8258_v7, %v5821_v8  ;;  %v5549_v16 = vld [vmem:[#allocation5 + $0x78] sm:$0xf0]  ;;  %v8214_v58 = vld [vmem:[#allocation5 + $0x12c] sm:$0xf] }
  0xe7   :  { %v8246_v62 = vld [vmem:[#allocation5 + $0x22c] sm:$0xf]  ;;  %v5629_v8 = vld [vmem:[#allocation5 + $0x118] sm:$0xf0] }
  0xe8   :  { %2029 = vmatpush.bf16.msrb.mxu1 %v6140_v27  ;;  %2042 = vmatpush.bf16.msrb.mxu2 %v6268_v28  ;;  %v1810_v12 = vpop.f32.mrf.mxu0  ;;  %v5677_v27 = vld [vmem:[#allocation5 + $0x178] sm:$0xf0]  ;;  %v8254_v28 = vld [vmem:[#allocation5 + $0x26c] sm:$0xf] }
  0xe9   :  { %2055 = vmatpush.bf16.msrb.mxu3 %v6396_v32  ;;  %2017 = vmatmul.bf16.vlgmr.msrb.gmra.mxu0 %v9244_v41  ;;  %v1811_v21 = vadd.f32 %v1810_v12, %v9269_v24  ;;  %v5936_v24 = vor.u32 %v8286_v30, %v5933_v31  ;;  %v8178_v3 = vld [vmem:[#allocation5 + $0xc] sm:$0xf]  ;;  %v5757_v12 = vld [vmem:[#allocation5 + $0x218] sm:$0xf0] }
  0xea   :  { %2061 = vmatpush.bf16.msra.mxu0 %v5616_v33  ;;  %v1823_v23 = vpop.f32.mrf.mxu1  ;;  %v5552_v33 = vor.u32 %v8190_v15, %v5549_v16  ;;  %v8210_v7 = vld [vmem:[#allocation5 + $0x10c] sm:$0xf]  ;;  %v6109_v39 = vld [vmem:[#allocation5 + $0x4d8] sm:$0xf0] }
  0xeb   :  { %2043 = vmatmul.bf16.vlgmr.msrb.gmra.mxu2 %v9242_v38  ;;  %2030 = vmatmul.bf16.vlgmr.msrb.gmra.mxu1 %v9248_v44  ;;  %v1824_v32 = vadd.f32 %v1823_v23, %v1811_v21  ;;  %v8242_v9 = vld [vmem:[#allocation5 + $0x20c] sm:$0xf]  ;;  %v5504_v23 = vor.u32 %v8178_v3, %v5501_v4  ;;  %v6237_v43 = vld [vmem:[#allocation5 + $0x5d8] sm:$0xf0] }
  0xec   :  { %2074 = vmatpush.bf16.msra.mxu1 %v5744_v34  ;;  %2087 = vmatpush.bf16.msra.mxu2 %v5872_v35  ;;  %v5680_v34 = vor.u32 %v8222_v17, %v5677_v27  ;;  %v5808_v35 = vor.u32 %v8254_v28, %v5805_v29  ;;  %v8334_v16 = vld [vmem:[#allocation5 + $0x4ec] sm:$0xf]  ;;  %v6125_v17 = vld [vmem:[#allocation5 + $0x4f8] sm:$0xf0]  ;;  %v5632_v29 = vor.u32 %v8210_v7, %v5629_v8 }
  0xed   :  { %2100 = vmatpush.bf16.msra.mxu3 %v6000_v40  ;;  %v8366_v21 = vld [vmem:[#allocation5 + $0x5ec] sm:$0xf]  ;;  %v6381_v28 = vld [vmem:[#allocation5 + $0x6f8] sm:$0xf0]  ;;  %v5760_v30 = vor.u32 %v8242_v9, %v5757_v12 }
  0xee   :  { %2056 = vmatmul.bf16.vlgmr.msrb.gmra.mxu3 %v9246_v42  ;;  %2062 = vmatpush.bf16.msra.mxu0 %v5600_v50  ;;  %v1836_v40 = vpop.f32.mrf.mxu2  ;;  %v5917_v50 = vld [vmem:[#allocation5 + $0x358] sm:$0xf0]  ;;  %v8398_v27 = vld [vmem:[#allocation5 + $0x6ec] sm:$0xf] }
  0xef   :  { %v1837_v47 = vadd.f32 %v1836_v40, %v1824_v32  ;;  %v5920_v60 = vor.u32 %v8282_v49, %v5917_v50  ;;  %v8430_v31 = vld [vmem:[#allocation5 + $0x7ec] sm:$0xf]  ;;  %v6509_v32 = vld [vmem:[#allocation5 + $0x7f8] sm:$0xf0]  ;;  %v6384_v36 = vor.u32 %v8398_v27, %v6381_v28 }
  0xf0   :  { %2075 = vmatpush.bf16.msra.mxu1 %v5728_v52  ;;  %2088 = vmatpush.bf16.msra.mxu2 %v5856_v53  ;;  %v1812_v53 = vpop.f32.mrf.mxu0  ;;  %v8330_v37 = vld [vmem:[#allocation5 + $0x4cc] sm:$0xf]  ;;  %v6365_v46 = vld [vmem:[#allocation5 + $0x6d8] sm:$0xf0] }
  0xf1   :  { %2101 = vmatpush.bf16.msra.mxu3 %v5984_v57  ;;  %v1849_v48 = vpop.f32.mrf.mxu3  ;;  %v5517_v57 = vld [vmem:[#allocation5 + $0x38] sm:$0xf0]  ;;  %v8362_v40 = vld [vmem:[#allocation5 + $0x5cc] sm:$0xf]  ;;  %v6112_v49 = vor.u32 %v8330_v37, %v6109_v39 }
  0xf2   :  { %2063 = vmatpush.bf16.msra.mxu0 %v5584_v63  ;;  %v9276_v52 = vadd.f32 %v1849_v48, %v1837_v47  ;;  %v1825_v59 = vpop.f32.mrf.mxu1  ;;  %v5773_v63 = vld [vmem:[#allocation5 + $0x238] sm:$0xf0]  ;;  %v5520_v2 = vor.u32 %v8182_v56, %v5517_v57  ;;  %v8394_v45 = vld [vmem:[#allocation5 + $0x6cc] sm:$0xf]  ;;  %v6240_v50 = vor.u32 %v8362_v40, %v6237_v43 }
  0xf3   :  { %v5776_v6 = vor.u32 %v8246_v62, %v5773_v63  ;;  %v8426_v47 = vld [vmem:[#allocation5 + $0x7cc] sm:$0xf]  ;;  %v6493_v48 = vld [vmem:[#allocation5 + $0x7d8] sm:$0xf0] }
  0xf4   :  { %2076 = vmatpush.bf16.msra.mxu1 %v5712_v0  ;;  %2089 = vmatpush.bf16.msra.mxu2 %v5840_v1  ;;  %v8278_v0 = vld [vmem:[#allocation5 + $0x32c] sm:$0xf]  ;;  %v5901_v1 = vld [vmem:[#allocation5 + $0x338] sm:$0xf0]  ;;  %v6496_v56 = vor.u32 %v8426_v47, %v6493_v48 }
  0xf5   :  { %2102 = vmatpush.bf16.msra.mxu3 %v5968_v5  ;;  %v5648_v5 = vor.u32 %v8214_v58, %v5645_v61  ;;  %v8326_v53 = vld [vmem:[#allocation5 + $0x4ac] sm:$0xf]  ;;  %v6221_v57 = vld [vmem:[#allocation5 + $0x5b8] sm:$0xf0] }
  0xf6   :  { %2064 = vmatpush.bf16.msra.mxu0 %v5568_v11  ;;  %v1838_v10 = vpop.f32.mrf.mxu2  ;;  %v5904_v11 = vor.u32 %v8278_v0, %v5901_v1  ;;  %v8390_v58 = vld [vmem:[#allocation5 + $0x6ac] sm:$0xf]  ;;  %v6349_v59 = vld [vmem:[#allocation5 + $0x6b8] sm:$0xf0] }
  0xf7   :  { %v6477_v61 = vld [vmem:[#allocation5 + $0x7b8] sm:$0xf0]  ;;  %v6352_v0 = vor.u32 %v8390_v58, %v6349_v59  ;;  %v8322_v1 = vld [vmem:[#allocation5 + $0x48c] sm:$0xf]  ;;  %v434_v58 = vperm.slane %v9266_v26, 1 }
  0xf8   :  { %2077 = vmatpush.bf16.msra.mxu1 %v5696_v13  ;;  %2090 = vmatpush.bf16.msra.mxu2 %v5824_v14  ;;  %v8274_v13 = vld [vmem:[#allocation5 + $0x30c] sm:$0xf]  ;;  %v5885_v14 = vld [vmem:[#allocation5 + $0x318] sm:$0xf0]  ;;  %v8463_v26 = vld [vmem:[#allocation8 + $0xec] sm:$0xf0] }
  0xf9   :  { %2103 = vmatpush.bf16.msra.mxu3 %v5952_v25  ;;  %v1851_v15 = vpop.f32.mrf.mxu3  ;;  %v6253_v25 = vld [vmem:[#allocation5 + $0x5f8] sm:$0xf0]  ;;  %v8418_v7 = vld [vmem:[#allocation5 + $0x78c] sm:$0xf] }
  0xfa   :  { %2065 = vmatpush.bf16.msra.mxu0 %v5552_v33  ;;  %v5888_v33 = vor.u32 %v8274_v13, %v5885_v14  ;;  %v6205_v4 = vld [vmem:[#allocation5 + $0x598] sm:$0xf0]  ;;  %v8318_v10 = vld [vmem:[#allocation5 + $0x46c] sm:$0xf] }
  0xfb   :  { %v8350_v12 = vld [vmem:[#allocation5 + $0x56c] sm:$0xf]  ;;  %v6189_v15 = vld [vmem:[#allocation5 + $0x578] sm:$0xf0] }
  0xfc   :  { %2078 = vmatpush.bf16.msra.mxu1 %v5680_v34  ;;  %2091 = vmatpush.bf16.msra.mxu2 %v5808_v35  ;;  %v6128_v34 = vor.u32 %v8334_v16, %v6125_v17  ;;  %v6256_v35 = vor.u32 %v8366_v21, %v6253_v25  ;;  %v8382_v16 = vld [vmem:[#allocation5 + $0x66c] sm:$0xf]  ;;  %v6317_v17 = vld [vmem:[#allocation5 + $0x678] sm:$0xf0]  ;;  %v6192_v27 = vor.u32 %v8350_v12, %v6189_v15 }
  0xfd   :  { %2104 = vmatpush.bf16.msra.mxu3 %v5936_v24  ;;  %v6512_v24 = vor.u32 %v8430_v31, %v6509_v32  ;;  %v8414_v21 = vld [vmem:[#allocation5 + $0x76c] sm:$0xf]  ;;  %v6320_v28 = vor.u32 %v8382_v16, %v6317_v17  ;;  %v6429_v40 = vld [vmem:[#allocation5 + $0x758] sm:$0xf0]  ;;  %v6883_v16 = vld [vmem:[#allocation8 + $0x2e0] sm:$0xf] }
  0xfe   :  { %2066 = vmatpush.bf16.msra.mxu0 %v5536_v51  ;;  %v6368_v51 = vor.u32 %v8394_v45, %v6365_v46  ;;  %v8346_v31 = vld [vmem:[#allocation5 + $0x54c] sm:$0xf]  ;;  %v6029_v48 = vld [vmem:[#allocation5 + $0x438] sm:$0xf0]  ;;  %v8527_v17 = vld [vmem:[#allocation8 + $0x2ec] sm:$0xf0] }
  0xff   :  { %v8410_v39 = vld [vmem:[#allocation5 + $0x74c] sm:$0xf] }
 0x100   :  { %2079 = vmatpush.bf16.msra.mxu1 %v5664_v54  ;;  %2092 = vmatpush.bf16.msra.mxu2 %v5792_v55  ;;  %v6093_v54 = vld [vmem:[#allocation5 + $0x4b8] sm:$0xf0]  ;;  %v8358_v55 = vld [vmem:[#allocation5 + $0x5ac] sm:$0xf] }
 0x101   :  { %2105 = vmatpush.bf16.msra.mxu3 %v5920_v60  ;;  %v8422_v60 = vld [vmem:[#allocation5 + $0x7ac] sm:$0xf]  ;;  %v6096_v62 = vor.u32 %v8326_v53, %v6093_v54  ;;  %v6224_v63 = vor.u32 %v8358_v55, %v6221_v57  ;;  %v6157_v53 = vld [vmem:[#allocation5 + $0x538] sm:$0xf0] }
 0x102   :  { %2067 = vmatpush.bf16.msra.mxu0 %v5520_v2  ;;  %v6077_v2 = vld [vmem:[#allocation5 + $0x498] sm:$0xf0]  ;;  %v6480_v3 = vor.u32 %v8422_v60, %v6477_v61  ;;  %v8310_v47 = vld [vmem:[#allocation5 + $0x42c] sm:$0xf] }
 0x103   :  { %v8374_v54 = vld [vmem:[#allocation5 + $0x62c] sm:$0xf]  ;;  %v6285_v55 = vld [vmem:[#allocation5 + $0x638] sm:$0xf0]  ;;  %v6032_v59 = vor.u32 %v8310_v47, %v6029_v48  ;;  %v6579_v47 = vld [vmem:[#allocation8 + $0x80] sm:$0xf] }
 0x104   :  { %2080 = vmatpush.bf16.msra.mxu1 %v5648_v5  ;;  %2093 = vmatpush.bf16.msra.mxu2 %v5776_v6  ;;  %v8386_v5 = vld [vmem:[#allocation5 + $0x68c] sm:$0xf]  ;;  %v6333_v6 = vld [vmem:[#allocation5 + $0x698] sm:$0xf0]  ;;  %v8451_v48 = vld [vmem:[#allocation8 + $0x8c] sm:$0xf0] }
 0x105   :  { %2106 = vmatpush.bf16.msra.mxu3 %v5904_v11  ;;  %v6336_v9 = vor.u32 %v8386_v5, %v6333_v6  ;;  %v6061_v11 = vld [vmem:[#allocation5 + $0x478] sm:$0xf0]  ;;  %v8306_v60 = vld [vmem:[#allocation5 + $0x40c] sm:$0xf] }
 0x106   :  { %2068 = vmatpush.bf16.msra.mxu0 %v5504_v23  ;;  %v9282_v8 = vpop.f32.mrf.mxu0  ;;  %v6445_v23 = vld [vmem:[#allocation5 + $0x778] sm:$0xf0]  ;;  %v6064_v25 = vor.u32 %v8318_v10, %v6061_v11  ;;  %v8402_v5 = vld [vmem:[#allocation5 + $0x70c] sm:$0xf]  ;;  %v8495_v10 = vld [vmem:[#allocation8 + $0x1ec] sm:$0xf0] }
 0x107   :  { %v6413_v57 = vld [vmem:[#allocation5 + $0x738] sm:$0xf0] }
 0x108   :  { %2081 = vmatpush.bf16.msra.mxu1 %v5632_v29  ;;  %2094 = vmatpush.bf16.msra.mxu2 %v5760_v30  ;;  %v9284_v13 = vpop.f32.mrf.mxu1  ;;  %v8314_v29 = vld [vmem:[#allocation5 + $0x44c] sm:$0xf]  ;;  %v6045_v30 = vld [vmem:[#allocation5 + $0x458] sm:$0xf0] }
 0x109   :  { %2107 = vmatpush.bf16.msra.mxu3 %v5888_v33  ;;  %2069 = vmatmul.bf16.vlgmr.msra.gmra.mxu0 %v9232_v19  ;;  %v6461_v19 = vld [vmem:[#allocation5 + $0x798] sm:$0xf0]  ;;  %v6448_v33 = vor.u32 %v8414_v21, %v6445_v23 }
 0x10a   :  { %2113 = vmatpush.bf16.msrb.mxu0 %v6128_v34  ;;  %v6464_v14 = vor.u32 %v8418_v7, %v6461_v19  ;;  %v6173_v34 = vld [vmem:[#allocation5 + $0x558] sm:$0xf0]  ;;  %v6627_v19 = vld [vmem:[#allocation8 + $0xe0] sm:$0xf] }
 0x10b   :  { %2095 = vmatmul.bf16.vlgmr.msra.gmra.mxu2 %v9230_v18  ;;  %2082 = vmatmul.bf16.vlgmr.msra.gmra.mxu1 %v9236_v22  ;;  %v8354_v18 = vld [vmem:[#allocation5 + $0x58c] sm:$0xf]  ;;  %v6176_v45 = vor.u32 %v8346_v31, %v6173_v34  ;;  %v6397_v7 = vld [vmem:[#allocation5 + $0x718] sm:$0xf0]  ;;  %v6628_v15 = vor.u32 %v8463_v26, %v6627_v19  ;;  %v6867_v31 = vld [vmem:[#allocation8 + $0x2c0] sm:$0xf] }
 0x10c   :  { %2126 = vmatpush.bf16.msrb.mxu1 %v6256_v35  ;;  %2139 = vmatpush.bf16.msrb.mxu2 %v6384_v36  ;;  %v6208_v22 = vor.u32 %v8354_v18, %v6205_v4  ;;  %v8378_v35 = vld [vmem:[#allocation5 + $0x64c] sm:$0xf]  ;;  %v6301_v36 = vld [vmem:[#allocation5 + $0x658] sm:$0xf0] }
 0x10d   :  { %2152 = vmatpush.bf16.msrb.mxu3 %v6512_v24  ;;  %v6048_v24 = vor.u32 %v8314_v29, %v6045_v30  ;;  %v6304_v46 = vor.u32 %v8378_v35, %v6301_v36  ;;  %v6269_v4 = vld [vmem:[#allocation5 + $0x618] sm:$0xf0]  ;;  %v6884_v29 = vor.u32 %v8527_v17, %v6883_v16  ;;  %v8455_v36 = vld [vmem:[#allocation8 + $0xac] sm:$0xf0] }
 0x10e   :  { %2108 = vmatmul.bf16.vlgmr.msra.gmra.mxu3 %v9234_v20  ;;  %2114 = vmatpush.bf16.msrb.mxu0 %v6112_v49  ;;  %v6080_v20 = vor.u32 %v8322_v1, %v6077_v2  ;;  %v9286_v32 = vpop.f32.mrf.mxu2  ;;  %v1864_v43 = vpop.f32.mrf.mxu0  ;;  %v8342_v49 = vld [vmem:[#allocation5 + $0x52c] sm:$0xf]  ;;  %v6141_v1 = vld [vmem:[#allocation5 + $0x518] sm:$0xf0]  ;;  %v8471_v16 = vld [vmem:[#allocation8 + $0x12c] sm:$0xf0] }
 0x10f   :  { %v6160_v61 = vor.u32 %v8342_v49, %v6157_v53  ;;  %v6707_v49 = vld [vmem:[#allocation8 + $0x180] sm:$0xf]  ;;  %v8515_v53 = vld [vmem:[#allocation8 + $0x28c] sm:$0xf0] }
 0x110   :  { %2127 = vmatpush.bf16.msrb.mxu1 %v6240_v50  ;;  %2140 = vmatpush.bf16.msrb.mxu2 %v6368_v51  ;;  %v1877_v50 = vpop.f32.mrf.mxu1  ;;  %v6432_v51 = vor.u32 %v8410_v39, %v6429_v40  ;;  %v6723_v39 = vld [vmem:[#allocation8 + $0x1a0] sm:$0xf]  ;;  %v8487_v40 = vld [vmem:[#allocation8 + $0x1ac] sm:$0xf0] }
 0x111   :  { %2153 = vmatpush.bf16.msrb.mxu3 %v6496_v56  ;;  %v9288_v37 = vpop.f32.mrf.mxu3  ;;  %v8406_v56 = vld [vmem:[#allocation5 + $0x72c] sm:$0xf]  ;;  %v6580_v50 = vor.u32 %v8451_v48, %v6579_v47  ;;  %v8525_v48 = vld [vmem:[#allocation8 + $0x2e4] sm:$0xf] }
 0x112   :  { %2115 = vmatpush.bf16.msrb.mxu0 %v6096_v62  ;;  %v6288_v62 = vor.u32 %v8374_v54, %v6285_v55  ;;  %v6416_v18 = vor.u32 %v8406_v56, %v6413_v57  ;;  %v6563_v55 = vld [vmem:[#allocation8 + $0x60] sm:$0xf]  ;;  %v8447_v56 = vld [vmem:[#allocation8 + $0x6c] sm:$0xf0] }
 0x114   :  { %2128 = vmatpush.bf16.msrb.mxu1 %v6224_v63  ;;  %2141 = vmatpush.bf16.msrb.mxu2 %v6352_v0  ;;  %v6013_v63 = vld [vmem:[#allocation5 + $0x418] sm:$0xf0]  ;;  %v8338_v0 = vld [vmem:[#allocation5 + $0x50c] sm:$0xf] }
 0x115   :  { %2154 = vmatpush.bf16.msrb.mxu3 %v6480_v3  ;;  %v8370_v3 = vld [vmem:[#allocation5 + $0x60c] sm:$0xf]  ;;  %v6144_v11 = vor.u32 %v8338_v0, %v6141_v1  ;;  %v8511_v0 = vld [vmem:[#allocation8 + $0x26c] sm:$0xf0] }
 0x116   :  { %2116 = vmatpush.bf16.msrb.mxu0 %v6080_v20  ;;  %v1890_v2 = vpop.f32.mrf.mxu2  ;;  %v1863_v20 = vadd.f32 %v9282_v8, %v434_v58  ;;  %v6272_v12 = vor.u32 %v8370_v3, %v6269_v4  ;;  %v6739_v8 = vld [vmem:[#allocation8 + $0x1c0] sm:$0xf] }
 0x117   :  { %v6547_v2 = vld [vmem:[#allocation8 + $0x40] sm:$0xf] }
 0x118   :  { %2129 = vmatpush.bf16.msrb.mxu1 %v6208_v22  ;;  %2142 = vmatpush.bf16.msrb.mxu2 %v6336_v9  ;;  %v6016_v22 = vor.u32 %v8306_v60, %v6013_v63  ;;  %v6755_v9 = vld [vmem:[#allocation8 + $0x1e0] sm:$0xf]  ;;  %v1876_v23 = vadd.f32 %v9284_v13, %v1863_v20 }
 0x119   :  { %2155 = vmatpush.bf16.msrb.mxu3 %v6464_v14  ;;  %v1903_v6 = vpop.f32.mrf.mxu3  ;;  %v6400_v14 = vor.u32 %v8402_v5, %v6397_v7  ;;  %v6756_v21 = vor.u32 %v8495_v10, %v6755_v9  ;;  %v6595_v13 = vld [vmem:[#allocation8 + $0xa0] sm:$0xf]  ;;  %v8475_v5 = vld [vmem:[#allocation8 + $0x14c] sm:$0xf0] }
 0x11a   :  { %2117 = vmatpush.bf16.msrb.mxu0 %v6064_v25  ;;  %v6611_v25 = vld [vmem:[#allocation8 + $0xc0] sm:$0xf]  ;;  %v1889_v35 = vadd.f32 %v9286_v32, %v1876_v23  ;;  %v6596_v43 = vor.u32 %v8455_v36, %v6595_v13  ;;  %v6724_v32 = vor.u32 %v8487_v40, %v6723_v39  ;;  %v8507_v9 = vld [vmem:[#allocation8 + $0x24c] sm:$0xf0]  ;;  %v8493_v36 = vld [vmem:[#allocation8 + $0x1e4] sm:$0xf] }
 0x11b   :  { %v6819_v63 = vld [vmem:[#allocation8 + $0x260] sm:$0xf]  ;;  %v6757_v39 = vld [vmem:[#allocation8 + $0x1f0] sm:$0xf0] }
 0x11c   :  { %2130 = vmatpush.bf16.msrb.mxu1 %v6192_v27  ;;  %2143 = vmatpush.bf16.msrb.mxu2 %v6320_v28  ;;  %v8459_v27 = vld [vmem:[#allocation8 + $0xcc] sm:$0xf0]  ;;  %v6675_v4 = vld [vmem:[#allocation8 + $0x140] sm:$0xf]  ;;  %v6820_v7 = vor.u32 %v8511_v0, %v6819_v63 }
 0x11d   :  { %2156 = vmatpush.bf16.msrb.mxu3 %v6448_v33  ;;  %v8491_v28 = vld [vmem:[#allocation8 + $0x1cc] sm:$0xf0]  ;;  %v6612_v30 = vor.u32 %v8459_v27, %v6611_v25  ;;  %v6676_v10 = vor.u32 %v8475_v5, %v6675_v4  ;;  %v6787_v25 = vld [vmem:[#allocation8 + $0x220] sm:$0xf]  ;;  %v6581_v4 = vld [vmem:[#allocation8 + $0x90] sm:$0xf0] }
 0x11e   :  { %2118 = vmatpush.bf16.msrb.mxu0 %v6048_v24  ;;  %v8523_v33 = vld [vmem:[#allocation8 + $0x2cc] sm:$0xf0]  ;;  %v6740_v34 = vor.u32 %v8491_v28, %v6739_v8  ;;  %v6515_v28 = vld [vmem:[#allocation8] sm:$0xf]  ;;  %v8481_v5 = vld [vmem:[#allocation8 + $0x184] sm:$0xf] }
 0x11f   :  { %v6868_v24 = vor.u32 %v8523_v33, %v6867_v31  ;;  %v8503_v27 = vld [vmem:[#allocation8 + $0x22c] sm:$0xf0] }
 0x120   :  { %2131 = vmatpush.bf16.msrb.mxu1 %v6176_v45  ;;  %2144 = vmatpush.bf16.msrb.mxu2 %v6304_v46  ;;  %v6851_v45 = vld [vmem:[#allocation8 + $0x2a0] sm:$0xf]  ;;  %v8519_v46 = vld [vmem:[#allocation8 + $0x2ac] sm:$0xf0]  ;;  %v6788_v40 = vor.u32 %v8503_v27, %v6787_v25  ;;  %v8441_v27 = vld [vmem:[#allocation8 + $0x44] sm:$0xf] }
 0x121   :  { %2157 = vmatpush.bf16.msrb.mxu3 %v6432_v51  ;;  %v8467_v33 = vld [vmem:[#allocation8 + $0x10c] sm:$0xf0] }
 0x122   :  { %2119 = vmatpush.bf16.msrb.mxu0 %v6032_v59  ;;  %v6691_v59 = vld [vmem:[#allocation8 + $0x160] sm:$0xf] }
 0x124   :  { %2132 = vmatpush.bf16.msrb.mxu1 %v6160_v61  ;;  %2145 = vmatpush.bf16.msrb.mxu2 %v6288_v62  ;;  %v6564_v61 = vor.u32 %v8447_v56, %v6563_v55 }
 0x125   :  { %2158 = vmatpush.bf16.msrb.mxu3 %v6416_v18  ;;  %v8443_v18 = vld [vmem:[#allocation8 + $0x4c] sm:$0xf0] }
 0x126   :  { %2120 = vmatpush.bf16.msrb.mxu0 %v6016_v22  ;;  %v1914_v51 = vpop.f32.mrf.mxu0  ;;  %v6548_v19 = vor.u32 %v8443_v18, %v6547_v2  ;;  %v6803_v22 = vld [vmem:[#allocation8 + $0x240] sm:$0xf]  ;;  %v6853_v2 = vld [vmem:[#allocation8 + $0x2b0] sm:$0xf0] }
 0x127   :  { %v6804_v17 = vor.u32 %v8507_v9, %v6803_v22  ;;  %v8445_v9 = vld [vmem:[#allocation8 + $0x64] sm:$0xf] }
 0x128   :  { %2133 = vmatpush.bf16.msrb.mxu1 %v6144_v11  ;;  %2146 = vmatpush.bf16.msrb.mxu2 %v6272_v12  ;;  %v1927_v58 = vpop.f32.mrf.mxu1  ;;  %v6531_v11 = vld [vmem:[#allocation8 + $0x20] sm:$0xf]  ;;  %v8439_v12 = vld [vmem:[#allocation8 + $0x2c] sm:$0xf0] }
 0x129   :  { %2159 = vmatpush.bf16.msrb.mxu3 %v6400_v14  ;;  %2121 = vmatmul.bf16.vlgmr.msrb.gmra.mxu0 %v9244_v41  ;;  %v1902_v41 = vadd.f32 %v9288_v37, %v1889_v35  ;;  %v8479_v37 = vld [vmem:[#allocation8 + $0x16c] sm:$0xf0]  ;;  %v6532_v23 = vor.u32 %v8439_v12, %v6531_v11  ;;  %v6629_v35 = vld [vmem:[#allocation8 + $0xf0] sm:$0xf0]  ;;  %v8477_v12 = vld [vmem:[#allocation8 + $0x164] sm:$0xf] }
 0x12a   :  { %2951 = vmatpush.bf16.msra.mxu0 %v6628_v15  ;;  %v6692_v1 = vor.u32 %v8479_v37, %v6691_v59  ;;  %v6659_v15 = vld [vmem:[#allocation8 + $0x120] sm:$0xf]  ;;  %v8453_v37 = vld [vmem:[#allocation8 + $0xa4] sm:$0xf] }
 0x12b   :  { %2134 = vmatmul.bf16.vlgmr.msrb.gmra.mxu1 %v9248_v44  ;;  %2147 = vmatmul.bf16.vlgmr.msrb.gmra.mxu2 %v9242_v38  ;;  %v8483_v44 = vld [vmem:[#allocation8 + $0x18c] sm:$0xf0]  ;;  %v6852_v38 = vor.u32 %v8519_v46, %v6851_v45  ;;  %v1915_v57 = vadd.f32 %v1914_v51, %v1902_v41  ;;  %v6660_v8 = vor.u32 %v8471_v16, %v6659_v15  ;;  %v6771_v45 = vld [vmem:[#allocation8 + $0x200] sm:$0xf]  ;;  %v2165_v41 = vmax.f32 %v9276_v52, 0.0 }
 0x12c   :  { %2964 = vmatpush.bf16.msra.mxu1 %v6756_v21  ;;  %2160 = vmatmul.bf16.vlgmr.msrb.gmra.mxu3 %v9246_v42  ;;  %v6835_v42 = vld [vmem:[#allocation8 + $0x280] sm:$0xf]  ;;  %v6708_v54 = vor.u32 %v8483_v44, %v6707_v49  ;;  %v8499_v46 = vld [vmem:[#allocation8 + $0x20c] sm:$0xf0]  ;;  %v6885_v49 = vld [vmem:[#allocation8 + $0x2f0] sm:$0xf0]  ;;  %v6760_v44 = vor.u32 %v8493_v36, %v6757_v39 }
 0x12d   :  { %2977 = vmatpush.bf16.msra.mxu2 %v6884_v29  ;;  %v6836_v60 = vor.u32 %v8515_v53, %v6835_v42  ;;  %v1928_v62 = vadd.f32 %v1927_v58, %v1915_v57  ;;  %v8435_v29 = vld [vmem:[#allocation8 + $0xc] sm:$0xf0]  ;;  %v8489_v51 = vld [vmem:[#allocation8 + $0x1c4] sm:$0xf]  ;;  %v6741_v42 = vld [vmem:[#allocation8 + $0x1d0] sm:$0xf0]  ;;  %v6772_v53 = vor.u32 %v8499_v46, %v6771_v45  ;;  %v6888_v55 = vor.u32 %v8525_v48, %v6885_v49 }
 0x12e   :  { %2952 = vmatpush.bf16.msra.mxu0 %v6612_v30  ;;  %v1940_v3 = vpop.f32.mrf.mxu2  ;;  %v1916_v20 = vpop.f32.mrf.mxu0  ;;  %v6643_v30 = vld [vmem:[#allocation8 + $0x100] sm:$0xf]  ;;  %v9302_v56 = vpack.c.bf16 %v2165_v41, %v2165_v41  ;;  %v8521_v57 = vld [vmem:[#allocation8 + $0x2c4] sm:$0xf]  ;;  %v6869_v58 = vld [vmem:[#allocation8 + $0x2d0] sm:$0xf0]  ;;  %v6744_v59 = vor.u32 %v8489_v51, %v6741_v42 }
 0x12f   :  { %v1941_v26 = vadd.f32 %v1940_v3, %v1928_v62  ;;  %v6725_v62 = vld [vmem:[#allocation8 + $0x1b0] sm:$0xf0]  ;;  %v6872_v63 = vor.u32 %v8521_v57, %v6869_v58  ;;  %v8449_v3 = vld [vmem:[#allocation8 + $0x84] sm:$0xf]  ;;  %v9312_v41 = vld [vmem:[#allocation7] sm:$0xf] }
 0x130   :  { %2965 = vmatpush.bf16.msra.mxu1 %v6740_v34  ;;  %v1929_v14 = vpop.f32.mrf.mxu1  ;;  %v8461_v34 = vld [vmem:[#allocation8 + $0xe4] sm:$0xf]  ;;  %v6837_v20 = vld [vmem:[#allocation8 + $0x290] sm:$0xf0]  ;;  %v6635_v57 = vld [vmem:[#allocation8 + $0xe8] sm:$0xf] }
 0x131   :  { %2978 = vmatpush.bf16.msra.mxu2 %v6868_v24  ;;  %v1953_v6 = vpop.f32.mrf.mxu3  ;;  %v6632_v47 = vor.u32 %v8461_v34, %v6629_v35  ;;  %v6693_v14 = vld [vmem:[#allocation8 + $0x170] sm:$0xf0]  ;;  %v8505_v35 = vld [vmem:[#allocation8 + $0x244] sm:$0xf]  ;;  %v8464_v58 = vld [vmem:[#allocation8 + $0xf4] sm:$0xf0] }
 0x132   :  { %2953 = vmatpush.bf16.msra.mxu0 %v6596_v43  ;;  %v1954_v21 = vadd.f32 %v1953_v6, %v1941_v26  ;;  %v6516_v43 = vor.u32 %v8435_v29, %v6515_v28  ;;  %v6709_v6 = vld [vmem:[#allocation8 + $0x190] sm:$0xf0]  ;;  %v8513_v26 = vld [vmem:[#allocation8 + $0x284] sm:$0xf]  ;;  %v6696_v25 = vor.u32 %v8477_v12, %v6693_v14  ;;  %v6979_v14 = vld [vmem:[#allocation8 + $0x3a0] sm:$0xf] }
 0x133   :  { %v6712_v22 = vor.u32 %v8481_v5, %v6709_v6  ;;  %v6840_v16 = vor.u32 %v8513_v26, %v6837_v20  ;;  %v8473_v28 = vld [vmem:[#allocation8 + $0x144] sm:$0xf]  ;;  %v6677_v29 = vld [vmem:[#allocation8 + $0x150] sm:$0xf0]  ;;  %v6995_v5 = vld [vmem:[#allocation8 + $0x3c0] sm:$0xf] }
 0x134   :  { %2966 = vmatpush.bf16.msra.mxu1 %v6724_v32  ;;  %v2166_v24 = vmax.f32 %v1954_v21, 0.0  ;;  %v6644_v32 = vor.u32 %v8467_v33, %v6643_v30  ;;  %v8509_v21 = vld [vmem:[#allocation8 + $0x264] sm:$0xf]  ;;  %v6680_v36 = vor.u32 %v8473_v28, %v6677_v29  ;;  %v6661_v45 = vld [vmem:[#allocation8 + $0x130] sm:$0xf0] }
 0x135   :  { %2979 = vmatpush.bf16.msra.mxu2 %v6852_v38  ;;  %v8457_v38 = vld [vmem:[#allocation8 + $0xc4] sm:$0xf]  ;;  %v8555_v6 = vld [vmem:[#allocation8 + $0x3cc] sm:$0xf0]  ;;  %v8460_v26 = vld [vmem:[#allocation8 + $0xd4] sm:$0xf0] }
 0x136   :  { %2954 = vmatpush.bf16.msra.mxu0 %v6580_v50  ;;  %v1942_v31 = vpop.f32.mrf.mxu2  ;;  %v6613_v50 = vld [vmem:[#allocation8 + $0xd0] sm:$0xf0]  ;;  %v8437_v39 = vld [vmem:[#allocation8 + $0x24] sm:$0xf]  ;;  %v6996_v20 = vor.u32 %v8555_v6, %v6995_v5  ;;  %v6963_v29 = vld [vmem:[#allocation8 + $0x380] sm:$0xf] }
 0x137   :  { %v6616_v52 = vor.u32 %v8457_v38, %v6613_v50  ;;  %v8501_v38 = vld [vmem:[#allocation8 + $0x224] sm:$0xf]  ;;  %v6789_v50 = vld [vmem:[#allocation8 + $0x230] sm:$0xf0]  ;;  %v6667_v5 = vld [vmem:[#allocation8 + $0x128] sm:$0xf] }
 0x138   :  { %2967 = vmatpush.bf16.msra.mxu1 %v6708_v54  ;;  %v9300_v54 = vpack.c.bf16 %v2166_v24, %v2166_v24  ;;  %v8465_v42 = vld [vmem:[#allocation8 + $0x104] sm:$0xf] }
 0x139   :  { %2980 = vmatpush.bf16.msra.mxu2 %v6836_v60  ;;  %v1955_v13 = vpop.f32.mrf.mxu3  ;;  %v6597_v60 = vld [vmem:[#allocation8 + $0xb0] sm:$0xf0] }
 0x13a   :  { %2955 = vmatpush.bf16.msra.mxu0 %v6564_v61  ;;  %v8485_v61 = vld [vmem:[#allocation8 + $0x1a4] sm:$0xf]  ;;  %v6600_v0 = vor.u32 %v8453_v37, %v6597_v60  ;;  %v6805_v13 = vld [vmem:[#allocation8 + $0x250] sm:$0xf0]  ;;  %v6763_v60 = vld [vmem:[#allocation8 + $0x1e8] sm:$0xf] }
 0x13b   :  { %v6728_v18 = vor.u32 %v8485_v61, %v6725_v62  ;;  %v6808_v48 = vor.u32 %v8505_v35, %v6805_v13  ;;  %v8496_v61 = vld [vmem:[#allocation8 + $0x1f4] sm:$0xf0]  ;;  %v6587_v35 = vld [vmem:[#allocation8 + $0x88] sm:$0xf] }
 0x13c   :  { %2968 = vmatpush.bf16.msra.mxu1 %v6692_v1  ;;  %v8517_v1 = vld [vmem:[#allocation8 + $0x2a4] sm:$0xf]  ;;  %v8452_v13 = vld [vmem:[#allocation8 + $0x94] sm:$0xf0] }
 0x13d   :  { %2981 = vmatpush.bf16.msra.mxu2 %v6820_v7  ;;  %v6856_v7 = vor.u32 %v8517_v1, %v6853_v2  ;;  %v8497_v2 = vld [vmem:[#allocation8 + $0x204] sm:$0xf] }
 0x13e   :  { %2956 = vmatpush.bf16.msra.mxu0 %v6548_v19  ;;  %v6584_v19 = vor.u32 %v8449_v3, %v6581_v4  ;;  %v6636_v4 = vor.u32 %v8464_v58, %v6635_v57  ;;  %v6555_v57 = vld [vmem:[#allocation8 + $0x48] sm:$0xf]  ;;  %v8444_v58 = vld [vmem:[#allocation8 + $0x54] sm:$0xf0] }
 0x140   :  { %2969 = vmatpush.bf16.msra.mxu1 %v6676_v10  ;;  %v6565_v10 = vld [vmem:[#allocation8 + $0x70] sm:$0xf0] }
 0x141   :  { %2982 = vmatpush.bf16.msra.mxu2 %v6804_v17  ;;  %v6568_v17 = vor.u32 %v8445_v9, %v6565_v10  ;;  %v8492_v9 = vld [vmem:[#allocation8 + $0x1d4] sm:$0xf0] }
 0x142   :  { %2957 = vmatpush.bf16.msra.mxu0 %v6532_v23  ;;  %v6821_v23 = vld [vmem:[#allocation8 + $0x270] sm:$0xf0] }
 0x143   :  { %v6824_v33 = vor.u32 %v8509_v21, %v6821_v23  ;;  %v6603_v21 = vld [vmem:[#allocation8 + $0xa8] sm:$0xf]  ;;  %v8456_v23 = vld [vmem:[#allocation8 + $0xb4] sm:$0xf0] }
 0x144   :  { %2970 = vmatpush.bf16.msra.mxu1 %v6660_v8  ;;  %v6549_v8 = vld [vmem:[#allocation8 + $0x50] sm:$0xf0] }
 0x145   :  { %2983 = vmatpush.bf16.msra.mxu2 %v6788_v40  ;;  %v6552_v34 = vor.u32 %v8441_v27, %v6549_v8  ;;  %v6533_v40 = vld [vmem:[#allocation8 + $0x30] sm:$0xf0]  ;;  %v6731_v27 = vld [vmem:[#allocation8 + $0x1a8] sm:$0xf]  ;;  %v8488_v8 = vld [vmem:[#allocation8 + $0x1b4] sm:$0xf0] }
 0x146   :  { %2958 = vmatpush.bf16.msra.mxu0 %v6516_v43  ;;  %v1966_v11 = vpop.f32.mrf.mxu0  ;;  %v8469_v43 = vld [vmem:[#allocation8 + $0x124] sm:$0xf]  ;;  %v6536_v49 = vor.u32 %v8437_v39, %v6533_v40  ;;  %v6715_v39 = vld [vmem:[#allocation8 + $0x188] sm:$0xf]  ;;  %v8484_v40 = vld [vmem:[#allocation8 + $0x194] sm:$0xf0] }
 0x147   :  { %v6664_v51 = vor.u32 %v8469_v43, %v6661_v45  ;;  %v6588_v43 = vor.u32 %v8452_v13, %v6587_v35  ;;  %v8543_v45 = vld [vmem:[#allocation8 + $0x36c] sm:$0xf0]  ;;  %v7013_v35 = vld [vmem:[#allocation8 + $0x3f0] sm:$0xf0]  ;;  %v6765_v13 = vld [vmem:[#allocation8 + $0x1f8] sm:$0xf0] }
 0x148   :  { %2971 = vmatpush.bf16.msra.mxu1 %v6644_v32  ;;  %v9306_v15 = vpop.f32.mrf.mxu1  ;;  %v435_v32 = vperm.slane %v9312_v41, 2 }
 0x149   :  { %2959 = vmatmul.bf16.vlgmr.msra.gmra.mxu0 %v9302_v56  ;;  %2984 = vmatpush.bf16.msra.mxu2 %v6772_v53  ;;  %v7011_v53 = vld [vmem:[#allocation8 + $0x3e0] sm:$0xf] }
 0x14a   :  { %3003 = vmatpush.bf16.msrb.mxu0 %v6632_v47  ;;  %v8433_v47 = vld [vmem:[#allocation8 + $0x4] sm:$0xf] }
 0x14b   :  { %2972 = vmatmul.bf16.vlgmr.msra.gmra.mxu1 %v9300_v54 }
 0x14c   :  { %3016 = vmatpush.bf16.msrb.mxu1 %v6760_v44  ;;  %v6517_v44 = vld [vmem:[#allocation8 + $0x10] sm:$0xf0] }
 0x14d   :  { %3029 = vmatpush.bf16.msrb.mxu2 %v6888_v55  ;;  %v8559_v55 = vld [vmem:[#allocation8 + $0x3ec] sm:$0xf0]  ;;  %v6520_v1 = vor.u32 %v8433_v47, %v6517_v44  ;;  %v8448_v47 = vld [vmem:[#allocation8 + $0x74] sm:$0xf0]  ;;  %v6699_v44 = vld [vmem:[#allocation8 + $0x168] sm:$0xf] }
 0x14e   :  { %3004 = vmatpush.bf16.msrb.mxu0 %v6616_v52  ;;  %v9308_v30 = vpop.f32.mrf.mxu2  ;;  %v1968_v24 = vpop.f32.mrf.mxu0  ;;  %v6645_v52 = vld [vmem:[#allocation8 + $0x110] sm:$0xf0]  ;;  %v7012_v37 = vor.u32 %v8559_v55, %v7011_v53  ;;  %v6931_v53 = vld [vmem:[#allocation8 + $0x340] sm:$0xf] }
 0x14f   :  { %v6648_v3 = vor.u32 %v8465_v42, %v6645_v52 }
 0x150   :  { %3017 = vmatpush.bf16.msrb.mxu1 %v6744_v59  ;;  %v1981_v46 = vpop.f32.mrf.mxu1  ;;  %2990 = vmatpush.bf16.msra.mxu3 %v7012_v37  ;;  %v6683_v37 = vld [vmem:[#allocation8 + $0x148] sm:$0xf] }
 0x151   :  { %3030 = vmatpush.bf16.msrb.mxu2 %v6872_v63  ;;  %v9310_v31 = vpop.f32.mrf.mxu3  ;;  %v6792_v63 = vor.u32 %v8501_v38, %v6789_v50  ;;  %v6716_v46 = vor.u32 %v8484_v40, %v6715_v39  ;;  %v8480_v38 = vld [vmem:[#allocation8 + $0x174] sm:$0xf0] }
 0x152   :  { %3005 = vmatpush.bf16.msrb.mxu0 %v6600_v0  ;;  %v1967_v0 = vadd.f32 %v1966_v11, %v435_v32  ;;  %v6571_v32 = vld [vmem:[#allocation8 + $0x68] sm:$0xf]  ;;  %v6700_v52 = vor.u32 %v8480_v38, %v6699_v44  ;;  %v8524_v39 = vld [vmem:[#allocation8 + $0x2d4] sm:$0xf0]  ;;  %v8458_v44 = vld [vmem:[#allocation8 + $0xcc] sm:$0xf] }
 0x153   :  { %v6572_v42 = vor.u32 %v8448_v47, %v6571_v32  ;;  %v8553_v32 = vld [vmem:[#allocation8 + $0x3c4] sm:$0xf]  ;;  %v6997_v47 = vld [vmem:[#allocation8 + $0x3d0] sm:$0xf0]  ;;  %v6621_v38 = vld [vmem:[#allocation8 + $0xd8] sm:$0xf0] }
 0x154   :  { %3018 = vmatpush.bf16.msrb.mxu1 %v6728_v18  ;;  %v6773_v18 = vld [vmem:[#allocation8 + $0x210] sm:$0xf0]  ;;  %v1980_v12 = vadd.f32 %v9306_v15, %v1967_v0  ;;  %2991 = vmatpush.bf16.msra.mxu3 %v6996_v20  ;;  %v6604_v15 = vor.u32 %v8456_v23, %v6603_v21  ;;  %v6556_v0 = vor.u32 %v8444_v58, %v6555_v57  ;;  %v8528_v20 = vld [vmem:[#allocation8 + $0x2f4] sm:$0xf0]  ;;  %v8531_v21 = vld [vmem:[#allocation8 + $0x30c] sm:$0xf0] }
 0x155   :  { %3031 = vmatpush.bf16.msrb.mxu2 %v6856_v7  ;;  %v6764_v7 = vor.u32 %v8496_v61, %v6763_v60  ;;  %v6776_v10 = vor.u32 %v8497_v2, %v6773_v18  ;;  %v8476_v60 = vld [vmem:[#allocation8 + $0x154] sm:$0xf0]  ;;  %v8535_v2 = vld [vmem:[#allocation8 + $0x32c] sm:$0xf0]  ;;  %v6981_v57 = vld [vmem:[#allocation8 + $0x3b0] sm:$0xf0] }
 0x156   :  { %3006 = vmatpush.bf16.msrb.mxu0 %v6584_v19  ;;  %v1994_v59 = vpop.f32.mrf.mxu2  ;;  %v6619_v19 = vld [vmem:[#allocation8 + $0xc8] sm:$0xf]  ;;  %v1993_v28 = vadd.f32 %v9308_v30, %v1980_v12  ;;  %v6947_v30 = vld [vmem:[#allocation8 + $0x360] sm:$0xf]  ;;  %v6684_v18 = vor.u32 %v8476_v60, %v6683_v37  ;;  %v8454_v37 = vld [vmem:[#allocation8 + $0xac] sm:$0xf] }
 0x157   :  { %v6620_v11 = vor.u32 %v8460_v26, %v6619_v19  ;;  %v8472_v19 = vld [vmem:[#allocation8 + $0x134] sm:$0xf0]  ;;  %v6891_v26 = vld [vmem:[#allocation8 + $0x2e8] sm:$0xf]  ;;  %v6605_v60 = vld [vmem:[#allocation8 + $0xb8] sm:$0xf0] }
 0x158   :  { %3019 = vmatpush.bf16.msrb.mxu1 %v6712_v22  ;;  %v6747_v22 = vld [vmem:[#allocation8 + $0x1c8] sm:$0xf]  ;;  %v2006_v24 = vadd.f32 %v9310_v31, %v1993_v28  ;;  %v8539_v31 = vld [vmem:[#allocation8 + $0x34c] sm:$0xf0]  ;;  %v6668_v23 = vor.u32 %v8472_v19, %v6667_v5  ;;  %v8482_v19 = vld [vmem:[#allocation8 + $0x18c] sm:$0xf] }
 0x159   :  { %3032 = vmatpush.bf16.msrb.mxu2 %v6840_v16  ;;  %v2007_v62 = vpop.f32.mrf.mxu3  ;;  %v8551_v16 = vld [vmem:[#allocation8 + $0x3ac] sm:$0xf0]  ;;  %v6932_v59 = vor.u32 %v8539_v31, %v6931_v53  ;;  %v8520_v53 = vld [vmem:[#allocation8 + $0x2b4] sm:$0xf0]  ;;  %v7000_v31 = vor.u32 %v8553_v32, %v6997_v47 }
 0x15a   :  { %3007 = vmatpush.bf16.msrb.mxu0 %v6568_v17  ;;  %v6748_v17 = vor.u32 %v8492_v9, %v6747_v22  ;;  %v6523_v9 = vld [vmem:[#allocation8 + $0x8] sm:$0xf] }
 0x15c   :  { %3020 = vmatpush.bf16.msrb.mxu1 %v6696_v25  ;;  %v6980_v25 = vor.u32 %v8551_v16, %v6979_v14  ;;  %v6651_v16 = vld [vmem:[#allocation8 + $0x108] sm:$0xf] }
 0x15d   :  { %3033 = vmatpush.bf16.msrb.mxu2 %v6824_v33  ;;  %v8547_v33 = vld [vmem:[#allocation8 + $0x38c] sm:$0xf0] }
 0x15e   :  { %3008 = vmatpush.bf16.msrb.mxu0 %v6552_v34  ;;  %2992 = vmatpush.bf16.msra.mxu3 %v6980_v25  ;;  %v6732_v34 = vor.u32 %v8488_v8, %v6731_v27  ;;  %v6892_v25 = vor.u32 %v8528_v20, %v6891_v26  ;;  %v8468_v27 = vld [vmem:[#allocation8 + $0x114] sm:$0xf0]  ;;  %v8462_v8 = vld [vmem:[#allocation8 + $0xec] sm:$0xf]  ;;  %v6717_v26 = vld [vmem:[#allocation8 + $0x198] sm:$0xf0] }
 0x15f   :  { %v6827_v20 = vld [vmem:[#allocation8 + $0x268] sm:$0xf] }
 0x160   :  { %3021 = vmatpush.bf16.msrb.mxu1 %v6680_v36  ;;  %v6964_v36 = vor.u32 %v8547_v33, %v6963_v29  ;;  %v6637_v33 = vld [vmem:[#allocation8 + $0xf8] sm:$0xf0] }
 0x161   :  { %3034 = vmatpush.bf16.msrb.mxu2 %v6808_v48  ;;  %v6948_v48 = vor.u32 %v8543_v45, %v6947_v30  ;;  %v6652_v45 = vor.u32 %v8468_v27, %v6651_v16  ;;  %v6811_v27 = vld [vmem:[#allocation8 + $0x248] sm:$0xf] }
 0x162   :  { %3009 = vmatpush.bf16.msrb.mxu0 %v6536_v49  ;;  %2993 = vmatpush.bf16.msra.mxu3 %v6964_v36  ;;  %v6875_v36 = vld [vmem:[#allocation8 + $0x2c8] sm:$0xf] }
 0x164   :  { %3022 = vmatpush.bf16.msrb.mxu1 %v6664_v51 }
 0x165   :  { %3035 = vmatpush.bf16.msrb.mxu2 %v6792_v63 }
 0x166   :  { %3010 = vmatpush.bf16.msrb.mxu0 %v6520_v1  ;;  %v2018_v49 = vpop.f32.mrf.mxu0  ;;  %2994 = vmatpush.bf16.msra.mxu3 %v6948_v48  ;;  %v6915_v1 = vld [vmem:[#allocation8 + $0x320] sm:$0xf] }
 0x167   :  { %v2019_v50 = vadd.f32 %v2018_v49, %v2006_v24  ;;  %v6916_v6 = vor.u32 %v8535_v2, %v6915_v1  ;;  %v6876_v49 = vor.u32 %v8524_v39, %v6875_v36  ;;  %v8545_v2 = vld [vmem:[#allocation8 + $0x384] sm:$0xf] }
 0x168   :  { %3023 = vmatpush.bf16.msrb.mxu1 %v6648_v3  ;;  %v2031_v51 = vpop.f32.mrf.mxu1  ;;  %v6539_v3 = vld [vmem:[#allocation8 + $0x28] sm:$0xf] }
 0x169   :  { %3011 = vmatmul.bf16.vlgmr.msrb.gmra.mxu0 %v9302_v56  ;;  %3036 = vmatpush.bf16.msrb.mxu2 %v6776_v10  ;;  %v2032_v55 = vadd.f32 %v2031_v51, %v2019_v50  ;;  %v8436_v10 = vld [vmem:[#allocation8 + $0x14] sm:$0xf0]  ;;  %v8490_v50 = vld [vmem:[#allocation8 + $0x1cc] sm:$0xf]  ;;  %v6749_v51 = vld [vmem:[#allocation8 + $0x1d8] sm:$0xf0] }
 0x16a   :  { %3055 = vmatpush.bf16.msra.mxu0 %v6636_v4  ;;  %2995 = vmatpush.bf16.msra.mxu3 %v6932_v59  ;;  %v8440_v4 = vld [vmem:[#allocation8 + $0x34] sm:$0xf0]  ;;  %v6752_v58 = vor.u32 %v8490_v50, %v6749_v51 }
 0x16b   :  { %3024 = vmatmul.bf16.vlgmr.msrb.gmra.mxu1 %v9300_v54  ;;  %v6540_v14 = vor.u32 %v8440_v4, %v6539_v3  ;;  %v6608_v3 = vor.u32 %v8454_v37, %v6605_v60  ;;  %v8526_v37 = vld [vmem:[#allocation8 + $0x2ec] sm:$0xf]  ;;  %v6893_v60 = vld [vmem:[#allocation8 + $0x2f8] sm:$0xf0] }
 0x16c   :  { %3068 = vmatpush.bf16.msra.mxu1 %v6764_v7 }
 0x16e   :  { %3056 = vmatpush.bf16.msra.mxu0 %v6620_v11  ;;  %v2044_v61 = vpop.f32.mrf.mxu2  ;;  %v2020_v22 = vpop.f32.mrf.mxu0  ;;  %2996 = vmatpush.bf16.msra.mxu3 %v6916_v6  ;;  %v8450_v6 = vld [vmem:[#allocation8 + $0x8c] sm:$0xf] }
 0x16f   :  { %v2045_v62 = vadd.f32 %v2044_v61, %v2032_v55  ;;  %v6624_v55 = vor.u32 %v8458_v44, %v6621_v38  ;;  %v8486_v61 = vld [vmem:[#allocation8 + $0x1ac] sm:$0xf]  ;;  %v8512_v22 = vld [vmem:[#allocation8 + $0x274] sm:$0xf0]  ;;  %v6917_v44 = vld [vmem:[#allocation8 + $0x330] sm:$0xf0] }
 0x170   :  { %3069 = vmatpush.bf16.msra.mxu1 %v6748_v17  ;;  %v2033_v12 = vpop.f32.mrf.mxu1  ;;  %v6899_v17 = vld [vmem:[#allocation8 + $0x300] sm:$0xf]  ;;  %v6828_v16 = vor.u32 %v8512_v22, %v6827_v20  ;;  %v6877_v20 = vld [vmem:[#allocation8 + $0x2d8] sm:$0xf0] }
 0x171   :  { %v2057_v63 = vpop.f32.mrf.mxu3  ;;  %v6900_v28 = vor.u32 %v8531_v21, %v6899_v17  ;;  %v8541_v12 = vld [vmem:[#allocation8 + $0x364] sm:$0xf]  ;;  %v8446_v17 = vld [vmem:[#allocation8 + $0x6c] sm:$0xf]  ;;  %v6573_v21 = vld [vmem:[#allocation8 + $0x78] sm:$0xf0] }
 0x172   :  { %3057 = vmatpush.bf16.msra.mxu0 %v6604_v15  ;;  %v2058_v7 = vadd.f32 %v2057_v63, %v2045_v62  ;;  %v8557_v15 = vld [vmem:[#allocation8 + $0x3e4] sm:$0xf]  ;;  %v6733_v62 = vld [vmem:[#allocation8 + $0x1b8] sm:$0xf0]  ;;  %v6843_v63 = vld [vmem:[#allocation8 + $0x288] sm:$0xf] }
 0x173   :  { %2997 = vmatpush.bf16.msra.mxu3 %v6900_v28  ;;  %v7016_v24 = vor.u32 %v8557_v15, %v7013_v35  ;;  %v6736_v4 = vor.u32 %v8486_v61, %v6733_v62  ;;  %v8537_v35 = vld [vmem:[#allocation8 + $0x344] sm:$0xf] }
 0x174   :  { %3070 = vmatpush.bf16.msra.mxu1 %v6732_v34  ;;  %v2167_v11 = vmax.f32 %v2058_v7, 0.0  ;;  %v8494_v34 = vld [vmem:[#allocation8 + $0x1ec] sm:$0xf]  ;;  %v6589_v7 = vld [vmem:[#allocation8 + $0x98] sm:$0xf0] }
 0x175   :  { %v6768_v48 = vor.u32 %v8494_v34, %v6765_v13  ;;  %v6933_v13 = vld [vmem:[#allocation8 + $0x350] sm:$0xf0] }
 0x176   :  { %3058 = vmatpush.bf16.msra.mxu0 %v6588_v43  ;;  %v9320_v29 = vpack.c.bf16 %v2167_v11, %v2167_v11  ;;  %v2046_v40 = vpop.f32.mrf.mxu2  ;;  %v6524_v43 = vor.u32 %v8436_v10, %v6523_v9  ;;  %v6592_v10 = vor.u32 %v8450_v6, %v6589_v7  ;;  %v6949_v11 = vld [vmem:[#allocation8 + $0x370] sm:$0xf0]  ;;  %v6936_v32 = vor.u32 %v8537_v35, %v6933_v13  ;;  %v6653_v6 = vld [vmem:[#allocation8 + $0x118] sm:$0xf0] }
 0x177   :  { %3042 = vmatpush.bf16.msrb.mxu3 %v7016_v24  ;;  %v6952_v28 = vor.u32 %v8541_v12, %v6949_v11  ;;  %v8442_v40 = vld [vmem:[#allocation8 + $0x4c] sm:$0xf]  ;;  %v6557_v24 = vld [vmem:[#allocation8 + $0x58] sm:$0xf0] }
 0x178   :  { %3071 = vmatpush.bf16.msra.mxu1 %v6716_v46  ;;  %2985 = vmatmul.bf16.vlgmr.msra.gmra.mxu2 %v9320_v29  ;;  %v6640_v46 = vor.u32 %v8462_v8, %v6637_v33  ;;  %v8508_v8 = vld [vmem:[#allocation8 + $0x254] sm:$0xf0]  ;;  %v6576_v33 = vor.u32 %v8446_v17, %v6573_v21  ;;  %v6560_v47 = vor.u32 %v8442_v40, %v6557_v24  ;;  %v6861_v17 = vld [vmem:[#allocation8 + $0x2b8] sm:$0xf0]  ;;  %v8502_v24 = vld [vmem:[#allocation8 + $0x22c] sm:$0xf] }
 0x179   :  { %v2059_v30 = vpop.f32.mrf.mxu3  ;;  %3081 = vmatpush.bf16.msra.mxu2 %v6892_v25  ;;  %v6701_v25 = vld [vmem:[#allocation8 + $0x178] sm:$0xf0]  ;;  %v6812_v39 = vor.u32 %v8508_v8, %v6811_v27 }
 0x17a   :  { %3059 = vmatpush.bf16.msra.mxu0 %v6572_v42  ;;  %v6859_v42 = vld [vmem:[#allocation8 + $0x2a8] sm:$0xf]  ;;  %v6685_v30 = vld [vmem:[#allocation8 + $0x158] sm:$0xf0] }
 0x17b   :  { %v6860_v59 = vor.u32 %v8520_v53, %v6859_v42  ;;  %3043 = vmatpush.bf16.msrb.mxu3 %v7000_v31  ;;  %v8438_v42 = vld [vmem:[#allocation8 + $0x2c] sm:$0xf]  ;;  %v6541_v53 = vld [vmem:[#allocation8 + $0x38] sm:$0xf0] }
 0x17c   :  { %3072 = vmatpush.bf16.msra.mxu1 %v6700_v52  ;;  %v8549_v52 = vld [vmem:[#allocation8 + $0x3a4] sm:$0xf]  ;;  %v8470_v31 = vld [vmem:[#allocation8 + $0x12c] sm:$0xf]  ;;  %v6544_v61 = vor.u32 %v8438_v42, %v6541_v53 }
 0x17d   :  { %3082 = vmatpush.bf16.msra.mxu2 %v6876_v49  ;;  %v6984_v1 = vor.u32 %v8549_v52, %v6981_v57  ;;  %v8533_v49 = vld [vmem:[#allocation8 + $0x324] sm:$0xf]  ;;  %v6779_v52 = vld [vmem:[#allocation8 + $0x208] sm:$0xf]  ;;  %v8500_v57 = vld [vmem:[#allocation8 + $0x214] sm:$0xf0] }
 0x17e   :  { %3060 = vmatpush.bf16.msra.mxu0 %v6556_v0  ;;  %v8516_v0 = vld [vmem:[#allocation8 + $0x294] sm:$0xf0] }
 0x17f   :  { %v6844_v5 = vor.u32 %v8516_v0, %v6843_v63  ;;  %3044 = vmatpush.bf16.msrb.mxu3 %v6984_v1  ;;  %v8529_v63 = vld [vmem:[#allocation8 + $0x304] sm:$0xf]  ;;  %v6901_v0 = vld [vmem:[#allocation8 + $0x310] sm:$0xf0] }
 0x180   :  { %3073 = vmatpush.bf16.msra.mxu1 %v6684_v18  ;;  %v6965_v18 = vld [vmem:[#allocation8 + $0x390] sm:$0xf0]  ;;  %v6904_v7 = vor.u32 %v8529_v63, %v6901_v0  ;;  %v6971_v63 = vld [vmem:[#allocation8 + $0x388] sm:$0xf]  ;;  %v8548_v0 = vld [vmem:[#allocation8 + $0x394] sm:$0xf0] }
 0x181   :  { %3083 = vmatpush.bf16.msra.mxu2 %v6860_v59  ;;  %v6968_v9 = vor.u32 %v8545_v2, %v6965_v18  ;;  %v6780_v2 = vor.u32 %v8500_v57, %v6779_v52  ;;  %v8434_v18 = vld [vmem:[#allocation8 + $0xc] sm:$0xf]  ;;  %v7003_v52 = vld [vmem:[#allocation8 + $0x3c8] sm:$0xf]  ;;  %v8556_v57 = vld [vmem:[#allocation8 + $0x3d4] sm:$0xf0] }
 0x182   :  { %3061 = vmatpush.bf16.msra.mxu0 %v6540_v14  ;;  %v6720_v14 = vor.u32 %v8482_v19, %v6717_v26  ;;  %v436_v19 = vperm.slane %v9312_v41, 3  ;;  %v8522_v26 = vld [vmem:[#allocation8 + $0x2cc] sm:$0xf] }
 0x183   :  { %3045 = vmatpush.bf16.msrb.mxu3 %v6968_v9  ;;  %v6880_v11 = vor.u32 %v8522_v26, %v6877_v20 }
 0x184   :  { %3074 = vmatpush.bf16.msra.mxu1 %v6668_v23  ;;  %v8478_v23 = vld [vmem:[#allocation8 + $0x16c] sm:$0xf] }
 0x185   :  { %3084 = vmatpush.bf16.msra.mxu2 %v6844_v5  ;;  %v6704_v36 = vor.u32 %v8478_v23, %v6701_v25  ;;  %v8466_v5 = vld [vmem:[#allocation8 + $0x10c] sm:$0xf]  ;;  %v6845_v25 = vld [vmem:[#allocation8 + $0x298] sm:$0xf0] }
 0x186   :  { %3062 = vmatpush.bf16.msra.mxu0 %v6524_v43  ;;  %v9326_v15 = vpop.f32.mrf.mxu0  ;;  %v8474_v43 = vld [vmem:[#allocation8 + $0x14c] sm:$0xf] }
 0x187   :  { %3046 = vmatpush.bf16.msrb.mxu3 %v6952_v28  ;;  %v6688_v38 = vor.u32 %v8474_v43, %v6685_v30  ;;  %v8514_v23 = vld [vmem:[#allocation8 + $0x28c] sm:$0xf]  ;;  %v6797_v43 = vld [vmem:[#allocation8 + $0x238] sm:$0xf0] }
 0x188   :  { %3075 = vmatpush.bf16.msra.mxu1 %v6652_v45  ;;  %3037 = vmatmul.bf16.vlgmr.msrb.gmra.mxu2 %v9320_v29  ;;  %v9328_v34 = vpop.f32.mrf.mxu1  ;;  %v6795_v45 = vld [vmem:[#allocation8 + $0x228] sm:$0xf]  ;;  %v6848_v27 = vor.u32 %v8514_v23, %v6845_v25  ;;  %v8510_v28 = vld [vmem:[#allocation8 + $0x26c] sm:$0xf] }
 0x189   :  { %3063 = vmatmul.bf16.vlgmr.msra.gmra.mxu0 %v9302_v56  ;;  %3085 = vmatpush.bf16.msra.mxu2 %v6828_v16  ;;  %v8518_v16 = vld [vmem:[#allocation8 + $0x2ac] sm:$0xf] }
 0x18a   :  { %3107 = vmatpush.bf16.msrb.mxu0 %v6640_v46  ;;  %v8504_v46 = vld [vmem:[#allocation8 + $0x234] sm:$0xf0]  ;;  %v6864_v41 = vor.u32 %v8518_v16, %v6861_v17 }
 0x18b   :  { %3076 = vmatmul.bf16.vlgmr.msra.gmra.mxu1 %v9300_v54  ;;  %v6796_v50 = vor.u32 %v8504_v46, %v6795_v45  ;;  %3047 = vmatpush.bf16.msrb.mxu3 %v6936_v32  ;;  %v6800_v45 = vor.u32 %v8502_v24, %v6797_v43  ;;  %v8532_v16 = vld [vmem:[#allocation8 + $0x314] sm:$0xf0] }
 0x18c   :  { %3120 = vmatpush.bf16.msrb.mxu1 %v6768_v48 }
 0x18d   :  { %3086 = vmatpush.bf16.msra.mxu2 %v6812_v39  ;;  %v6813_v39 = vld [vmem:[#allocation8 + $0x258] sm:$0xf0] }
 0x18e   :  { %3108 = vmatpush.bf16.msrb.mxu0 %v6624_v55  ;;  %v9330_v48 = vpop.f32.mrf.mxu2  ;;  %v6669_v55 = vld [vmem:[#allocation8 + $0x138] sm:$0xf0]  ;;  %v2072_v59 = vpop.f32.mrf.mxu0 }
 0x18f   :  { %v6672_v1 = vor.u32 %v8470_v31, %v6669_v55 }
 0x190   :  { %3121 = vmatpush.bf16.msrb.mxu1 %v6752_v58  ;;  %v6920_v58 = vor.u32 %v8533_v49, %v6917_v44  ;;  %v2085_v62 = vpop.f32.mrf.mxu1  ;;  %v6781_v49 = vld [vmem:[#allocation8 + $0x218] sm:$0xf0] }
 0x191   :  { %v2109_v51 = vpop.f32.mrf.mxu3  ;;  %3087 = vmatpush.bf16.msra.mxu2 %v6796_v50  ;;  %v7019_v50 = vld [vmem:[#allocation8 + $0x3e8] sm:$0xf] }
 0x192   :  { %3109 = vmatpush.bf16.msrb.mxu0 %v6608_v3  ;;  %v6525_v3 = vld [vmem:[#allocation8 + $0x18] sm:$0xf0]  ;;  %3048 = vmatpush.bf16.msrb.mxu3 %v6920_v58 }
 0x193   :  { %v6528_v22 = vor.u32 %v8434_v18, %v6525_v3  ;;  %v6955_v18 = vld [vmem:[#allocation8 + $0x368] sm:$0xf]  ;;  %v8544_v3 = vld [vmem:[#allocation8 + $0x374] sm:$0xf0] }
 0x194   :  { %3122 = vmatpush.bf16.msrb.mxu1 %v6736_v4  ;;  %v6896_v4 = vor.u32 %v8526_v37, %v6893_v60  ;;  %v7004_v37 = vor.u32 %v8556_v57, %v7003_v52  ;;  %v6987_v60 = vld [vmem:[#allocation8 + $0x3a8] sm:$0xf]  ;;  %v7107_v52 = vld [vmem:[#allocation11 + $0xa0] sm:$0xf]  ;;  %v8583_v57 = vld [vmem:[#allocation11 + $0xac] sm:$0xf0] }
 0x195   :  { %3088 = vmatpush.bf16.msra.mxu2 %v6780_v2  ;;  %v6972_v2 = vor.u32 %v8548_v0, %v6971_v63  ;;  %v7091_v63 = vld [vmem:[#allocation11 + $0x80] sm:$0xf]  ;;  %v8579_v0 = vld [vmem:[#allocation11 + $0x8c] sm:$0xf0] }
 0x196   :  { %3110 = vmatpush.bf16.msrb.mxu0 %v6592_v10  ;;  %v2098_v9 = vpop.f32.mrf.mxu2  ;;  %v6656_v10 = vor.u32 %v8466_v5, %v6653_v6  ;;  %3049 = vmatpush.bf16.msrb.mxu3 %v6904_v7  ;;  %v6956_v5 = vor.u32 %v8544_v3, %v6955_v18  ;;  %v6939_v7 = vld [vmem:[#allocation8 + $0x348] sm:$0xf]  ;;  %v7267_v18 = vld [vmem:[#allocation11 + $0x1e0] sm:$0xf]  ;;  %v8623_v3 = vld [vmem:[#allocation11 + $0x1ec] sm:$0xf0] }
 0x197   :  { %v6923_v9 = vld [vmem:[#allocation8 + $0x328] sm:$0xf] }
 0x198   :  { %3123 = vmatpush.bf16.msrb.mxu1 %v6720_v14  ;;  %v2071_v14 = vadd.f32 %v9326_v15, %v436_v19  ;;  %3089 = vmatmul.bf16.vlgmr.msra.gmra.mxu2 %v9320_v29  ;;  %v6829_v15 = vld [vmem:[#allocation8 + $0x278] sm:$0xf0]  ;;  %v8540_v19 = vld [vmem:[#allocation8 + $0x354] sm:$0xf0] }
 0x199   :  { %v2111_v12 = vpop.f32.mrf.mxu3  ;;  %3133 = vmatpush.bf16.msrb.mxu2 %v6896_v4 }
 0x19a   :  { %3111 = vmatpush.bf16.msrb.mxu0 %v6576_v33  ;;  %v2084_v21 = vadd.f32 %v9328_v34, %v2071_v14  ;;  %v6832_v33 = vor.u32 %v8510_v28, %v6829_v15  ;;  %v6907_v14 = vld [vmem:[#allocation8 + $0x308] sm:$0xf]  ;;  %v8550_v15 = vld [vmem:[#allocation8 + $0x3ac] sm:$0xf] }
 0x19b   :  { %v6908_v23 = vor.u32 %v8532_v16, %v6907_v14  ;;  %v8567_v14 = vld [vmem:[#allocation11 + $0x2c] sm:$0xf0]  ;;  %v7235_v16 = vld [vmem:[#allocation11 + $0x1a0] sm:$0xf] }
 0x19c   :  { %3124 = vmatpush.bf16.msrb.mxu1 %v6704_v36  ;;  %v2097_v8 = vadd.f32 %v9330_v48, %v2084_v21  ;;  %v8506_v36 = vld [vmem:[#allocation8 + $0x24c] sm:$0xf]  ;;  %v7021_v21 = vld [vmem:[#allocation8 + $0x3f8] sm:$0xf0] }
 0x19d   :  { %3134 = vmatpush.bf16.msrb.mxu2 %v6880_v11  ;;  %v8498_v48 = vld [vmem:[#allocation8 + $0x20c] sm:$0xf] }
 0x19e   :  { %3112 = vmatpush.bf16.msrb.mxu0 %v6560_v47  ;;  %v2110_v35 = vadd.f32 %v2109_v51, %v2097_v8  ;;  %v8560_v51 = vld [vmem:[#allocation8 + $0x3f4] sm:$0xf0]  ;;  %v6784_v42 = vor.u32 %v8498_v48, %v6781_v49  ;;  %v7005_v8 = vld [vmem:[#allocation8 + $0x3d8] sm:$0xf0]  ;;  %v7139_v48 = vld [vmem:[#allocation11 + $0xe0] sm:$0xf] }
 0x19f   :  { %v7020_v31 = vor.u32 %v8560_v51, %v7019_v50  ;;  %v8591_v49 = vld [vmem:[#allocation11 + $0xec] sm:$0xf0]  ;;  %v7123_v51 = vld [vmem:[#allocation11 + $0xc0] sm:$0xf] }
 0x1a0   :  { %3125 = vmatpush.bf16.msrb.mxu1 %v6688_v38  ;;  %v7140_v50 = vor.u32 %v8591_v49, %v7139_v48 }
 0x1a1   :  { %3135 = vmatpush.bf16.msrb.mxu2 %v6864_v41  ;;  %v8558_v41 = vld [vmem:[#allocation8 + $0x3ec] sm:$0xf] }
 0x1a2   :  { %3113 = vmatpush.bf16.msrb.mxu0 %v6544_v61  ;;  %v8552_v61 = vld [vmem:[#allocation8 + $0x3b4] sm:$0xf0]  ;;  %v7024_v25 = vor.u32 %v8558_v41, %v7021_v21 }
 0x1a3   :  { %v6988_v62 = vor.u32 %v8552_v61, %v6987_v60  ;;  %v7108_v61 = vor.u32 %v8583_v57, %v7107_v52  ;;  %v7109_v52 = vld [vmem:[#allocation11 + $0xb0] sm:$0xf0] }
 0x1a4   :  { %3126 = vmatpush.bf16.msrb.mxu1 %v6672_v1  ;;  %v9343_v1 = vld [vmem:[#allocation10] sm:$0xf] }
 0x1a5   :  { %3136 = vmatpush.bf16.msrb.mxu2 %v6848_v27  ;;  %v2303_v4 = vperm.slane %v9343_v1, 0  ;;  %v8554_v27 = vld [vmem:[#allocation8 + $0x3cc] sm:$0xf] }
 0x1a6   :  { %3114 = vmatpush.bf16.msrb.mxu0 %v6528_v22  ;;  %v2122_v13 = vpop.f32.mrf.mxu0  ;;  %v6940_v22 = vor.u32 %v8540_v19, %v6939_v7  ;;  %v7008_v28 = vor.u32 %v8554_v27, %v7005_v8  ;;  %v7059_v19 = vld [vmem:[#allocation11 + $0x40] sm:$0xf] }
 0x1a7   :  { %v2123_v34 = vadd.f32 %v2122_v13, %v2110_v35  ;;  %v8546_v13 = vld [vmem:[#allocation8 + $0x38c] sm:$0xf]  ;;  %v7027_v8 = vld [vmem:[#allocation11] sm:$0xf] }
 0x1a8   :  { %3127 = vmatpush.bf16.msrb.mxu1 %v6656_v10  ;;  %v2135_v40 = vpop.f32.mrf.mxu1  ;;  %v8536_v10 = vld [vmem:[#allocation8 + $0x334] sm:$0xf0] }
 0x1a9   :  { %3115 = vmatmul.bf16.vlgmr.msrb.gmra.mxu0 %v9302_v56  ;;  %3137 = vmatpush.bf16.msrb.mxu2 %v6832_v33  ;;  %v6816_v56 = vor.u32 %v8506_v36, %v6813_v39  ;;  %v2136_v30 = vadd.f32 %v2135_v40, %v2123_v34  ;;  %v6924_v12 = vor.u32 %v8536_v10, %v6923_v9  ;;  %v6989_v33 = vld [vmem:[#allocation8 + $0x3b8] sm:$0xf0]  ;;  %v8542_v40 = vld [vmem:[#allocation8 + $0x36c] sm:$0xf] }
 0x1aa   :  { %v6992_v35 = vor.u32 %v8550_v15, %v6989_v33  ;;  %v6973_v36 = vld [vmem:[#allocation8 + $0x398] sm:$0xf0]  ;;  %3945 = vmatpush.bf16.msra.mxu0 %v7140_v50  ;;  %v7219_v15 = vld [vmem:[#allocation11 + $0x180] sm:$0xf]  ;;  %v8603_v50 = vld [vmem:[#allocation11 + $0x14c] sm:$0xf0] }
 0x1ab   :  { %3128 = vmatmul.bf16.vlgmr.msrb.gmra.mxu1 %v9300_v54  ;;  %v6976_v39 = vor.u32 %v8546_v13, %v6973_v36  ;;  %v6957_v34 = vld [vmem:[#allocation8 + $0x378] sm:$0xf0] }
 0x1ac   :  { %v6960_v24 = vor.u32 %v8542_v40, %v6957_v34  ;;  %v7141_v40 = vld [vmem:[#allocation11 + $0xf0] sm:$0xf0] }
 0x1ad   :  { %3138 = vmatpush.bf16.msrb.mxu2 %v6816_v56  ;;  %v2304_v56 = vperm.slane %v9343_v1, 1 }
 0x1ae   :  { %v2148_v54 = vpop.f32.mrf.mxu2  ;;  %v2124_v47 = vpop.f32.mrf.mxu0 }
 0x1af   :  { %v2149_v46 = vadd.f32 %v2148_v54, %v2136_v30  ;;  %v2161_v32 = vpop.f32.mrf.mxu3  ;;  %v8538_v30 = vld [vmem:[#allocation8 + $0x34c] sm:$0xf]  ;;  %v6941_v54 = vld [vmem:[#allocation8 + $0x358] sm:$0xf0] }
 0x1b0   :  { %v2137_v44 = vpop.f32.mrf.mxu1  ;;  %v6944_v47 = vor.u32 %v8538_v30, %v6941_v54 }
 0x1b1   :  { %v2162_v38 = vadd.f32 %v2161_v32, %v2149_v46  ;;  %3139 = vmatpush.bf16.msrb.mxu2 %v6800_v45  ;;  %v8534_v44 = vld [vmem:[#allocation8 + $0x32c] sm:$0xf] }
 0x1b3   :  { %v2168_v53 = vmax.f32 %v2162_v38, 0.0  ;;  %v6925_v38 = vld [vmem:[#allocation8 + $0x338] sm:$0xf0] }
 0x1b5   :  { %v9339_v55 = vpack.c.bf16 %v2168_v53, %v2168_v53  ;;  %3140 = vmatpush.bf16.msrb.mxu2 %v6784_v42  ;;  %v8587_v42 = vld [vmem:[#allocation11 + $0xcc] sm:$0xf0]  ;;  %v6928_v53 = vor.u32 %v8534_v44, %v6925_v38  ;;  %v7187_v38 = vld [vmem:[#allocation11 + $0x140] sm:$0xf] }
 0x1b6   :  { %v2150_v58 = vpop.f32.mrf.mxu2  ;;  %v7188_v57 = vor.u32 %v8603_v50, %v7187_v38  ;;  %v8609_v38 = vld [vmem:[#allocation11 + $0x184] sm:$0xf] }
 0x1b7   :  { %v2163_v59 = vpop.f32.mrf.mxu3  ;;  %2998 = vmatmul.bf16.vlgmr.msra.gmra.mxu3 %v9339_v55 }
 0x1b8   :  { %3094 = vmatpush.bf16.msra.mxu3 %v7020_v31  ;;  %3141 = vmatmul.bf16.vlgmr.msrb.gmra.mxu2 %v9320_v29  ;;  %v7124_v31 = vor.u32 %v8587_v42, %v7123_v51  ;;  %v8530_v59 = vld [vmem:[#allocation8 + $0x30c] sm:$0xf]  ;;  %v7379_v51 = vld [vmem:[#allocation11 + $0x2c0] sm:$0xf] }
 0x1ba   :  { %3946 = vmatpush.bf16.msra.mxu0 %v7124_v31  ;;  %v8581_v31 = vld [vmem:[#allocation11 + $0xa4] sm:$0xf] }
 0x1bc   :  { %3095 = vmatpush.bf16.msra.mxu3 %v7004_v37  ;;  %v6909_v37 = vld [vmem:[#allocation8 + $0x318] sm:$0xf0] }
 0x1be   :  { %3947 = vmatpush.bf16.msra.mxu0 %v7108_v61  ;;  %v7363_v61 = vld [vmem:[#allocation11 + $0x2a0] sm:$0xf] }
 0x1c0   :  { %3096 = vmatpush.bf16.msra.mxu3 %v6988_v62  ;;  %v6912_v62 = vor.u32 %v8530_v59, %v6909_v37  ;;  %v7171_v59 = vld [vmem:[#allocation11 + $0x120] sm:$0xf]  ;;  %v7112_v37 = vor.u32 %v8581_v31, %v7109_v52 }
 0x1c1   :  { %v7283_v52 = vld [vmem:[#allocation11 + $0x200] sm:$0xf] }
 0x1c4   :  { %3097 = vmatpush.bf16.msra.mxu3 %v6972_v2  ;;  %v7092_v2 = vor.u32 %v8579_v0, %v7091_v63  ;;  %v8577_v63 = vld [vmem:[#allocation11 + $0x84] sm:$0xf]  ;;  %v7093_v0 = vld [vmem:[#allocation11 + $0x90] sm:$0xf0] }
 0x1c6   :  { %v2960_v6 = vpop.f32.mrf.mxu0  ;;  %3948 = vmatpush.bf16.msra.mxu0 %v7092_v2 }
 0x1c7   :  { %v2961_v29 = vadd.f32 %v2960_v6, %v2303_v4  ;;  %3050 = vmatmul.bf16.vlgmr.msrb.gmra.mxu3 %v9339_v55  ;;  %v7075_v4 = vld [vmem:[#allocation11 + $0x60] sm:$0xf]  ;;  %v7268_v6 = vor.u32 %v8623_v3, %v7267_v18 }
 0x1c8   :  { %v2973_v26 = vpop.f32.mrf.mxu1  ;;  %3098 = vmatpush.bf16.msra.mxu3 %v6956_v5  ;;  %v8575_v5 = vld [vmem:[#allocation11 + $0x6c] sm:$0xf0]  ;;  %v7155_v3 = vld [vmem:[#allocation11 + $0x100] sm:$0xf] }
 0x1c9   :  { %v9347_v20 = vadd.f32 %v2973_v26, %v2961_v29  ;;  %3958 = vmatpush.bf16.msra.mxu1 %v7268_v6  ;;  %v7076_v7 = vor.u32 %v8575_v5, %v7075_v4  ;;  %v8571_v29 = vld [vmem:[#allocation11 + $0x4c] sm:$0xf0]  ;;  %v7251_v26 = vld [vmem:[#allocation11 + $0x1c0] sm:$0xf]  ;;  %v7096_v6 = vor.u32 %v8577_v63, %v7093_v0  ;;  %v8653_v0 = vld [vmem:[#allocation11 + $0x2e4] sm:$0xf] }
 0x1ca   :  { %v7060_v9 = vor.u32 %v8571_v29, %v7059_v19  ;;  %v8595_v4 = vld [vmem:[#allocation11 + $0x10c] sm:$0xf0]  ;;  %v8573_v29 = vld [vmem:[#allocation11 + $0x64] sm:$0xf] }
 0x1cb   :  { %3949 = vmatpush.bf16.msra.mxu0 %v7076_v7  ;;  %v7347_v7 = vld [vmem:[#allocation11 + $0x280] sm:$0xf]  ;;  %v8643_v19 = vld [vmem:[#allocation11 + $0x28c] sm:$0xf0] }
 0x1cc   :  { %3099 = vmatpush.bf16.msra.mxu3 %v6940_v22  ;;  %v8619_v22 = vld [vmem:[#allocation11 + $0x1cc] sm:$0xf0] }
 0x1cd   :  { %v7252_v10 = vor.u32 %v8619_v22, %v7251_v26  ;;  %v7077_v26 = vld [vmem:[#allocation11 + $0x70] sm:$0xf0]  ;;  %v8621_v22 = vld [vmem:[#allocation11 + $0x1e4] sm:$0xf] }
 0x1ce   :  { %v2962_v11 = vpop.f32.mrf.mxu0 }
 0x1cf   :  { %3959 = vmatpush.bf16.msra.mxu1 %v7252_v10  ;;  %3950 = vmatpush.bf16.msra.mxu0 %v7060_v9  ;;  %v7043_v11 = vld [vmem:[#allocation11 + $0x20] sm:$0xf]  ;;  %v7269_v9 = vld [vmem:[#allocation11 + $0x1f0] sm:$0xf0]  ;;  %v7156_v10 = vor.u32 %v8595_v4, %v7155_v3 }
 0x1d0   :  { %v2975_v17 = vpop.f32.mrf.mxu1  ;;  %3100 = vmatpush.bf16.msra.mxu3 %v6924_v12  ;;  %v2305_v12 = vperm.slane %v9343_v1, 2  ;;  %v7044_v41 = vor.u32 %v8567_v14, %v7043_v11  ;;  %v7080_v11 = vor.u32 %v8573_v29, %v7077_v26  ;;  %v7272_v14 = vor.u32 %v8621_v22, %v7269_v9  ;;  %v8601_v29 = vld [vmem:[#allocation11 + $0x144] sm:$0xf]  ;;  %v7189_v26 = vld [vmem:[#allocation11 + $0x150] sm:$0xf0] }
 0x1d1   :  { %v8649_v22 = vld [vmem:[#allocation11 + $0x2c4] sm:$0xf] }
 0x1d3   :  { %3951 = vmatpush.bf16.msra.mxu0 %v7044_v41  ;;  %v8639_v41 = vld [vmem:[#allocation11 + $0x26c] sm:$0xf0] }
 0x1d4   :  { %3101 = vmatpush.bf16.msra.mxu3 %v6908_v23 }
 0x1d7   :  { %3102 = vmatmul.bf16.vlgmr.msra.gmra.mxu3 %v9339_v55 }
 0x1d8   :  { %3146 = vmatpush.bf16.msrb.mxu3 %v7024_v25 }
 0x1dc   :  { %3147 = vmatpush.bf16.msrb.mxu3 %v7008_v28  ;;  %v8563_v28 = vld [vmem:[#allocation11 + $0xc] sm:$0xf0] }
 0x1dd   :  { %v7028_v33 = vor.u32 %v8563_v28, %v7027_v8 }
 0x1df   :  { %3952 = vmatpush.bf16.msra.mxu0 %v7028_v33  ;;  %v2306_v33 = vperm.slane %v9343_v1, 3 }
 0x1e0   :  { %3148 = vmatpush.bf16.msrb.mxu3 %v6992_v35  ;;  %v8611_v35 = vld [vmem:[#allocation11 + $0x18c] sm:$0xf0] }
 0x1e1   :  { %v7220_v36 = vor.u32 %v8611_v35, %v7219_v15  ;;  %v7315_v35 = vld [vmem:[#allocation11 + $0x240] sm:$0xf] }
 0x1e4   :  { %3149 = vmatpush.bf16.msrb.mxu3 %v6976_v39  ;;  %v8589_v39 = vld [vmem:[#allocation11 + $0xe4] sm:$0xf] }
 0x1e5   :  { %v7144_v34 = vor.u32 %v8589_v39, %v7141_v40  ;;  %v8565_v40 = vld [vmem:[#allocation11 + $0x24] sm:$0xf] }
 0x1e6   :  { %v3012_v43 = vpop.f32.mrf.mxu0 }
 0x1e7   :  { %v3013_v45 = vadd.f32 %v3012_v43, %v2304_v56  ;;  %3997 = vmatpush.bf16.msrb.mxu0 %v7144_v34  ;;  %v7203_v56 = vld [vmem:[#allocation11 + $0x160] sm:$0xf]  ;;  %v7045_v34 = vld [vmem:[#allocation11 + $0x30] sm:$0xf0] }
 0x1e8   :  { %v3025_v46 = vpop.f32.mrf.mxu1  ;;  %3150 = vmatpush.bf16.msrb.mxu3 %v6960_v24  ;;  %v8607_v24 = vld [vmem:[#allocation11 + $0x16c] sm:$0xf0]  ;;  %v7395_v43 = vld [vmem:[#allocation11 + $0x2e0] sm:$0xf] }
 0x1e9   :  { %v9351_v32 = vadd.f32 %v3025_v46, %v3013_v45  ;;  %v7204_v54 = vor.u32 %v8607_v24, %v7203_v56  ;;  %v8655_v45 = vld [vmem:[#allocation11 + $0x2ec] sm:$0xf0]  ;;  %v8585_v46 = vld [vmem:[#allocation11 + $0xc4] sm:$0xf]  ;;  %v7048_v24 = vor.u32 %v8565_v40, %v7045_v34  ;;  %v7349_v34 = vld [vmem:[#allocation11 + $0x290] sm:$0xf0] }
 0x1ea   :  { %v7396_v49 = vor.u32 %v8655_v45, %v7395_v43  ;;  %v8613_v56 = vld [vmem:[#allocation11 + $0x1a4] sm:$0xf]  ;;  %v7237_v43 = vld [vmem:[#allocation11 + $0x1b0] sm:$0xf0] }
 0x1ec   :  { %3151 = vmatpush.bf16.msrb.mxu3 %v6944_v47  ;;  %v7125_v47 = vld [vmem:[#allocation11 + $0xd0] sm:$0xf0]  ;;  %3971 = vmatpush.bf16.msra.mxu2 %v7396_v49  ;;  %v8561_v49 = vld [vmem:[#allocation11 + $0x4] sm:$0xf] }
 0x1ed   :  { %v7128_v44 = vor.u32 %v8585_v46, %v7125_v47  ;;  %v7299_v47 = vld [vmem:[#allocation11 + $0x220] sm:$0xf] }
 0x1ee   :  { %v3014_v58 = vpop.f32.mrf.mxu0 }
 0x1ef   :  { %3998 = vmatpush.bf16.msrb.mxu0 %v7128_v44  ;;  %v7029_v44 = vld [vmem:[#allocation11 + $0x10] sm:$0xf0] }
 0x1f0   :  { %v3027_v60 = vpop.f32.mrf.mxu1  ;;  %3152 = vmatpush.bf16.msrb.mxu3 %v6928_v53  ;;  %v8651_v53 = vld [vmem:[#allocation11 + $0x2cc] sm:$0xf0] }
 0x1f1   :  { %v7380_v58 = vor.u32 %v8651_v53, %v7379_v51  ;;  %v8599_v60 = vld [vmem:[#allocation11 + $0x12c] sm:$0xf0]  ;;  %v7221_v53 = vld [vmem:[#allocation11 + $0x190] sm:$0xf0] }
 0x1f2   :  { %v7172_v2 = vor.u32 %v8599_v60, %v7171_v59  ;;  %v7224_v31 = vor.u32 %v8609_v38, %v7221_v53  ;;  %v8605_v60 = vld [vmem:[#allocation11 + $0x164] sm:$0xf]  ;;  %v7427_v53 = vld [vmem:[#allocation11 + $0x320] sm:$0xf] }
 0x1f3   :  { %3972 = vmatpush.bf16.msra.mxu2 %v7380_v58  ;;  %3999 = vmatpush.bf16.msrb.mxu0 %v7112_v37  ;;  %v7523_v58 = vld [vmem:[#allocation11 + $0x3e0] sm:$0xf]  ;;  %v8687_v37 = vld [vmem:[#allocation11 + $0x3ec] sm:$0xf0] }
 0x1f4   :  { %3153 = vmatpush.bf16.msrb.mxu3 %v6912_v62  ;;  %v8647_v62 = vld [vmem:[#allocation11 + $0x2ac] sm:$0xf0] }
 0x1f5   :  { %v7364_v18 = vor.u32 %v8647_v62, %v7363_v61  ;;  %v7205_v61 = vld [vmem:[#allocation11 + $0x170] sm:$0xf0]  ;;  %v7524_v62 = vor.u32 %v8687_v37, %v7523_v58  ;;  %v8629_v58 = vld [vmem:[#allocation11 + $0x224] sm:$0xf] }
 0x1f6   :  { %v7208_v63 = vor.u32 %v8605_v60, %v7205_v61  ;;  %v7147_v60 = vld [vmem:[#allocation11 + $0xe8] sm:$0xf]  ;;  %v8592_v61 = vld [vmem:[#allocation11 + $0xf4] sm:$0xf0] }
 0x1f7   :  { %3154 = vmatmul.bf16.vlgmr.msrb.gmra.mxu3 %v9339_v55  ;;  %v8615_v55 = vld [vmem:[#allocation11 + $0x1ac] sm:$0xf0]  ;;  %3973 = vmatpush.bf16.msra.mxu2 %v7364_v18 }
 0x1f8   :  { %v7236_v23 = vor.u32 %v8615_v55, %v7235_v16  ;;  %4000 = vmatpush.bf16.msrb.mxu0 %v7096_v6  ;;  %v7331_v16 = vld [vmem:[#allocation11 + $0x260] sm:$0xf]  ;;  %v8569_v55 = vld [vmem:[#allocation11 + $0x44] sm:$0xf]  ;;  %3984 = vmatpush.bf16.msra.mxu3 %v7524_v62 }
 0x1f9   :  { %v7507_v6 = vld [vmem:[#allocation11 + $0x3c0] sm:$0xf] }
 0x1fa   :  { %3960 = vmatpush.bf16.msra.mxu1 %v7236_v23  ;;  %v8617_v23 = vld [vmem:[#allocation11 + $0x1c4] sm:$0xf] }
 0x1fb   :  { %v9355_v17 = vpop.f32.mrf.mxu2 }
 0x1fc   :  { %4001 = vmatpush.bf16.msrb.mxu0 %v7080_v11 }
 0x1fe   :  { %3961 = vmatpush.bf16.msra.mxu1 %v7220_v36  ;;  %v8635_v36 = vld [vmem:[#allocation11 + $0x24c] sm:$0xf0] }
 0x1ff   :  { %v7316_v39 = vor.u32 %v8635_v36, %v7315_v35  ;;  %v8593_v35 = vld [vmem:[#allocation11 + $0x104] sm:$0xf]  ;;  %v7157_v36 = vld [vmem:[#allocation11 + $0x110] sm:$0xf0] }
 0x200   :  { %v7160_v40 = vor.u32 %v8593_v35, %v7157_v36 }
 0x202   :  { %3962 = vmatpush.bf16.msra.mxu1 %v7204_v54  ;;  %v7240_v54 = vor.u32 %v8613_v56, %v7237_v43  ;;  %v8671_v43 = vld [vmem:[#allocation11 + $0x36c] sm:$0xf0] }
 0x203   :  { %v2988_v30 = vpop.f32.mrf.mxu2 }
 0x206   :  { %v3064_v21 = vpop.f32.mrf.mxu0  ;;  %3963 = vmatpush.bf16.msra.mxu1 %v7188_v57  ;;  %v8627_v57 = vld [vmem:[#allocation11 + $0x20c] sm:$0xf0] }
 0x207   :  { %v3065_v25 = vadd.f32 %v3064_v21, %v2305_v12  ;;  %v7348_v12 = vor.u32 %v8643_v19, %v7347_v7  ;;  %v7061_v21 = vld [vmem:[#allocation11 + $0x50] sm:$0xf0]  ;;  %v7284_v59 = vor.u32 %v8627_v57, %v7283_v52  ;;  %v8683_v7 = vld [vmem:[#allocation11 + $0x3cc] sm:$0xf0] }
 0x208   :  { %v3077_v27 = vpop.f32.mrf.mxu1  ;;  %v7064_v28 = vor.u32 %v8569_v55, %v7061_v21  ;;  %v7508_v19 = vor.u32 %v8683_v7, %v7507_v6  ;;  %v8597_v55 = vld [vmem:[#allocation11 + $0x124] sm:$0xf]  ;;  %v7173_v21 = vld [vmem:[#allocation11 + $0x130] sm:$0xf0] }
 0x209   :  { %v9357_v13 = vadd.f32 %v3077_v27, %v3065_v25  ;;  %v7253_v25 = vld [vmem:[#allocation11 + $0x1d0] sm:$0xf0]  ;;  %3974 = vmatpush.bf16.msra.mxu2 %v7348_v12  ;;  %v7332_v27 = vor.u32 %v8639_v41, %v7331_v16  ;;  %v8679_v16 = vld [vmem:[#allocation11 + $0x3ac] sm:$0xf0]  ;;  %v8685_v6 = vld [vmem:[#allocation11 + $0x3e4] sm:$0xf] }
 0x20a   :  { %3964 = vmatpush.bf16.msra.mxu1 %v7172_v2  ;;  %v7256_v15 = vor.u32 %v8617_v23, %v7253_v25  ;;  %4002 = vmatpush.bf16.msrb.mxu0 %v7064_v28  ;;  %v7397_v2 = vld [vmem:[#allocation11 + $0x2f0] sm:$0xf0]  ;;  %v8645_v23 = vld [vmem:[#allocation11 + $0x2a4] sm:$0xf]  ;;  %v7176_v25 = vor.u32 %v8597_v55, %v7173_v21  ;;  %v7475_v28 = vld [vmem:[#allocation11 + $0x380] sm:$0xf] }
 0x20b   :  { %v9359_v5 = vpop.f32.mrf.mxu2  ;;  %v7400_v3 = vor.u32 %v8653_v0, %v7397_v2  ;;  %v7381_v12 = vld [vmem:[#allocation11 + $0x2d0] sm:$0xf0]  ;;  %3985 = vmatpush.bf16.msra.mxu3 %v7508_v19  ;;  %v7411_v2 = vld [vmem:[#allocation11 + $0x300] sm:$0xf]  ;;  %v7131_v19 = vld [vmem:[#allocation11 + $0xc8] sm:$0xf] }
 0x20c   :  { %v7384_v11 = vor.u32 %v8649_v22, %v7381_v12  ;;  %v7525_v22 = vld [vmem:[#allocation11 + $0x3f0] sm:$0xf0] }
 0x20d   :  { %3975 = vmatpush.bf16.msra.mxu2 %v7332_v27  ;;  %v7365_v27 = vld [vmem:[#allocation11 + $0x2b0] sm:$0xf0] }
 0x20e   :  { %v3066_v48 = vpop.f32.mrf.mxu0  ;;  %3965 = vmatpush.bf16.msra.mxu1 %v7156_v10  ;;  %4003 = vmatpush.bf16.msrb.mxu0 %v7048_v24  ;;  %v7192_v10 = vor.u32 %v8601_v29, %v7189_v26  ;;  %v7459_v24 = vld [vmem:[#allocation11 + $0x360] sm:$0xf]  ;;  %v8588_v29 = vld [vmem:[#allocation11 + $0xd4] sm:$0xf0] }
 0x20f   :  { %v8631_v48 = vld [vmem:[#allocation11 + $0x22c] sm:$0xf0]  ;;  %v7132_v12 = vor.u32 %v8588_v29, %v7131_v19  ;;  %v8590_v19 = vld [vmem:[#allocation11 + $0xec] sm:$0xf]  ;;  %v7149_v29 = vld [vmem:[#allocation11 + $0xf8] sm:$0xf0] }
 0x210   :  { %v3079_v42 = vpop.f32.mrf.mxu1  ;;  %v7300_v1 = vor.u32 %v8631_v48, %v7299_v47  ;;  %v7443_v47 = vld [vmem:[#allocation11 + $0x340] sm:$0xf]  ;;  %v8667_v48 = vld [vmem:[#allocation11 + $0x34c] sm:$0xf0] }
 0x211   :  { %3976 = vmatpush.bf16.msra.mxu2 %v7316_v39  ;;  %v7032_v42 = vor.u32 %v8561_v49, %v7029_v44  ;;  %v8641_v39 = vld [vmem:[#allocation11 + $0x284] sm:$0xf]  ;;  %v7317_v44 = vld [vmem:[#allocation11 + $0x250] sm:$0xf0] }
 0x212   :  { %4010 = vmatpush.bf16.msrb.mxu1 %v7272_v14  ;;  %v7491_v14 = vld [vmem:[#allocation11 + $0x3a0] sm:$0xf]  ;;  %v7352_v56 = vor.u32 %v8641_v39, %v7349_v34  ;;  %v8633_v49 = vld [vmem:[#allocation11 + $0x244] sm:$0xf]  ;;  %v7083_v39 = vld [vmem:[#allocation11 + $0x68] sm:$0xf] }
 0x213   :  { %v3040_v8 = vpop.f32.mrf.mxu2  ;;  %4004 = vmatpush.bf16.msrb.mxu0 %v7032_v42  ;;  %v7492_v41 = vor.u32 %v8679_v16, %v7491_v14  ;;  %v7320_v38 = vor.u32 %v8633_v49, %v7317_v44  ;;  %v2987_v42 = vadd.f32 %v9355_v17, %v9347_v20  ;;  %v8625_v17 = vld [vmem:[#allocation11 + $0x204] sm:$0xf]  ;;  %v8584_v14 = vld [vmem:[#allocation11 + $0xb4] sm:$0xf0]  ;;  %v7275_v34 = vld [vmem:[#allocation11 + $0x1e8] sm:$0xf] }
 0x214   :  { %v7368_v8 = vor.u32 %v8645_v23, %v7365_v27  ;;  %v8681_v16 = vld [vmem:[#allocation11 + $0x3c4] sm:$0xf]  ;;  %v8580_v27 = vld [vmem:[#allocation11 + $0x94] sm:$0xf0]  ;;  %v7259_v49 = vld [vmem:[#allocation11 + $0x1c8] sm:$0xf] }
 0x215   :  { %3977 = vmatpush.bf16.msra.mxu2 %v7300_v1  ;;  %3986 = vmatpush.bf16.msra.mxu3 %v7492_v41  ;;  %v7444_v1 = vor.u32 %v8667_v48, %v7443_v47  ;;  %v7509_v41 = vld [vmem:[#allocation11 + $0x3d0] sm:$0xf0]  ;;  %v7067_v48 = vld [vmem:[#allocation11 + $0x48] sm:$0xf]  ;;  %v8669_v44 = vld [vmem:[#allocation11 + $0x364] sm:$0xf] }
 0x216   :  { %4011 = vmatpush.bf16.msrb.mxu1 %v7256_v15  ;;  %v8675_v15 = vld [vmem:[#allocation11 + $0x38c] sm:$0xf0]  ;;  %v7512_v21 = vor.u32 %v8681_v16, %v7509_v41  ;;  %v7152_v41 = vor.u32 %v8590_v19, %v7149_v29 }
 0x219   :  { %3978 = vmatpush.bf16.msra.mxu2 %v7284_v59  ;;  %v7301_v59 = vld [vmem:[#allocation11 + $0x230] sm:$0xf0] }
 0x21a   :  { %4012 = vmatpush.bf16.msrb.mxu1 %v7240_v54  ;;  %v8637_v54 = vld [vmem:[#allocation11 + $0x264] sm:$0xf]  ;;  %v7304_v62 = vor.u32 %v8629_v58, %v7301_v59  ;;  %v8568_v58 = vld [vmem:[#allocation11 + $0x34] sm:$0xf0]  ;;  %v7243_v59 = vld [vmem:[#allocation11 + $0x1a8] sm:$0xf] }
 0x21b   :  { %v9364_v51 = vpop.f32.mrf.mxu2 }
 0x21d   :  { %4023 = vmatpush.bf16.msrb.mxu2 %v7400_v3  ;;  %v7148_v3 = vor.u32 %v8592_v61, %v7147_v60  ;;  %v8665_v60 = vld [vmem:[#allocation11 + $0x344] sm:$0xf]  ;;  %v7445_v61 = vld [vmem:[#allocation11 + $0x350] sm:$0xf0] }
 0x21e   :  { %4013 = vmatpush.bf16.msrb.mxu1 %v7224_v31  ;;  %v8663_v31 = vld [vmem:[#allocation11 + $0x32c] sm:$0xf0] }
 0x21f   :  { %v7428_v57 = vor.u32 %v8663_v31, %v7427_v53 }
 0x221   :  { %4024 = vmatpush.bf16.msrb.mxu2 %v7384_v11  ;;  %v7115_v11 = vld [vmem:[#allocation11 + $0xa8] sm:$0xf] }
 0x222   :  { %4014 = vmatpush.bf16.msrb.mxu1 %v7208_v63  ;;  %v7116_v23 = vor.u32 %v8584_v14, %v7115_v11  ;;  %v7211_v11 = vld [vmem:[#allocation11 + $0x168] sm:$0xf]  ;;  %v8608_v14 = vld [vmem:[#allocation11 + $0x174] sm:$0xf0] }
 0x223   :  { %v3092_v9 = vpop.f32.mrf.mxu2 }
 0x224   :  { %v7528_v9 = vor.u32 %v8685_v6, %v7525_v22  ;;  %v7429_v6 = vld [vmem:[#allocation11 + $0x330] sm:$0xf0]  ;;  %v3091_v22 = vadd.f32 %v9364_v51, %v9357_v13  ;;  %v7212_v13 = vor.u32 %v8608_v14, %v7211_v11  ;;  %v8614_v11 = vld [vmem:[#allocation11 + $0x1ac] sm:$0xf]  ;;  %v7245_v14 = vld [vmem:[#allocation11 + $0x1b8] sm:$0xf0] }
 0x225   :  { %4025 = vmatpush.bf16.msrb.mxu2 %v7368_v8  ;;  %v8677_v8 = vld [vmem:[#allocation11 + $0x3a4] sm:$0xf] }
 0x226   :  { %v3116_v30 = vpop.f32.mrf.mxu0  ;;  %4015 = vmatpush.bf16.msrb.mxu1 %v7192_v10 }
 0x227   :  { %v3117_v45 = vadd.f32 %v3116_v30, %v2306_v33  ;;  %v7476_v33 = vor.u32 %v8675_v15, %v7475_v28  ;;  %v7460_v30 = vor.u32 %v8671_v43, %v7459_v24  ;;  %v7493_v28 = vld [vmem:[#allocation11 + $0x3b0] sm:$0xf0]  ;;  %v8624_v24 = vld [vmem:[#allocation11 + $0x1f4] sm:$0xf0]  ;;  %v8673_v43 = vld [vmem:[#allocation11 + $0x384] sm:$0xf] }
 0x228   :  { %v3129_v46 = vpop.f32.mrf.mxu1  ;;  %v7496_v15 = vor.u32 %v8677_v8, %v7493_v28  ;;  %v7276_v47 = vor.u32 %v8624_v24, %v7275_v34  ;;  %v7133_v8 = vld [vmem:[#allocation11 + $0xd8] sm:$0xf0]  ;;  %v8652_v34 = vld [vmem:[#allocation11 + $0x2d4] sm:$0xf0] }
 0x229   :  { %v9362_v50 = vadd.f32 %v3129_v46, %v3117_v45  ;;  %3987 = vmatpush.bf16.msra.mxu3 %v7476_v33  ;;  %4026 = vmatpush.bf16.msrb.mxu2 %v7352_v56  ;;  %v7333_v45 = vld [vmem:[#allocation11 + $0x270] sm:$0xf0]  ;;  %v3039_v33 = vadd.f32 %v9359_v5, %v9351_v32  ;;  %v8620_v5 = vld [vmem:[#allocation11 + $0x1d4] sm:$0xf0]  ;;  %v7117_v24 = vld [vmem:[#allocation11 + $0xb8] sm:$0xf0] }
 0x22a   :  { %4016 = vmatpush.bf16.msrb.mxu1 %v7176_v25  ;;  %v7336_v46 = vor.u32 %v8637_v54, %v7333_v45  ;;  %v7099_v25 = vld [vmem:[#allocation11 + $0x88] sm:$0xf] }
 0x22b   :  { %v7100_v36 = vor.u32 %v8580_v27, %v7099_v25  ;;  %v8656_v25 = vld [vmem:[#allocation11 + $0x2f4] sm:$0xf0]  ;;  %v8586_v27 = vld [vmem:[#allocation11 + $0xcc] sm:$0xf] }
 0x22d   :  { %3988 = vmatpush.bf16.msra.mxu3 %v7460_v30  ;;  %4027 = vmatpush.bf16.msrb.mxu2 %v7336_v46  ;;  %v7477_v30 = vld [vmem:[#allocation11 + $0x390] sm:$0xf0] }
 0x22e   :  { %v3118_v18 = vpop.f32.mrf.mxu0  ;;  %4017 = vmatpush.bf16.msrb.mxu1 %v7160_v40  ;;  %v8576_v40 = vld [vmem:[#allocation11 + $0x74] sm:$0xf0]  ;;  %v7480_v54 = vor.u32 %v8673_v43, %v7477_v30 }
 0x22f   :  { %v8659_v18 = vld [vmem:[#allocation11 + $0x30c] sm:$0xf0]  ;;  %v7084_v46 = vor.u32 %v8576_v40, %v7083_v39  ;;  %v8604_v39 = vld [vmem:[#allocation11 + $0x154] sm:$0xf0]  ;;  %v7387_v40 = vld [vmem:[#allocation11 + $0x2c8] sm:$0xf] }
 0x230   :  { %v3131_v4 = vpop.f32.mrf.mxu1  ;;  %v7412_v20 = vor.u32 %v8659_v18, %v7411_v2  ;;  %v7035_v18 = vld [vmem:[#allocation11 + $0x8] sm:$0xf] }
 0x231   :  { %3989 = vmatpush.bf16.msra.mxu3 %v7444_v1  ;;  %4028 = vmatpush.bf16.msrb.mxu2 %v7320_v38  ;;  %v7285_v4 = vld [vmem:[#allocation11 + $0x210] sm:$0xf0]  ;;  %v8572_v1 = vld [vmem:[#allocation11 + $0x54] sm:$0xf0] }
 0x232   :  { %v7288_v26 = vor.u32 %v8625_v17, %v7285_v4  ;;  %v7461_v38 = vld [vmem:[#allocation11 + $0x370] sm:$0xf0]  ;;  %v7068_v31 = vor.u32 %v8572_v1, %v7067_v48  ;;  %v8612_v17 = vld [vmem:[#allocation11 + $0x194] sm:$0xf0]  ;;  %v8661_v4 = vld [vmem:[#allocation11 + $0x324] sm:$0xf] }
 0x233   :  { %v7371_v48 = vld [vmem:[#allocation11 + $0x2a8] sm:$0xf]  ;;  %v8648_v1 = vld [vmem:[#allocation11 + $0x2b4] sm:$0xf0] }
 0x235   :  { %3990 = vmatpush.bf16.msra.mxu3 %v7428_v57  ;;  %4029 = vmatpush.bf16.msrb.mxu2 %v7304_v62  ;;  %v7051_v57 = vld [vmem:[#allocation11 + $0x28] sm:$0xf]  ;;  %v7448_v62 = vor.u32 %v8665_v60, %v7445_v61  ;;  %v7277_v60 = vld [vmem:[#allocation11 + $0x1f8] sm:$0xf0] }
 0x239   :  { %3991 = vmatpush.bf16.msra.mxu3 %v7412_v20  ;;  %4030 = vmatpush.bf16.msrb.mxu2 %v7288_v26  ;;  %v7227_v20 = vld [vmem:[#allocation11 + $0x188] sm:$0xf]  ;;  %v7432_v26 = vor.u32 %v8661_v4, %v7429_v6  ;;  %v8618_v4 = vld [vmem:[#allocation11 + $0x1cc] sm:$0xf]  ;;  %v7261_v6 = vld [vmem:[#allocation11 + $0x1d8] sm:$0xf0] }
 0x23a   :  { %v2999_v52 = vpop.f32.mrf.mxu3 }
 0x23b   :  { %v3000_v37 = vadd.f32 %v2999_v52, %v2987_v42  ;;  %v9368_v63 = vpop.f32.mrf.mxu2  ;;  %v7464_v42 = vor.u32 %v8669_v44, %v7461_v38  ;;  %v7260_v52 = vor.u32 %v8620_v5, %v7259_v49  ;;  %v8578_v49 = vld [vmem:[#allocation11 + $0x8c] sm:$0xf]  ;;  %v7101_v5 = vld [vmem:[#allocation11 + $0x98] sm:$0xf0]  ;;  %v7372_v38 = vor.u32 %v8648_v1, %v7371_v48 }
 0x23d   :  { %v3159_v0 = vmax.f32 %v3000_v37, 0.0  ;;  %4036 = vmatpush.bf16.msrb.mxu3 %v7528_v9  ;;  %v8616_v37 = vld [vmem:[#allocation11 + $0x1b4] sm:$0xf0] }
 0x23e   :  { %v7244_v2 = vor.u32 %v8616_v37, %v7243_v59  ;;  %v7085_v59 = vld [vmem:[#allocation11 + $0x78] sm:$0xf0]  ;;  %v8622_v37 = vld [vmem:[#allocation11 + $0x1ec] sm:$0xf] }
 0x23f   :  { %v9370_v7 = vpack.c.bf16 %v3159_v0, %v3159_v0  ;;  %v7052_v0 = vor.u32 %v8568_v58, %v7051_v57  ;;  %v8644_v57 = vld [vmem:[#allocation11 + $0x294] sm:$0xf0]  ;;  %v8574_v58 = vld [vmem:[#allocation11 + $0x6c] sm:$0xf] }
 0x241   :  { %3953 = vmatmul.bf16.vlgmr.msra.gmra.mxu0 %v9370_v7  ;;  %4037 = vmatpush.bf16.msrb.mxu3 %v7512_v21  ;;  %v8657_v21 = vld [vmem:[#allocation11 + $0x304] sm:$0xf] }
 0x242   :  { %4049 = vmatpush.bf16.msra.mxu0 %v7148_v3  ;;  %v3001_v10 = vpop.f32.mrf.mxu3  ;;  %v8564_v3 = vld [vmem:[#allocation11 + $0x14] sm:$0xf0] }
 0x243   :  { %v3144_v55 = vpop.f32.mrf.mxu2  ;;  %v7036_v10 = vor.u32 %v8564_v3, %v7035_v18  ;;  %v7280_v18 = vor.u32 %v8622_v37, %v7277_v60  ;;  %v8640_v3 = vld [vmem:[#allocation11 + $0x274] sm:$0xf0]  ;;  %v8598_v60 = vld [vmem:[#allocation11 + $0x12c] sm:$0xf] }
 0x244   :  { %v7403_v55 = vld [vmem:[#allocation11 + $0x2e8] sm:$0xf]  ;;  %v8680_v37 = vld [vmem:[#allocation11 + $0x3b4] sm:$0xf0] }
 0x245   :  { %4038 = vmatpush.bf16.msrb.mxu3 %v7496_v15 }
 0x246   :  { %4050 = vmatpush.bf16.msra.mxu0 %v7132_v12  ;;  %v7228_v12 = vor.u32 %v8612_v17, %v7227_v20  ;;  %v8570_v20 = vld [vmem:[#allocation11 + $0x4c] sm:$0xf]  ;;  %v7069_v17 = vld [vmem:[#allocation11 + $0x58] sm:$0xf0] }
 0x247   :  { %v7072_v29 = vor.u32 %v8570_v20, %v7069_v17  ;;  %v8676_v20 = vld [vmem:[#allocation11 + $0x394] sm:$0xf0]  ;;  %v8594_v17 = vld [vmem:[#allocation11 + $0x10c] sm:$0xf] }
 0x249   :  { %4039 = vmatpush.bf16.msrb.mxu3 %v7480_v54  ;;  %v7388_v54 = vor.u32 %v8652_v34, %v7387_v40 }
 0x24a   :  { %4051 = vmatpush.bf16.msra.mxu0 %v7116_v23  ;;  %v3051_v35 = vpop.f32.mrf.mxu3  ;;  %v7413_v23 = vld [vmem:[#allocation11 + $0x310] sm:$0xf0] }
 0x24b   :  { %v3052_v56 = vadd.f32 %v3051_v35, %v3039_v33  ;;  %v7416_v28 = vor.u32 %v8657_v21, %v7413_v23  ;;  %v7404_v33 = vor.u32 %v8656_v25, %v7403_v55  ;;  %v7136_v35 = vor.u32 %v8586_v27, %v7133_v8  ;;  %v7307_v55 = vld [vmem:[#allocation11 + $0x228] sm:$0xf]  ;;  %v8632_v23 = vld [vmem:[#allocation11 + $0x234] sm:$0xf0]  ;;  %v8562_v25 = vld [vmem:[#allocation11 + $0xc] sm:$0xf] }
 0x24c   :  { %v7248_v21 = vor.u32 %v8614_v11, %v7245_v14  ;;  %v7037_v27 = vld [vmem:[#allocation11 + $0x18] sm:$0xf0]  ;;  %v8610_v8 = vld [vmem:[#allocation11 + $0x18c] sm:$0xf] }
 0x24d   :  { %v3160_v45 = vmax.f32 %v3052_v56, 0.0  ;;  %4040 = vmatpush.bf16.msrb.mxu3 %v7464_v42  ;;  %v8582_v56 = vld [vmem:[#allocation11 + $0xac] sm:$0xf]  ;;  %v7104_v42 = vor.u32 %v8578_v49, %v7101_v5  ;;  %v7515_v49 = vld [vmem:[#allocation11 + $0x3c8] sm:$0xf] }
 0x24e   :  { %4052 = vmatpush.bf16.msra.mxu0 %v7100_v36  ;;  %v7195_v36 = vld [vmem:[#allocation11 + $0x148] sm:$0xf]  ;;  %v8684_v5 = vld [vmem:[#allocation11 + $0x3d4] sm:$0xf0]  ;;  %v7341_v11 = vld [vmem:[#allocation11 + $0x278] sm:$0xf0] }
 0x24f   :  { %v9375_v32 = vpack.c.bf16 %v3160_v45, %v3160_v45  ;;  %v7196_v30 = vor.u32 %v8604_v39, %v7195_v36  ;;  %v7120_v45 = vor.u32 %v8582_v56, %v7117_v24  ;;  %v7291_v36 = vld [vmem:[#allocation11 + $0x208] sm:$0xf]  ;;  %v8628_v39 = vld [vmem:[#allocation11 + $0x214] sm:$0xf0] }
 0x250   :  { %v7531_v56 = vld [vmem:[#allocation11 + $0x3e8] sm:$0xf]  ;;  %v8688_v24 = vld [vmem:[#allocation11 + $0x3f4] sm:$0xf0] }
 0x251   :  { %3966 = vmatmul.bf16.vlgmr.msra.gmra.mxu1 %v9375_v32  ;;  %4005 = vmatmul.bf16.vlgmr.msrb.gmra.mxu0 %v9370_v7 }
 0x252   :  { %4053 = vmatpush.bf16.msra.mxu0 %v7084_v46  ;;  %4062 = vmatpush.bf16.msra.mxu1 %v7276_v47  ;;  %v3053_v53 = vpop.f32.mrf.mxu3  ;;  %v7179_v46 = vld [vmem:[#allocation11 + $0x128] sm:$0xf]  ;;  %v8600_v47 = vld [vmem:[#allocation11 + $0x134] sm:$0xf0] }
 0x253   :  { %4041 = vmatpush.bf16.msrb.mxu3 %v7448_v62  ;;  %v7180_v44 = vor.u32 %v8600_v47, %v7179_v46  ;;  %v7163_v53 = vld [vmem:[#allocation11 + $0x108] sm:$0xf] }
 0x256   :  { %4054 = vmatpush.bf16.msra.mxu0 %v7068_v31  ;;  %4063 = vmatpush.bf16.msra.mxu1 %v7260_v52  ;;  %v8596_v31 = vld [vmem:[#allocation11 + $0x114] sm:$0xf0]  ;;  %v7355_v52 = vld [vmem:[#allocation11 + $0x288] sm:$0xf] }
 0x257   :  { %4042 = vmatpush.bf16.msrb.mxu3 %v7432_v26  ;;  %v7164_v61 = vor.u32 %v8596_v31, %v7163_v53  ;;  %v7356_v62 = vor.u32 %v8644_v57, %v7355_v52  ;;  %v7323_v26 = vld [vmem:[#allocation11 + $0x248] sm:$0xf]  ;;  %v7389_v53 = vld [vmem:[#allocation11 + $0x2d8] sm:$0xf0]  ;;  %v7516_v52 = vor.u32 %v8684_v5, %v7515_v49 }
 0x258   :  { %v7485_v49 = vld [vmem:[#allocation11 + $0x398] sm:$0xf0] }
 0x25a   :  { %4055 = vmatpush.bf16.msra.mxu0 %v7052_v0  ;;  %4064 = vmatpush.bf16.msra.mxu1 %v7244_v2  ;;  %v3103_v9 = vpop.f32.mrf.mxu3  ;;  %v7088_v0 = vor.u32 %v8574_v58, %v7085_v59  ;;  %v7339_v2 = vld [vmem:[#allocation11 + $0x268] sm:$0xf] }
 0x25b   :  { %v3104_v16 = vadd.f32 %v3103_v9, %v3091_v22  ;;  %4043 = vmatpush.bf16.msrb.mxu3 %v7416_v28  ;;  %v7340_v19 = vor.u32 %v8640_v3, %v7339_v2  ;;  %v7264_v22 = vor.u32 %v8618_v4, %v7261_v6  ;;  %v8636_v9 = vld [vmem:[#allocation11 + $0x254] sm:$0xf0]  ;;  %v7229_v28 = vld [vmem:[#allocation11 + $0x198] sm:$0xf0]  ;;  %v7499_v59 = vld [vmem:[#allocation11 + $0x3a8] sm:$0xf] }
 0x25c   :  { %v7232_v34 = vor.u32 %v8610_v8, %v7229_v28  ;;  %v7500_v2 = vor.u32 %v8680_v37, %v7499_v59  ;;  %v7483_v3 = vld [vmem:[#allocation11 + $0x388] sm:$0xf]  ;;  %v7165_v4 = vld [vmem:[#allocation11 + $0x118] sm:$0xf0]  ;;  %v8642_v6 = vld [vmem:[#allocation11 + $0x28c] sm:$0xf] }
 0x25d   :  { %v3161_v15 = vmax.f32 %v3104_v16, 0.0  ;;  %v7324_v16 = vor.u32 %v8636_v9, %v7323_v26  ;;  %v7168_v26 = vor.u32 %v8594_v17, %v7165_v4  ;;  %v7467_v9 = vld [vmem:[#allocation11 + $0x368] sm:$0xf]  ;;  %v8664_v28 = vld [vmem:[#allocation11 + $0x334] sm:$0xf0] }
 0x25e   :  { %4056 = vmatpush.bf16.msra.mxu0 %v7036_v10  ;;  %4065 = vmatpush.bf16.msra.mxu1 %v7228_v12  ;;  %v8566_v10 = vld [vmem:[#allocation11 + $0x2c] sm:$0xf]  ;;  %v7053_v12 = vld [vmem:[#allocation11 + $0x38] sm:$0xf0]  ;;  %v7435_v8 = vld [vmem:[#allocation11 + $0x328] sm:$0xf] }
 0x25f   :  { %v9381_v51 = vpack.c.bf16 %v3161_v15, %v3161_v15  ;;  %v3143_v15 = vadd.f32 %v9368_v63, %v9362_v50  ;;  %v7292_v50 = vor.u32 %v8628_v39, %v7291_v36  ;;  %v7532_v63 = vor.u32 %v8688_v24, %v7531_v56  ;;  %v7419_v36 = vld [vmem:[#allocation11 + $0x308] sm:$0xf]  ;;  %v8660_v39 = vld [vmem:[#allocation11 + $0x314] sm:$0xf0]  ;;  %v8686_v56 = vld [vmem:[#allocation11 + $0x3ec] sm:$0xf] }
 0x260   :  { %v7533_v24 = vld [vmem:[#allocation11 + $0x3f8] sm:$0xf0]  ;;  %v8662_v37 = vld [vmem:[#allocation11 + $0x32c] sm:$0xf]  ;;  %v7603_v4 = vld [vmem:[#allocation13 + $0x80] sm:$0xf] }
 0x261   :  { %3979 = vmatmul.bf16.vlgmr.msra.gmra.mxu2 %v9381_v51  ;;  %4018 = vmatmul.bf16.vlgmr.msrb.gmra.mxu1 %v9375_v32 }
 0x262   :  { %4101 = vmatpush.bf16.msrb.mxu0 %v7152_v41  ;;  %4066 = vmatpush.bf16.msra.mxu1 %v7212_v13  ;;  %v3105_v43 = vpop.f32.mrf.mxu3  ;;  %v7056_v41 = vor.u32 %v8566_v10, %v7053_v12  ;;  %v8672_v10 = vld [vmem:[#allocation11 + $0x374] sm:$0xf0]  ;;  %v8638_v12 = vld [vmem:[#allocation11 + $0x26c] sm:$0xf] }
 0x263   :  { %4057 = vmatmul.bf16.vlgmr.msra.gmra.mxu0 %v9370_v7  ;;  %4075 = vmatpush.bf16.msra.mxu2 %v7404_v33  ;;  %v7308_v33 = vor.u32 %v8632_v23, %v7307_v55  ;;  %v8606_v43 = vld [vmem:[#allocation11 + $0x16c] sm:$0xf]  ;;  %v7468_v14 = vor.u32 %v8672_v10, %v7467_v9  ;;  %v8668_v55 = vld [vmem:[#allocation11 + $0x354] sm:$0xf0]  ;;  %v7325_v23 = vld [vmem:[#allocation11 + $0x258] sm:$0xf0] }
 0x264   :  { %v8751_v9 = vld [vmem:[#allocation13 + $0x1ec] sm:$0xf0] }
 0x266   :  { %4102 = vmatpush.bf16.msrb.mxu0 %v7136_v35  ;;  %4067 = vmatpush.bf16.msra.mxu1 %v7196_v30  ;;  %v7040_v35 = vor.u32 %v8562_v25, %v7037_v27  ;;  %v7213_v30 = vld [vmem:[#allocation11 + $0x178] sm:$0xf0] }
 0x267   :  { %4076 = vmatpush.bf16.msra.mxu2 %v7388_v54  ;;  %v8654_v54 = vld [vmem:[#allocation11 + $0x2ec] sm:$0xf]  ;;  %v7216_v48 = vor.u32 %v8606_v43, %v7213_v30  ;;  %v7420_v43 = vor.u32 %v8660_v39, %v7419_v36  ;;  %v7536_v30 = vor.u32 %v8686_v56, %v7533_v24  ;;  %v7731_v36 = vld [vmem:[#allocation13 + $0x180] sm:$0xf]  ;;  %v7653_v56 = vld [vmem:[#allocation13 + $0xf0] sm:$0xf0] }
 0x26a   :  { %4103 = vmatpush.bf16.msrb.mxu0 %v7120_v45  ;;  %4068 = vmatpush.bf16.msra.mxu1 %v7180_v44  ;;  %v7405_v45 = vld [vmem:[#allocation11 + $0x2f8] sm:$0xf0]  ;;  %v8602_v44 = vld [vmem:[#allocation11 + $0x14c] sm:$0xf] }
 0x26b   :  { %4077 = vmatpush.bf16.msra.mxu2 %v7372_v38  ;;  %v7408_v1 = vor.u32 %v8654_v54, %v7405_v45  ;;  %v7197_v38 = vld [vmem:[#allocation11 + $0x158] sm:$0xf0]  ;;  %v8682_v54 = vld [vmem:[#allocation11 + $0x3cc] sm:$0xf] }
 0x26c   :  { %v7200_v57 = vor.u32 %v8602_v44, %v7197_v38  ;;  %v7517_v45 = vld [vmem:[#allocation11 + $0x3d8] sm:$0xf0]  ;;  %v8670_v44 = vld [vmem:[#allocation11 + $0x36c] sm:$0xf] }
 0x26d   :  { %v7469_v38 = vld [vmem:[#allocation11 + $0x378] sm:$0xf0] }
 0x26e   :  { %4104 = vmatpush.bf16.msrb.mxu0 %v7104_v42  ;;  %4069 = vmatpush.bf16.msra.mxu1 %v7164_v61  ;;  %v8650_v42 = vld [vmem:[#allocation11 + $0x2cc] sm:$0xf]  ;;  %v7181_v61 = vld [vmem:[#allocation11 + $0x138] sm:$0xf0] }
 0x26f   :  { %4078 = vmatpush.bf16.msra.mxu2 %v7356_v62  ;;  %v7392_v58 = vor.u32 %v8650_v42, %v7389_v53  ;;  %v8646_v62 = vld [vmem:[#allocation11 + $0x2ac] sm:$0xf]  ;;  %v7651_v42 = vld [vmem:[#allocation13 + $0xe0] sm:$0xf]  ;;  %v8719_v53 = vld [vmem:[#allocation13 + $0xec] sm:$0xf0] }
 0x271   :  { %4031 = vmatmul.bf16.vlgmr.msrb.gmra.mxu2 %v9381_v51  ;;  %4070 = vmatmul.bf16.vlgmr.msra.gmra.mxu1 %v9375_v32 }
 0x272   :  { %4105 = vmatpush.bf16.msrb.mxu0 %v7088_v0  ;;  %4114 = vmatpush.bf16.msrb.mxu1 %v7280_v18  ;;  %v7373_v0 = vld [vmem:[#allocation11 + $0x2b8] sm:$0xf0] }
 0x273   :  { %4079 = vmatpush.bf16.msra.mxu2 %v7340_v19  ;;  %v7376_v18 = vor.u32 %v8646_v62, %v7373_v0  ;;  %v7357_v19 = vld [vmem:[#allocation11 + $0x298] sm:$0xf0] }
 0x276   :  { %4106 = vmatpush.bf16.msrb.mxu0 %v7072_v29  ;;  %4115 = vmatpush.bf16.msrb.mxu1 %v7264_v22  ;;  %v7484_v29 = vor.u32 %v8676_v20, %v7483_v3  ;;  %v7360_v22 = vor.u32 %v8642_v6, %v7357_v19  ;;  %v7421_v3 = vld [vmem:[#allocation11 + $0x318] sm:$0xf0]  ;;  %v8707_v6 = vld [vmem:[#allocation13 + $0x8c] sm:$0xf0]  ;;  %v7587_v19 = vld [vmem:[#allocation13 + $0x60] sm:$0xf] }
 0x277   :  { %4080 = vmatpush.bf16.msra.mxu2 %v7324_v16  ;;  %v7344_v16 = vor.u32 %v8638_v12, %v7341_v11 }
 0x27a   :  { %v3155_v13 = vpop.f32.mrf.mxu3  ;;  %4107 = vmatpush.bf16.msrb.mxu0 %v7056_v41  ;;  %4116 = vmatpush.bf16.msrb.mxu1 %v7248_v21  ;;  %v7451_v41 = vld [vmem:[#allocation11 + $0x348] sm:$0xf]  ;;  %v8634_v21 = vld [vmem:[#allocation11 + $0x24c] sm:$0xf] }
 0x27b   :  { %v3156_v40 = vadd.f32 %v3155_v13, %v3143_v15  ;;  %4081 = vmatpush.bf16.msra.mxu2 %v7308_v33  ;;  %v7452_v25 = vor.u32 %v8668_v55, %v7451_v41  ;;  %v7328_v27 = vor.u32 %v8634_v21, %v7325_v23  ;;  %v8630_v15 = vld [vmem:[#allocation11 + $0x22c] sm:$0xf]  ;;  %v7309_v13 = vld [vmem:[#allocation11 + $0x238] sm:$0xf0]  ;;  %v7436_v33 = vor.u32 %v8664_v28, %v7435_v8  ;;  %v7763_v41 = vld [vmem:[#allocation13 + $0x1c0] sm:$0xf] }
 0x27c   :  { %v8747_v21 = vld [vmem:[#allocation13 + $0x1cc] sm:$0xf0]  ;;  %v7747_v8 = vld [vmem:[#allocation13 + $0x1a0] sm:$0xf] }
 0x27d   :  { %v3162_v46 = vmax.f32 %v3156_v40, 0.0  ;;  %v8626_v40 = vld [vmem:[#allocation11 + $0x20c] sm:$0xf]  ;;  %v7764_v23 = vor.u32 %v8747_v21, %v7763_v41  ;;  %v7843_v41 = vld [vmem:[#allocation13 + $0x260] sm:$0xf] }
 0x27e   :  { %4108 = vmatpush.bf16.msrb.mxu0 %v7040_v35  ;;  %4117 = vmatpush.bf16.msrb.mxu1 %v7232_v34  ;;  %v7312_v35 = vor.u32 %v8630_v15, %v7309_v13  ;;  %v7293_v34 = vld [vmem:[#allocation11 + $0x218] sm:$0xf0]  ;;  %v8743_v15 = vld [vmem:[#allocation13 + $0x1ac] sm:$0xf0]  ;;  %v8697_v21 = vld [vmem:[#allocation13 + $0x44] sm:$0xf] }
 0x27f   :  { %v9390_v47 = vpack.c.bf16 %v3162_v46, %v3162_v46  ;;  %4082 = vmatpush.bf16.msra.mxu2 %v7292_v50  ;;  %v7520_v46 = vor.u32 %v8682_v54, %v7517_v45  ;;  %v8678_v50 = vld [vmem:[#allocation11 + $0x3ac] sm:$0xf]  ;;  %v7907_v54 = vld [vmem:[#allocation13 + $0x2e0] sm:$0xf] }
 0x281   :  { %3992 = vmatmul.bf16.vlgmr.msra.gmra.mxu3 %v9390_v47  ;;  %4109 = vmatmul.bf16.vlgmr.msrb.gmra.mxu0 %v9370_v7  ;;  %v7184_v7 = vor.u32 %v8598_v60, %v7181_v61  ;;  %v7635_v60 = vld [vmem:[#allocation13 + $0xc0] sm:$0xf]  ;;  %v8715_v61 = vld [vmem:[#allocation13 + $0xcc] sm:$0xf0] }
 0x282   :  { %4088 = vmatpush.bf16.msra.mxu3 %v7532_v63  ;;  %v3157_v31 = vpop.f32.mrf.mxu3  ;;  %4118 = vmatpush.bf16.msrb.mxu1 %v7216_v48  ;;  %v7501_v63 = vld [vmem:[#allocation11 + $0x3b8] sm:$0xf0]  ;;  %v7636_v0 = vor.u32 %v8715_v61, %v7635_v60  ;;  %v7875_v60 = vld [vmem:[#allocation13 + $0x2a0] sm:$0xf] }
 0x283   :  { %4127 = vmatpush.bf16.msrb.mxu2 %v7408_v1  ;;  %v7504_v48 = vor.u32 %v8678_v50, %v7501_v63  ;;  %v8674_v1 = vld [vmem:[#allocation11 + $0x38c] sm:$0xf]  ;;  %v7652_v31 = vor.u32 %v8719_v53, %v7651_v42  ;;  %v8713_v50 = vld [vmem:[#allocation13 + $0xc4] sm:$0xf]  ;;  %v7637_v63 = vld [vmem:[#allocation13 + $0xd0] sm:$0xf0] }
 0x284   :  { %4083 = vmatmul.bf16.vlgmr.msra.gmra.mxu2 %v9381_v51  ;;  %v7488_v5 = vor.u32 %v8674_v1, %v7485_v49  ;;  %v7891_v42 = vld [vmem:[#allocation13 + $0x2c0] sm:$0xf] }
 0x285   :  { %4939 = vmatpush.bf16.msra.mxu0 %v7652_v31  ;;  %v8779_v31 = vld [vmem:[#allocation13 + $0x2cc] sm:$0xf0] }
 0x286   :  { %4089 = vmatpush.bf16.msra.mxu3 %v7516_v52  ;;  %4119 = vmatpush.bf16.msrb.mxu1 %v7200_v57  ;;  %v7472_v52 = vor.u32 %v8670_v44, %v7469_v38  ;;  %v8666_v57 = vld [vmem:[#allocation11 + $0x34c] sm:$0xf]  ;;  %v7699_v44 = vld [vmem:[#allocation13 + $0x140] sm:$0xf]  ;;  %v8731_v38 = vld [vmem:[#allocation13 + $0x14c] sm:$0xf0] }
 0x287   :  { %4128 = vmatpush.bf16.msrb.mxu2 %v7392_v58  ;;  %v7453_v58 = vld [vmem:[#allocation11 + $0x358] sm:$0xf0]  ;;  %v7700_v53 = vor.u32 %v8731_v38, %v7699_v44  ;;  %v7733_v44 = vld [vmem:[#allocation13 + $0x190] sm:$0xf0] }
 0x288   :  { %v7456_v59 = vor.u32 %v8666_v57, %v7453_v58  ;;  %v7621_v57 = vld [vmem:[#allocation13 + $0xb0] sm:$0xf0]  ;;  %v7892_v58 = vor.u32 %v8779_v31, %v7891_v42  ;;  %v8755_v31 = vld [vmem:[#allocation13 + $0x20c] sm:$0xf0] }
 0x289   :  { %4940 = vmatpush.bf16.msra.mxu0 %v7636_v0  ;;  %v8705_v0 = vld [vmem:[#allocation13 + $0x84] sm:$0xf] }
 0x28a   :  { %4090 = vmatpush.bf16.msra.mxu3 %v7500_v2  ;;  %4120 = vmatpush.bf16.msrb.mxu1 %v7184_v7  ;;  %v7619_v2 = vld [vmem:[#allocation13 + $0xa0] sm:$0xf]  ;;  %v8711_v7 = vld [vmem:[#allocation13 + $0xac] sm:$0xf0] }
 0x28b   :  { %4129 = vmatpush.bf16.msrb.mxu2 %v7376_v18  ;;  %v8658_v18 = vld [vmem:[#allocation11 + $0x30c] sm:$0xf]  ;;  %v7620_v20 = vor.u32 %v8711_v7, %v7619_v2  ;;  %v7605_v2 = vld [vmem:[#allocation13 + $0x90] sm:$0xf0] }
 0x28c   :  { %v7424_v17 = vor.u32 %v8658_v18, %v7421_v3 }
 0x28d   :  { %4941 = vmatpush.bf16.msra.mxu0 %v7620_v20  ;;  %v7608_v20 = vor.u32 %v8705_v0, %v7605_v2 }
 0x28e   :  { %4091 = vmatpush.bf16.msra.mxu3 %v7484_v29  ;;  %4121 = vmatpush.bf16.msrb.mxu1 %v7168_v26  ;;  %v7604_v29 = vor.u32 %v8707_v6, %v7603_v4  ;;  %v8703_v26 = vld [vmem:[#allocation13 + $0x6c] sm:$0xf0]  ;;  %v7859_v6 = vld [vmem:[#allocation13 + $0x280] sm:$0xf] }
 0x28f   :  { %4130 = vmatpush.bf16.msrb.mxu2 %v7360_v22  ;;  %v7779_v22 = vld [vmem:[#allocation13 + $0x1e0] sm:$0xf]  ;;  %v7588_v12 = vor.u32 %v8703_v26, %v7587_v19  ;;  %v8723_v4 = vld [vmem:[#allocation13 + $0x10c] sm:$0xf0] }
 0x290   :  { %v7780_v10 = vor.u32 %v8751_v9, %v7779_v22  ;;  %v8771_v19 = vld [vmem:[#allocation13 + $0x28c] sm:$0xf0]  ;;  %v8701_v22 = vld [vmem:[#allocation13 + $0x64] sm:$0xf]  ;;  %v7589_v9 = vld [vmem:[#allocation13 + $0x70] sm:$0xf0] }
 0x291   :  { %4044 = vmatmul.bf16.vlgmr.msrb.gmra.mxu3 %v9390_v47  ;;  %4122 = vmatmul.bf16.vlgmr.msrb.gmra.mxu1 %v9375_v32  ;;  %v7296_v32 = vor.u32 %v8626_v40, %v7293_v34  ;;  %v8739_v40 = vld [vmem:[#allocation13 + $0x18c] sm:$0xf0]  ;;  %v8717_v34 = vld [vmem:[#allocation13 + $0xe4] sm:$0xf]  ;;  %v7860_v26 = vor.u32 %v8771_v19, %v7859_v6 }
 0x292   :  { %4092 = vmatpush.bf16.msra.mxu3 %v7468_v14  ;;  %4942 = vmatpush.bf16.msra.mxu0 %v7604_v29  ;;  %v7571_v14 = vld [vmem:[#allocation13 + $0x40] sm:$0xf]  ;;  %v7732_v24 = vor.u32 %v8739_v40, %v7731_v36  ;;  %v7557_v40 = vld [vmem:[#allocation13 + $0x30] sm:$0xf0] }
 0x293   :  { %4131 = vmatpush.bf16.msrb.mxu2 %v7344_v16  ;;  %4952 = vmatpush.bf16.msra.mxu1 %v7780_v10  ;;  %v8699_v16 = vld [vmem:[#allocation13 + $0x4c] sm:$0xf0]  ;;  %v8749_v10 = vld [vmem:[#allocation13 + $0x1e4] sm:$0xf] }
 0x294   :  { %v7572_v55 = vor.u32 %v8699_v16, %v7571_v14  ;;  %v7781_v14 = vld [vmem:[#allocation13 + $0x1f0] sm:$0xf0] }
 0x295   :  { %v7784_v16 = vor.u32 %v8749_v10, %v7781_v14  ;;  %v7685_v14 = vld [vmem:[#allocation13 + $0x130] sm:$0xf0] }
 0x296   :  { %4093 = vmatpush.bf16.msra.mxu3 %v7452_v25  ;;  %4943 = vmatpush.bf16.msra.mxu0 %v7588_v12  ;;  %v7555_v25 = vld [vmem:[#allocation13 + $0x20] sm:$0xf]  ;;  %v7592_v12 = vor.u32 %v8701_v22, %v7589_v9  ;;  %v8807_v9 = vld [vmem:[#allocation13 + $0x3ac] sm:$0xf0] }
 0x297   :  { %4132 = vmatpush.bf16.msrb.mxu2 %v7328_v27  ;;  %4953 = vmatpush.bf16.msra.mxu1 %v7764_v23  ;;  %v8695_v27 = vld [vmem:[#allocation13 + $0x2c] sm:$0xf0]  ;;  %v8003_v22 = vld [vmem:[#allocation13 + $0x3a0] sm:$0xf] }
 0x298   :  { %v7556_v28 = vor.u32 %v8695_v27, %v7555_v25  ;;  %v7573_v25 = vld [vmem:[#allocation13 + $0x50] sm:$0xf0]  ;;  %v8745_v27 = vld [vmem:[#allocation13 + $0x1c4] sm:$0xf]  ;;  %v8004_v10 = vor.u32 %v8807_v9, %v8003_v22  ;;  %v7643_v22 = vld [vmem:[#allocation13 + $0xc8] sm:$0xf] }
 0x299   :  { %v8716_v9 = vld [vmem:[#allocation13 + $0xd4] sm:$0xf0] }
 0x29a   :  { %4094 = vmatpush.bf16.msra.mxu3 %v7436_v33  ;;  %4944 = vmatpush.bf16.msra.mxu0 %v7572_v55  ;;  %v7748_v33 = vor.u32 %v8743_v15, %v7747_v8  ;;  %v8767_v55 = vld [vmem:[#allocation13 + $0x26c] sm:$0xf0]  ;;  %v7765_v8 = vld [vmem:[#allocation13 + $0x1d0] sm:$0xf0]  ;;  %v7576_v15 = vor.u32 %v8697_v21, %v7573_v25 }
 0x29b   :  { %4133 = vmatpush.bf16.msrb.mxu2 %v7312_v35  ;;  %v8691_v35 = vld [vmem:[#allocation13 + $0xc] sm:$0xf0]  ;;  %v7844_v23 = vor.u32 %v8767_v55, %v7843_v41  ;;  %v7877_v55 = vld [vmem:[#allocation13 + $0x2b0] sm:$0xf0] }
 0x29c   :  { %4954 = vmatpush.bf16.msra.mxu1 %v7748_v33 }
 0x29e   :  { %4095 = vmatpush.bf16.msra.mxu3 %v7420_v43  ;;  %4945 = vmatpush.bf16.msra.mxu0 %v7556_v28  ;;  %v7656_v43 = vor.u32 %v8717_v34, %v7653_v56  ;;  %v8741_v34 = vld [vmem:[#allocation13 + $0x1a4] sm:$0xf] }
 0x29f   :  { %4134 = vmatpush.bf16.msrb.mxu2 %v7296_v32  ;;  %v7715_v32 = vld [vmem:[#allocation13 + $0x160] sm:$0xf] }
 0x2a0   :  { %4955 = vmatpush.bf16.msra.mxu1 %v7732_v24  ;;  %v7749_v24 = vld [vmem:[#allocation13 + $0x1b0] sm:$0xf0] }
 0x2a1   :  { %4096 = vmatmul.bf16.vlgmr.msra.gmra.mxu3 %v9390_v47 }
 0x2a2   :  { %4140 = vmatpush.bf16.msrb.mxu3 %v7536_v30  ;;  %4135 = vmatmul.bf16.vlgmr.msrb.gmra.mxu2 %v9381_v51  ;;  %v7437_v51 = vld [vmem:[#allocation11 + $0x338] sm:$0xf0]  ;;  %v8735_v30 = vld [vmem:[#allocation13 + $0x16c] sm:$0xf0] }
 0x2a3   :  { %v7440_v62 = vor.u32 %v8662_v37, %v7437_v51  ;;  %v7716_v45 = vor.u32 %v8735_v30, %v7715_v32  ;;  %v7683_v37 = vld [vmem:[#allocation13 + $0x120] sm:$0xf]  ;;  %v8727_v51 = vld [vmem:[#allocation13 + $0x12c] sm:$0xf0] }
 0x2a4   :  { %v7684_v61 = vor.u32 %v8727_v51, %v7683_v37  ;;  %v7811_v30 = vld [vmem:[#allocation13 + $0x220] sm:$0xf]  ;;  %v7717_v37 = vld [vmem:[#allocation13 + $0x170] sm:$0xf0] }
 0x2a5   :  { %4956 = vmatpush.bf16.msra.mxu1 %v7716_v45 }
 0x2a6   :  { %4141 = vmatpush.bf16.msrb.mxu3 %v7520_v46  ;;  %v8783_v46 = vld [vmem:[#allocation13 + $0x2ec] sm:$0xf0] }
 0x2a7   :  { %v7908_v49 = vor.u32 %v8783_v46, %v7907_v54  ;;  %v8759_v54 = vld [vmem:[#allocation13 + $0x22c] sm:$0xf0]  ;;  %v8689_v46 = vld [vmem:[#allocation13 + $0x4] sm:$0xf] }
 0x2a8   :  { %v7812_v45 = vor.u32 %v8759_v54, %v7811_v30  ;;  %v8765_v54 = vld [vmem:[#allocation13 + $0x264] sm:$0xf] }
 0x2a9   :  { %4965 = vmatpush.bf16.msra.mxu2 %v7908_v49  ;;  %4957 = vmatpush.bf16.msra.mxu1 %v7700_v53  ;;  %v7795_v53 = vld [vmem:[#allocation13 + $0x200] sm:$0xf] }
 0x2aa   :  { %4142 = vmatpush.bf16.msrb.mxu3 %v7504_v48 }
 0x2ad   :  { %4966 = vmatpush.bf16.msra.mxu2 %v7892_v58  ;;  %4958 = vmatpush.bf16.msra.mxu1 %v7684_v61  ;;  %v8815_v58 = vld [vmem:[#allocation13 + $0x3ec] sm:$0xf0]  ;;  %v8781_v61 = vld [vmem:[#allocation13 + $0x2e4] sm:$0xf] }
 0x2ae   :  { %4143 = vmatpush.bf16.msrb.mxu3 %v7488_v5  ;;  %v7640_v5 = vor.u32 %v8713_v50, %v7637_v63  ;;  %v7541_v50 = vld [vmem:[#allocation13 + $0x10] sm:$0xf0]  ;;  %v8737_v63 = vld [vmem:[#allocation13 + $0x184] sm:$0xf] }
 0x2af   :  { %v7736_v42 = vor.u32 %v8737_v63, %v7733_v44  ;;  %v8795_v44 = vld [vmem:[#allocation13 + $0x34c] sm:$0xf0] }
 0x2b2   :  { %4144 = vmatpush.bf16.msrb.mxu3 %v7472_v52  ;;  %v8709_v52 = vld [vmem:[#allocation13 + $0xa4] sm:$0xf] }
 0x2b6   :  { %4145 = vmatpush.bf16.msrb.mxu3 %v7456_v59  ;;  %v7624_v59 = vor.u32 %v8709_v52, %v7621_v57  ;;  %v8035_v52 = vld [vmem:[#allocation13 + $0x3e0] sm:$0xf]  ;;  %v7796_v57 = vor.u32 %v8755_v31, %v7795_v53  ;;  %v7829_v53 = vld [vmem:[#allocation13 + $0x250] sm:$0xf0] }
 0x2b7   :  { %v8036_v51 = vor.u32 %v8815_v58, %v8035_v52  ;;  %v7939_v58 = vld [vmem:[#allocation13 + $0x320] sm:$0xf] }
 0x2ba   :  { %4146 = vmatpush.bf16.msrb.mxu3 %v7440_v62  ;;  %v8775_v62 = vld [vmem:[#allocation13 + $0x2ac] sm:$0xf0] }
 0x2bb   :  { %v7876_v3 = vor.u32 %v8775_v62, %v7875_v60  ;;  %v7909_v62 = vld [vmem:[#allocation13 + $0x2f0] sm:$0xf0] }
 0x2bc   :  { %v7912_v0 = vor.u32 %v8781_v61, %v7909_v62  ;;  %v7659_v62 = vld [vmem:[#allocation13 + $0xe8] sm:$0xf] }
 0x2bd   :  { %4967 = vmatpush.bf16.msra.mxu2 %v7876_v3 }
 0x2be   :  { %4147 = vmatpush.bf16.msrb.mxu3 %v7424_v17  ;;  %v9400_v11 = vpop.f32.mrf.mxu0  ;;  %v7667_v17 = vld [vmem:[#allocation13 + $0x100] sm:$0xf] }
 0x2bf   :  { %v7668_v29 = vor.u32 %v8723_v4, %v7667_v17  ;;  %v7701_v17 = vld [vmem:[#allocation13 + $0x150] sm:$0xf0]  ;;  %v8777_v4 = vld [vmem:[#allocation13 + $0x2c4] sm:$0xf] }
 0x2c1   :  { %4148 = vmatmul.bf16.vlgmr.msrb.gmra.mxu3 %v9390_v47  ;;  %v7539_v47 = vld [vmem:[#allocation13] sm:$0xf]  ;;  %4959 = vmatpush.bf16.msra.mxu1 %v7668_v29  ;;  %v7893_v29 = vld [vmem:[#allocation13 + $0x2d0] sm:$0xf0] }
 0x2c2   :  { %v7540_v39 = vor.u32 %v8691_v35, %v7539_v47  ;;  %4968 = vmatpush.bf16.msra.mxu2 %v7860_v26  ;;  %v7827_v47 = vld [vmem:[#allocation13 + $0x240] sm:$0xf]  ;;  %v8763_v35 = vld [vmem:[#allocation13 + $0x24c] sm:$0xf0]  ;;  %4978 = vmatpush.bf16.msra.mxu3 %v8036_v51  ;;  %v7896_v26 = vor.u32 %v8777_v4, %v7893_v29  ;;  %v8753_v4 = vld [vmem:[#allocation13 + $0x204] sm:$0xf] }
 0x2c3   :  { %v7828_v36 = vor.u32 %v8763_v35, %v7827_v47  ;;  %v7669_v47 = vld [vmem:[#allocation13 + $0x110] sm:$0xf0]  ;;  %v8769_v35 = vld [vmem:[#allocation13 + $0x284] sm:$0xf] }
 0x2c4   :  { %4946 = vmatpush.bf16.msra.mxu0 %v7540_v39  ;;  %v8693_v39 = vld [vmem:[#allocation13 + $0x24] sm:$0xf] }
 0x2c5   :  { %5004 = vmatpush.bf16.msrb.mxu1 %v7784_v16  ;;  %v7560_v56 = vor.u32 %v8693_v39, %v7557_v40  ;;  %v8773_v16 = vld [vmem:[#allocation13 + $0x2a4] sm:$0xf]  ;;  %v7861_v40 = vld [vmem:[#allocation13 + $0x290] sm:$0xf0] }
 0x2c6   :  { %v3956_v13 = vpop.f32.mrf.mxu0  ;;  %4969 = vmatpush.bf16.msra.mxu2 %v7844_v23  ;;  %v7880_v21 = vor.u32 %v8773_v16, %v7877_v55  ;;  %v9417_v23 = vld [vmem:[%s9499_s6] sm:$0xf]  ;;  %v8813_v29 = vld [vmem:[#allocation13 + $0x3e4] sm:$0xf]  ;;  %v7644_v55 = vor.u32 %v8716_v9, %v7643_v22 }
 0x2c7   :  { %v7768_v13 = vor.u32 %v8745_v27, %v7765_v8  ;;  %v7987_v27 = vld [vmem:[#allocation13 + $0x380] sm:$0xf]  ;;  %v8803_v8 = vld [vmem:[#allocation13 + $0x38c] sm:$0xf0]  ;;  %v3298_v16 = vperm.slane %v9417_v23, 1 }
 0x2c8   :  { %4991 = vmatpush.bf16.msrb.mxu0 %v7656_v43  ;;  %v7752_v43 = vor.u32 %v8741_v34, %v7749_v24  ;;  %v7864_v34 = vor.u32 %v8769_v35, %v7861_v40  ;;  %v7971_v24 = vld [vmem:[#allocation13 + $0x360] sm:$0xf]  ;;  %v7611_v40 = vld [vmem:[#allocation13 + $0x88] sm:$0xf] }
 0x2c9   :  { %5005 = vmatpush.bf16.msrb.mxu1 %v7768_v13  ;;  %v8721_v13 = vld [vmem:[#allocation13 + $0x104] sm:$0xf] }
 0x2ca   :  { %4970 = vmatpush.bf16.msra.mxu2 %v7828_v36  ;;  %v7672_v39 = vor.u32 %v8721_v13, %v7669_v47 }
 0x2cc   :  { %4992 = vmatpush.bf16.msrb.mxu0 %v7640_v5  ;;  %v7544_v5 = vor.u32 %v8689_v46, %v7541_v50 }
 0x2cd   :  { %5006 = vmatpush.bf16.msrb.mxu1 %v7752_v43  ;;  %v8799_v43 = vld [vmem:[#allocation13 + $0x36c] sm:$0xf0] }
 0x2ce   :  { %v9402_v48 = vpop.f32.mrf.mxu1  ;;  %v9404_v1 = vpop.f32.mrf.mxu0  ;;  %4971 = vmatpush.bf16.msra.mxu2 %v7812_v45  ;;  %v7972_v30 = vor.u32 %v8799_v43, %v7971_v24  ;;  %v7845_v45 = vld [vmem:[#allocation13 + $0x270] sm:$0xf0]  ;;  %v8805_v24 = vld [vmem:[#allocation13 + $0x3a4] sm:$0xf] }
 0x2cf   :  { %v7848_v46 = vor.u32 %v8765_v54, %v7845_v45  ;;  %v4007_v47 = vadd.f32 %v9404_v1, %v3298_v16  ;;  %v8005_v43 = vld [vmem:[#allocation13 + $0x3b0] sm:$0xf0]  ;;  %v8704_v1 = vld [vmem:[#allocation13 + $0x74] sm:$0xf0] }
 0x2d0   :  { %4993 = vmatpush.bf16.msrb.mxu0 %v7624_v59  ;;  %v8733_v59 = vld [vmem:[#allocation13 + $0x164] sm:$0xf] }
 0x2d1   :  { %5007 = vmatpush.bf16.msrb.mxu1 %v7736_v42  ;;  %v7720_v60 = vor.u32 %v8733_v59, %v7717_v37  ;;  %v8761_v42 = vld [vmem:[#allocation13 + $0x244] sm:$0xf]  ;;  %v8791_v59 = vld [vmem:[#allocation13 + $0x32c] sm:$0xf0] }
 0x2d2   :  { %4972 = vmatpush.bf16.msra.mxu2 %v7796_v57  ;;  %v7832_v52 = vor.u32 %v8761_v42, %v7829_v53  ;;  %v7940_v51 = vor.u32 %v8791_v59, %v7939_v58  ;;  %v7989_v42 = vld [vmem:[#allocation13 + $0x390] sm:$0xf0]  ;;  %v7579_v58 = vld [vmem:[#allocation13 + $0x48] sm:$0xf]  ;;  %v8700_v59 = vld [vmem:[#allocation13 + $0x54] sm:$0xf0] }
 0x2d4   :  { %4994 = vmatpush.bf16.msrb.mxu0 %v7608_v20  ;;  %v8729_v20 = vld [vmem:[#allocation13 + $0x144] sm:$0xf] }
 0x2d5   :  { %5008 = vmatpush.bf16.msrb.mxu1 %v7720_v60  ;;  %v7704_v19 = vor.u32 %v8729_v20, %v7701_v17  ;;  %v7813_v60 = vld [vmem:[#allocation13 + $0x230] sm:$0xf0] }
 0x2d6   :  { %v3969_v7 = vpop.f32.mrf.mxu1  ;;  %v4008_v18 = vpop.f32.mrf.mxu0  ;;  %5017 = vmatpush.bf16.msrb.mxu2 %v7912_v0  ;;  %v8720_v0 = vld [vmem:[#allocation13 + $0xf4] sm:$0xf0] }
 0x2d7   :  { %v8019_v7 = vld [vmem:[#allocation13 + $0x3c0] sm:$0xf]  ;;  %v8811_v18 = vld [vmem:[#allocation13 + $0x3cc] sm:$0xf0] }
 0x2d8   :  { %4995 = vmatpush.bf16.msrb.mxu0 %v7592_v12  ;;  %v8020_v3 = vor.u32 %v8811_v18, %v8019_v7  ;;  %v8725_v12 = vld [vmem:[#allocation13 + $0x124] sm:$0xf] }
 0x2d9   :  { %5009 = vmatpush.bf16.msrb.mxu1 %v7704_v19  ;;  %v7688_v41 = vor.u32 %v8725_v12, %v7685_v14  ;;  %v7797_v19 = vld [vmem:[#allocation13 + $0x210] sm:$0xf0] }
 0x2da   :  { %4979 = vmatpush.bf16.msra.mxu3 %v8020_v3  ;;  %5018 = vmatpush.bf16.msrb.mxu2 %v7896_v26  ;;  %v7923_v3 = vld [vmem:[#allocation13 + $0x300] sm:$0xf]  ;;  %v8037_v12 = vld [vmem:[#allocation13 + $0x3f0] sm:$0xf0] }
 0x2db   :  { %v8040_v14 = vor.u32 %v8813_v29, %v8037_v12  ;;  %v8692_v12 = vld [vmem:[#allocation13 + $0x14] sm:$0xf0] }
 0x2dc   :  { %4996 = vmatpush.bf16.msrb.mxu0 %v7576_v15  ;;  %v7988_v15 = vor.u32 %v8803_v8, %v7987_v27  ;;  %v8712_v27 = vld [vmem:[#allocation13 + $0xb4] sm:$0xf0]  ;;  %v8809_v8 = vld [vmem:[#allocation13 + $0x3c4] sm:$0xf] }
 0x2dd   :  { %5010 = vmatpush.bf16.msrb.mxu1 %v7688_v41 }
 0x2de   :  { %v9406_v28 = vpop.f32.mrf.mxu1  ;;  %4980 = vmatpush.bf16.msra.mxu3 %v8004_v10  ;;  %5019 = vmatpush.bf16.msrb.mxu2 %v7880_v21  ;;  %v7800_v10 = vor.u32 %v8753_v4, %v7797_v19  ;;  %v7627_v21 = vld [vmem:[#allocation13 + $0xa8] sm:$0xf]  ;;  %v7957_v4 = vld [vmem:[#allocation13 + $0x350] sm:$0xf0] }
 0x2e0   :  { %v9408_v33 = vpop.f32.mrf.mxu0  ;;  %4997 = vmatpush.bf16.msrb.mxu0 %v7560_v56  ;;  %v3297_v56 = vperm.slane %v9417_v23, 0 }
 0x2e1   :  { %5011 = vmatpush.bf16.msrb.mxu1 %v7672_v39  ;;  %v7628_v39 = vor.u32 %v8712_v27, %v7627_v21  ;;  %v7941_v21 = vld [vmem:[#allocation13 + $0x330] sm:$0xf0]  ;;  %v8718_v27 = vld [vmem:[#allocation13 + $0xec] sm:$0xf] }
 0x2e2   :  { %4981 = vmatpush.bf16.msra.mxu3 %v7988_v15  ;;  %5020 = vmatpush.bf16.msrb.mxu2 %v7864_v34  ;;  %v3955_v63 = vadd.f32 %v9400_v11, %v3297_v56  ;;  %v8757_v11 = vld [vmem:[#allocation13 + $0x224] sm:$0xf]  ;;  %v8021_v15 = vld [vmem:[#allocation13 + $0x3d0] sm:$0xf0]  ;;  %v4020_v34 = vadd.f32 %v9406_v28, %v4007_v47  ;;  %v8708_v56 = vld [vmem:[#allocation13 + $0x94] sm:$0xf0] }
 0x2e3   :  { %v8024_v13 = vor.u32 %v8809_v8, %v8021_v15  ;;  %v7661_v8 = vld [vmem:[#allocation13 + $0xf8] sm:$0xf0] }
 0x2e4   :  { %v9410_v32 = vpop.f32.mrf.mxu2  ;;  %4998 = vmatpush.bf16.msrb.mxu0 %v7544_v5  ;;  %v7955_v5 = vld [vmem:[#allocation13 + $0x340] sm:$0xf]  ;;  %v3968_v31 = vadd.f32 %v9402_v48, %v3955_v63  ;;  %v8787_v48 = vld [vmem:[#allocation13 + $0x30c] sm:$0xf0]  ;;  %v7595_v63 = vld [vmem:[#allocation13 + $0x68] sm:$0xf] }
 0x2e5   :  { %v7924_v17 = vor.u32 %v8787_v48, %v7923_v3  ;;  %v8696_v3 = vld [vmem:[#allocation13 + $0x34] sm:$0xf0]  ;;  %v7755_v48 = vld [vmem:[#allocation13 + $0x1a8] sm:$0xf] }
 0x2e6   :  { %v4021_v49 = vpop.f32.mrf.mxu1  ;;  %4982 = vmatpush.bf16.msra.mxu3 %v7972_v30  ;;  %5021 = vmatpush.bf16.msrb.mxu2 %v7848_v46  ;;  %v3981_v57 = vadd.f32 %v9410_v32, %v3968_v31  ;;  %v7660_v32 = vor.u32 %v8720_v0, %v7659_v62  ;;  %v8008_v30 = vor.u32 %v8805_v24, %v8005_v43  ;;  %v3299_v62 = vperm.slane %v9417_v23, 2  ;;  %v7915_v24 = vld [vmem:[#allocation13 + $0x2e8] sm:$0xf]  ;;  %v8785_v43 = vld [vmem:[#allocation13 + $0x304] sm:$0xf] }
 0x2e7   :  { %v7612_v46 = vor.u32 %v8708_v56, %v7611_v40  ;;  %v8736_v40 = vld [vmem:[#allocation13 + $0x174] sm:$0xf0] }
 0x2e8   :  { %v4060_v38 = vpop.f32.mrf.mxu0  ;;  %v4059_v29 = vadd.f32 %v9408_v33, %v3299_v62  ;;  %v8776_v62 = vld [vmem:[#allocation13 + $0x2b4] sm:$0xf0] }
 0x2e9   :  { %v7956_v38 = vor.u32 %v8795_v44, %v7955_v5  ;;  %v8752_v44 = vld [vmem:[#allocation13 + $0x1f4] sm:$0xf0] }
 0x2ea   :  { %5022 = vmatpush.bf16.msrb.mxu2 %v7832_v52  ;;  %v7596_v52 = vor.u32 %v8704_v1, %v7595_v63 }
 0x2eb   :  { %4983 = vmatpush.bf16.msra.mxu3 %v7956_v38  ;;  %v8801_v38 = vld [vmem:[#allocation13 + $0x384] sm:$0xf] }
 0x2ec   :  { %v3982_v2 = vpop.f32.mrf.mxu2  ;;  %v7992_v53 = vor.u32 %v8801_v38, %v7989_v42  ;;  %v7707_v38 = vld [vmem:[#allocation13 + $0x148] sm:$0xf]  ;;  %v8732_v42 = vld [vmem:[#allocation13 + $0x154] sm:$0xf0] }
 0x2ed   :  { %v7816_v2 = vor.u32 %v8757_v11, %v7813_v60  ;;  %v8797_v11 = vld [vmem:[#allocation13 + $0x364] sm:$0xf]  ;;  %v7973_v60 = vld [vmem:[#allocation13 + $0x370] sm:$0xf0] }
 0x2ee   :  { %v9412_v6 = vpop.f32.mrf.mxu1 }
 0x2ef   :  { %4984 = vmatpush.bf16.msra.mxu3 %v7940_v51  ;;  %5023 = vmatpush.bf16.msrb.mxu2 %v7816_v2  ;;  %v8748_v51 = vld [vmem:[#allocation13 + $0x1d4] sm:$0xf0]  ;;  %v7580_v2 = vor.u32 %v8700_v59, %v7579_v58  ;;  %v4072_v16 = vadd.f32 %v9412_v6, %v4059_v29  ;;  %v7664_v6 = vor.u32 %v8718_v27, %v7661_v8  ;;  %v7597_v29 = vld [vmem:[#allocation13 + $0x78] sm:$0xf0]  ;;  %v8746_v8 = vld [vmem:[#allocation13 + $0x1cc] sm:$0xf] }
 0x2f0   :  { %v7708_v58 = vor.u32 %v8732_v42, %v7707_v38  ;;  %v7581_v27 = vld [vmem:[#allocation13 + $0x58] sm:$0xf0] }
 0x2f1   :  { %v7741_v38 = vld [vmem:[#allocation13 + $0x198] sm:$0xf0] }
 0x2f3   :  { %4985 = vmatpush.bf16.msra.mxu3 %v7924_v17  ;;  %5024 = vmatpush.bf16.msrb.mxu2 %v7800_v10  ;;  %v8793_v17 = vld [vmem:[#allocation13 + $0x344] sm:$0xf]  ;;  %v7547_v10 = vld [vmem:[#allocation13 + $0x8] sm:$0xf] }
 0x2f4   :  { %v9419_v25 = vpop.f32.mrf.mxu2  ;;  %v7960_v19 = vor.u32 %v8793_v17, %v7957_v4  ;;  %v7548_v47 = vor.u32 %v8692_v12, %v7547_v10  ;;  %v7867_v17 = vld [vmem:[#allocation13 + $0x288] sm:$0xf]  ;;  %v8772_v4 = vld [vmem:[#allocation13 + $0x294] sm:$0xf0] }
 0x2f5   :  { %v4033_v54 = vadd.f32 %v9419_v25, %v4020_v34  ;;  %v7771_v25 = vld [vmem:[#allocation13 + $0x1c8] sm:$0xf]  ;;  %v7868_v12 = vor.u32 %v8772_v4, %v7867_v17  ;;  %v8778_v17 = vld [vmem:[#allocation13 + $0x2cc] sm:$0xf]  ;;  %v7901_v4 = vld [vmem:[#allocation13 + $0x2d8] sm:$0xf0] }
 0x2f6   :  { %v4073_v36 = vpop.f32.mrf.mxu1 }
 0x2f7   :  { %5030 = vmatpush.bf16.msrb.mxu3 %v8040_v14  ;;  %v7739_v14 = vld [vmem:[#allocation13 + $0x188] sm:$0xf] }
 0x2fb   :  { %5031 = vmatpush.bf16.msrb.mxu3 %v8024_v13 }
 0x2fc   :  { %v4034_v49 = vpop.f32.mrf.mxu2 }
 0x2fd   :  { %v7787_v49 = vld [vmem:[#allocation13 + $0x1e8] sm:$0xf] }
 0x2fe   :  { %v9422_v50 = vpop.f32.mrf.mxu0 }
 0x2ff   :  { %5032 = vmatpush.bf16.msrb.mxu3 %v8008_v30  ;;  %v7925_v30 = vld [vmem:[#allocation13 + $0x310] sm:$0xf0] }
 0x300   :  { %v7928_v63 = vor.u32 %v8785_v43, %v7925_v30  ;;  %v7757_v43 = vld [vmem:[#allocation13 + $0x1b8] sm:$0xf0] }
 0x303   :  { %5033 = vmatpush.bf16.msrb.mxu3 %v7992_v53  ;;  %v7899_v53 = vld [vmem:[#allocation13 + $0x2c8] sm:$0xf] }
 0x304   :  { %v3993_v37 = vpop.f32.mrf.mxu3 }
 0x305   :  { %v3994_v61 = vadd.f32 %v3993_v37, %v3981_v57  ;;  %v7788_v57 = vor.u32 %v8752_v44, %v7787_v49 }
 0x306   :  { %v4112_v7 = vpop.f32.mrf.mxu0 }
 0x307   :  { %v4153_v18 = vmax.f32 %v3994_v61, 0.0  ;;  %v9427_v20 = vpop.f32.mrf.mxu2  ;;  %v7976_v61 = vor.u32 %v8797_v11, %v7973_v60  ;;  %v7772_v7 = vor.u32 %v8748_v51, %v7771_v25  ;;  %v7691_v11 = vld [vmem:[#allocation13 + $0x128] sm:$0xf]  ;;  %v8728_v60 = vld [vmem:[#allocation13 + $0x134] sm:$0xf0] }
 0x308   :  { %v4085_v13 = vadd.f32 %v9427_v20, %v4072_v16  ;;  %v7851_v16 = vld [vmem:[#allocation13 + $0x268] sm:$0xf] }
 0x309   :  { %v9429_v26 = vpack.c.bf16 %v4153_v18, %v4153_v18  ;;  %v7563_v18 = vld [vmem:[#allocation13 + $0x28] sm:$0xf]  ;;  %5034 = vmatpush.bf16.msrb.mxu3 %v7976_v61 }
 0x30a   :  { %v7564_v22 = vor.u32 %v8696_v3, %v7563_v18  ;;  %v7883_v61 = vld [vmem:[#allocation13 + $0x2a8] sm:$0xf] }
 0x30b   :  { %4947 = vmatmul.bf16.vlgmr.msra.gmra.mxu0 %v9429_v26  ;;  %v7884_v18 = vor.u32 %v8776_v62, %v7883_v61 }
 0x30c   :  { %5043 = vmatpush.bf16.msra.mxu0 %v7660_v32  ;;  %v3995_v41 = vpop.f32.mrf.mxu3  ;;  %v8744_v32 = vld [vmem:[#allocation13 + $0x1b4] sm:$0xf0] }
 0x30d   :  { %v7756_v9 = vor.u32 %v8744_v32, %v7755_v48  ;;  %v8740_v41 = vld [vmem:[#allocation13 + $0x194] sm:$0xf0]  ;;  %5035 = vmatpush.bf16.msrb.mxu3 %v7960_v19  ;;  %v7675_v48 = vld [vmem:[#allocation13 + $0x108] sm:$0xf]  ;;  %v8702_v19 = vld [vmem:[#allocation13 + $0x6c] sm:$0xf] }
 0x30e   :  { %v9434_v35 = vpop.f32.mrf.mxu1  ;;  %v8724_v32 = vld [vmem:[#allocation13 + $0x114] sm:$0xf0] }
 0x30f   :  { %v4086_v36 = vpop.f32.mrf.mxu2  ;;  %v7676_v10 = vor.u32 %v8724_v32, %v7675_v48  ;;  %v8730_v48 = vld [vmem:[#allocation13 + $0x14c] sm:$0xf]  ;;  %v7709_v32 = vld [vmem:[#allocation13 + $0x158] sm:$0xf0] }
 0x310   :  { %5044 = vmatpush.bf16.msra.mxu0 %v7644_v55  ;;  %v8789_v55 = vld [vmem:[#allocation13 + $0x324] sm:$0xf]  ;;  %v7740_v36 = vor.u32 %v8740_v41, %v7739_v14  ;;  %v7600_v14 = vor.u32 %v8702_v19, %v7597_v29 }
 0x311   :  { %v7944_v15 = vor.u32 %v8789_v55, %v7941_v21  ;;  %v8768_v55 = vld [vmem:[#allocation13 + $0x274] sm:$0xf0]  ;;  %v8698_v21 = vld [vmem:[#allocation13 + $0x4c] sm:$0xf] }
 0x313   :  { %5036 = vmatpush.bf16.msrb.mxu3 %v7944_v15  ;;  %v7773_v15 = vld [vmem:[#allocation13 + $0x1d8] sm:$0xf0] }
 0x314   :  { %5045 = vmatpush.bf16.msra.mxu0 %v7628_v39  ;;  %v4045_v45 = vpop.f32.mrf.mxu3  ;;  %v7723_v39 = vld [vmem:[#allocation13 + $0x168] sm:$0xf] }
 0x315   :  { %v4046_v5 = vadd.f32 %v4045_v45, %v4033_v54  ;;  %v8784_v54 = vld [vmem:[#allocation13 + $0x2f4] sm:$0xf0]  ;;  %v8714_v45 = vld [vmem:[#allocation13 + $0xcc] sm:$0xf]  ;;  %v7724_v1 = vor.u32 %v8736_v40, %v7723_v39  ;;  %v7776_v39 = vor.u32 %v8746_v8, %v7773_v15  ;;  %v7995_v8 = vld [vmem:[#allocation13 + $0x388] sm:$0xf] }
 0x316   :  { %v4125_v31 = vpop.f32.mrf.mxu1  ;;  %v8764_v40 = vld [vmem:[#allocation13 + $0x254] sm:$0xf0] }
 0x317   :  { %v4154_v28 = vmax.f32 %v4046_v5, 0.0  ;;  %v7916_v5 = vor.u32 %v8784_v54, %v7915_v24  ;;  %5037 = vmatpush.bf16.msrb.mxu3 %v7928_v63  ;;  %v8710_v31 = vld [vmem:[#allocation13 + $0xac] sm:$0xf]  ;;  %v8804_v15 = vld [vmem:[#allocation13 + $0x394] sm:$0xf0] }
 0x318   :  { %5046 = vmatpush.bf16.msra.mxu0 %v7612_v46  ;;  %v7645_v46 = vld [vmem:[#allocation13 + $0xd8] sm:$0xf0]  ;;  %v8742_v24 = vld [vmem:[#allocation13 + $0x1ac] sm:$0xf] }
 0x319   :  { %v9438_v37 = vpack.c.bf16 %v4154_v28, %v4154_v28  ;;  %v7648_v44 = vor.u32 %v8714_v45, %v7645_v46  ;;  %v8780_v28 = vld [vmem:[#allocation13 + $0x2d4] sm:$0xf0]  ;;  %v7819_v45 = vld [vmem:[#allocation13 + $0x228] sm:$0xf]  ;;  %v7760_v63 = vor.u32 %v8742_v24, %v7757_v43  ;;  %v8766_v43 = vld [vmem:[#allocation13 + $0x26c] sm:$0xf] }
 0x31a   :  { %v7900_v25 = vor.u32 %v8780_v28, %v7899_v53  ;;  %v8800_v24 = vld [vmem:[#allocation13 + $0x374] sm:$0xf0] }
 0x31b   :  { %4960 = vmatmul.bf16.vlgmr.msra.gmra.mxu1 %v9438_v37  ;;  %4999 = vmatmul.bf16.vlgmr.msrb.gmra.mxu0 %v9429_v26 }
 0x31c   :  { %5047 = vmatpush.bf16.msra.mxu0 %v7596_v52  ;;  %5056 = vmatpush.bf16.msra.mxu1 %v7788_v57  ;;  %v4047_v0 = vpop.f32.mrf.mxu3  ;;  %v7629_v52 = vld [vmem:[#allocation13 + $0xb8] sm:$0xf0] }
 0x31d   :  { %v7632_v51 = vor.u32 %v8710_v31, %v7629_v52  ;;  %v8706_v0 = vld [vmem:[#allocation13 + $0x8c] sm:$0xf]  ;;  %v7803_v31 = vld [vmem:[#allocation13 + $0x208] sm:$0xf]  ;;  %v8756_v52 = vld [vmem:[#allocation13 + $0x214] sm:$0xf0] }
 0x320   :  { %5048 = vmatpush.bf16.msra.mxu0 %v7580_v2  ;;  %5057 = vmatpush.bf16.msra.mxu1 %v7772_v7  ;;  %v7613_v2 = vld [vmem:[#allocation13 + $0x98] sm:$0xf0]  ;;  %v7692_v7 = vor.u32 %v8728_v60, %v7691_v11  ;;  %v8782_v11 = vld [vmem:[#allocation13 + $0x2ec] sm:$0xf] }
 0x321   :  { %v7616_v3 = vor.u32 %v8706_v0, %v7613_v2  ;;  %v7917_v60 = vld [vmem:[#allocation13 + $0x2f8] sm:$0xf0] }
 0x324   :  { %5049 = vmatpush.bf16.msra.mxu0 %v7564_v22  ;;  %5058 = vmatpush.bf16.msra.mxu1 %v7756_v9  ;;  %v4097_v33 = vpop.f32.mrf.mxu3  ;;  %v8750_v22 = vld [vmem:[#allocation13 + $0x1ec] sm:$0xf]  ;;  %v7789_v9 = vld [vmem:[#allocation13 + $0x1f8] sm:$0xf0] }
 0x325   :  { %v4098_v34 = vadd.f32 %v4097_v33, %v4085_v13  ;;  %v9446_v56 = vpop.f32.mrf.mxu2  ;;  %v7792_v41 = vor.u32 %v8750_v22, %v7789_v9  ;;  %v3300_v13 = vperm.slane %v9417_v23, 3  ;;  %v7852_v33 = vor.u32 %v8768_v55, %v7851_v16  ;;  %v7693_v16 = vld [vmem:[#allocation13 + $0x138] sm:$0xf0] }
 0x326   :  { %v7712_v22 = vor.u32 %v8730_v48, %v7709_v32  ;;  %v7904_v9 = vor.u32 %v8778_v17, %v7901_v4  ;;  %v7885_v55 = vld [vmem:[#allocation13 + $0x2b8] sm:$0xf0]  ;;  %v8798_v48 = vld [vmem:[#allocation13 + $0x36c] sm:$0xf] }
 0x327   :  { %v4155_v20 = vmax.f32 %v4098_v34, 0.0  ;;  %v8694_v34 = vld [vmem:[#allocation13 + $0x2c] sm:$0xf]  ;;  %v4111_v30 = vadd.f32 %v9422_v50, %v3300_v13  ;;  %v7981_v32 = vld [vmem:[#allocation13 + $0x378] sm:$0xf0] }
 0x328   :  { %5050 = vmatpush.bf16.msra.mxu0 %v7548_v47  ;;  %5059 = vmatpush.bf16.msra.mxu1 %v7740_v36  ;;  %v7584_v47 = vor.u32 %v8698_v21, %v7581_v27  ;;  %v7835_v36 = vld [vmem:[#allocation13 + $0x248] sm:$0xf]  ;;  %v8722_v13 = vld [vmem:[#allocation13 + $0x10c] sm:$0xf]  ;;  %v7984_v17 = vor.u32 %v8798_v48, %v7981_v32 }
 0x329   :  { %v9448_v49 = vpack.c.bf16 %v4155_v20, %v4155_v20  ;;  %v7836_v23 = vor.u32 %v8764_v40, %v7835_v36  ;;  %v4124_v46 = vadd.f32 %v9434_v35, %v4111_v30  ;;  %v8760_v20 = vld [vmem:[#allocation13 + $0x234] sm:$0xf0]  ;;  %v8043_v35 = vld [vmem:[#allocation13 + $0x3e8] sm:$0xf]  ;;  %v7869_v36 = vld [vmem:[#allocation13 + $0x298] sm:$0xf0] }
 0x32a   :  { %v7820_v50 = vor.u32 %v8760_v20, %v7819_v45  ;;  %v7853_v30 = vld [vmem:[#allocation13 + $0x278] sm:$0xf0]  ;;  %v7963_v45 = vld [vmem:[#allocation13 + $0x348] sm:$0xf]  ;;  %v8794_v4 = vld [vmem:[#allocation13 + $0x34c] sm:$0xf] }
 0x32b   :  { %4973 = vmatmul.bf16.vlgmr.msra.gmra.mxu2 %v9448_v49  ;;  %5012 = vmatmul.bf16.vlgmr.msrb.gmra.mxu1 %v9438_v37  ;;  %v4137_v42 = vadd.f32 %v9446_v56, %v4124_v46  ;;  %v7804_v56 = vor.u32 %v8756_v52, %v7803_v31  ;;  %v8796_v46 = vld [vmem:[#allocation13 + $0x354] sm:$0xf0]  ;;  %v7837_v20 = vld [vmem:[#allocation13 + $0x258] sm:$0xf0]  ;;  %v7931_v31 = vld [vmem:[#allocation13 + $0x308] sm:$0xf] }
 0x32c   :  { %5095 = vmatpush.bf16.msrb.mxu0 %v7664_v6  ;;  %5060 = vmatpush.bf16.msra.mxu1 %v7724_v1  ;;  %v4099_v57 = vpop.f32.mrf.mxu3  ;;  %v7565_v6 = vld [vmem:[#allocation13 + $0x38] sm:$0xf0]  ;;  %v8690_v1 = vld [vmem:[#allocation13 + $0xc] sm:$0xf]  ;;  %v8788_v52 = vld [vmem:[#allocation13 + $0x314] sm:$0xf0] }
 0x32d   :  { %5051 = vmatmul.bf16.vlgmr.msra.gmra.mxu0 %v9429_v26  ;;  %5069 = vmatpush.bf16.msra.mxu2 %v7916_v5  ;;  %v4138_v59 = vpop.f32.mrf.mxu2  ;;  %v7568_v54 = vor.u32 %v8694_v34, %v7565_v6  ;;  %v7549_v5 = vld [vmem:[#allocation13 + $0x18] sm:$0xf0]  ;;  %v7979_v6 = vld [vmem:[#allocation13 + $0x368] sm:$0xf] }
 0x32e   :  { %v7552_v28 = vor.u32 %v8690_v1, %v7549_v5  ;;  %v8816_v59 = vld [vmem:[#allocation13 + $0x3f4] sm:$0xf0]  ;;  %v7964_v1 = vor.u32 %v8796_v46, %v7963_v45  ;;  %v8828_v46 = vld [vmem:[#allocation16 + $0x58] sm:$0xff] }
 0x32f   :  { %v8044_v62 = vor.u32 %v8816_v59, %v8043_v35  ;;  %v8814_v35 = vld [vmem:[#allocation13 + $0x3ec] sm:$0xf]  ;;  %v8045_v59 = vld [vmem:[#allocation13 + $0x3f8] sm:$0xf0] }
 0x330   :  { %5096 = vmatpush.bf16.msrb.mxu0 %v7648_v44  ;;  %5061 = vmatpush.bf16.msra.mxu1 %v7708_v58  ;;  %v8738_v44 = vld [vmem:[#allocation13 + $0x18c] sm:$0xf] }
 0x331   :  { %5070 = vmatpush.bf16.msra.mxu2 %v7900_v25  ;;  %v7744_v58 = vor.u32 %v8738_v44, %v7741_v38  ;;  %v8734_v25 = vld [vmem:[#allocation13 + $0x16c] sm:$0xf]  ;;  %v7947_v44 = vld [vmem:[#allocation13 + $0x328] sm:$0xf]  ;;  %v8792_v38 = vld [vmem:[#allocation13 + $0x334] sm:$0xf0] }
 0x334   :  { %5097 = vmatpush.bf16.msrb.mxu0 %v7632_v51  ;;  %5062 = vmatpush.bf16.msra.mxu1 %v7692_v7  ;;  %v7725_v51 = vld [vmem:[#allocation13 + $0x178] sm:$0xf0]  ;;  %v7920_v7 = vor.u32 %v8782_v11, %v7917_v60  ;;  %v8810_v11 = vld [vmem:[#allocation13 + $0x3cc] sm:$0xf] }
 0x335   :  { %5071 = vmatpush.bf16.msra.mxu2 %v7884_v18  ;;  %v7728_v2 = vor.u32 %v8734_v25, %v7725_v51  ;;  %v8027_v18 = vld [vmem:[#allocation13 + $0x3c8] sm:$0xf]  ;;  %v7932_v25 = vor.u32 %v8788_v52, %v7931_v31  ;;  %v8048_v51 = vor.u32 %v8814_v35, %v8045_v59  ;;  %v8029_v60 = vld [vmem:[#allocation13 + $0x3d8] sm:$0xf0]  ;;  %v9477_v31 = vld [vmem:[#allocation14] sm:$0xf] }
 0x336   :  { %v8835_v35 = vld [vmem:[#allocation16 + $0x90] sm:$0xff]  ;;  %v4292_v32 = vperm.slane %v9477_v31, 1 }
 0x338   :  { %5098 = vmatpush.bf16.msrb.mxu0 %v7616_v3  ;;  %5063 = vmatpush.bf16.msra.mxu1 %v7676_v10  ;;  %v8812_v3 = vld [vmem:[#allocation13 + $0x3d4] sm:$0xf0]  ;;  %v8011_v10 = vld [vmem:[#allocation13 + $0x3a8] sm:$0xf] }
 0x339   :  { %5072 = vmatpush.bf16.msra.mxu2 %v7868_v12  ;;  %v8028_v29 = vor.u32 %v8812_v3, %v8027_v18  ;;  %v8808_v12 = vld [vmem:[#allocation13 + $0x3b4] sm:$0xf0]  ;;  %v7997_v18 = vld [vmem:[#allocation13 + $0x398] sm:$0xf0] }
 0x33a   :  { %v8012_v21 = vor.u32 %v8808_v12, %v8011_v10  ;;  %v8786_v12 = vld [vmem:[#allocation13 + $0x30c] sm:$0xf] }
 0x33b   :  { %5025 = vmatmul.bf16.vlgmr.msrb.gmra.mxu2 %v9448_v49  ;;  %5064 = vmatmul.bf16.vlgmr.msra.gmra.mxu1 %v9438_v37 }
 0x33c   :  { %5099 = vmatpush.bf16.msrb.mxu0 %v7600_v14  ;;  %5108 = vmatpush.bf16.msrb.mxu1 %v7792_v41  ;;  %v8726_v14 = vld [vmem:[#allocation13 + $0x12c] sm:$0xf] }
 0x33d   :  { %5073 = vmatpush.bf16.msra.mxu2 %v7852_v33  ;;  %v8774_v41 = vld [vmem:[#allocation13 + $0x2ac] sm:$0xf]  ;;  %v7677_v33 = vld [vmem:[#allocation13 + $0x118] sm:$0xf0] }
 0x33e   :  { %v7888_v27 = vor.u32 %v8774_v41, %v7885_v55  ;;  %v7680_v40 = vor.u32 %v8722_v13, %v7677_v33  ;;  %v8824_v55 = vld [vmem:[#allocation16 + $0x38] sm:$0xff] }
 0x340   :  { %5100 = vmatpush.bf16.msrb.mxu0 %v7584_v47  ;;  %5109 = vmatpush.bf16.msrb.mxu1 %v7776_v39  ;;  %v8770_v47 = vld [vmem:[#allocation13 + $0x28c] sm:$0xf]  ;;  %v7996_v39 = vor.u32 %v8804_v15, %v7995_v8  ;;  %v8821_v15 = vld [vmem:[#allocation16 + $0x20] sm:$0xff] }
 0x341   :  { %5074 = vmatpush.bf16.msra.mxu2 %v7836_v23  ;;  %v7872_v34 = vor.u32 %v8770_v47, %v7869_v36  ;;  %v7980_v23 = vor.u32 %v8800_v24, %v7979_v6  ;;  %v8822_v8 = vld [vmem:[#allocation16 + $0x28] sm:$0xff]  ;;  %v8820_v47 = vld [vmem:[#allocation16 + $0x18] sm:$0xff] }
 0x342   :  { %v8832_v36 = vld [vmem:[#allocation16 + $0x78] sm:$0xff]  ;;  %v8818_v6 = vld [vmem:[#allocation16 + $0x8] sm:$0xff] }
 0x343   :  { %v8830_v24 = vld [vmem:[#allocation16 + $0x68] sm:$0xff] }
 0x344   :  { %v4149_v53 = vpop.f32.mrf.mxu3  ;;  %5101 = vmatpush.bf16.msrb.mxu0 %v7568_v54  ;;  %5110 = vmatpush.bf16.msrb.mxu1 %v7760_v63  ;;  %v7856_v54 = vor.u32 %v8766_v43, %v7853_v30  ;;  %v8762_v63 = vld [vmem:[#allocation13 + $0x24c] sm:$0xf]  ;;  %v8817_v30 = vld [vmem:[#allocation16] sm:$0xff] }
 0x345   :  { %v4150_v57 = vadd.f32 %v4149_v53, %v4137_v42  ;;  %5075 = vmatpush.bf16.msra.mxu2 %v7820_v50  ;;  %v7840_v5 = vor.u32 %v8762_v63, %v7837_v20  ;;  %v8758_v42 = vld [vmem:[#allocation13 + $0x22c] sm:$0xf]  ;;  %v7821_v53 = vld [vmem:[#allocation13 + $0x238] sm:$0xf0]  ;;  %v7948_v50 = vor.u32 %v8792_v38, %v7947_v44 }
 0x346   :  { %v8840_v63 = vld [vmem:[#allocation16 + $0xb8] sm:$0xff]  ;;  %v8826_v38 = vld [vmem:[#allocation16 + $0x48] sm:$0xff] }
 0x347   :  { %v4156_v61 = vmax.f32 %v4150_v57, 0.0  ;;  %v8754_v57 = vld [vmem:[#allocation13 + $0x20c] sm:$0xf] }
 0x348   :  { %5102 = vmatpush.bf16.msrb.mxu0 %v7552_v28  ;;  %5111 = vmatpush.bf16.msrb.mxu1 %v7744_v58  ;;  %v7824_v28 = vor.u32 %v8758_v42, %v7821_v53  ;;  %v7805_v58 = vld [vmem:[#allocation13 + $0x218] sm:$0xf0]  ;;  %v8838_v42 = vld [vmem:[#allocation16 + $0xa8] sm:$0xff] }
 0x349   :  { %v9459_v0 = vpack.c.bf16 %v4156_v61, %v4156_v61  ;;  %5076 = vmatpush.bf16.msra.mxu2 %v7804_v56  ;;  %v8032_v61 = vor.u32 %v8810_v11, %v8029_v60  ;;  %v8806_v56 = vld [vmem:[#allocation13 + $0x3ac] sm:$0xf] }
 0x34a   :  { %v8834_v60 = vld [vmem:[#allocation16 + $0x88] sm:$0xff] }
 0x34b   :  { %4986 = vmatmul.bf16.vlgmr.msra.gmra.mxu3 %v9459_v0  ;;  %5103 = vmatmul.bf16.vlgmr.msrb.gmra.mxu0 %v9429_v26  ;;  %v7696_v26 = vor.u32 %v8726_v14, %v7693_v16 }
 0x34c   :  { %5082 = vmatpush.bf16.msra.mxu3 %v8044_v62  ;;  %v4151_v19 = vpop.f32.mrf.mxu3  ;;  %5112 = vmatpush.bf16.msrb.mxu1 %v7728_v2  ;;  %v8013_v62 = vld [vmem:[#allocation13 + $0x3b8] sm:$0xf0] }
 0x34d   :  { %5121 = vmatpush.bf16.msrb.mxu2 %v7920_v7  ;;  %v8016_v2 = vor.u32 %v8806_v56, %v8013_v62  ;;  %v8802_v7 = vld [vmem:[#allocation13 + $0x38c] sm:$0xf]  ;;  %v7965_v19 = vld [vmem:[#allocation13 + $0x358] sm:$0xf0]  ;;  %5415 = vmatpush.bf16.msra.mxu0 %v8824_v55 }
 0x34e   :  { %5077 = vmatmul.bf16.vlgmr.msra.gmra.mxu2 %v9448_v49  ;;  %v8000_v3 = vor.u32 %v8802_v7, %v7997_v18  ;;  %v8833_v7 = vld [vmem:[#allocation16 + $0x80] sm:$0xff]  ;;  %v8848_v18 = vld [vmem:[#allocation16 + $0xf8] sm:$0xff] }
 0x350   :  { %5083 = vmatpush.bf16.msra.mxu3 %v8028_v29  ;;  %5113 = vmatpush.bf16.msrb.mxu1 %v7712_v22  ;;  %v7968_v29 = vor.u32 %v8794_v4, %v7965_v19  ;;  %v8790_v22 = vld [vmem:[#allocation13 + $0x32c] sm:$0xf] }
 0x351   :  { %5122 = vmatpush.bf16.msrb.mxu2 %v7904_v9  ;;  %v7949_v9 = vld [vmem:[#allocation13 + $0x338] sm:$0xf0]  ;;  %v8846_v19 = vld [vmem:[#allocation16 + $0xe8] sm:$0xff] }
 0x352   :  { %v7952_v10 = vor.u32 %v8790_v22, %v7949_v9 }
 0x354   :  { %5084 = vmatpush.bf16.msra.mxu3 %v8012_v21  ;;  %5114 = vmatpush.bf16.msrb.mxu1 %v7696_v26  ;;  %v8823_v21 = vld [vmem:[#allocation16 + $0x30] sm:$0xff] }
 0x355   :  { %5123 = vmatpush.bf16.msrb.mxu2 %v7888_v27  ;;  %5416 = vmatpush.bf16.msra.mxu0 %v8823_v21 }
 0x358   :  { %5085 = vmatpush.bf16.msra.mxu3 %v7996_v39  ;;  %5115 = vmatpush.bf16.msrb.mxu1 %v7680_v40  ;;  %v8831_v39 = vld [vmem:[#allocation16 + $0x70] sm:$0xff] }
 0x359   :  { %5124 = vmatpush.bf16.msrb.mxu2 %v7872_v34  ;;  %5417 = vmatpush.bf16.msra.mxu0 %v8822_v8  ;;  %v8843_v8 = vld [vmem:[#allocation16 + $0xd0] sm:$0xff] }
 0x35b   :  { %5038 = vmatmul.bf16.vlgmr.msrb.gmra.mxu3 %v9459_v0  ;;  %5116 = vmatmul.bf16.vlgmr.msrb.gmra.mxu1 %v9438_v37  ;;  %v7808_v37 = vor.u32 %v8754_v57, %v7805_v58  ;;  %v4291_v57 = vperm.slane %v9477_v31, 0  ;;  %v8836_v58 = vld [vmem:[#allocation16 + $0x98] sm:$0xff] }
 0x35c   :  { %5086 = vmatpush.bf16.msra.mxu3 %v7980_v23  ;;  %5428 = vmatpush.bf16.msra.mxu1 %v8832_v36  ;;  %v8829_v23 = vld [vmem:[#allocation16 + $0x60] sm:$0xff] }
 0x35d   :  { %5125 = vmatpush.bf16.msrb.mxu2 %v7856_v54  ;;  %5418 = vmatpush.bf16.msra.mxu0 %v8821_v15  ;;  %v4293_v15 = vperm.slane %v9477_v31, 2 }
 0x360   :  { %5087 = vmatpush.bf16.msra.mxu3 %v7964_v1  ;;  %5429 = vmatpush.bf16.msra.mxu1 %v8831_v39  ;;  %v8827_v1 = vld [vmem:[#allocation16 + $0x50] sm:$0xff] }
 0x361   :  { %5126 = vmatpush.bf16.msrb.mxu2 %v7840_v5  ;;  %5419 = vmatpush.bf16.msra.mxu0 %v8820_v47  ;;  %v8839_v5 = vld [vmem:[#allocation16 + $0xb0] sm:$0xff] }
 0x364   :  { %5088 = vmatpush.bf16.msra.mxu3 %v7948_v50  ;;  %5430 = vmatpush.bf16.msra.mxu1 %v8830_v24  ;;  %v8825_v50 = vld [vmem:[#allocation16 + $0x40] sm:$0xff] }
 0x365   :  { %5127 = vmatpush.bf16.msrb.mxu2 %v7824_v28  ;;  %v8837_v28 = vld [vmem:[#allocation16 + $0xa0] sm:$0xff] }
 0x368   :  { %5089 = vmatpush.bf16.msra.mxu3 %v7932_v25  ;;  %5431 = vmatpush.bf16.msra.mxu1 %v8829_v23 }
 0x369   :  { %5128 = vmatpush.bf16.msrb.mxu2 %v7808_v37 }
 0x36b   :  { %5090 = vmatmul.bf16.vlgmr.msra.gmra.mxu3 %v9459_v0 }
 0x36c   :  { %5134 = vmatpush.bf16.msrb.mxu3 %v8048_v51  ;;  %5129 = vmatmul.bf16.vlgmr.msrb.gmra.mxu2 %v9448_v49  ;;  %v7933_v49 = vld [vmem:[#allocation13 + $0x318] sm:$0xf0] }
 0x36d   :  { %v7936_v14 = vor.u32 %v8786_v12, %v7933_v49  ;;  %5432 = vmatpush.bf16.msra.mxu1 %v8828_v46  ;;  %5441 = vmatpush.bf16.msra.mxu2 %v8840_v63  ;;  %v8845_v12 = vld [vmem:[#allocation16 + $0xe0] sm:$0xff] }
 0x370   :  { %5135 = vmatpush.bf16.msrb.mxu3 %v8032_v61 }
 0x371   :  { %5433 = vmatpush.bf16.msra.mxu1 %v8827_v1  ;;  %5442 = vmatpush.bf16.msra.mxu2 %v8839_v5 }
 0x374   :  { %5136 = vmatpush.bf16.msrb.mxu3 %v8016_v2 }
 0x375   :  { %5434 = vmatpush.bf16.msra.mxu1 %v8826_v38  ;;  %5443 = vmatpush.bf16.msra.mxu2 %v8838_v42 }
 0x378   :  { %5137 = vmatpush.bf16.msrb.mxu3 %v8000_v3 }
 0x379   :  { %5435 = vmatpush.bf16.msra.mxu1 %v8825_v50  ;;  %5444 = vmatpush.bf16.msra.mxu2 %v8837_v28 }
 0x37c   :  { %5138 = vmatpush.bf16.msrb.mxu3 %v7984_v17  ;;  %v8847_v17 = vld [vmem:[#allocation16 + $0xf0] sm:$0xff] }
 0x37d   :  { %5445 = vmatpush.bf16.msra.mxu2 %v8836_v58 }
 0x380   :  { %5139 = vmatpush.bf16.msrb.mxu3 %v7968_v29 }
 0x381   :  { %5446 = vmatpush.bf16.msra.mxu2 %v8835_v35 }
 0x384   :  { %5140 = vmatpush.bf16.msrb.mxu3 %v7952_v10 }
 0x385   :  { %5447 = vmatpush.bf16.msra.mxu2 %v8834_v60 }
 0x388   :  { %5141 = vmatpush.bf16.msrb.mxu3 %v7936_v14  ;;  %v4948_v16 = vpop.f32.mrf.mxu0 }
 0x389   :  { %v4949_v25 = vadd.f32 %v4948_v16, %v4291_v57  ;;  %5448 = vmatpush.bf16.msra.mxu2 %v8833_v7  ;;  %v8863_v57 = vld [vmem:[%s9503_s10] ss:$0 sm:$0xff] }
 0x38b   :  { %5142 = vmatmul.bf16.vlgmr.msrb.gmra.mxu3 %v9459_v0  ;;  %v8819_v0 = vld [vmem:[#allocation16 + $0x10] sm:$0xff] }
 0x38c   :  { %5420 = vmatpush.bf16.msra.mxu0 %v8819_v0  ;;  %5454 = vmatpush.bf16.msra.mxu3 %v8848_v18  ;;  %v8841_v0 = vld [vmem:[#allocation16 + $0xc0] sm:$0xff] }
 0x390   :  { %v4950_v41 = vpop.f32.mrf.mxu0  ;;  %5421 = vmatpush.bf16.msra.mxu0 %v8818_v6  ;;  %5455 = vmatpush.bf16.msra.mxu3 %v8847_v17 }
 0x391   :  { %v8844_v41 = vld [vmem:[#allocation16 + $0xd8] sm:$0xff] }
 0x394   :  { %5422 = vmatpush.bf16.msra.mxu0 %v8817_v30  ;;  %5456 = vmatpush.bf16.msra.mxu3 %v8846_v19 }
 0x398   :  { %v4961_v26 = vpop.f32.mrf.mxu1  ;;  %v9469_v27 = vpop.f32.mrf.mxu0  ;;  %5457 = vmatpush.bf16.msra.mxu3 %v8845_v12 }
 0x399   :  { %v4962_v51 = vadd.f32 %v4961_v26, %v4949_v25  ;;  %v5001_v29 = vadd.f32 %v9469_v27, %v4292_v32 }
 0x39c   :  { %5458 = vmatpush.bf16.msra.mxu3 %v8844_v41 }
 0x3a0   :  { %v4963_v13 = vpop.f32.mrf.mxu1  ;;  %v5002_v33 = vpop.f32.mrf.mxu0  ;;  %5459 = vmatpush.bf16.msra.mxu3 %v8843_v8 }
 0x3a1   :  { %v8842_v33 = vld [vmem:[#allocation16 + $0xc8] sm:$0xff] }
 0x3a4   :  { %5460 = vmatpush.bf16.msra.mxu3 %v8842_v33 }
 0x3a8   :  { %v9471_v40 = vpop.f32.mrf.mxu1  ;;  %5461 = vmatpush.bf16.msra.mxu3 %v8841_v0 }
 0x3a9   :  { %v5014_v10 = vadd.f32 %v9471_v40, %v5001_v29 }
 0x3aa   :  { %v9473_v34 = vpop.f32.mrf.mxu0 }
 0x3ab   :  { %v5053_v13 = vadd.f32 %v9473_v34, %v4293_v15 }
 0x3ae   :  { %v4974_v43 = vpop.f32.mrf.mxu2 }
 0x3af   :  { %v4975_v11 = vadd.f32 %v4974_v43, %v4962_v51 }
 0x3b0   :  { %v5015_v54 = vpop.f32.mrf.mxu1 }
 0x3b1   :  { %v4294_v54 = vperm.slane %v9477_v31, 3 }
 0x3b2   :  { %v5054_v45 = vpop.f32.mrf.mxu0 }
 0x3b6   :  { %v4976_v20 = vpop.f32.mrf.mxu2 }
 0x3b8   :  { %v9475_v44 = vpop.f32.mrf.mxu1 }
 0x3b9   :  { %v5066_v47 = vadd.f32 %v9475_v44, %v5053_v13 }
 0x3be   :  { %v5026_v53 = vpop.f32.mrf.mxu2 }
 0x3bf   :  { %v5027_v49 = vadd.f32 %v5026_v53, %v5014_v10 }
 0x3c0   :  { %v5067_v52 = vpop.f32.mrf.mxu1 }
 0x3c6   :  { %v5028_v37 = vpop.f32.mrf.mxu2 }
 0x3c8   :  { %v5104_v59 = vpop.f32.mrf.mxu0 }
 0x3c9   :  { %v5105_v45 = vadd.f32 %v5104_v59, %v4294_v54 }
 0x3ce   :  { %v4987_v61 = vpop.f32.mrf.mxu3 }
 0x3cf   :  { %v4988_v56 = vadd.f32 %v4987_v61, %v4975_v11 }
 0x3d0   :  { %v5106_v62 = vpop.f32.mrf.mxu0 }
 0x3d1   :  { %v5147_v2 = vmax.f32 %v4988_v56, 0.0  ;;  %v5078_v3 = vpop.f32.mrf.mxu2 }
 0x3d2   :  { %v5079_v36 = vadd.f32 %v5078_v3, %v5066_v47 }
 0x3d3   :  { %v5151_v48 = vpack.c.bf16 %v5147_v2, %v5147_v2 }
 0x3d5   :  { %5423 = vmatmul.bf16.vlgmr.msra.gmra.mxu0 %v5151_v48 }
 0x3d6   :  { %v4989_v4 = vpop.f32.mrf.mxu3 }
 0x3d8   :  { %v5117_v22 = vpop.f32.mrf.mxu1 }
 0x3d9   :  { %v5080_v9 = vpop.f32.mrf.mxu2  ;;  %v5118_v46 = vadd.f32 %v5117_v22, %v5105_v45 }
 0x3de   :  { %v5039_v14 = vpop.f32.mrf.mxu3 }
 0x3df   :  { %v5040_v16 = vadd.f32 %v5039_v14, %v5027_v49 }
 0x3e0   :  { %v5119_v21 = vpop.f32.mrf.mxu1 }
 0x3e1   :  { %v5148_v55 = vmax.f32 %v5040_v16, 0.0 }
 0x3e3   :  { %v5152_v26 = vpack.c.bf16 %v5148_v55, %v5148_v55 }
 0x3e5   :  { %5436 = vmatmul.bf16.vlgmr.msra.gmra.mxu1 %v5152_v26 }
 0x3e6   :  { %v5041_v27 = vpop.f32.mrf.mxu3 }
 0x3ee   :  { %v5091_v39 = vpop.f32.mrf.mxu3 }
 0x3ef   :  { %v5092_v40 = vadd.f32 %v5091_v39, %v5079_v36  ;;  %v5130_v6 = vpop.f32.mrf.mxu2 }
 0x3f0   :  { %v5131_v34 = vadd.f32 %v5130_v6, %v5118_v46 }
 0x3f1   :  { %v5149_v24 = vmax.f32 %v5092_v40, 0.0 }
 0x3f3   :  { %v5153_v43 = vpack.c.bf16 %v5149_v24, %v5149_v24 }
 0x3f5   :  { %5449 = vmatmul.bf16.vlgmr.msra.gmra.mxu2 %v5153_v43 }
 0x3f6   :  { %v5093_v30 = vpop.f32.mrf.mxu3 }
 0x3f7   :  { %v5132_v23 = vpop.f32.mrf.mxu2 }
 0x40e   :  { %v5143_v63 = vpop.f32.mrf.mxu3 }
 0x40f   :  { %v5144_v20 = vadd.f32 %v5143_v63, %v5131_v34 }
 0x411   :  { %v5150_v1 = vmax.f32 %v5144_v20, 0.0 }
 0x413   :  { %v5154_v5 = vpack.c.bf16 %v5150_v1, %v5150_v1 }
 0x415   :  { %5462 = vmatmul.bf16.vlgmr.msra.gmra.mxu3 %v5154_v5 }
 0x416   :  { %v5145_v44 = vpop.f32.mrf.mxu3 }
 0x452   :  { %v5424_v38 = vpop.f32.mrf.mxu0 }
 0x453   :  { %v5425_v31 = vadd.f32 %v8863_v57, %v5424_v38 }
 0x45a   :  { %v5426_v42 = vpop.f32.mrf.mxu0 }
 0x462   :  { %v5437_v53 = vpop.f32.mrf.mxu1 }
 0x463   :  { %v5438_v58 = vadd.f32 %v5437_v53, %v5425_v31 }
 0x46a   :  { %v5439_v50 = vpop.f32.mrf.mxu1 }
 0x478   :  { %v5450_v28 = vpop.f32.mrf.mxu2 }
 0x479   :  { %v5451_v35 = vadd.f32 %v5450_v28, %v5438_v58 }
 0x480   :  { %v5452_v52 = vpop.f32.mrf.mxu2 }
 0x498   :  { %v5463_v59 = vpop.f32.mrf.mxu3 }
 0x499   :  { %v5464_v25 = vadd.f32 %v5463_v59, %v5451_v35 }
 0x49b   :  { %5467 = vst [vmem:[#allocation17] sm:$0xff] %v5464_v25 }
 0x49c   :  { %5478 = dma.vmem_to_hbm [thread:$0]  %s5474_s20, 128, %s5476_s22, [#allocation4]  }
 0x4a0   :  { %v5465_v37 = vpop.f32.mrf.mxu3 }
 0x4a1   :  { %9115 = dma.done.wait [#allocation4], 128  }
 0x4a2   :  { %9116 = vsyncadd [#allocation4], 4294967168 }
 0x4a3   :  { %5483 = vsyncpa [#allocation3], 1 }
 0x4a4   :  { %5484 = vsyncpa [#allocation6], 1 }
 0x4a5   :  { %5485 = vsyncpa [#allocation9], 1 }
 0x4a6   :  { %5486 = vsyncpa [#allocation12], 1 }
 0x4a7   :  { %5487 = vsyncpa [#allocation15], 1 }
 0x4a8   :  { %5488 = vsyncpa [#allocation4], 1 }

</bundles_post_ra>
